<compile_context>
chip_gen: v7x
topology: tpu7x:2x2x1
jax: 0.10.0
libtpu: 0.0.40
codegen_flags: <defaults>
</compile_context>

<pallas_src>
import numpy as np
import jax
import jax.numpy as jnp
from jax.experimental import pallas as pl
from jax.experimental.pallas import tpu as pltpu


def _dilran_kernel(x_ref, w_ref, b_ref, o_ref, pad_ref, slab_ref):
    # x_ref  : (1, H, Wp, 2C) f32   W-pair packed input (lane = parity*C + ch)
    # w_ref  : (9*2C, 2C)     bf16  packed im2col weight, K block k = ky*3 + kx2
    # b_ref  : (1, 2C)        f32   bias duplicated over the two column parities
    # o_ref  : (1, H, Wp, 2C) f32   packed output
    # pad_ref : VMEM (H+2, Wp+2, 2C) bf16  zero-halo staging buffer
    # slab_ref: VMEM (H*Wp, 9*2C)    bf16  im2col slab (one MXU matmul per conv)
    H = x_ref.shape[1]
    Wp = x_ref.shape[2]
    C2 = x_ref.shape[3]
    C = C2 // 2
    HW = H * Wp

    bias = b_ref[...]                 # (1, C2) f32
    w_all = w_ref[...]                # (9*C2, C2) bf16

    # Zero the whole halo'd staging buffer once per grid step (cheap, and keeps
    # the kernel correct when the batch axis is split across TensorCores).
    pad_ref[...] = jnp.zeros_like(pad_ref)

    def stage(v_flat):                # (H*Wp, C2) f32 -> bf16 interior
        pad_ref[1:H + 1, 1:Wp + 1, :] = (
            v_flat.reshape(H, Wp, C2).astype(jnp.bfloat16))

    def conv3x3_from_pad():
        # One 'same' 3x3 conv of whatever sits in pad_ref's interior:
        # 9 packed taps (each a full 128-lane block) -> (H*Wp, 9*C2) bf16 slab,
        # then a single accumulating MXU matmul with f32 accumulation.
        for k in range(9):
            ky, kx2 = k // 3, k % 3
            tap = pad_ref[ky:ky + H, kx2:kx2 + Wp, :]        # (H, Wp, C2) bf16
            slab_ref[:, k * C2:(k + 1) * C2] = tap.reshape(HW, C2)
        out = jnp.dot(slab_ref[...], w_all, preferred_element_type=jnp.float32)
        return out + bias                                    # (H*Wp, C2) f32

    # --- conv path first (keeps only `acc` live across the matmuls) -----------
    pad_ref[1:H + 1, 1:Wp + 1, :] = x_ref[0].astype(jnp.bfloat16)   # stage x
    c = conv3x3_from_pad()            # c1 = conv(x)
    acc = c
    stage(c)
    c = conv3x3_from_pad()            # c2 = conv(c1)
    acc = acc + c
    stage(c)
    acc = acc + conv3x3_from_pad()    # c3 = conv(c2)

    # --- pur = relu(upsample2x(avgpool2x2(x))) in packed layout ----------------
    x = x_ref[0]                      # (H, Wp, C2) f32
    # W pair-sum: lanes are (col parity, channel); a lane roll by C makes every
    # lane hold (x_even + x_odd) for its channel -> already the packed,
    # column-duplicated form.  Roll runs on the XLU slot (idle here).
    t = x + pltpu.roll(x, C, 2)
    # H pair-sum + nearest-neighbour row duplication via leading-dim reshapes.
    t4 = t.reshape(H // 2, 2, Wp, C2)
    hsum = t4[:, 0] + t4[:, 1]        # (H//2, Wp, C2)
    pur = jnp.maximum(
        0.25 * jnp.concatenate([hsum[:, None], hsum[:, None]],
                               axis=1).reshape(H, Wp, C2),
        0.0)

    o_ref[0] = x + pur * acc.reshape(H, Wp, C2)


def dilran_v1_forward(x_nchw, weight_oihw, bias):
    """x_nchw: (B, 64, H, W) f32; weight_oihw: (64, 64, 3, 3); bias: (64,)."""
    B, C, H, W = x_nchw.shape
    assert H % 2 == 0 and W % 2 == 0, "avgpool2x2 + upsample2x needs even H, W"
    Wp, C2 = W // 2, 2 * C

    # Pack two adjacent W columns' channels onto the lane axis:
    #   x_packed[b, h, w2, p*C + c] = x[b, c, h, 2*w2 + p]
    x_nhwc = jnp.transpose(x_nchw, (0, 2, 3, 1)).astype(jnp.float32)
    x_packed = x_nhwc.reshape(B, H, Wp, C2)

    # Packed im2col weight.  K block k = ky*3 + kx2 consumes packed input column
    # (w2 + kx2 - 1) for packed output column w2.  Each (2C, 2C) block is a 2x2
    # grid of (C, C) sub-blocks [p_in, p_out]:
    #   even output (p_out=0): col 2w2-1 -> tap kx=0 (from kx2=0, p_in=1),
    #                          col 2w2   -> kx=1,  col 2w2+1 -> kx=2 (kx2=1)
    #   odd  output (p_out=1): col 2w2   -> kx=0,  col 2w2+1 -> kx=1 (kx2=1),
    #                          col 2w2+2 -> kx=2 (kx2=2, p_in=0)
    w_t = jnp.transpose(weight_oihw, (2, 3, 1, 0)).astype(jnp.float32)  # [ky,kx,ci,co]
    Z = jnp.zeros((C, C), jnp.float32)
    blocks = []
    for ky in range(3):
        t0, t1, t2 = w_t[ky, 0], w_t[ky, 1], w_t[ky, 2]
        blocks.append(jnp.block([[Z, Z], [t0, Z]]))       # kx2 = 0
        blocks.append(jnp.block([[t1, t0], [t2, t1]]))    # kx2 = 1
        blocks.append(jnp.block([[Z, t2], [Z, Z]]))       # kx2 = 2
    w_big = jnp.concatenate(blocks, axis=0).astype(jnp.bfloat16)   # (9*2C, 2C)

    b2 = jnp.concatenate([bias, bias]).reshape(1, C2).astype(jnp.float32)

    out_packed = pl.pallas_call(
        _dilran_kernel,
        out_shape=jax.ShapeDtypeStruct((B, H, Wp, C2), jnp.float32),
        grid_spec=pltpu.PrefetchScalarGridSpec(
            num_scalar_prefetch=0,
            grid=(B,),
            in_specs=[
                pl.BlockSpec((1, H, Wp, C2), lambda bi: (bi, 0, 0, 0)),
                pl.BlockSpec((9 * C2, C2), lambda bi: (0, 0)),
                pl.BlockSpec((1, C2), lambda bi: (0, 0)),
            ],
            out_specs=pl.BlockSpec((1, H, Wp, C2), lambda bi: (bi, 0, 0, 0)),
            scratch_shapes=[
                pltpu.VMEM((H + 2, Wp + 2, C2), jnp.bfloat16),   # zero-halo staging
                pltpu.VMEM((H * Wp, 9 * C2), jnp.bfloat16),      # im2col slab
            ],
        ),
        compiler_params=pltpu.CompilerParams(
            dimension_semantics=("parallel",)),
    )(x_packed, w_big, b2)

    out = out_packed.reshape(B, H, W, C)          # unpack (w2, parity) -> W
    return jnp.transpose(out, (0, 3, 1, 2))       # back to NCHW


def _reference(x_nchw, weight_oihw, bias):
    """Pure-JAX reference matching the PyTorch forward semantics."""
    x = jnp.transpose(x_nchw, (0, 2, 3, 1)).astype(jnp.float32)       # NHWC
    w_hwio = jnp.transpose(weight_oihw, (2, 3, 1, 0)).astype(jnp.float32)

    def conv(v):
        return jax.lax.conv_general_dilated(
            v, w_hwio, window_strides=(1, 1), padding="SAME",
            dimension_numbers=("NHWC", "HWIO", "NHWC")) + bias.reshape(1, 1, 1, -1)

    c1 = conv(x)
    c2 = conv(c1)
    c3 = conv(c2)

    B, H, W, C = x.shape
    pooled = x.reshape(B, H // 2, 2, W // 2, 2, C).mean(axis=(2, 4))
    up = jnp.repeat(jnp.repeat(pooled, 2, axis=1), 2, axis=2)
    pur = jnp.maximum(up, 0.0)

    out = x + pur * (c1 + c2 + c3)
    return jnp.transpose(out, (0, 3, 1, 2))


if __name__ == "__main__":
    key = jax.random.PRNGKey(0)
    kx_, kw_, kb_ = jax.random.split(key, 3)

    B, C, H, W = 2, 64, 16, 16        # channels fixed at 64 by the module
    x = jax.random.normal(kx_, (B, C, H, W), dtype=jnp.float32)
    weight = jax.random.normal(kw_, (C, C, 3, 3), dtype=jnp.float32) * 0.03
    bias = jax.random.normal(kb_, (C,), dtype=jnp.float32) * 0.03

    out = jax.block_until_ready(dilran_v1_forward(x, weight, bias))
    ref = jax.block_until_ready(_reference(x, weight, bias))

    np.testing.assert_allclose(np.asarray(out), np.asarray(ref),
                               rtol=3e-2, atol=3e-2)
    print("KERNEL_OK")
</pallas_src>

<mosaic_0001>
module attributes {stable_mosaic.version = 11 : i64} {
  func.func @_dilran_kernel(%arg0: i32, %arg1: memref<1x16x8x128xf32, #tpu.memory_space<vmem>>, %arg2: memref<1152x128xbf16, #tpu.memory_space<vmem>>, %arg3: memref<1x128xf32, #tpu.memory_space<vmem>>, %arg4: memref<1x16x8x128xf32, #tpu.memory_space<vmem>>, %arg5: memref<18x10x128xbf16, #tpu.memory_space<vmem>>, %arg6: memref<128x1152xbf16, #tpu.memory_space<vmem>>) attributes {dimension_semantics = [#tpu.dimension_semantics<parallel>], iteration_bounds = array<i64: 2>, scalar_prefetch = 0 : i64, scratch_operands = 2 : i64, tpu.core_type = #tpu.core_type<tc>, window_params = [{transform_indices = @transform_0, window_bounds = array<i64: 1, 16, 8, 128>}, {pipeline_mode = #tpu.pipeline_mode<synchronous>, transform_indices = @transform_1, window_bounds = array<i64: 1152, 128>}, {pipeline_mode = #tpu.pipeline_mode<synchronous>, transform_indices = @transform_2, window_bounds = array<i64: 1, 128>}, {transform_indices = @transform_3, window_bounds = array<i64: 1, 16, 8, 128>}]} {
    %c0 = arith.constant 0 : index
    %c0_0 = arith.constant 0 : index
    %0 = vector.load %arg3[%c0, %c0_0] : memref<1x128xf32, #tpu.memory_space<vmem>>, vector<1x128xf32>
    %c0_1 = arith.constant 0 : index
    %c0_2 = arith.constant 0 : index
    %1 = vector.load %arg2[%c0_1, %c0_2] : memref<1152x128xbf16, #tpu.memory_space<vmem>>, vector<1152x128xbf16>
    %cst = arith.constant 0.000000e+00 : bf16
    %2 = vector.broadcast %cst : bf16 to vector<18x10x128xbf16>
    %c0_3 = arith.constant 0 : index
    %c0_4 = arith.constant 0 : index
    %c0_5 = arith.constant 0 : index
    %3 = vector.load %arg5[%c0_3, %c0_4, %c0_5] : memref<18x10x128xbf16, #tpu.memory_space<vmem>>, vector<18x10x128xbf16>
    tpu.vector_store %arg5[%c0_3, %c0_4, %c0_5], %2 {strides = array<i32>} : memref<18x10x128xbf16, #tpu.memory_space<vmem>>, vector<18x10x128xbf16>,
    %c0_6 = arith.constant 0 : index
    %c0_7 = arith.constant 0 : index
    %c0_8 = arith.constant 0 : index
    %c0_9 = arith.constant 0 : index
    %4 = vector.load %arg1[%c0_6, %c0_7, %c0_8, %c0_9] : memref<1x16x8x128xf32, #tpu.memory_space<vmem>>, vector<1x16x8x128xf32>
    %5 = vector.shape_cast %4 : vector<1x16x8x128xf32> to vector<16x8x128xf32>
    %6 = arith.truncf %5 : vector<16x8x128xf32> to vector<16x8x128xbf16>
    %c1 = arith.constant 1 : index
    %c1_10 = arith.constant 1 : index
    %c0_11 = arith.constant 0 : index
    %7 = vector.load %arg5[%c1, %c1_10, %c0_11] : memref<18x10x128xbf16, #tpu.memory_space<vmem>>, vector<16x8x128xbf16>
    tpu.vector_store %arg5[%c1, %c1_10, %c0_11], %6 {strides = array<i32>} : memref<18x10x128xbf16, #tpu.memory_space<vmem>>, vector<16x8x128xbf16>,
    %c0_12 = arith.constant 0 : index
    %c0_13 = arith.constant 0 : index
    %c0_14 = arith.constant 0 : index
    %8 = vector.load %arg5[%c0_12, %c0_13, %c0_14] : memref<18x10x128xbf16, #tpu.memory_space<vmem>>, vector<16x8x128xbf16>
    %9 = vector.shape_cast %8 : vector<16x8x128xbf16> to vector<128x128xbf16>
    %c0_15 = arith.constant 0 : index
    %c0_16 = arith.constant 0 : index
    %10 = vector.load %arg6[%c0_15, %c0_16] : memref<128x1152xbf16, #tpu.memory_space<vmem>>, vector<128x128xbf16>
    tpu.vector_store %arg6[%c0_15, %c0_16], %9 {strides = array<i32>} : memref<128x1152xbf16, #tpu.memory_space<vmem>>, vector<128x128xbf16>,
    %c0_17 = arith.constant 0 : index
    %c1_18 = arith.constant 1 : index
    %c0_19 = arith.constant 0 : index
    %11 = vector.load %arg5[%c0_17, %c1_18, %c0_19] : memref<18x10x128xbf16, #tpu.memory_space<vmem>>, vector<16x8x128xbf16>
    %12 = vector.shape_cast %11 : vector<16x8x128xbf16> to vector<128x128xbf16>
    %c0_20 = arith.constant 0 : index
    %c128 = arith.constant 128 : index
    %13 = vector.load %arg6[%c0_20, %c128] : memref<128x1152xbf16, #tpu.memory_space<vmem>>, vector<128x128xbf16>
    tpu.vector_store %arg6[%c0_20, %c128], %12 {strides = array<i32>} : memref<128x1152xbf16, #tpu.memory_space<vmem>>, vector<128x128xbf16>,
    %c0_21 = arith.constant 0 : index
    %c2 = arith.constant 2 : index
    %c0_22 = arith.constant 0 : index
    %14 = vector.load %arg5[%c0_21, %c2, %c0_22] : memref<18x10x128xbf16, #tpu.memory_space<vmem>>, vector<16x8x128xbf16>
    %15 = vector.shape_cast %14 : vector<16x8x128xbf16> to vector<128x128xbf16>
    %c0_23 = arith.constant 0 : index
    %c256 = arith.constant 256 : index
    %16 = vector.load %arg6[%c0_23, %c256] : memref<128x1152xbf16, #tpu.memory_space<vmem>>, vector<128x128xbf16>
    tpu.vector_store %arg6[%c0_23, %c256], %15 {strides = array<i32>} : memref<128x1152xbf16, #tpu.memory_space<vmem>>, vector<128x128xbf16>,
    %c1_24 = arith.constant 1 : index
    %c0_25 = arith.constant 0 : index
    %c0_26 = arith.constant 0 : index
    %17 = vector.load %arg5[%c1_24, %c0_25, %c0_26] : memref<18x10x128xbf16, #tpu.memory_space<vmem>>, vector<16x8x128xbf16>
    %18 = vector.shape_cast %17 : vector<16x8x128xbf16> to vector<128x128xbf16>
    %c0_27 = arith.constant 0 : index
    %c384 = arith.constant 384 : index
    %19 = vector.load %arg6[%c0_27, %c384] : memref<128x1152xbf16, #tpu.memory_space<vmem>>, vector<128x128xbf16>
    tpu.vector_store %arg6[%c0_27, %c384], %18 {strides = array<i32>} : memref<128x1152xbf16, #tpu.memory_space<vmem>>, vector<128x128xbf16>,
    %c1_28 = arith.constant 1 : index
    %c1_29 = arith.constant 1 : index
    %c0_30 = arith.constant 0 : index
    %20 = vector.load %arg5[%c1_28, %c1_29, %c0_30] : memref<18x10x128xbf16, #tpu.memory_space<vmem>>, vector<16x8x128xbf16>
    %21 = vector.shape_cast %20 : vector<16x8x128xbf16> to vector<128x128xbf16>
    %c0_31 = arith.constant 0 : index
    %c512 = arith.constant 512 : index
    %22 = vector.load %arg6[%c0_31, %c512] : memref<128x1152xbf16, #tpu.memory_space<vmem>>, vector<128x128xbf16>
    tpu.vector_store %arg6[%c0_31, %c512], %21 {strides = array<i32>} : memref<128x1152xbf16, #tpu.memory_space<vmem>>, vector<128x128xbf16>,
    %c1_32 = arith.constant 1 : index
    %c2_33 = arith.constant 2 : index
    %c0_34 = arith.constant 0 : index
    %23 = vector.load %arg5[%c1_32, %c2_33, %c0_34] : memref<18x10x128xbf16, #tpu.memory_space<vmem>>, vector<16x8x128xbf16>
    %24 = vector.shape_cast %23 : vector<16x8x128xbf16> to vector<128x128xbf16>
    %c0_35 = arith.constant 0 : index
    %c640 = arith.constant 640 : index
    %25 = vector.load %arg6[%c0_35, %c640] : memref<128x1152xbf16, #tpu.memory_space<vmem>>, vector<128x128xbf16>
    tpu.vector_store %arg6[%c0_35, %c640], %24 {strides = array<i32>} : memref<128x1152xbf16, #tpu.memory_space<vmem>>, vector<128x128xbf16>,
    %c2_36 = arith.constant 2 : index
    %c0_37 = arith.constant 0 : index
    %c0_38 = arith.constant 0 : index
    %26 = vector.load %arg5[%c2_36, %c0_37, %c0_38] : memref<18x10x128xbf16, #tpu.memory_space<vmem>>, vector<16x8x128xbf16>
    %27 = vector.shape_cast %26 : vector<16x8x128xbf16> to vector<128x128xbf16>
    %c0_39 = arith.constant 0 : index
    %c768 = arith.constant 768 : index
    %28 = vector.load %arg6[%c0_39, %c768] : memref<128x1152xbf16, #tpu.memory_space<vmem>>, vector<128x128xbf16>
    tpu.vector_store %arg6[%c0_39, %c768], %27 {strides = array<i32>} : memref<128x1152xbf16, #tpu.memory_space<vmem>>, vector<128x128xbf16>,
    %c2_40 = arith.constant 2 : index
    %c1_41 = arith.constant 1 : index
    %c0_42 = arith.constant 0 : index
    %29 = vector.load %arg5[%c2_40, %c1_41, %c0_42] : memref<18x10x128xbf16, #tpu.memory_space<vmem>>, vector<16x8x128xbf16>
    %30 = vector.shape_cast %29 : vector<16x8x128xbf16> to vector<128x128xbf16>
    %c0_43 = arith.constant 0 : index
    %c896 = arith.constant 896 : index
    %31 = vector.load %arg6[%c0_43, %c896] : memref<128x1152xbf16, #tpu.memory_space<vmem>>, vector<128x128xbf16>
    tpu.vector_store %arg6[%c0_43, %c896], %30 {strides = array<i32>} : memref<128x1152xbf16, #tpu.memory_space<vmem>>, vector<128x128xbf16>,
    %c2_44 = arith.constant 2 : index
    %c2_45 = arith.constant 2 : index
    %c0_46 = arith.constant 0 : index
    %32 = vector.load %arg5[%c2_44, %c2_45, %c0_46] : memref<18x10x128xbf16, #tpu.memory_space<vmem>>, vector<16x8x128xbf16>
    %33 = vector.shape_cast %32 : vector<16x8x128xbf16> to vector<128x128xbf16>
    %c0_47 = arith.constant 0 : index
    %c1024 = arith.constant 1024 : index
    %34 = vector.load %arg6[%c0_47, %c1024] : memref<128x1152xbf16, #tpu.memory_space<vmem>>, vector<128x128xbf16>
    tpu.vector_store %arg6[%c0_47, %c1024], %33 {strides = array<i32>} : memref<128x1152xbf16, #tpu.memory_space<vmem>>, vector<128x128xbf16>,
    %c0_48 = arith.constant 0 : index
    %c0_49 = arith.constant 0 : index
    %35 = vector.load %arg6[%c0_48, %c0_49] : memref<128x1152xbf16, #tpu.memory_space<vmem>>, vector<128x1152xbf16>
    %cst_50 = arith.constant dense<0.000000e+00> : vector<128x128xf32>
    %36 = tpu.matmul %35, %1, %cst_50 {dimension_numbers = #tpu.dot_dimension_numbers<[1], [0], [0], [1], [0, 0, 1, 1], [], []>} : vector<128x1152xbf16>, vector<1152x128xbf16>, vector<128x128xf32> -> vector<128x128xf32>
    %37 = vector.broadcast %0 : vector<1x128xf32> to vector<128x128xf32>
    %38 = arith.addf %36, %37 : vector<128x128xf32>
    %39 = vector.shape_cast %38 : vector<128x128xf32> to vector<16x8x128xf32>
    %40 = arith.truncf %39 : vector<16x8x128xf32> to vector<16x8x128xbf16>
    %c1_51 = arith.constant 1 : index
    %c1_52 = arith.constant 1 : index
    %c0_53 = arith.constant 0 : index
    %41 = vector.load %arg5[%c1_51, %c1_52, %c0_53] : memref<18x10x128xbf16, #tpu.memory_space<vmem>>, vector<16x8x128xbf16>
    tpu.vector_store %arg5[%c1_51, %c1_52, %c0_53], %40 {strides = array<i32>} : memref<18x10x128xbf16, #tpu.memory_space<vmem>>, vector<16x8x128xbf16>,
    %c0_54 = arith.constant 0 : index
    %c0_55 = arith.constant 0 : index
    %c0_56 = arith.constant 0 : index
    %42 = vector.load %arg5[%c0_54, %c0_55, %c0_56] : memref<18x10x128xbf16, #tpu.memory_space<vmem>>, vector<16x8x128xbf16>
    %43 = vector.shape_cast %42 : vector<16x8x128xbf16> to vector<128x128xbf16>
    %c0_57 = arith.constant 0 : index
    %c0_58 = arith.constant 0 : index
    %44 = vector.load %arg6[%c0_57, %c0_58] : memref<128x1152xbf16, #tpu.memory_space<vmem>>, vector<128x128xbf16>
    tpu.vector_store %arg6[%c0_57, %c0_58], %43 {strides = array<i32>} : memref<128x1152xbf16, #tpu.memory_space<vmem>>, vector<128x128xbf16>,
    %c0_59 = arith.constant 0 : index
    %c1_60 = arith.constant 1 : index
    %c0_61 = arith.constant 0 : index
    %45 = vector.load %arg5[%c0_59, %c1_60, %c0_61] : memref<18x10x128xbf16, #tpu.memory_space<vmem>>, vector<16x8x128xbf16>
    %46 = vector.shape_cast %45 : vector<16x8x128xbf16> to vector<128x128xbf16>
    %c0_62 = arith.constant 0 : index
    %c128_63 = arith.constant 128 : index
    %47 = vector.load %arg6[%c0_62, %c128_63] : memref<128x1152xbf16, #tpu.memory_space<vmem>>, vector<128x128xbf16>
    tpu.vector_store %arg6[%c0_62, %c128_63], %46 {strides = array<i32>} : memref<128x1152xbf16, #tpu.memory_space<vmem>>, vector<128x128xbf16>,
    %c0_64 = arith.constant 0 : index
    %c2_65 = arith.constant 2 : index
    %c0_66 = arith.constant 0 : index
    %48 = vector.load %arg5[%c0_64, %c2_65, %c0_66] : memref<18x10x128xbf16, #tpu.memory_space<vmem>>, vector<16x8x128xbf16>
    %49 = vector.shape_cast %48 : vector<16x8x128xbf16> to vector<128x128xbf16>
    %c0_67 = arith.constant 0 : index
    %c256_68 = arith.constant 256 : index
    %50 = vector.load %arg6[%c0_67, %c256_68] : memref<128x1152xbf16, #tpu.memory_space<vmem>>, vector<128x128xbf16>
    tpu.vector_store %arg6[%c0_67, %c256_68], %49 {strides = array<i32>} : memref<128x1152xbf16, #tpu.memory_space<vmem>>, vector<128x128xbf16>,
    %c1_69 = arith.constant 1 : index
    %c0_70 = arith.constant 0 : index
    %c0_71 = arith.constant 0 : index
    %51 = vector.load %arg5[%c1_69, %c0_70, %c0_71] : memref<18x10x128xbf16, #tpu.memory_space<vmem>>, vector<16x8x128xbf16>
    %52 = vector.shape_cast %51 : vector<16x8x128xbf16> to vector<128x128xbf16>
    %c0_72 = arith.constant 0 : index
    %c384_73 = arith.constant 384 : index
    %53 = vector.load %arg6[%c0_72, %c384_73] : memref<128x1152xbf16, #tpu.memory_space<vmem>>, vector<128x128xbf16>
    tpu.vector_store %arg6[%c0_72, %c384_73], %52 {strides = array<i32>} : memref<128x1152xbf16, #tpu.memory_space<vmem>>, vector<128x128xbf16>,
    %c1_74 = arith.constant 1 : index
    %c1_75 = arith.constant 1 : index
    %c0_76 = arith.constant 0 : index
    %54 = vector.load %arg5[%c1_74, %c1_75, %c0_76] : memref<18x10x128xbf16, #tpu.memory_space<vmem>>, vector<16x8x128xbf16>
    %55 = vector.shape_cast %54 : vector<16x8x128xbf16> to vector<128x128xbf16>
    %c0_77 = arith.constant 0 : index
    %c512_78 = arith.constant 512 : index
    %56 = vector.load %arg6[%c0_77, %c512_78] : memref<128x1152xbf16, #tpu.memory_space<vmem>>, vector<128x128xbf16>
    tpu.vector_store %arg6[%c0_77, %c512_78], %55 {strides = array<i32>} : memref<128x1152xbf16, #tpu.memory_space<vmem>>, vector<128x128xbf16>,
    %c1_79 = arith.constant 1 : index
    %c2_80 = arith.constant 2 : index
    %c0_81 = arith.constant 0 : index
    %57 = vector.load %arg5[%c1_79, %c2_80, %c0_81] : memref<18x10x128xbf16, #tpu.memory_space<vmem>>, vector<16x8x128xbf16>
    %58 = vector.shape_cast %57 : vector<16x8x128xbf16> to vector<128x128xbf16>
    %c0_82 = arith.constant 0 : index
    %c640_83 = arith.constant 640 : index
    %59 = vector.load %arg6[%c0_82, %c640_83] : memref<128x1152xbf16, #tpu.memory_space<vmem>>, vector<128x128xbf16>
    tpu.vector_store %arg6[%c0_82, %c640_83], %58 {strides = array<i32>} : memref<128x1152xbf16, #tpu.memory_space<vmem>>, vector<128x128xbf16>,
    %c2_84 = arith.constant 2 : index
    %c0_85 = arith.constant 0 : index
    %c0_86 = arith.constant 0 : index
    %60 = vector.load %arg5[%c2_84, %c0_85, %c0_86] : memref<18x10x128xbf16, #tpu.memory_space<vmem>>, vector<16x8x128xbf16>
    %61 = vector.shape_cast %60 : vector<16x8x128xbf16> to vector<128x128xbf16>
    %c0_87 = arith.constant 0 : index
    %c768_88 = arith.constant 768 : index
    %62 = vector.load %arg6[%c0_87, %c768_88] : memref<128x1152xbf16, #tpu.memory_space<vmem>>, vector<128x128xbf16>
    tpu.vector_store %arg6[%c0_87, %c768_88], %61 {strides = array<i32>} : memref<128x1152xbf16, #tpu.memory_space<vmem>>, vector<128x128xbf16>,
    %c2_89 = arith.constant 2 : index
    %c1_90 = arith.constant 1 : index
    %c0_91 = arith.constant 0 : index
    %63 = vector.load %arg5[%c2_89, %c1_90, %c0_91] : memref<18x10x128xbf16, #tpu.memory_space<vmem>>, vector<16x8x128xbf16>
    %64 = vector.shape_cast %63 : vector<16x8x128xbf16> to vector<128x128xbf16>
    %c0_92 = arith.constant 0 : index
    %c896_93 = arith.constant 896 : index
    %65 = vector.load %arg6[%c0_92, %c896_93] : memref<128x1152xbf16, #tpu.memory_space<vmem>>, vector<128x128xbf16>
    tpu.vector_store %arg6[%c0_92, %c896_93], %64 {strides = array<i32>} : memref<128x1152xbf16, #tpu.memory_space<vmem>>, vector<128x128xbf16>,
    %c2_94 = arith.constant 2 : index
    %c2_95 = arith.constant 2 : index
    %c0_96 = arith.constant 0 : index
    %66 = vector.load %arg5[%c2_94, %c2_95, %c0_96] : memref<18x10x128xbf16, #tpu.memory_space<vmem>>, vector<16x8x128xbf16>
    %67 = vector.shape_cast %66 : vector<16x8x128xbf16> to vector<128x128xbf16>
    %c0_97 = arith.constant 0 : index
    %c1024_98 = arith.constant 1024 : index
    %68 = vector.load %arg6[%c0_97, %c1024_98] : memref<128x1152xbf16, #tpu.memory_space<vmem>>, vector<128x128xbf16>
    tpu.vector_store %arg6[%c0_97, %c1024_98], %67 {strides = array<i32>} : memref<128x1152xbf16, #tpu.memory_space<vmem>>, vector<128x128xbf16>,
    %c0_99 = arith.constant 0 : index
    %c0_100 = arith.constant 0 : index
    %69 = vector.load %arg6[%c0_99, %c0_100] : memref<128x1152xbf16, #tpu.memory_space<vmem>>, vector<128x1152xbf16>
    %cst_101 = arith.constant dense<0.000000e+00> : vector<128x128xf32>
    %70 = tpu.matmul %69, %1, %cst_101 {dimension_numbers = #tpu.dot_dimension_numbers<[1], [0], [0], [1], [0, 0, 1, 1], [], []>} : vector<128x1152xbf16>, vector<1152x128xbf16>, vector<128x128xf32> -> vector<128x128xf32>
    %71 = vector.broadcast %0 : vector<1x128xf32> to vector<128x128xf32>
    %72 = arith.addf %70, %71 : vector<128x128xf32>
    %73 = arith.addf %38, %72 : vector<128x128xf32>
    %74 = vector.shape_cast %72 : vector<128x128xf32> to vector<16x8x128xf32>
    %75 = arith.truncf %74 : vector<16x8x128xf32> to vector<16x8x128xbf16>
    %c1_102 = arith.constant 1 : index
    %c1_103 = arith.constant 1 : index
    %c0_104 = arith.constant 0 : index
    %76 = vector.load %arg5[%c1_102, %c1_103, %c0_104] : memref<18x10x128xbf16, #tpu.memory_space<vmem>>, vector<16x8x128xbf16>
    tpu.vector_store %arg5[%c1_102, %c1_103, %c0_104], %75 {strides = array<i32>} : memref<18x10x128xbf16, #tpu.memory_space<vmem>>, vector<16x8x128xbf16>,
    %c0_105 = arith.constant 0 : index
    %c0_106 = arith.constant 0 : index
    %c0_107 = arith.constant 0 : index
    %77 = vector.load %arg5[%c0_105, %c0_106, %c0_107] : memref<18x10x128xbf16, #tpu.memory_space<vmem>>, vector<16x8x128xbf16>
    %78 = vector.shape_cast %77 : vector<16x8x128xbf16> to vector<128x128xbf16>
    %c0_108 = arith.constant 0 : index
    %c0_109 = arith.constant 0 : index
    %79 = vector.load %arg6[%c0_108, %c0_109] : memref<128x1152xbf16, #tpu.memory_space<vmem>>, vector<128x128xbf16>
    tpu.vector_store %arg6[%c0_108, %c0_109], %78 {strides = array<i32>} : memref<128x1152xbf16, #tpu.memory_space<vmem>>, vector<128x128xbf16>,
    %c0_110 = arith.constant 0 : index
    %c1_111 = arith.constant 1 : index
    %c0_112 = arith.constant 0 : index
    %80 = vector.load %arg5[%c0_110, %c1_111, %c0_112] : memref<18x10x128xbf16, #tpu.memory_space<vmem>>, vector<16x8x128xbf16>
    %81 = vector.shape_cast %80 : vector<16x8x128xbf16> to vector<128x128xbf16>
    %c0_113 = arith.constant 0 : index
    %c128_114 = arith.constant 128 : index
    %82 = vector.load %arg6[%c0_113, %c128_114] : memref<128x1152xbf16, #tpu.memory_space<vmem>>, vector<128x128xbf16>
    tpu.vector_store %arg6[%c0_113, %c128_114], %81 {strides = array<i32>} : memref<128x1152xbf16, #tpu.memory_space<vmem>>, vector<128x128xbf16>,
    %c0_115 = arith.constant 0 : index
    %c2_116 = arith.constant 2 : index
    %c0_117 = arith.constant 0 : index
    %83 = vector.load %arg5[%c0_115, %c2_116, %c0_117] : memref<18x10x128xbf16, #tpu.memory_space<vmem>>, vector<16x8x128xbf16>
    %84 = vector.shape_cast %83 : vector<16x8x128xbf16> to vector<128x128xbf16>
    %c0_118 = arith.constant 0 : index
    %c256_119 = arith.constant 256 : index
    %85 = vector.load %arg6[%c0_118, %c256_119] : memref<128x1152xbf16, #tpu.memory_space<vmem>>, vector<128x128xbf16>
    tpu.vector_store %arg6[%c0_118, %c256_119], %84 {strides = array<i32>} : memref<128x1152xbf16, #tpu.memory_space<vmem>>, vector<128x128xbf16>,
    %c1_120 = arith.constant 1 : index
    %c0_121 = arith.constant 0 : index
    %c0_122 = arith.constant 0 : index
    %86 = vector.load %arg5[%c1_120, %c0_121, %c0_122] : memref<18x10x128xbf16, #tpu.memory_space<vmem>>, vector<16x8x128xbf16>
    %87 = vector.shape_cast %86 : vector<16x8x128xbf16> to vector<128x128xbf16>
    %c0_123 = arith.constant 0 : index
    %c384_124 = arith.constant 384 : index
    %88 = vector.load %arg6[%c0_123, %c384_124] : memref<128x1152xbf16, #tpu.memory_space<vmem>>, vector<128x128xbf16>
    tpu.vector_store %arg6[%c0_123, %c384_124], %87 {strides = array<i32>} : memref<128x1152xbf16, #tpu.memory_space<vmem>>, vector<128x128xbf16>,
    %c1_125 = arith.constant 1 : index
    %c1_126 = arith.constant 1 : index
    %c0_127 = arith.constant 0 : index
    %89 = vector.load %arg5[%c1_125, %c1_126, %c0_127] : memref<18x10x128xbf16, #tpu.memory_space<vmem>>, vector<16x8x128xbf16>
    %90 = vector.shape_cast %89 : vector<16x8x128xbf16> to vector<128x128xbf16>
    %c0_128 = arith.constant 0 : index
    %c512_129 = arith.constant 512 : index
    %91 = vector.load %arg6[%c0_128, %c512_129] : memref<128x1152xbf16, #tpu.memory_space<vmem>>, vector<128x128xbf16>
    tpu.vector_store %arg6[%c0_128, %c512_129], %90 {strides = array<i32>} : memref<128x1152xbf16, #tpu.memory_space<vmem>>, vector<128x128xbf16>,
    %c1_130 = arith.constant 1 : index
    %c2_131 = arith.constant 2 : index
    %c0_132 = arith.constant 0 : index
    %92 = vector.load %arg5[%c1_130, %c2_131, %c0_132] : memref<18x10x128xbf16, #tpu.memory_space<vmem>>, vector<16x8x128xbf16>
    %93 = vector.shape_cast %92 : vector<16x8x128xbf16> to vector<128x128xbf16>
    %c0_133 = arith.constant 0 : index
    %c640_134 = arith.constant 640 : index
    %94 = vector.load %arg6[%c0_133, %c640_134] : memref<128x1152xbf16, #tpu.memory_space<vmem>>, vector<128x128xbf16>
    tpu.vector_store %arg6[%c0_133, %c640_134], %93 {strides = array<i32>} : memref<128x1152xbf16, #tpu.memory_space<vmem>>, vector<128x128xbf16>,
    %c2_135 = arith.constant 2 : index
    %c0_136 = arith.constant 0 : index
    %c0_137 = arith.constant 0 : index
    %95 = vector.load %arg5[%c2_135, %c0_136, %c0_137] : memref<18x10x128xbf16, #tpu.memory_space<vmem>>, vector<16x8x128xbf16>
    %96 = vector.shape_cast %95 : vector<16x8x128xbf16> to vector<128x128xbf16>
    %c0_138 = arith.constant 0 : index
    %c768_139 = arith.constant 768 : index
    %97 = vector.load %arg6[%c0_138, %c768_139] : memref<128x1152xbf16, #tpu.memory_space<vmem>>, vector<128x128xbf16>
    tpu.vector_store %arg6[%c0_138, %c768_139], %96 {strides = array<i32>} : memref<128x1152xbf16, #tpu.memory_space<vmem>>, vector<128x128xbf16>,
    %c2_140 = arith.constant 2 : index
    %c1_141 = arith.constant 1 : index
    %c0_142 = arith.constant 0 : index
    %98 = vector.load %arg5[%c2_140, %c1_141, %c0_142] : memref<18x10x128xbf16, #tpu.memory_space<vmem>>, vector<16x8x128xbf16>
    %99 = vector.shape_cast %98 : vector<16x8x128xbf16> to vector<128x128xbf16>
    %c0_143 = arith.constant 0 : index
    %c896_144 = arith.constant 896 : index
    %100 = vector.load %arg6[%c0_143, %c896_144] : memref<128x1152xbf16, #tpu.memory_space<vmem>>, vector<128x128xbf16>
    tpu.vector_store %arg6[%c0_143, %c896_144], %99 {strides = array<i32>} : memref<128x1152xbf16, #tpu.memory_space<vmem>>, vector<128x128xbf16>,
    %c2_145 = arith.constant 2 : index
    %c2_146 = arith.constant 2 : index
    %c0_147 = arith.constant 0 : index
    %101 = vector.load %arg5[%c2_145, %c2_146, %c0_147] : memref<18x10x128xbf16, #tpu.memory_space<vmem>>, vector<16x8x128xbf16>
    %102 = vector.shape_cast %101 : vector<16x8x128xbf16> to vector<128x128xbf16>
    %c0_148 = arith.constant 0 : index
    %c1024_149 = arith.constant 1024 : index
    %103 = vector.load %arg6[%c0_148, %c1024_149] : memref<128x1152xbf16, #tpu.memory_space<vmem>>, vector<128x128xbf16>
    tpu.vector_store %arg6[%c0_148, %c1024_149], %102 {strides = array<i32>} : memref<128x1152xbf16, #tpu.memory_space<vmem>>, vector<128x128xbf16>,
    %c0_150 = arith.constant 0 : index
    %c0_151 = arith.constant 0 : index
    %104 = vector.load %arg6[%c0_150, %c0_151] : memref<128x1152xbf16, #tpu.memory_space<vmem>>, vector<128x1152xbf16>
    %cst_152 = arith.constant dense<0.000000e+00> : vector<128x128xf32>
    %105 = tpu.matmul %104, %1, %cst_152 {dimension_numbers = #tpu.dot_dimension_numbers<[1], [0], [0], [1], [0, 0, 1, 1], [], []>} : vector<128x1152xbf16>, vector<1152x128xbf16>, vector<128x128xf32> -> vector<128x128xf32>
    %106 = vector.broadcast %0 : vector<1x128xf32> to vector<128x128xf32>
    %107 = arith.addf %105, %106 : vector<128x128xf32>
    %108 = arith.addf %73, %107 : vector<128x128xf32>
    %c0_153 = arith.constant 0 : index
    %c0_154 = arith.constant 0 : index
    %c0_155 = arith.constant 0 : index
    %c0_156 = arith.constant 0 : index
    %109 = vector.load %arg1[%c0_153, %c0_154, %c0_155, %c0_156] : memref<1x16x8x128xf32, #tpu.memory_space<vmem>>, vector<1x16x8x128xf32>
    %110 = vector.shape_cast %109 : vector<1x16x8x128xf32> to vector<16x8x128xf32>
    %c64_i32 = arith.constant 64 : i32
    %111 = tpu.dynamic_rotate %110 by %c64_i32 dim 2 : vector<16x8x128xf32>, i32 -> vector<16x8x128xf32>
    %112 = arith.addf %110, %111 : vector<16x8x128xf32>
    %113 = vector.shape_cast %112 : vector<16x8x128xf32> to vector<8x2x8x128xf32>
    %114 = vector.extract_strided_slice %113 {offsets = [0, 0, 0, 0], sizes = [8, 1, 8, 128], strides = [1, 1, 1, 1]} : vector<8x2x8x128xf32> to vector<8x1x8x128xf32>
    %115 = vector.shape_cast %114 : vector<8x1x8x128xf32> to vector<8x8x128xf32>
    %116 = vector.extract_strided_slice %113 {offsets = [0, 1, 0, 0], sizes = [8, 1, 8, 128], strides = [1, 1, 1, 1]} : vector<8x2x8x128xf32> to vector<8x1x8x128xf32>
    %117 = vector.shape_cast %116 : vector<8x1x8x128xf32> to vector<8x8x128xf32>
    %118 = arith.addf %115, %117 : vector<8x8x128xf32>
    %119 = vector.shape_cast %118 : vector<8x8x128xf32> to vector<8x1x8x128xf32>
    %120 = vector.shape_cast %118 : vector<8x8x128xf32> to vector<8x1x8x128xf32>
    %121 = tpu.concatenate %119, %120 in 1 : vector<8x1x8x128xf32>, vector<8x1x8x128xf32> -> vector<8x2x8x128xf32>
    %122 = vector.shape_cast %121 : vector<8x2x8x128xf32> to vector<16x8x128xf32>
    %cst_157 = arith.constant 2.500000e-01 : f32
    %123 = vector.broadcast %cst_157 : f32 to vector<16x8x128xf32>
    %124 = arith.mulf %123, %122 : vector<16x8x128xf32>
    %cst_158 = arith.constant 0.000000e+00 : f32
    %125 = vector.broadcast %cst_158 : f32 to vector<16x8x128xf32>
    %126 = arith.maximumf %124, %125 : vector<16x8x128xf32>
    %127 = vector.shape_cast %108 : vector<128x128xf32> to vector<16x8x128xf32>
    %128 = arith.mulf %126, %127 : vector<16x8x128xf32>
    %129 = arith.addf %110, %128 : vector<16x8x128xf32>
    %c0_159 = arith.constant 0 : index
    %c0_160 = arith.constant 0 : index
    %c0_161 = arith.constant 0 : index
    %c0_162 = arith.constant 0 : index
    %130 = vector.load %arg4[%c0_159, %c0_160, %c0_161, %c0_162] : memref<1x16x8x128xf32, #tpu.memory_space<vmem>>, vector<1x16x8x128xf32>
    %131 = vector.shape_cast %130 : vector<1x16x8x128xf32> to vector<16x8x128xf32>
    %132 = vector.shape_cast %129 : vector<16x8x128xf32> to vector<1x16x8x128xf32>
    tpu.vector_store %arg4[%c0_159, %c0_160, %c0_161, %c0_162], %132 {strides = array<i32>} : memref<1x16x8x128xf32, #tpu.memory_space<vmem>>, vector<1x16x8x128xf32>,
    return
  }
  func.func @transform_0(%arg0: i32) -> (i32, i32, i32, i32) {
    %c0_i32 = arith.constant 0 : i32
    %c0_i32_0 = arith.constant 0 : i32
    %c0_i32_1 = arith.constant 0 : i32
    %c0_i32_2 = arith.constant 0 : i32
    return %arg0, %c0_i32, %c0_i32_0, %c0_i32_1 : i32, i32, i32, i32
  }
  func.func @transform_1(%arg0: i32) -> (i32, i32) {
    %c0_i32 = arith.constant 0 : i32
    %c0_i32_0 = arith.constant 0 : i32
    %c0_i32_1 = arith.constant 0 : i32
    return %c0_i32, %c0_i32_0 : i32, i32
  }
  func.func @transform_2(%arg0: i32) -> (i32, i32) {
    %c0_i32 = arith.constant 0 : i32
    %c0_i32_0 = arith.constant 0 : i32
    %c0_i32_1 = arith.constant 0 : i32
    return %c0_i32, %c0_i32_0 : i32, i32
  }
  func.func @transform_3(%arg0: i32) -> (i32, i32, i32, i32) {
    %c0_i32 = arith.constant 0 : i32
    %c0_i32_0 = arith.constant 0 : i32
    %c0_i32_1 = arith.constant 0 : i32
    %c0_i32_2 = arith.constant 0 : i32
    return %arg0, %c0_i32, %c0_i32_0, %c0_i32_1 : i32, i32, i32, i32
  }
}

</mosaic_0001>

<bundles_post_ra>
// kernel: tpu_custom_call.1
= control target key start
LH: loop header
LB: loop body
LE: loop exit
PB: predicated region body
PF: predicated region fallthrough
CT: control target
= control target key end

     0   :  { %8 = vsyncpa [#allocation5], 0  ;;  %s12534_s0 = inlined_call_operand.hbm [shape: f32[2,16,8,128], index: 0, kind: input, shape index: {}]   ;;  %s12535_s1 = inlined_call_operand.hbm [shape: bf16[1152,128], index: 1, kind: input, shape index: {}]   ;;  %s12536_s2 = inlined_call_operand.vmem [shape: f32[1,128], index: 2, kind: input, shape index: {}]   ;;  %s12537_s3 = inlined_call_operand.hbm [shape: f32[2,16,8,128], index: 3, kind: output, shape index: {}]  }
   0x1   :  { %10 = vsyncpa [#allocation5 + $0x1], 0 }
   0x2   :  { %11 = vsyncpa [#allocation8], 0 }
   0x3   :  { %12 = vsyncpa [#allocation6], 0 }
   0x4   :  { %14 = vsyncpa [#allocation6 + $0x1], 0  ;;  %s10581_s12 = smov 0   ;;  %s10583_s13 = smov 0  }
   0x5   :  { %s10585_s14 = smov 0   ;;  %s10587_s15 = smov 0  }
   0x6 LB: > { %s10602_s16 = sadd.s32 4294967295, %s10548_s15   ;;  %s8574_s17 = sadd.s32 4294967294, %s10548_s15   ;;  %s10548_s15 = sphi %s10587_s15, %s12621_s15   ;;  %s10544_s14 = sphi %s10585_s14, %s12620_s14   ;;  %s10540_s13 = sphi %s10583_s13, %s12619_s13   ;;  %s10536_s12 = sphi %s10581_s12, %s12618_s12  }
   0x7   : > { %p40_p0 = scmp.ne.s32.totalorder %s10540_s13, %s10536_s12  ;;  %p12538_p1 = scmp.eq.s32.totalorder %s10602_s16, 0 }
   0x8   : > { %p112_p3 = scmp.eq.s32.totalorder %s8574_s17, 1  ;;  %p8575_p5 = scmp.ge.s32.totalorder %s10548_s15, 1 }
   0x9   : > { %p10611_p4 = por %p12538_p1, %p40_p0  ;;  %p119_p7 = scmp.lt.s32.totalorder %s10548_s15, 3 }
   0xa   : > { %p10616_p6 = por %p112_p3, %p40_p0  ;;  %s10550_s21 = smov [#allocation7]  }
   0xb   : > { %s12551_s18 = scalar_select %p10611_p4, 1, 0 }
   0xc   : > { %s12552_s19 = scalar_select %p10616_p6, 1, 0 }
   0xd   : > { %p10621_p8 = pnand %p8575_p5, %p119_p7  ;;  %s131_s22 = sshll.u32 %s10550_s21, 4  ;;  %s10625_s22 = int_to_ptr.vmem [resolvable:$true] %s131_s22 }
   0xe   : > { %s10637_s24 = sadd.s32 1, %s10548_s15   ;;  %s27_s25 = sadd.s32 1, %s10544_s14 }
   0xf   : > { %s12553_s20 = scalar_select %p10621_p8, 1, 0 }
  0x10   : > { %p10057_p9 = pneg %p10621_p8  ;;  %s24_s26 = ssub.s32 %s10548_s15, %s10637_s24 }
  0x11   : > { %s10420_s29 = scalar_lea.hbm %s12535_s1, 9216 }
  0x12   : > { %p10632_p11 = pnand %p10057_p9, %p12538_p1  ;;  %p10421_p12 = scmp.ne.s32.totalorder %s12535_s1, %s10420_s29 }
  0x13   : > { %p10427_p5 = scmp.lt.u32.totalorder %s10420_s29, %s12535_s1 }
  0x14   : > { %p10422_p13 = pneg %p10632_p11 }
  0x16   : > { %p10423_p0 = pnand %p10422_p13, %p10421_p12 }
  0x18   : > { %p10424_p3 = pneg %p10423_p0 }
  0x1a   : > { %p10429_p7 = pnand %p10427_p5, %p10424_p3 }
  0x1c   : > { %10432 = shalt.err (!%p10429_p7)
}
  0x1d   : > { %s10433_s7 = scalar_lea.vmem %s10625_s22, 9216  ;;  %p10441_p2 = scmp.lt.s32.totalorder %s10625_s22, %s10625_s22 }
  0x1e   : > { %p10434_p9 = scmp.ne.s32.totalorder %s10625_s22, %s10433_s7  ;;  %p10442_p6 = scmp.lt.s32.totalorder %s10433_s7, %s10433_s7 }
  0x20   : > { %p10436_p10 = pnand %p10434_p9, %p10422_p13  ;;  %p10443_p4 = por %p10442_p6, %p10441_p2 }
  0x22   : > { %p10437_p1 = pneg %p10436_p10 }
  0x24   : > { %p10444_p8 = pnand %p10443_p4, %p10437_p1 }
  0x26   : > { %10447 = shalt.err (!%p10444_p8)
}
  0x27   : > { %s10551_s8 = smov 64   ;;  %s10552_s9 = smov 4  }
  0x28   : > { %10060 = dma.hbm_to_vmem [thread:$0]  (!%p10632_p11), %s12535_s1, 9216, %s10625_s22, [#allocation8], %s10551_s8, %s10551_s8, %s10552_s9  }
  0x29   : > { %p25_p2 = scmp.eq.s32.totalorder %s24_s26, 0  ;;  %p34_p1 = scmp.ne.s32.totalorder %s10544_s14, %s10540_s13 }
  0x2a   : > { %p35_p4 = scmp.eq.s32.totalorder %s10548_s15, 0  ;;  %p10070_p6 = scmp.lt.s32.totalorder %s10548_s15, 2 }
  0x2b   : > { %s10668_s17 = scalar_select %p25_p2, %s10544_s14, %s27_s25  }
  0x2c   : > { %p36_p8 = por %p35_p4, %p34_p1  ;;  %p12555_p10 = scmp.eq.s32.totalorder %s10602_s16, 1 }
  0x2d   : > { %s148_s27 = sand.u32 1, %s10544_s14   ;;  %s9071_s28 = sshll.u32 %s10548_s15, 11 }
  0x2e   : > { %p10672_p12 = por %p12555_p10, %p34_p1  ;;  %s8578_s29 = sshll.u32 %s148_s27, 7 }
  0x2f   : > { %s10681_s4 = scalar_lea.hbm %s12534_s0, %s9071_s28  ;;  %s152_s22 = scalar_lea.vmem [#allocation4], %s8578_s29 }
  0x30   : > { %s159_s25 = sshll.u32 %s152_s22, 4  ;;  %p10683_p11 = pnand %p10070_p6, %p36_p8  ;;  %s10687_s25 = int_to_ptr.vmem [resolvable:$true] %s159_s25 }
  0x31   : > { %s10689_s5 = scalar_lea.sflag [#allocation5], %s148_s27  ;;  %s10448_s6 = scalar_lea.hbm %s10681_s4, 2048 }
  0x32   : > { %p10449_p13 = scmp.ne.s32.totalorder %s10681_s4, %s10448_s6  ;;  %p10450_p0 = pneg %p10683_p11 }
  0x33   : > { %s10453_s9 = scalar_lea.hbm %s12534_s0, 4096  ;;  %p10454_p7 = scmp.lt.u32.totalorder %s10681_s4, %s12534_s0 }
  0x34   : > { %p10451_p3 = pnand %p10450_p0, %p10449_p13  ;;  %p10455_p9 = scmp.lt.u32.totalorder %s10453_s9, %s10448_s6 }
  0x35   : > { %p10457_p1 = scmp.lt.u32.totalorder %s10448_s6, %s10681_s4 }
  0x36   : > { %p10452_p5 = pneg %p10451_p3  ;;  %p10456_p2 = por %p10455_p9, %p10454_p7 }
  0x38   : > { %p10458_p4 = por %p10457_p1, %p10456_p2 }
  0x3a   : > { %p10459_p6 = pnand %p10458_p4, %p10452_p5 }
  0x3c   : > { %10462 = shalt.err (!%p10459_p6)
}
  0x3d   : > { %s10463_s27 = scalar_lea.vmem %s10687_s25, 2048  ;;  %s10553_s28 = smov [#allocation4]  }
  0x3e   : > { %p10464_p8 = scmp.ne.s32.totalorder %s10687_s25, %s10463_s27  ;;  %s10468_s29 = sshll.u32 %s10553_s28, 4  ;;  %s10469_s29 = int_to_ptr.vmem [resolvable:$false] %s10468_s29 }
  0x3f   : > { %s10470_s23 = scalar_lea.vmem %s10469_s29, 4096  ;;  %p10471_p3 = scmp.lt.s32.totalorder %s10687_s25, %s10469_s29 }
  0x40   : > { %p10466_p10 = pnand %p10464_p8, %p10450_p0  ;;  %p10472_p7 = scmp.lt.s32.totalorder %s10470_s23, %s10463_s27 }
  0x42   : > { %p10467_p13 = pneg %p10466_p10  ;;  %p10473_p9 = por %p10472_p7, %p10471_p3 }
  0x44   : > { %p10474_p2 = pnand %p10473_p9, %p10467_p13 }
  0x46   : > { %10477 = shalt.err (!%p10474_p2)
}
  0x47   : > { %s10554_s30 = smov 128   ;;  %s10555_s22 = smov 8  }
  0x48   : > { %10064 = dma.hbm_to_vmem [thread:$0]  (!%p10683_p11), %s10681_s4, 2048, %s10687_s25, %s10689_s5, %s10554_s30, %s10554_s30, %s10555_s22  }
  0x49   : > { %p12558_p0 = scmp.ne.s32.totalorder %s12553_s20, 0 }
  0x4b   : > { %171 = sbr.rel (%p12558_p0) target bundleno = 1384 (0x568), region = 32 }
  0x52   : > { %s10720_s6 = sand.u32 1, %s10540_s13   ;;  %p12559_p5 = scmp.ne.s32.totalorder %s12551_s18, 0 }
  0x53   : > { %s8582_s7 = sshll.u32 %s10720_s6, 7  ;;  %s174_s8 = scalar_lea.sflag [#allocation5], %s10720_s6 }
  0x54   : > { %s10726_s9 = scalar_lea.vmem [#allocation4], %s8582_s7 }
  0x55   : > { %10523 = dma.done.wait (%p12559_p5), %s174_s8, 2048  }
  0x56   : > { %10525 = vsyncadd (%p12559_p5), %s174_s8, 4294965248  ;;  %p12560_p11 = scmp.eq.s32.totalorder %s10602_s16, 0 }
  0x58   : > { %10527 = dma.done.wait (%p12560_p11), [#allocation8], 9216   ;;  %p12561_p1 = pmov %p12560_p11 }
  0x59   : > { %v10556_v0 = vmov 0   ;;  %v10114_v1 = vld [vmem:[#allocation7 + $0x40] sm:$0xff]   ;;  %v10118_v5 = vld [vmem:[#allocation7 + $0x48] sm:$0xff]   ;;  %v10122_v9 = vld [vmem:[#allocation7 + $0x50] sm:$0xff]   ;;  %vm627_vm0 = vcmask 1043456   ;;  %vm633_vm2 = vcmask 1040384  }
  0x5a   : > { %10529 = vsyncadd (%p12561_p1), [#allocation8], 4294958080  ;;  %350 = vst [vmem:[#allocation2] sm:$0xf] %v10556_v0  ;;  %v10115_v2 = vld [vmem:[#allocation7] sm:$0xff]   ;;  %9121 = vmatprep.subr.bf16.mxu0 %v10114_v1  ;;  %v10119_v6 = vld [vmem:[#allocation7 + $0x8] sm:$0xff]  }
  0x5b   : > { %351 = vst [vmem:[#allocation2 + $0x4] sm:$0x1] %v10556_v0  ;;  %352 = vst [vmem:[#allocation2 + $0x8] sm:$0xf] %v10556_v0  ;;  %v10116_v3 = vld [vmem:[#allocation7 + $0xc0] sm:$0xff]   ;;  %9122 = vmatpush3.bf16.msra.mxu0 %v10115_v2  ;;  %v10120_v7 = vld [vmem:[#allocation7 + $0xc8] sm:$0xff]  }
  0x5c   : > { %353 = vst [vmem:[#allocation2 + $0xc] sm:$0x1] %v10556_v0  ;;  %354 = vst [vmem:[#allocation2 + $0x10] sm:$0xf] %v10556_v0  ;;  %v10117_v4 = vld [vmem:[#allocation7 + $0x80] sm:$0xff]   ;;  %9185 = vmatprep.subr.bf16.mxu1 %v10116_v3  ;;  %9123 = vmatprep.subr.bf16.mxu0 %v10118_v5  ;;  %v10121_v8 = vld [vmem:[#allocation7 + $0x88] sm:$0xff]  }
  0x5d   : > { %355 = vst [vmem:[#allocation2 + $0x14] sm:$0x1] %v10556_v0  ;;  %356 = vst [vmem:[#allocation2 + $0x18] sm:$0xf] %v10556_v0  ;;  %9186 = vmatpush3.bf16.msra.mxu1 %v10117_v4  ;;  %v10123_v10 = vld [vmem:[#allocation7 + $0x10] sm:$0xff]   ;;  %v10126_v13 = vld [vmem:[#allocation7 + $0x58] sm:$0xff]  }
  0x5e   : > { %357 = vst [vmem:[#allocation2 + $0x1c] sm:$0x1] %v10556_v0  ;;  %358 = vst [vmem:[#allocation2 + $0x20] sm:$0xf] %v10556_v0  ;;  %9187 = vmatprep.subr.bf16.mxu1 %v10120_v7  ;;  %v10124_v11 = vld [vmem:[#allocation7 + $0xd0] sm:$0xff]   ;;  %v10127_v14 = vld [vmem:[#allocation7 + $0x18] sm:$0xff]  }
  0x5f   : > { %359 = vst [vmem:[#allocation2 + $0x24] sm:$0x1] %v10556_v0  ;;  %360 = vst [vmem:[#allocation2 + $0x28] sm:$0xf] %v10556_v0  ;;  %9124 = vmatpush3.bf16.msra.mxu0 %v10119_v6  ;;  %v10125_v12 = vld [vmem:[#allocation7 + $0x90] sm:$0xff]   ;;  %v10128_v15 = vld [vmem:[#allocation7 + $0xd8] sm:$0xff]  }
  0x60   : > { %361 = vst [vmem:[#allocation2 + $0x2c] sm:$0x1] %v10556_v0  ;;  %362 = vst [vmem:[#allocation2 + $0x30] sm:$0xf] %v10556_v0  ;;  %9125 = vmatprep.subr.bf16.mxu0 %v10122_v9  ;;  %v10129_v16 = vld [vmem:[#allocation7 + $0x98] sm:$0xff]   ;;  %v10130_v17 = vld [vmem:[#allocation7 + $0x60] sm:$0xff]  }
  0x61   : > { %363 = vst [vmem:[#allocation2 + $0x34] sm:$0x1] %v10556_v0  ;;  %364 = vst [vmem:[#allocation2 + $0x38] sm:$0xf] %v10556_v0  ;;  %9188 = vmatpush3.bf16.msra.mxu1 %v10121_v8  ;;  %v10131_v18 = vld [vmem:[#allocation7 + $0x20] sm:$0xff]   ;;  %v10134_v21 = vld [vmem:[#allocation7 + $0x68] sm:$0xff]  }
  0x62   : > { %365 = vst [vmem:[#allocation2 + $0x3c] sm:$0x1] %v10556_v0  ;;  %366 = vst [vmem:[#allocation2 + $0x40] sm:$0xf] %v10556_v0  ;;  %9189 = vmatprep.subr.bf16.mxu1 %v10124_v11  ;;  %v10132_v19 = vld [vmem:[#allocation7 + $0xe0] sm:$0xff]   ;;  %v10135_v22 = vld [vmem:[#allocation7 + $0x28] sm:$0xff]  }
  0x63   : > { %367 = vst [vmem:[#allocation2 + $0x44] sm:$0x1] %v10556_v0  ;;  %368 = vst [vmem:[#allocation2 + $0x48] sm:$0xf] %v10556_v0  ;;  %9126 = vmatpush3.bf16.msra.mxu0 %v10123_v10  ;;  %v10133_v20 = vld [vmem:[#allocation7 + $0xa0] sm:$0xff]   ;;  %v10136_v23 = vld [vmem:[#allocation7 + $0xe8] sm:$0xff]  }
  0x64   : > { %369 = vst [vmem:[#allocation2 + $0x4c] sm:$0x1] %v10556_v0  ;;  %370 = vst [vmem:[#allocation2 + $0x50] sm:$0xf] %v10556_v0  ;;  %9127 = vmatprep.subr.bf16.mxu0 %v10126_v13  ;;  %v10137_v24 = vld [vmem:[#allocation7 + $0xa8] sm:$0xff]   ;;  %v10138_v25 = vld [vmem:[#allocation7 + $0x70] sm:$0xff]  }
  0x65   : > { %371 = vst [vmem:[#allocation2 + $0x54] sm:$0x1] %v10556_v0  ;;  %372 = vst [vmem:[#allocation2 + $0x58] sm:$0xf] %v10556_v0  ;;  %9190 = vmatpush3.bf16.msra.mxu1 %v10125_v12  ;;  %v10139_v26 = vld [vmem:[#allocation7 + $0x30] sm:$0xff]   ;;  %v10142_v29 = vld [vmem:[#allocation7 + $0x78] sm:$0xff]  }
  0x66   : > { %373 = vst [vmem:[#allocation2 + $0x5c] sm:$0x1] %v10556_v0  ;;  %374 = vst [vmem:[#allocation2 + $0x60] sm:$0xf] %v10556_v0  ;;  %9191 = vmatprep.subr.bf16.mxu1 %v10128_v15  ;;  %v10140_v27 = vld [vmem:[#allocation7 + $0xf0] sm:$0xff]   ;;  %v10143_v30 = vld [vmem:[#allocation7 + $0x38] sm:$0xff]  }
  0x67   : > { %375 = vst [vmem:[#allocation2 + $0x64] sm:$0x1] %v10556_v0  ;;  %376 = vst [vmem:[#allocation2 + $0x68] sm:$0xf] %v10556_v0  ;;  %9128 = vmatpush3.bf16.msra.mxu0 %v10127_v14  ;;  %v10141_v28 = vld [vmem:[#allocation7 + $0xb0] sm:$0xff]   ;;  %v10144_v31 = vld [vmem:[#allocation7 + $0xf8] sm:$0xff]  }
  0x68   : > { %377 = vst [vmem:[#allocation2 + $0x6c] sm:$0x1] %v10556_v0  ;;  %378 = vst [vmem:[#allocation2 + $0x70] sm:$0xf] %v10556_v0  ;;  %9129 = vmatprep.subr.bf16.mxu0 %v10130_v17  ;;  %v386_v32 = vld [vmem:[%s10726_s9] sm:$0xff]  ;;  %v10145_v38 = vld [vmem:[#allocation7 + $0xb8] sm:$0xff]  }
  0x69   : > { %379 = vst [vmem:[#allocation2 + $0x74] sm:$0x1] %v10556_v0  ;;  %380 = vst [vmem:[#allocation2 + $0x78] sm:$0xf] %v10556_v0  ;;  %9192 = vmatpush3.bf16.msra.mxu1 %v10129_v16  ;;  %vm628_vm1 = vsmask.f32 7938  ;;  %v9072_v33 = vpack.c.bf16 %v386_v32, %v386_v32 }
  0x6a   : > { %381 = vst [vmem:[#allocation2 + $0x7c] sm:$0x1] %v10556_v0  ;;  %382 = vst [vmem:[#allocation2 + $0x80] sm:$0xf] %v10556_v0  ;;  %9193 = vmatprep.subr.bf16.mxu1 %v10132_v19  ;;  %vm634_vm3 = vsmask.f32 256 }
  0x6b   : > { %383 = vst [vmem:[#allocation2 + $0x84] sm:$0x1] %v10556_v0  ;;  %384 = vst [vmem:[#allocation2 + $0x88] sm:$0xf] %v10556_v0  ;;  %9130 = vmatpush3.bf16.msra.mxu0 %v10131_v18  ;;  %v801_v34 = vld [vmem:[#allocation2] sm:$0xf] }
  0x6c   : > { %385 = vst [vmem:[#allocation2 + $0x8c] sm:$0x1] %v10556_v0  ;;  %9131 = vmatprep.subr.bf16.mxu0 %v10134_v21  ;;  %v802_v35 = vld [vmem:[#allocation2 + $0x4] sm:$0x1]  ;;  %v837_v36 = vshrl.u32 %v801_v34, 16  ;;  %v840_v37 = vshll.u32 %v801_v34, 16  ;;  %vm10738_vm4 = vmand %vm627_vm0, %vm628_vm1 }
  0x6d   : > { %9194 = vmatpush3.bf16.msra.mxu1 %v10133_v20  ;;  %v467_v39 = vshrl.u32 %v9072_v33, 16  ;;  %v470_v40 = vshll.u32 %v9072_v33, 16  ;;  %vm10742_vm5 = vmand %vm633_vm2, %vm634_vm3  ;;  %v846_v45 = vshll.u32 %v802_v35, 16  ;;  %v10147_v46 = vld [vmem:[#allocation7 + $0x140] sm:$0xff]   ;;  %vm1164_vm6 = vcmask 1042432   ;;  %v387_v49 = vld [vmem:[%s10726_s9 + $0x8] sm:$0xff] }
  0x6e   : > { %9195 = vmatprep.subr.bf16.mxu1 %v10136_v23  ;;  %v839_v43 = vrot.slane %v837_v36, 4  ;;  %v842_v44 = vrot.slane %v840_v37, 5  ;;  %v630_v48 = vld [vmem:[#allocation2 + $0x8] sm:$0xf]  ;;  %v636_v50 = vld [vmem:[#allocation2 + $0xc] sm:$0x1]  ;;  %v9073_v51 = vpack.c.bf16 %v387_v49, %v387_v49 }
  0x6f   : > { %9132 = vmatpush3.bf16.msra.mxu0 %v10135_v22  ;;  %v469_v47 = vrot.slane %v467_v39, 7  ;;  %v10747_v52 = vld [vmem:[#allocation2] sm:$0xe]  ;;  %vm833_vm7 = vsmask.f32 3328  ;;  %vm1165_vm9 = vcmask 1046532  }
  0x70   : > { %9133 = vmatprep.subr.bf16.mxu0 %v10138_v25  ;;  %vm834_vm8 = vsmask.f32 7440  ;;  %v388_v55 = vld [vmem:[%s10726_s9 + $0x10] sm:$0xff]  ;;  %v843_v56 = vor.u32 %v842_v44, %v839_v43  ;;  %v10750_v57 = vrot.slane %v846_v45, 5  ;;  %v475_v58 = vshrl.u32 %v9073_v51, 16  ;;  %v389_v4 = vld [vmem:[%s10726_s9 + $0x18] sm:$0xff]  ;;  %vm10767_vm10 = vmor %vm1164_vm6, %vm1165_vm9 }
  0x71   : > { %9196 = vmatpush3.bf16.msra.mxu1 %v10137_v24  ;;  %v472_v53 = vor.u32 %v470_v40, %v469_v47  ;;  %v473_v54 = vrot.slane %v469_v47, 4  ;;  %v478_v59 = vshll.u32 %v9073_v51, 16  ;;  %v639_v62 = vld [vmem:[#allocation2 + $0x10] sm:$0xf]  ;;  %v1101_v63 = vld [vmem:[#allocation2 + $0x4] sm:$0x1]  ;;  %v9074_v1 = vpack.c.bf16 %v388_v55, %v388_v55  ;;  %vm10778_vm11 = vmor %vm833_vm7, %vm834_vm8 }
  0x72   : > { %9197 = vmatprep.subr.bf16.mxu1 %v10140_v27  ;;  %v8617_v0 = vrot.slane %v10747_v52, 9  ;;  %v477_v2 = vrot.slane %v475_v58, 7  ;;  %v642_v3 = vld [vmem:[#allocation2 + $0x14] sm:$0x1]  ;;  %v9075_v7 = vpack.c.bf16 %v389_v4, %v389_v4  ;;  %v10758_v8 = vrot.slane %v843_v56, 4  ;;  %s10557_s26 = smov 64  }
  0x73   : > { %9134 = vmatpush3.bf16.msra.mxu0 %v10139_v26  ;;  %v631_v60 = vsel %vm10738_vm4, %v472_v53, %v630_v48  ;;  %v637_v61 = vsel %vm10742_vm5, %v473_v54, %v636_v50  ;;  %v483_v5 = vshrl.u32 %v9074_v1, 16  ;;  %v486_v6 = vshll.u32 %v9074_v1, 16  ;;  %v390_v12 = vld [vmem:[%s10726_s9 + $0x20] sm:$0xff]  ;;  %v645_v14 = vld [vmem:[#allocation2 + $0x18] sm:$0xf]  ;;  %s12425_s11 = scalar_lea.vmem [#allocation9], %s8582_s7 }
  0x74   : > { %9135 = vmatprep.subr.bf16.mxu0 %v10142_v29  ;;  %632 = vst [vmem:[#allocation2 + $0x8] sm:$0xf] %v631_v60  ;;  %638 = vst [vmem:[#allocation2 + $0xc] sm:$0x1] %v637_v61  ;;  %v480_v9 = vor.u32 %v478_v59, %v477_v2  ;;  %v481_v10 = vrot.slane %v477_v2, 4  ;;  %v1169_v11 = vrot.slane %v1101_v63, 5  ;;  %v9076_v17 = vpack.c.bf16 %v390_v12, %v390_v12 }
  0x75   : > { %9198 = vmatpush3.bf16.msra.mxu1 %v10141_v28  ;;  %v485_v13 = vrot.slane %v483_v5, 7  ;;  %v491_v15 = vshrl.u32 %v9075_v7, 16  ;;  %v494_v16 = vshll.u32 %v9075_v7, 16  ;;  %v648_v20 = vld [vmem:[#allocation2 + $0x1c] sm:$0x1]  ;;  %v849_v55 = vsel %vm10778_vm11, %v10758_v8, %v10750_v57  ;;  %s9120_s27 = sshll.u32 %s10602_s16, 11 }
  0x76   : > { %9199 = vmatprep.subr.bf16.mxu1 %v10144_v31  ;;  %v640_v18 = vsel %vm10738_vm4, %v480_v9, %v639_v62  ;;  %v643_v19 = vsel %vm10742_vm5, %v481_v10, %v642_v3  ;;  %v651_v25 = vld [vmem:[#allocation2 + $0x20] sm:$0xf]  ;;  %v499_v26 = vshrl.u32 %v9076_v17, 16  ;;  %v502_v27 = vshll.u32 %v9076_v17, 16  ;;  %v391_v28 = vld [vmem:[%s10726_s9 + $0x28] sm:$0xff]  ;;  %s8491_s28 = sshll.u32 %s12425_s11, 4  ;;  %s12484_s30 = scalar_lea.hbm %s12537_s3, %s9120_s27  ;;  %s12486_s28 = int_to_ptr.vmem [resolvable:$true] %s8491_s28 }
  0x77   : > { %9136 = vmatpush3.bf16.msra.mxu0 %v10143_v30  ;;  %641 = vst [vmem:[#allocation2 + $0x10] sm:$0xf] %v640_v18  ;;  %v488_v22 = vor.u32 %v486_v6, %v485_v13  ;;  %v489_v23 = vrot.slane %v485_v13, 4  ;;  %644 = vst [vmem:[#allocation2 + $0x14] sm:$0x1] %v643_v19  ;;  %v493_v24 = vrot.slane %v491_v15, 7  ;;  %v1170_v44 = vsel %vm10767_vm10, %v8617_v0, %v1169_v11 }
  0x78   : > { %9249 = vmatprep.subr.bf16.mxu0 %v10147_v46  ;;  %v654_v39 = vld [vmem:[#allocation2 + $0x24] sm:$0x1]  ;;  %v10786_v49 = vpack.c.bf16 %v391_v28, %v391_v28  ;;  %v10788_v52 = vrot.slane %v499_v26, 7  ;;  %v657_v54 = vld [vmem:[#allocation2 + $0x28] sm:$0xf]  ;;  %v10149_v6 = vld [vmem:[#allocation7 + $0x100] sm:$0xff]  }
  0x79   : > { %9200 = vmatpush3.bf16.msra.mxu1 %v10145_v38  ;;  %v646_v31 = vsel %vm10738_vm4, %v488_v22, %v645_v14  ;;  %v649_v32 = vsel %vm10742_vm5, %v489_v23, %v648_v20  ;;  %v496_v33 = vor.u32 %v494_v16, %v493_v24  ;;  %v497_v38 = vrot.slane %v493_v24, 4  ;;  %v10151_v16 = vld [vmem:[#allocation7 + $0x148] sm:$0xff]   ;;  %v392_v17 = vld [vmem:[%s10726_s9 + $0x30] sm:$0xff]  ;;  %s8478_s16 = scalar_lea.sflag [#allocation6], %s10720_s6  ;;  %s10478_s22 = scalar_lea.vmem %s12486_s28, 2048 }
  0x7a   : > { %647 = vst [vmem:[#allocation2 + $0x18] sm:$0xf] %v646_v31  ;;  %650 = vst [vmem:[#allocation2 + $0x1c] sm:$0x1] %v649_v32  ;;  %v504_v0 = vor.u32 %v502_v27, %v10788_v52  ;;  %v507_v57 = vshrl.u32 %v10786_v49, 16  ;;  %p10479_p4 = scmp.ne.s32.totalorder %s12486_s28, %s10478_s22  ;;  %s10558_s7 = smov [#allocation9]  }
  0x7b   : > { %v803_v29 = vld [vmem:[#allocation2 + $0x8] sm:$0xf]  ;;  %v804_v30 = vld [vmem:[#allocation2 + $0xc] sm:$0x1]  ;;  %v652_v45 = vsel %vm10738_vm4, %v496_v33, %v651_v25  ;;  %v655_v53 = vsel %vm10742_vm5, %v497_v38, %v654_v39  ;;  %v10805_v33 = vpack.c.bf16 %v392_v17, %v392_v17  ;;  %s10482_s8 = sshll.u32 %s10558_s7, 4  ;;  %s10483_s8 = int_to_ptr.vmem [resolvable:$false] %s10482_s8 }
  0x7c   : > { %v851_v35 = vshrl.u32 %v803_v29, 16  ;;  %v854_v36 = vshll.u32 %v803_v29, 16  ;;  %v860_v37 = vshll.u32 %v804_v30, 16  ;;  %v1102_v40 = vld [vmem:[#allocation2 + $0x8] sm:$0xe]  ;;  %v658_v11 = vsel %vm10738_vm4, %v504_v0, %v657_v54  ;;  %v10153_v30 = vld [vmem:[#allocation7 + $0x108] sm:$0xff]   ;;  %p10480_p6 = pnand %p10479_p4, %p10672_p12  ;;  %p10485_p10 = scmp.lt.s32.totalorder %s12486_s28, %s10483_s8 }
  0x7d   : > { %v1103_v43 = vld [vmem:[#allocation2 + $0xc] sm:$0x1]  ;;  %v8618_v48 = vrot.slane %v1102_v40, 9  ;;  %653 = vst [vmem:[#allocation2 + $0x20] sm:$0xf] %v652_v45  ;;  %v10155_v40 = vld [vmem:[#allocation7 + $0x150] sm:$0xff]  }
  0x7e   : > { %v853_v46 = vrot.slane %v851_v35, 4  ;;  %v856_v47 = vrot.slane %v854_v36, 5  ;;  %v862_v50 = vrot.slane %v860_v37, 5  ;;  %v1173_v51 = vrot.slane %v1103_v43, 5  ;;  %v10148_v58 = vld [vmem:[#allocation2 + $0x8] ss:$8 sps:$4 sm:$0xff]   ;;  %p10481_p8 = pneg %p10480_p6 }
  0x7f   : > { %v805_v59 = vld [vmem:[#allocation2 + $0x10] sm:$0xf]  ;;  %656 = vst [vmem:[#allocation2 + $0x24] sm:$0x1] %v655_v53  ;;  %v806_v61 = vld [vmem:[#allocation2 + $0x14] sm:$0x1]  ;;  %2983 = vmatprep.mubr.bf16.mxu1 %v10148_v58 }
  0x80   : > { %v857_v56 = vor.u32 %v856_v47, %v853_v46  ;;  %v1174_v60 = vsel %vm10767_vm10, %v8618_v48, %v1173_v51  ;;  %v865_v62 = vshrl.u32 %v805_v59, 16  ;;  %v868_v63 = vshll.u32 %v805_v59, 16  ;;  %v10146_v2 = vld [vmem:[#allocation2] ss:$8 sps:$4 sm:$0xff]   ;;  %v1104_v5 = vld [vmem:[#allocation2 + $0x10] sm:$0xe] }
  0x81   : > { %v8633_v3 = vcombine.low %v1170_v44, %v1174_v60  ;;  %v874_v4 = vshll.u32 %v806_v61, 16  ;;  %v807_v7 = vld [vmem:[#allocation2 + $0x18] sm:$0xf]  ;;  %v808_v8 = vld [vmem:[#allocation2 + $0x1c] sm:$0x1]  ;;  %v8619_v23 = vrot.slane %v1104_v5, 9 }
  0x82   : > { %v858_v1 = vrot.slane %v857_v56, 4  ;;  %v867_v9 = vrot.slane %v865_v62, 4  ;;  %v870_v10 = vrot.slane %v868_v63, 5  ;;  %v879_v14 = vshrl.u32 %v807_v7, 16  ;;  %659 = vst [vmem:[#allocation2 + $0x28] sm:$0xf] %v658_v11 }
  0x83   : > { %2984 = vmatmul.mubr.bf16.vlgmr.msra.gmra.mrb[0].mxu1 %v8633_v3  ;;  %v876_v13 = vrot.slane %v874_v4, 5  ;;  %v882_v15 = vshll.u32 %v807_v7, 16  ;;  %v888_v20 = vshll.u32 %v808_v8, 16  ;;  %v1105_v22 = vld [vmem:[#allocation2 + $0x14] sm:$0x1]  ;;  %v505_v44 = vrot.slane %v10788_v52, 4 }
  0x84   : > { %v863_v12 = vsel %vm10778_vm11, %v858_v1, %v862_v50  ;;  %v871_v19 = vor.u32 %v870_v10, %v867_v9  ;;  %v881_v24 = vrot.slane %v879_v14, 4  ;;  %v10152_v26 = vld [vmem:[#allocation2 + $0x18] ss:$8 sps:$4 sm:$0xff]   ;;  %v660_v27 = vld [vmem:[#allocation2 + $0x2c] sm:$0x1]  ;;  %v1177_v36 = vrot.slane %v1105_v22, 5 }
  0x85   : > { %v8609_v18 = vcombine.low %v849_v55, %v863_v12  ;;  %v884_v25 = vrot.slane %v882_v15, 5  ;;  %v890_v29 = vrot.slane %v888_v20, 5  ;;  %v1106_v31 = vld [vmem:[#allocation2 + $0x18] sm:$0xe]  ;;  %v1107_v32 = vld [vmem:[#allocation2 + $0x1c] sm:$0x1]  ;;  %2991 = vmatprep.mubr.bf16.mxu1 %v10152_v26  ;;  %v661_v58 = vsel %vm10742_vm5, %v505_v44, %v660_v27 }
  0x86   : > { %v872_v28 = vrot.slane %v871_v19, 4  ;;  %v8620_v37 = vrot.slane %v1106_v31, 9  ;;  %v1181_v38 = vrot.slane %v1107_v32, 5  ;;  %v809_v39 = vld [vmem:[#allocation2 + $0x20] sm:$0xf]  ;;  %v393_v48 = vld [vmem:[%s10726_s9 + $0x38] sm:$0xff]  ;;  %v1178_v51 = vsel %vm10767_vm10, %v8619_v23, %v1177_v36 }
  0x87   : > { %2886 = vmatprep.mubr.bf16.mxu0 %v8609_v18  ;;  %v885_v35 = vor.u32 %v884_v25, %v881_v24  ;;  %v810_v45 = vld [vmem:[#allocation2 + $0x24] sm:$0x1]  ;;  %v893_v46 = vshrl.u32 %v809_v39, 16  ;;  %v896_v47 = vshll.u32 %v809_v39, 16  ;;  %v10815_v55 = vld [vmem:[#allocation2 + $0x20] sm:$0xe]  ;;  %v9079_v5 = vpack.c.bf16 %v393_v48, %v393_v48 }
  0x88   : > { %2887 = vmatmul.mubr.bf16.vlgmr.msra.gmra.mrb[0].mxu0 %v10146_v2  ;;  %v877_v43 = vsel %vm10778_vm11, %v872_v28, %v876_v13  ;;  %v1182_v53 = vsel %vm10767_vm10, %v8620_v37, %v1181_v38  ;;  %v902_v54 = vshll.u32 %v810_v45, 16  ;;  %v10157_v61 = vld [vmem:[#allocation7 + $0x110] sm:$0xff]   ;;  %v10150_v63 = vld [vmem:[#allocation2 + $0x10] ss:$8 sps:$4 sm:$0xff]   ;;  %662 = vst [vmem:[#allocation2 + $0x2c] sm:$0x1] %v661_v58 }
  0x89   : > { %9250 = vmatpush3.bf16.msra.mxu0 %v10149_v6  ;;  %v886_v50 = vrot.slane %v885_v35, 4  ;;  %v8634_v56 = vcombine.low %v1178_v51, %v1182_v53  ;;  %v811_v52 = vld [vmem:[#allocation2 + $0x28] sm:$0xf]  ;;  %v895_v59 = vrot.slane %v893_v46, 4  ;;  %v898_v60 = vrot.slane %v896_v47, 5  ;;  %v10163_v25 = vld [vmem:[#allocation7 + $0x160] sm:$0xff]  }
  0x8a   : > { %9251 = vmatprep.subr.bf16.mxu0 %v10151_v16  ;;  %v907_v0 = vshrl.u32 %v811_v52, 16  ;;  %v910_v1 = vshll.u32 %v811_v52, 16  ;;  %v663_v2 = vld [vmem:[#allocation2 + $0x30] sm:$0xf]  ;;  %v666_v3 = vld [vmem:[#allocation2 + $0x34] sm:$0x1] }
  0x8b   : > { %v891_v62 = vsel %vm10778_vm11, %v886_v50, %v890_v29  ;;  %v10159_v4 = vld [vmem:[#allocation7 + $0x158] sm:$0xff]   ;;  %2992 = vmatmul.mubr.bf16.gmra.mrb[4].mxu1 %v8634_v56  ;;  %v899_v7 = vor.u32 %v898_v60, %v895_v59  ;;  %v509_v8 = vrot.slane %v507_v57, 7  ;;  %v510_v9 = vshll.u32 %v10786_v49, 16  ;;  %v1109_v10 = vld [vmem:[#allocation2 + $0x24] sm:$0x1]  ;;  %v394_v57 = vld [vmem:[%s10726_s9 + $0x40] sm:$0xff] }
  0x8c   : > { %v8610_v6 = vcombine.low %v877_v43, %v891_v62  ;;  %v10824_v11 = vrot.slane %v902_v54, 5  ;;  %v909_v12 = vrot.slane %v907_v0, 4  ;;  %v912_v13 = vrot.slane %v910_v1, 5  ;;  %v1110_v14 = vld [vmem:[#allocation2 + $0x28] sm:$0xe]  ;;  %v395_v26 = vld [vmem:[%s10726_s9 + $0x48] sm:$0xff] }
  0x8d   : > { %9252 = vmatpush3.bf16.msra.mxu0 %v10153_v30  ;;  %v8621_v15 = vrot.slane %v10815_v55, 9  ;;  %v10827_v16 = vrot.slane %v899_v7, 4  ;;  %v512_v17 = vor.u32 %v510_v9, %v509_v8  ;;  %v513_v18 = vrot.slane %v509_v8, 4  ;;  %v10161_v20 = vld [vmem:[#allocation7 + $0x118] sm:$0xff]   ;;  %v669_v29 = vld [vmem:[#allocation2 + $0x38] sm:$0xf] }
  0x8e   : > { %9253 = vmatprep.subr.bf16.mxu0 %v10155_v40  ;;  %2894 = vmatprep.mubr.bf16.mxu0 %v8610_v6  ;;  %v1185_v19 = vrot.slane %v1109_v10, 5  ;;  %v913_v49 = vor.u32 %v912_v13, %v909_v12  ;;  %v8622_v22 = vrot.slane %v1110_v14, 9  ;;  %v515_v23 = vshrl.u32 %v10805_v33, 16  ;;  %v672_v30 = vld [vmem:[#allocation2 + $0x3c] sm:$0x1]  ;;  %v10166_v32 = vld [vmem:[#allocation7 + $0x1c0] sm:$0xff]  }
  0x8f   : > { %v518_v24 = vshll.u32 %v10805_v33, 16  ;;  %v664_v27 = vsel %vm10738_vm4, %v512_v17, %v663_v2  ;;  %v667_v28 = vsel %vm10742_vm5, %v513_v18, %v666_v3  ;;  %v523_v31 = vshrl.u32 %v9079_v5, 16  ;;  %v675_v33 = vld [vmem:[#allocation2 + $0x40] sm:$0xf]  ;;  %v10167_v39 = vld [vmem:[#allocation7 + $0x180] sm:$0xff]   ;;  %9313 = vmatprep.subr.bf16.mxu1 %v10166_v32  ;;  %v10168_v48 = vld [vmem:[#allocation7 + $0x1c8] sm:$0xff]  }
  0x90   : > { %2895 = vmatmul.mubr.bf16.gmra.mrb[4].mxu0 %v10150_v63  ;;  %v914_v35 = vrot.slane %v913_v49, 4  ;;  %665 = vst [vmem:[#allocation2 + $0x30] sm:$0xf] %v664_v27  ;;  %v517_v36 = vrot.slane %v515_v23, 7  ;;  %668 = vst [vmem:[#allocation2 + $0x34] sm:$0x1] %v667_v28  ;;  %v9080_v38 = vpack.c.bf16 %v394_v57, %v394_v57  ;;  %v905_v43 = vsel %vm10778_vm11, %v10827_v16, %v10824_v11 }
  0x91   : > { %9254 = vmatpush3.bf16.msra.mxu0 %v10157_v61  ;;  %v526_v37 = vshll.u32 %v9079_v5, 16  ;;  %v812_v40 = vld [vmem:[#allocation2 + $0x2c] sm:$0x1]  ;;  %v1186_v45 = vsel %vm10767_vm10, %v8621_v15, %v1185_v19  ;;  %v525_v46 = vrot.slane %v523_v31, 7  ;;  %v10843_v47 = vpack.c.bf16 %v395_v26, %v395_v26  ;;  %v10165_v55 = vld [vmem:[#allocation7 + $0x120] sm:$0xff]   ;;  %9314 = vmatpush3.bf16.msra.mxu1 %v10167_v39  ;;  %v10169_v61 = vld [vmem:[#allocation7 + $0x188] sm:$0xff]  }
  0x92   : > { %9255 = vmatprep.subr.bf16.mxu0 %v10159_v4  ;;  %v1111_v44 = vld [vmem:[#allocation2 + $0x2c] sm:$0x1]  ;;  %v916_v50 = vshll.u32 %v812_v40, 16  ;;  %v520_v53 = vor.u32 %v518_v24, %v517_v36  ;;  %v521_v54 = vrot.slane %v517_v36, 4  ;;  %v531_v52 = vshrl.u32 %v9080_v38, 16  ;;  %9315 = vmatprep.subr.bf16.mxu1 %v10168_v48  ;;  %v10171_v4 = vld [vmem:[#allocation7 + $0x168] sm:$0xff]  }
  0x93   : > { %v1189_v51 = vrot.slane %v1111_v44, 5  ;;  %v528_v56 = vor.u32 %v526_v37, %v525_v46  ;;  %v529_v58 = vrot.slane %v525_v46, 4  ;;  %v534_v59 = vshll.u32 %v9080_v38, 16  ;;  %v678_v60 = vld [vmem:[#allocation2 + $0x44] sm:$0x1] }
  0x94   : > { %v918_v62 = vrot.slane %v916_v50, 5  ;;  %v10154_v63 = vld [vmem:[#allocation2 + $0x20] ss:$8 sps:$4 sm:$0xff]   ;;  %v670_v1 = vsel %vm10738_vm4, %v520_v53, %v669_v29  ;;  %v673_v2 = vsel %vm10742_vm5, %v521_v54, %v672_v30  ;;  %v533_v6 = vrot.slane %v531_v52, 7  ;;  %v684_v10 = vld [vmem:[#allocation2 + $0x4c] sm:$0x1] }
  0x95   : > { %9256 = vmatpush3.bf16.msra.mxu0 %v10161_v20  ;;  %v1190_v0 = vsel %vm10767_vm10, %v8622_v22, %v1189_v51  ;;  %v681_v3 = vld [vmem:[#allocation2 + $0x48] sm:$0xf]  ;;  %671 = vst [vmem:[#allocation2 + $0x38] sm:$0xf] %v670_v1  ;;  %674 = vst [vmem:[#allocation2 + $0x3c] sm:$0x1] %v673_v2  ;;  %v676_v5 = vsel %vm10738_vm4, %v528_v56, %v675_v33  ;;  %v679_v7 = vsel %vm10742_vm5, %v529_v58, %v678_v60 }
  0x96   : > { %9257 = vmatprep.subr.bf16.mxu0 %v10163_v25  ;;  %v919_v8 = vsel %vm10778_vm11, %v914_v35, %v918_v62  ;;  %v8635_v9 = vcombine.low %v1186_v45, %v1190_v0  ;;  %677 = vst [vmem:[#allocation2 + $0x40] sm:$0xf] %v676_v5  ;;  %680 = vst [vmem:[#allocation2 + $0x44] sm:$0x1] %v679_v7  ;;  %v539_v11 = vshrl.u32 %v10843_v47, 16  ;;  %v542_v12 = vshll.u32 %v10843_v47, 16 }
  0x97   : > { %9316 = vmatpush3.bf16.msra.mxu1 %v10169_v61  ;;  %v8611_v13 = vcombine.low %v905_v43, %v919_v8  ;;  %v10156_v14 = vld [vmem:[#allocation2 + $0x28] ss:$8 sps:$4 sm:$0xff]   ;;  %v536_v16 = vor.u32 %v534_v59, %v533_v6  ;;  %v814_v17 = vld [vmem:[#allocation2 + $0x34] sm:$0x1]  ;;  %v537_v22 = vrot.slane %v533_v6, 4  ;;  %v396_v40 = vld [vmem:[%s10726_s9 + $0x50] sm:$0xff] }
  0x98   : > { %v813_v15 = vld [vmem:[#allocation2 + $0x30] sm:$0xf]  ;;  %2999 = vmatprep.mubr.bf16.mxu1 %v10156_v14  ;;  %v930_v20 = vshll.u32 %v814_v17, 16  ;;  %v1113_v49 = vld [vmem:[#allocation2 + $0x34] sm:$0x1]  ;;  %v10863_v31 = vrot.slane %v539_v11, 7  ;;  %v10870_v58 = vpack.c.bf16 %v396_v40, %v396_v40 }
  0x99   : > { %9258 = vmatpush3.bf16.msra.mxu0 %v10165_v55  ;;  %v921_v18 = vshrl.u32 %v813_v15, 16  ;;  %v924_v19 = vshll.u32 %v813_v15, 16  ;;  %2902 = vmatprep.mubr.bf16.mxu0 %v8611_v13  ;;  %v1112_v57 = vld [vmem:[#allocation2 + $0x30] sm:$0xe]  ;;  %v682_v23 = vsel %vm10738_vm4, %v536_v16, %v681_v3  ;;  %v1193_v27 = vrot.slane %v1113_v49, 5  ;;  %v10173_v43 = vld [vmem:[#allocation7 + $0x128] sm:$0xff]  }
  0x9a   : > { %9259 = vmatprep.subr.bf16.mxu0 %v10171_v4  ;;  %2903 = vmatmul.mubr.bf16.gmra.mrb[8].mxu0 %v10154_v63  ;;  %v8623_v26 = vrot.slane %v1112_v57, 9  ;;  %683 = vst [vmem:[#allocation2 + $0x48] sm:$0xf] %v682_v23  ;;  %v687_v28 = vld [vmem:[#allocation2 + $0x50] sm:$0xf]  ;;  %v932_v29 = vrot.slane %v930_v20, 5  ;;  %v685_v30 = vsel %vm10742_vm5, %v537_v22, %v684_v10  ;;  %v544_v39 = vor.u32 %v542_v12, %v10863_v31 }
  0x9b   : > { %3000 = vmatmul.mubr.bf16.gmra.mrb[8].mxu1 %v8635_v9  ;;  %v923_v24 = vrot.slane %v921_v18, 4  ;;  %v926_v25 = vrot.slane %v924_v19, 5  ;;  %686 = vst [vmem:[#allocation2 + $0x4c] sm:$0x1] %v685_v30  ;;  %v545_v45 = vrot.slane %v10863_v31, 4  ;;  %v10174_v53 = vld [vmem:[#allocation7 + $0x1d0] sm:$0xff]  }
  0x9c   : > { %v815_v32 = vld [vmem:[#allocation2 + $0x38] sm:$0xf]  ;;  %v816_v35 = vld [vmem:[#allocation2 + $0x3c] sm:$0x1]  ;;  %v688_v51 = vsel %vm10738_vm4, %v544_v39, %v687_v28  ;;  %v1194_v59 = vsel %vm10767_vm10, %v8623_v26, %v1193_v27  ;;  %9317 = vmatprep.subr.bf16.mxu1 %v10174_v53  ;;  %v397_v14 = vld [vmem:[%s10726_s9 + $0x58] sm:$0xff] }
  0x9d   : > { %v927_v36 = vor.u32 %v926_v25, %v923_v24  ;;  %v935_v37 = vshrl.u32 %v815_v32, 16  ;;  %v938_v33 = vshll.u32 %v815_v32, 16  ;;  %v944_v38 = vshll.u32 %v816_v35, 16  ;;  %v10160_v50 = vld [vmem:[#allocation2 + $0x38] ss:$8 sps:$4 sm:$0xff]   ;;  %9260 = vmatpush3.bf16.msra.mxu0 %v10173_v43  ;;  %v10176_v20 = vld [vmem:[#allocation7 + $0x1d8] sm:$0xff]  }
  0x9e   : > { %v1114_v54 = vld [vmem:[#allocation2 + $0x38] sm:$0xe]  ;;  %v1115_v55 = vld [vmem:[#allocation2 + $0x3c] sm:$0x1]  ;;  %v817_v56 = vld [vmem:[#allocation2 + $0x40] sm:$0xf]  ;;  %3007 = vmatprep.mubr.bf16.mxu1 %v10160_v50 }
  0x9f   : > { %v928_v44 = vrot.slane %v927_v36, 4  ;;  %v937_v46 = vrot.slane %v935_v37, 4  ;;  %v940_v47 = vrot.slane %v938_v33, 5  ;;  %v946_v48 = vrot.slane %v944_v38, 5  ;;  %689 = vst [vmem:[#allocation2 + $0x50] sm:$0xf] %v688_v51 }
  0xa0   : > { %v8624_v60 = vrot.slane %v1114_v54, 9  ;;  %v1197_v61 = vrot.slane %v1115_v55, 5  ;;  %v818_v62 = vld [vmem:[#allocation2 + $0x44] sm:$0x1]  ;;  %v949_v0 = vshrl.u32 %v817_v56, 16  ;;  %v952_v1 = vshll.u32 %v817_v56, 16 }
  0xa1   : > { %v941_v52 = vor.u32 %v940_v47, %v937_v46  ;;  %v819_v63 = vld [vmem:[#allocation2 + $0x48] sm:$0xf]  ;;  %v958_v2 = vshll.u32 %v818_v62, 16  ;;  %v933_v4 = vsel %vm10778_vm11, %v928_v44, %v932_v29  ;;  %v10158_v9 = vld [vmem:[#allocation2 + $0x30] ss:$8 sps:$4 sm:$0xff]   ;;  %v10175_v15 = vld [vmem:[#allocation7 + $0x190] sm:$0xff]   ;;  %v9083_v38 = vpack.c.bf16 %v397_v14, %v397_v14 }
  0xa2   : > { %v963_v3 = vshrl.u32 %v819_v63, 16  ;;  %v1198_v6 = vsel %vm10767_vm10, %v8624_v60, %v1197_v61  ;;  %v820_v7 = vld [vmem:[#allocation2 + $0x4c] sm:$0x1]  ;;  %v966_v8 = vshll.u32 %v819_v63, 16  ;;  %v951_v11 = vrot.slane %v949_v0, 4  ;;  %9318 = vmatpush3.bf16.msra.mxu1 %v10175_v15  ;;  %v398_v60 = vld [vmem:[%s10726_s9 + $0x60] sm:$0xff] }
  0xa3   : > { %v942_v5 = vrot.slane %v941_v52, 4  ;;  %v8636_v10 = vcombine.low %v1194_v59, %v1198_v6  ;;  %v954_v12 = vrot.slane %v952_v1, 5  ;;  %v960_v13 = vrot.slane %v958_v2, 5  ;;  %v1116_v22 = vld [vmem:[#allocation2 + $0x40] sm:$0xe]  ;;  %9319 = vmatprep.subr.bf16.mxu1 %v10176_v20 }
  0xa4   : > { %v965_v17 = vrot.slane %v963_v3, 4  ;;  %v968_v18 = vrot.slane %v966_v8, 5  ;;  %v972_v19 = vshll.u32 %v820_v7, 16  ;;  %v1117_v23 = vld [vmem:[#allocation2 + $0x44] sm:$0x1]  ;;  %v8625_v28 = vrot.slane %v1116_v22, 9 }
  0xa5   : > { %v947_v16 = vsel %vm10778_vm11, %v942_v5, %v946_v48  ;;  %3008 = vmatmul.mubr.bf16.gmra.mrb[12].mxu1 %v8636_v10  ;;  %v955_v49 = vor.u32 %v954_v12, %v951_v11  ;;  %v1118_v24 = vld [vmem:[#allocation2 + $0x48] sm:$0xe]  ;;  %v1119_v30 = vld [vmem:[#allocation2 + $0x4c] sm:$0x1]  ;;  %v1201_v32 = vrot.slane %v1117_v23, 5  ;;  %v547_v36 = vshrl.u32 %v10870_v58, 16 }
  0xa6   : > { %v8612_v57 = vcombine.low %v933_v4, %v947_v16  ;;  %v969_v25 = vor.u32 %v968_v18, %v965_v17  ;;  %v974_v26 = vrot.slane %v972_v19, 5  ;;  %v10164_v27 = vld [vmem:[#allocation2 + $0x48] ss:$8 sps:$4 sm:$0xff]   ;;  %v8626_v35 = vrot.slane %v1118_v24, 9  ;;  %v690_v50 = vld [vmem:[#allocation2 + $0x54] sm:$0x1] }
  0xa7   : > { %v956_v29 = vrot.slane %v955_v49, 4  ;;  %3015 = vmatprep.mubr.bf16.mxu1 %v10164_v27  ;;  %v1205_v33 = vrot.slane %v1119_v30, 5  ;;  %v1202_v40 = vsel %vm10767_vm10, %v8625_v28, %v1201_v32  ;;  %v549_v43 = vrot.slane %v547_v36, 7  ;;  %v10162_v47 = vld [vmem:[#allocation2 + $0x40] ss:$8 sps:$4 sm:$0xff]   ;;  %v399_v36 = vld [vmem:[%s10726_s9 + $0x68] sm:$0xff] }
  0xa8   : > { %2910 = vmatprep.mubr.bf16.mxu0 %v8612_v57  ;;  %v970_v37 = vrot.slane %v969_v25, 4  ;;  %v550_v44 = vshll.u32 %v10870_v58, 16  ;;  %v693_v51 = vld [vmem:[#allocation2 + $0x58] sm:$0xf]  ;;  %v696_v53 = vld [vmem:[#allocation2 + $0x5c] sm:$0x1]  ;;  %v691_v58 = vsel %vm10742_vm5, %v545_v45, %v690_v50  ;;  %v9084_v63 = vpack.c.bf16 %v398_v60, %v398_v60 }
  0xa9   : > { %2911 = vmatmul.mubr.bf16.gmra.mrb[12].mxu0 %v10158_v9  ;;  %v961_v39 = vsel %vm10778_vm11, %v956_v29, %v960_v13  ;;  %v1206_v48 = vsel %vm10767_vm10, %v8626_v35, %v1205_v33  ;;  %v553_v52 = vrot.slane %v549_v43, 4  ;;  %v821_v59 = vld [vmem:[#allocation2 + $0x50] sm:$0xf]  ;;  %692 = vst [vmem:[#allocation2 + $0x54] sm:$0x1] %v691_v58  ;;  %v555_v2 = vshrl.u32 %v9083_v38, 16 }
  0xaa   : > { %v975_v46 = vsel %vm10778_vm11, %v970_v37, %v974_v26  ;;  %v8637_v55 = vcombine.low %v1202_v40, %v1206_v48  ;;  %v552_v56 = vor.u32 %v550_v44, %v549_v43  ;;  %v977_v61 = vshrl.u32 %v821_v59, 16  ;;  %v699_v5 = vld [vmem:[#allocation2 + $0x60] sm:$0xf]  ;;  %v1120_v6 = vld [vmem:[#allocation2 + $0x50] sm:$0xe]  ;;  %v10177_v13 = vld [vmem:[#allocation7 + $0x198] sm:$0xff]  }
  0xab   : > { %v8613_v54 = vcombine.low %v961_v39, %v975_v46  ;;  %v980_v62 = vshll.u32 %v821_v59, 16  ;;  %v697_v1 = vsel %vm10742_vm5, %v553_v52, %v696_v53  ;;  %v558_v3 = vshll.u32 %v9083_v38, 16  ;;  %v702_v18 = vld [vmem:[#allocation2 + $0x64] sm:$0x1]  ;;  %v705_v19 = vld [vmem:[#allocation2 + $0x68] sm:$0xf]  ;;  %9320 = vmatpush3.bf16.msra.mxu1 %v10177_v13 }
  0xac   : > { %v694_v0 = vsel %vm10738_vm4, %v552_v56, %v693_v51  ;;  %698 = vst [vmem:[#allocation2 + $0x5c] sm:$0x1] %v697_v1  ;;  %v979_v31 = vrot.slane %v977_v61, 4  ;;  %v557_v45 = vrot.slane %v555_v2, 7  ;;  %v563_v7 = vshrl.u32 %v9084_v63, 16  ;;  %v10179_v20 = vld [vmem:[#allocation7 + $0x170] sm:$0xff]  }
  0xad   : > { %2918 = vmatprep.mubr.bf16.mxu0 %v8613_v54  ;;  %3016 = vmatmul.mubr.bf16.gmra.mrb[16].mxu1 %v8637_v55  ;;  %695 = vst [vmem:[#allocation2 + $0x58] sm:$0xf] %v694_v0  ;;  %v982_v4 = vrot.slane %v980_v62, 5  ;;  %v566_v8 = vshll.u32 %v9084_v63, 16  ;;  %v8627_v12 = vrot.slane %v1120_v6, 9  ;;  %v9085_v38 = vpack.c.bf16 %v399_v36, %v399_v36  ;;  %v10181_v39 = vld [vmem:[#allocation7 + $0x130] sm:$0xff]  }
  0xae   : > { %v560_v9 = vor.u32 %v558_v3, %v557_v45  ;;  %v561_v10 = vrot.slane %v557_v45, 4  ;;  %v565_v11 = vrot.slane %v563_v7, 7  ;;  %v708_v23 = vld [vmem:[#allocation2 + $0x6c] sm:$0x1]  ;;  %9261 = vmatprep.subr.bf16.mxu0 %v10179_v20  ;;  %v10183_v2 = vld [vmem:[#allocation7 + $0x1a0] sm:$0xff]  }
  0xaf   : > { %v983_v14 = vor.u32 %v982_v4, %v979_v31  ;;  %v571_v51 = vshrl.u32 %v9085_v38, 16  ;;  %9262 = vmatpush3.bf16.msra.mxu0 %v10181_v39  ;;  %v574_v56 = vshll.u32 %v9085_v38, 16 }
  0xb0   : > { %v700_v15 = vsel %vm10738_vm4, %v560_v9, %v699_v5  ;;  %v568_v16 = vor.u32 %v566_v8, %v565_v11  ;;  %v569_v17 = vrot.slane %v565_v11, 4  ;;  %v822_v57 = vld [vmem:[#allocation2 + $0x54] sm:$0x1]  ;;  %v703_v22 = vsel %vm10742_vm5, %v561_v10, %v702_v18  ;;  %v10184_v10 = vld [vmem:[#allocation7 + $0x1e8] sm:$0xff]  }
  0xb1   : > { %2919 = vmatmul.mubr.bf16.gmra.mrb[16].mxu0 %v10162_v47  ;;  %701 = vst [vmem:[#allocation2 + $0x60] sm:$0xf] %v700_v15  ;;  %v1121_v49 = vld [vmem:[#allocation2 + $0x54] sm:$0x1]  ;;  %v986_v26 = vshll.u32 %v822_v57, 16  ;;  %v984_v37 = vrot.slane %v983_v14, 4 }
  0xb2   : > { %v1209_v27 = vrot.slane %v1121_v49, 5  ;;  %704 = vst [vmem:[#allocation2 + $0x64] sm:$0x1] %v703_v22  ;;  %v706_v28 = vsel %vm10738_vm4, %v568_v16, %v705_v19  ;;  %v709_v29 = vsel %vm10742_vm5, %v569_v17, %v708_v23  ;;  %v10182_v47 = vld [vmem:[#allocation7 + $0x1e0] sm:$0xff]   ;;  %v573_v45 = vrot.slane %v571_v51, 7  ;;  %v400_v19 = vld [vmem:[%s10726_s9 + $0x70] sm:$0xff] }
  0xb3   : > { %v824_v25 = vld [vmem:[#allocation2 + $0x5c] sm:$0x1]  ;;  %707 = vst [vmem:[#allocation2 + $0x68] sm:$0xf] %v706_v28  ;;  %710 = vst [vmem:[#allocation2 + $0x6c] sm:$0x1] %v709_v29  ;;  %9321 = vmatprep.subr.bf16.mxu1 %v10182_v47  ;;  %v9086_v29 = vpack.c.bf16 %v400_v19, %v400_v19 }
  0xb4   : > { %v823_v24 = vld [vmem:[#allocation2 + $0x58] sm:$0xf]  ;;  %v1000_v35 = vshll.u32 %v824_v25, 16  ;;  %v988_v33 = vrot.slane %v986_v26, 5  ;;  %v1123_v48 = vld [vmem:[#allocation2 + $0x5c] sm:$0x1]  ;;  %v1210_v54 = vsel %vm10767_vm10, %v8627_v12, %v1209_v27  ;;  %9322 = vmatpush3.bf16.msra.mxu1 %v10183_v2  ;;  %v576_v17 = vor.u32 %v574_v56, %v573_v45 }
  0xb5   : > { %v991_v30 = vshrl.u32 %v823_v24, 16  ;;  %v994_v32 = vshll.u32 %v823_v24, 16  ;;  %v1122_v46 = vld [vmem:[#allocation2 + $0x58] sm:$0xe]  ;;  %v1213_v55 = vrot.slane %v1123_v48, 5  ;;  %v577_v18 = vrot.slane %v573_v45, 4  ;;  %9323 = vmatprep.subr.bf16.mxu1 %v10184_v10 }
  0xb6   : > { %v1002_v44 = vrot.slane %v1000_v35, 5  ;;  %v8628_v50 = vrot.slane %v1122_v46, 9  ;;  %v989_v52 = vsel %vm10778_vm11, %v984_v37, %v988_v33  ;;  %v10170_v61 = vld [vmem:[#allocation2 + $0x50] ss:$8 sps:$4 sm:$0xff]   ;;  %v10187_v37 = vld [vmem:[#allocation7 + $0x178] sm:$0xff]   ;;  %v579_v47 = vshrl.u32 %v9086_v29, 16 }
  0xb7   : > { %v993_v40 = vrot.slane %v991_v30, 4  ;;  %v996_v43 = vrot.slane %v994_v32, 5  ;;  %v711_v49 = vld [vmem:[#allocation2 + $0x70] sm:$0xf]  ;;  %v10185_v24 = vld [vmem:[#allocation7 + $0x1a8] sm:$0xff]   ;;  %9263 = vmatprep.subr.bf16.mxu0 %v10187_v37  ;;  %v582_v48 = vshll.u32 %v9086_v29, 16 }
  0xb8   : > { %v10172_v59 = vld [vmem:[#allocation2 + $0x58] ss:$8 sps:$4 sm:$0xff]   ;;  %v1214_v62 = vsel %vm10767_vm10, %v8628_v50, %v1213_v55  ;;  %v712_v23 = vsel %vm10738_vm4, %v576_v17, %v711_v49  ;;  %9324 = vmatpush3.bf16.msra.mxu1 %v10185_v24  ;;  %v714_v50 = vld [vmem:[#allocation2 + $0x74] sm:$0x1]  ;;  %v720_v55 = vld [vmem:[#allocation2 + $0x7c] sm:$0x1] }
  0xb9   : > { %v997_v53 = vor.u32 %v996_v43, %v993_v40  ;;  %v825_v60 = vld [vmem:[#allocation2 + $0x60] sm:$0xf]  ;;  %v826_v63 = vld [vmem:[#allocation2 + $0x64] sm:$0x1]  ;;  %3023 = vmatprep.mubr.bf16.mxu1 %v10172_v59  ;;  %v8638_v3 = vcombine.low %v1210_v54, %v1214_v62  ;;  %713 = vst [vmem:[#allocation2 + $0x70] sm:$0xf] %v712_v23 }
  0xba   : > { %v1005_v0 = vshrl.u32 %v825_v60, 16  ;;  %v1008_v1 = vshll.u32 %v825_v60, 16  ;;  %v827_v31 = vld [vmem:[#allocation2 + $0x68] sm:$0xf]  ;;  %v828_v4 = vld [vmem:[#allocation2 + $0x6c] sm:$0x1] }
  0xbb   : > { %v998_v58 = vrot.slane %v997_v53, 4  ;;  %v1014_v5 = vshll.u32 %v826_v63, 16  ;;  %v1019_v9 = vshrl.u32 %v827_v31, 16  ;;  %3024 = vmatmul.mubr.bf16.gmra.mrb[20].mxu1 %v8638_v3  ;;  %v1022_v13 = vshll.u32 %v827_v31, 16  ;;  %v1124_v26 = vld [vmem:[#allocation2 + $0x60] sm:$0xe] }
  0xbc   : > { %v1007_v7 = vrot.slane %v1005_v0, 4  ;;  %v1010_v8 = vrot.slane %v1008_v1, 5  ;;  %v1028_v14 = vshll.u32 %v828_v4, 16  ;;  %v1125_v27 = vld [vmem:[#allocation2 + $0x64] sm:$0x1]  ;;  %v8629_v32 = vrot.slane %v1124_v26, 9 }
  0xbd   : > { %v1003_v6 = vsel %vm10778_vm11, %v998_v58, %v1002_v44  ;;  %v1016_v12 = vrot.slane %v1014_v5, 5  ;;  %v1021_v16 = vrot.slane %v1019_v9, 4  ;;  %v1024_v20 = vrot.slane %v1022_v13, 5  ;;  %v1126_v28 = vld [vmem:[#allocation2 + $0x68] sm:$0xe]  ;;  %v10190_v10 = vld [vmem:[#allocation7 + $0x1f0] sm:$0xff]  }
  0xbe   : > { %v8614_v11 = vcombine.low %v989_v52, %v1003_v6  ;;  %v1011_v15 = vor.u32 %v1010_v8, %v1007_v7  ;;  %v1030_v57 = vrot.slane %v1028_v14, 5  ;;  %v1127_v30 = vld [vmem:[#allocation2 + $0x6c] sm:$0x1]  ;;  %v1217_v35 = vrot.slane %v1125_v27, 5  ;;  %v10178_v39 = vld [vmem:[#allocation2 + $0x60] ss:$8 sps:$4 sm:$0xff]   ;;  %9325 = vmatprep.subr.bf16.mxu1 %v10190_v10 }
  0xbf   : > { %v1025_v25 = vor.u32 %v1024_v20, %v1021_v16  ;;  %v8630_v36 = vrot.slane %v1126_v28, 9  ;;  %v1221_v40 = vrot.slane %v1127_v30, 5  ;;  %v715_v53 = vsel %vm10742_vm5, %v577_v18, %v714_v50  ;;  %v717_v54 = vld [vmem:[#allocation2 + $0x78] sm:$0xf]  ;;  %v401_v59 = vld [vmem:[%s10726_s9 + $0x78] sm:$0xff] }
  0xc0   : > { %2926 = vmatprep.mubr.bf16.mxu0 %v8614_v11  ;;  %v1012_v22 = vrot.slane %v1011_v15, 4  ;;  %v1218_v43 = vsel %vm10767_vm10, %v8629_v32, %v1217_v35  ;;  %v581_v52 = vrot.slane %v579_v47, 7  ;;  %716 = vst [vmem:[#allocation2 + $0x74] sm:$0x1] %v715_v53  ;;  %v10180_v60 = vld [vmem:[#allocation2 + $0x68] ss:$8 sps:$4 sm:$0xff]  }
  0xc1   : > { %2927 = vmatmul.mubr.bf16.gmra.mrb[20].mxu0 %v10170_v61  ;;  %v1026_v38 = vrot.slane %v1025_v25, 4  ;;  %v1222_v46 = vsel %vm10767_vm10, %v8630_v36, %v1221_v40  ;;  %v829_v58 = vld [vmem:[#allocation2 + $0x70] sm:$0xf]  ;;  %v9087_v61 = vpack.c.bf16 %v401_v59, %v401_v59  ;;  %v10189_v2 = vld [vmem:[#allocation7 + $0x138] sm:$0xff]   ;;  %3031 = vmatprep.mubr.bf16.mxu1 %v10180_v60  ;;  %v723_v7 = vld [vmem:[#allocation2 + $0x80] sm:$0xf] }
  0xc2   : > { %v1017_v33 = vsel %vm10778_vm11, %v1012_v22, %v1016_v12  ;;  %v8639_v56 = vcombine.low %v1218_v43, %v1222_v46  ;;  %v584_v62 = vor.u32 %v582_v48, %v581_v52  ;;  %v585_v63 = vrot.slane %v581_v52, 4  ;;  %9264 = vmatpush3.bf16.msra.mxu0 %v10189_v2  ;;  %v1128_v9 = vld [vmem:[#allocation2 + $0x70] sm:$0xe]  ;;  %v10191_v12 = vld [vmem:[#allocation7 + $0x1b0] sm:$0xff]   ;;  %v10192_v16 = vld [vmem:[#allocation7 + $0x1f8] sm:$0xff]  }
  0xc3   : > { %v1031_v44 = vsel %vm10778_vm11, %v1026_v38, %v1030_v57  ;;  %v1033_v0 = vshrl.u32 %v829_v58, 16  ;;  %v1036_v1 = vshll.u32 %v829_v58, 16  ;;  %v587_v3 = vshrl.u32 %v9087_v61, 16  ;;  %9326 = vmatpush3.bf16.msra.mxu1 %v10191_v12  ;;  %v10193_v20 = vld [vmem:[#allocation7 + $0x1b8] sm:$0xff]   ;;  %v1641_v25 = vld [vmem:[#allocation2 + $0x10] sm:$0xe] }
  0xc4   : > { %v8615_v51 = vcombine.low %v1017_v33, %v1031_v44  ;;  %v590_v31 = vshll.u32 %v9087_v61, 16  ;;  %3032 = vmatmul.mubr.bf16.gmra.mrb[24].mxu1 %v8639_v56  ;;  %v718_v4 = vsel %vm10738_vm4, %v584_v62, %v717_v54  ;;  %v721_v5 = vsel %vm10742_vm5, %v585_v63, %v720_v55  ;;  %9327 = vmatprep.subr.bf16.mxu1 %v10192_v16  ;;  %v1639_v49 = vld [vmem:[#allocation2 + $0x8] sm:$0xe]  ;;  %v1640_v24 = vld [vmem:[#allocation2 + $0xc] sm:$0x1]  ;;  %v10942_v33 = vld [vmem:[#allocation7 + $0x200] sm:$0xff]  }
  0xc5   : > { %v1035_v45 = vrot.slane %v1033_v0, 4  ;;  %v1038_v6 = vrot.slane %v1036_v1, 5  ;;  %719 = vst [vmem:[#allocation2 + $0x78] sm:$0xf] %v718_v4  ;;  %722 = vst [vmem:[#allocation2 + $0x7c] sm:$0x1] %v721_v5  ;;  %9937 = vmatprep.subr.bf16.mxu0 %v10942_v33 }
  0xc6   : > { %2934 = vmatprep.mubr.bf16.mxu0 %v8615_v51  ;;  %v10935_v8 = vrot.slane %v587_v3, 7  ;;  %v8631_v19 = vrot.slane %v1128_v9, 9  ;;  %v1642_v26 = vld [vmem:[#allocation2 + $0x14] sm:$0x1]  ;;  %v8657_v27 = vrot.slane %v1639_v49, 9  ;;  %v1705_v28 = vrot.slane %v1640_v24, 5 }
  0xc7   : > { %v1039_v11 = vor.u32 %v1038_v6, %v1035_v45  ;;  %v830_v13 = vld [vmem:[#allocation2 + $0x74] sm:$0x1]  ;;  %9328 = vmatpush3.bf16.msra.mxu1 %v10193_v20  ;;  %v8658_v37 = vrot.slane %v1641_v25, 9  ;;  %v1709_v51 = vrot.slane %v1642_v26, 5  ;;  %v1343_v53 = vld [vmem:[#allocation2 + $0x8] sm:$0xf] }
  0xc8   : > { %v592_v14 = vor.u32 %v590_v31, %v10935_v8  ;;  %v1129_v15 = vld [vmem:[#allocation2 + $0x74] sm:$0x1]  ;;  %v1042_v18 = vshll.u32 %v830_v13, 16  ;;  %v1344_v54 = vld [vmem:[#allocation2 + $0xc] sm:$0x1]  ;;  %v1706_v52 = vsel %vm10767_vm10, %v8657_v27, %v1705_v28  ;;  %v1376_v62 = vshrl.u32 %v1343_v53, 16 }
  0xc9   : > { %2935 = vmatmul.mubr.bf16.gmra.mrb[24].mxu0 %v10178_v39  ;;  %v10938_v17 = vrot.slane %v1039_v11, 4  ;;  %v1225_v23 = vrot.slane %v1129_v15, 5  ;;  %v10258_v38 = vld [vmem:[#allocation7 + $0x40] sm:$0xff]   ;;  %v1710_v58 = vsel %vm10767_vm10, %v8658_v37, %v1709_v51  ;;  %v1379_v63 = vshll.u32 %v1343_v53, 16  ;;  %v1883_v15 = vld [vmem:[#allocation2 + $0x1c] sm:$0x1] }
  0xca   : > { %v724_v57 = vsel %vm10738_vm4, %v592_v14, %v723_v7  ;;  %v1044_v22 = vrot.slane %v1042_v18, 5  ;;  %9393 = vmatprep.subr.bf16.mxu1 %v10258_v38  ;;  %v1345_v59 = vld [vmem:[#allocation2 + $0x10] sm:$0xf]  ;;  %v1346_v61 = vld [vmem:[#allocation2 + $0x14] sm:$0x1]  ;;  %v1385_v31 = vshll.u32 %v1344_v54, 16  ;;  %v8673_v11 = vcombine.low %v1706_v52, %v1710_v58 }
  0xcb   : > { %725 = vst [vmem:[#allocation2 + $0x80] sm:$0xf] %v724_v57  ;;  %v1226_v48 = vsel %vm10767_vm10, %v8631_v19, %v1225_v23  ;;  %v1880_v4 = vld [vmem:[#allocation2 + $0x10] sm:$0xf]  ;;  %v1378_v5 = vrot.slane %v1376_v62, 4  ;;  %v1381_v45 = vrot.slane %v1379_v63, 5 }
  0xcc   : > { %v831_v29 = vld [vmem:[#allocation2 + $0x78] sm:$0xf]  ;;  %v832_v30 = vld [vmem:[#allocation2 + $0x7c] sm:$0x1]  ;;  %v1045_v0 = vsel %vm10778_vm11, %v10938_v17, %v1044_v22  ;;  %v1390_v6 = vshrl.u32 %v1345_v59, 16  ;;  %v1393_v7 = vshll.u32 %v1345_v59, 16 }
  0xcd   : > { %v1047_v32 = vshrl.u32 %v831_v29, 16  ;;  %v1050_v35 = vshll.u32 %v831_v29, 16  ;;  %v1056_v36 = vshll.u32 %v832_v30, 16  ;;  %v1130_v39 = vld [vmem:[#allocation2 + $0x78] sm:$0xe]  ;;  %v1387_v12 = vrot.slane %v1385_v31, 5 }
  0xce   : > { %v1131_v40 = vld [vmem:[#allocation2 + $0x7c] sm:$0x1]  ;;  %v8632_v47 = vrot.slane %v1130_v39, 9  ;;  %v10186_v2 = vld [vmem:[#allocation2 + $0x70] ss:$8 sps:$4 sm:$0xff]   ;;  %v1399_v13 = vshll.u32 %v1346_v61, 16  ;;  %v1382_v17 = vor.u32 %v1381_v45, %v1378_v5 }
  0xcf   : > { %v1049_v43 = vrot.slane %v1047_v32, 4  ;;  %v1052_v44 = vrot.slane %v1050_v35, 5  ;;  %v1058_v46 = vrot.slane %v1056_v36, 5  ;;  %v1229_v50 = vrot.slane %v1131_v40, 5  ;;  %v1881_v9 = vld [vmem:[#allocation2 + $0x14] sm:$0x1] }
  0xd0   : > { %v1882_v14 = vld [vmem:[#allocation2 + $0x18] sm:$0xf]  ;;  %v1392_v18 = vrot.slane %v1390_v6, 4  ;;  %v1395_v19 = vrot.slane %v1393_v7, 5  ;;  %v1401_v20 = vrot.slane %v1399_v13, 5  ;;  %v1913_v57 = vshrl.u32 %v1880_v4, 16 }
  0xd1   : > { %v1053_v55 = vor.u32 %v1052_v44, %v1049_v43  ;;  %v1230_v60 = vsel %vm10767_vm10, %v8632_v47, %v1229_v50  ;;  %v1916_v49 = vshll.u32 %v1880_v4, 16  ;;  %v1922_v22 = vshll.u32 %v1881_v9, 16  ;;  %v1643_v27 = vld [vmem:[#allocation2 + $0x18] sm:$0xe]  ;;  %v1644_v35 = vld [vmem:[#allocation2 + $0x1c] sm:$0x1] }
  0xd2   : > { %v10188_v56 = vld [vmem:[#allocation2 + $0x78] ss:$8 sps:$4 sm:$0xff]   ;;  %v8640_v3 = vcombine.low %v1226_v48, %v1230_v60  ;;  %v1383_v23 = vrot.slane %v1382_v17, 4  ;;  %v1396_v24 = vor.u32 %v1395_v19, %v1392_v18  ;;  %v1927_v25 = vshrl.u32 %v1882_v14, 16  ;;  %v1350_v61 = vld [vmem:[#allocation2 + $0x24] sm:$0x1] }
  0xd3   : > { %v1054_v1 = vrot.slane %v1053_v55, 4  ;;  %3039 = vmatprep.mubr.bf16.mxu1 %v10188_v56  ;;  %v1930_v26 = vshll.u32 %v1882_v14, 16  ;;  %v1915_v28 = vrot.slane %v1913_v57, 4  ;;  %v1918_v29 = vrot.slane %v1916_v49, 5  ;;  %v1645_v40 = vld [vmem:[#allocation2 + $0x20] sm:$0xe] }
  0xd4   : > { %3040 = vmatmul.mubr.bf16.gmra.mrb[28].mxu1 %v8640_v3  ;;  %v1924_v30 = vrot.slane %v1922_v22, 5  ;;  %v1936_v32 = vshll.u32 %v1883_v15, 16  ;;  %v1388_v36 = vsel %vm10778_vm11, %v1383_v23, %v1387_v12  ;;  %v1397_v37 = vrot.slane %v1396_v24, 4  ;;  %v1347_v55 = vld [vmem:[#allocation2 + $0x18] sm:$0xf]  ;;  %v10198_v22 = vld [vmem:[#allocation7 + $0x210] sm:$0xff]  }
  0xd5   : > { %v1059_v10 = vsel %vm10778_vm11, %v1054_v1, %v1058_v46  ;;  %v1929_v38 = vrot.slane %v1927_v25, 4  ;;  %v1932_v39 = vrot.slane %v1930_v26, 5  ;;  %v1919_v43 = vor.u32 %v1918_v29, %v1915_v28  ;;  %v1646_v46 = vld [vmem:[#allocation2 + $0x24] sm:$0x1]  ;;  %v1348_v56 = vld [vmem:[#allocation2 + $0x1c] sm:$0x1] }
  0xd6   : > { %v8616_v16 = vcombine.low %v1045_v0, %v1059_v10  ;;  %v1938_v44 = vrot.slane %v1936_v32, 5  ;;  %v8659_v47 = vrot.slane %v1643_v27, 9  ;;  %v1713_v48 = vrot.slane %v1644_v35, 5  ;;  %v1349_v58 = vld [vmem:[#allocation2 + $0x20] sm:$0xf]  ;;  %v10196_v31 = vld [vmem:[#allocation7 + $0x208] sm:$0xff]  }
  0xd7   : > { %v1402_v50 = vsel %vm10778_vm11, %v1397_v37, %v1401_v20  ;;  %v1933_v51 = vor.u32 %v1932_v39, %v1929_v38  ;;  %v8660_v53 = vrot.slane %v1645_v40, 9  ;;  %v1717_v54 = vrot.slane %v1646_v46, 5  ;;  %v10195_v0 = vld [vmem:[#allocation2 + $0x10] ss:$8 sps:$4 sm:$0xff]   ;;  %v1884_v7 = vld [vmem:[#allocation2 + $0x20] sm:$0xf] }
  0xd8   : > { %2942 = vmatprep.mubr.bf16.mxu0 %v8616_v16  ;;  %v8649_v52 = vcombine.low %v1388_v36, %v1402_v50  ;;  %v1920_v59 = vrot.slane %v1919_v43, 4  ;;  %v1714_v60 = vsel %vm10767_vm10, %v8659_v47, %v1713_v48  ;;  %v1404_v62 = vshrl.u32 %v1347_v55, 16  ;;  %v1885_v13 = vld [vmem:[#allocation2 + $0x24] sm:$0x1]  ;;  %v1886_v17 = vld [vmem:[#allocation2 + $0x28] sm:$0xf] }
  0xd9   : > { %2943 = vmatmul.mubr.bf16.gmra.mrb[28].mxu0 %v10186_v2  ;;  %v1934_v63 = vrot.slane %v1933_v51, 4  ;;  %v1718_v1 = vsel %vm10767_vm10, %v8660_v53, %v1717_v54  ;;  %v1407_v2 = vshll.u32 %v1347_v55, 16  ;;  %v1413_v3 = vshll.u32 %v1348_v56, 16  ;;  %v1887_v18 = vld [vmem:[#allocation2 + $0x2c] sm:$0x1]  ;;  %v10259_v38 = vld [vmem:[#allocation7] sm:$0xff]  }
  0xda   : > { %3080 = vmatprep.mubr.bf16.mxu0 %v8673_v11  ;;  %v1925_v4 = vsel %vm10778_vm11, %v1920_v59, %v1924_v30  ;;  %v8674_v5 = vcombine.low %v1714_v60, %v1718_v1  ;;  %v1406_v45 = vrot.slane %v1404_v62, 4  ;;  %v1418_v6 = vshrl.u32 %v1349_v58, 16  ;;  %v1647_v37 = vld [vmem:[#allocation2 + $0x28] sm:$0xe]  ;;  %v1649_v46 = vld [vmem:[#allocation2 + $0x30] sm:$0xe] }
  0xdb   : > { %v1939_v9 = vsel %vm10778_vm11, %v1934_v63, %v1938_v44  ;;  %v1409_v10 = vrot.slane %v1407_v2, 5  ;;  %v1415_v11 = vrot.slane %v1413_v3, 5  ;;  %v1421_v12 = vshll.u32 %v1349_v58, 16  ;;  %v1648_v44 = vld [vmem:[#allocation2 + $0x2c] sm:$0x1]  ;;  %v10260_v48 = vld [vmem:[#allocation7 + $0x48] sm:$0xff]  }
  0xdc   : > { %v8689_v14 = vcombine.low %v1925_v4, %v1939_v9  ;;  %v1420_v15 = vrot.slane %v1418_v6, 4  ;;  %v1427_v16 = vshll.u32 %v1350_v61, 16  ;;  %v1941_v57 = vshrl.u32 %v1884_v7, 16  ;;  %v1650_v53 = vld [vmem:[#allocation2 + $0x34] sm:$0x1]  ;;  %v10200_v56 = vld [vmem:[#allocation7 + $0x218] sm:$0xff]  }
  0xdd   : > { %v1410_v19 = vor.u32 %v1409_v10, %v1406_v45  ;;  %v1423_v20 = vrot.slane %v1421_v12, 5  ;;  %v1944_v49 = vshll.u32 %v1884_v7, 16  ;;  %v1950_v24 = vshll.u32 %v1885_v13, 16  ;;  %v1351_v58 = vld [vmem:[#allocation2 + $0x28] sm:$0xf]  ;;  %v10202_v4 = vld [vmem:[#allocation7 + $0x220] sm:$0xff]  }
  0xde   : > { %3177 = vmatprep.mubr.bf16.mxu1 %v8689_v14  ;;  %v1429_v23 = vrot.slane %v1427_v16, 5  ;;  %v1955_v25 = vshrl.u32 %v1886_v17, 16  ;;  %v1958_v26 = vshll.u32 %v1886_v17, 16  ;;  %v1943_v29 = vrot.slane %v1941_v57, 4  ;;  %v1352_v61 = vld [vmem:[#allocation2 + $0x2c] sm:$0x1] }
  0xdf   : > { %3178 = vmatmul.mubr.bf16.vlgmr.msra.gmra.mrb[32].mxu1 %v10195_v0  ;;  %v1411_v27 = vrot.slane %v1410_v19, 4  ;;  %v1424_v28 = vor.u32 %v1423_v20, %v1420_v15  ;;  %v1946_v30 = vrot.slane %v1944_v49, 5  ;;  %v1952_v32 = vrot.slane %v1950_v24, 5  ;;  %v10197_v0 = vld [vmem:[#allocation2 + $0x20] ss:$8 sps:$4 sm:$0xff]  }
  0xe0   : > { %v1957_v35 = vrot.slane %v1955_v25, 4  ;;  %v1964_v36 = vshll.u32 %v1887_v18, 16  ;;  %9394 = vmatpush3.bf16.msra.mxu1 %v10259_v38  ;;  %v8661_v47 = vrot.slane %v1647_v37, 9  ;;  %v1721_v54 = vrot.slane %v1648_v44, 5  ;;  %v1353_v2 = vld [vmem:[#allocation2 + $0x30] sm:$0xf] }
  0xe1   : > { %3081 = vmatmul.mubr.bf16.vlgmr.msra.gmra.mrb[32].mxu0 %v8649_v52  ;;  %v1416_v39 = vsel %vm10778_vm11, %v1411_v27, %v1415_v11  ;;  %v1425_v40 = vrot.slane %v1424_v28, 4  ;;  %v1947_v43 = vor.u32 %v1946_v30, %v1943_v29  ;;  %9395 = vmatprep.subr.bf16.mxu1 %v10260_v48  ;;  %v8662_v55 = vrot.slane %v1649_v46, 9  ;;  %v1354_v3 = vld [vmem:[#allocation2 + $0x34] sm:$0x1]  ;;  %v10262_v10 = vld [vmem:[#allocation7 + $0x50] sm:$0xff]   ;;  %v10264_v44 = vld [vmem:[#allocation7 + $0x58] sm:$0xff]  }
  0xe2   : > { %9938 = vmatpush3.bf16.msra.mxu0 %v10942_v33  ;;  %3088 = vmatprep.mubr.bf16.mxu0 %v8674_v5  ;;  %v1960_v33 = vrot.slane %v1958_v26, 5  ;;  %v1966_v51 = vrot.slane %v1964_v36, 5  ;;  %v1725_v60 = vrot.slane %v1650_v53, 5  ;;  %v1722_v1 = vsel %vm10767_vm10, %v8661_v47, %v1721_v54  ;;  %v10261_v5 = vld [vmem:[#allocation7 + $0x8] sm:$0xff]   ;;  %v1888_v15 = vld [vmem:[#allocation2 + $0x30] sm:$0xf] }
  0xe3   : > { %9939 = vmatprep.subr.bf16.mxu0 %v10196_v31  ;;  %v1430_v52 = vsel %vm10778_vm11, %v1425_v40, %v1429_v23  ;;  %v1948_v59 = vrot.slane %v1947_v43, 4  ;;  %v1435_v7 = vshll.u32 %v1351_v58, 16  ;;  %v1441_v9 = vshll.u32 %v1352_v61, 16  ;;  %v1889_v16 = vld [vmem:[#allocation2 + $0x34] sm:$0x1]  ;;  %v10263_v26 = vld [vmem:[#allocation7 + $0x10] sm:$0xff]  }
  0xe4   : > { %v1961_v50 = vor.u32 %v1960_v33, %v1957_v35  ;;  %v8650_v62 = vcombine.low %v1416_v39, %v1430_v52  ;;  %9396 = vmatpush3.bf16.msra.mxu1 %v10261_v5  ;;  %v1726_v6 = vsel %vm10767_vm10, %v8662_v55, %v1725_v60  ;;  %v1446_v14 = vshrl.u32 %v1353_v2, 16  ;;  %v1890_v57 = vld [vmem:[#allocation2 + $0x38] sm:$0xf]  ;;  %v1891_v23 = vld [vmem:[#allocation2 + $0x3c] sm:$0x1]  ;;  %v10265_v53 = vld [vmem:[#allocation7 + $0x18] sm:$0xff]  }
  0xe5   : > { %v1953_v45 = vsel %vm10778_vm11, %v1948_v59, %v1952_v32  ;;  %9397 = vmatprep.subr.bf16.mxu1 %v10262_v10  ;;  %v8675_v12 = vcombine.low %v1722_v1, %v1726_v6  ;;  %v1437_v18 = vrot.slane %v1435_v7, 5  ;;  %v1443_v19 = vrot.slane %v1441_v9, 5  ;;  %v10204_v32 = vld [vmem:[#allocation7 + $0x228] sm:$0xff]   ;;  %v1654_v52 = vld [vmem:[#allocation2 + $0x44] sm:$0x1]  ;;  %v10266_v60 = vld [vmem:[#allocation7 + $0x60] sm:$0xff]  }
  0xe6   : > { %9940 = vmatpush3.bf16.msra.mxu0 %v10196_v31  ;;  %v1962_v63 = vrot.slane %v1961_v50, 4  ;;  %v1432_v31 = vshrl.u32 %v1351_v58, 16  ;;  %v1449_v20 = vshll.u32 %v1353_v2, 16  ;;  %v1448_v49 = vrot.slane %v1446_v14, 4  ;;  %v1651_v50 = vld [vmem:[#allocation2 + $0x38] sm:$0xe] }
  0xe7   : > { %9941 = vmatprep.subr.bf16.mxu0 %v10198_v22  ;;  %v1969_v24 = vshrl.u32 %v1888_v15, 16  ;;  %v1972_v25 = vshll.u32 %v1888_v15, 16  ;;  %v1978_v29 = vshll.u32 %v1889_v16, 16  ;;  %v1983_v30 = vshrl.u32 %v1890_v57, 16  ;;  %v10206_v1 = vld [vmem:[#allocation7 + $0x230] sm:$0xff]  }
  0xe8   : > { %v1967_v11 = vsel %vm10778_vm11, %v1962_v63, %v1966_v51  ;;  %v1434_v13 = vrot.slane %v1432_v31, 4  ;;  %9398 = vmatpush3.bf16.msra.mxu1 %v10263_v26  ;;  %v1451_v28 = vrot.slane %v1449_v20, 5  ;;  %v1986_v37 = vshll.u32 %v1890_v57, 16  ;;  %v1652_v51 = vld [vmem:[#allocation2 + $0x3c] sm:$0x1] }
  0xe9   : > { %3089 = vmatmul.mubr.bf16.gmra.mrb[36].mxu0 %v8650_v62  ;;  %v8690_v17 = vcombine.low %v1953_v45, %v1967_v11  ;;  %v1971_v33 = vrot.slane %v1969_v24, 4  ;;  %v1974_v36 = vrot.slane %v1972_v25, 5  ;;  %v1980_v40 = vrot.slane %v1978_v29, 5  ;;  %9399 = vmatprep.subr.bf16.mxu1 %v10264_v44  ;;  %v1356_v5 = vld [vmem:[#allocation2 + $0x3c] sm:$0x1] }
  0xea   : > { %9942 = vmatpush3.bf16.msra.mxu0 %v10198_v22  ;;  %3096 = vmatprep.mubr.bf16.mxu0 %v8675_v12  ;;  %v1455_v22 = vshll.u32 %v1354_v3, 16  ;;  %v1438_v27 = vor.u32 %v1437_v18, %v1434_v13  ;;  %v1452_v39 = vor.u32 %v1451_v28, %v1448_v49  ;;  %v1985_v43 = vrot.slane %v1983_v30, 4  ;;  %v1357_v45 = vld [vmem:[#allocation2 + $0x40] sm:$0xf]  ;;  %v10199_v9 = vld [vmem:[#allocation2 + $0x30] ss:$8 sps:$4 sm:$0xff]  }
  0xeb   : > { %9943 = vmatprep.subr.bf16.mxu0 %v10200_v56  ;;  %3185 = vmatprep.mubr.bf16.mxu1 %v8690_v17  ;;  %v1975_v46 = vor.u32 %v1974_v36, %v1971_v33  ;;  %v1988_v47 = vrot.slane %v1986_v37, 5  ;;  %v1992_v48 = vshll.u32 %v1891_v23, 16  ;;  %v8663_v59 = vrot.slane %v1651_v50, 9  ;;  %v1358_v11 = vld [vmem:[#allocation2 + $0x44] sm:$0x1]  ;;  %v10267_v12 = vld [vmem:[#allocation7 + $0x20] sm:$0xff]  }
  0xec   : > { %3186 = vmatmul.mubr.bf16.gmra.mrb[36].mxu1 %v10197_v0  ;;  %v1457_v35 = vrot.slane %v1455_v22, 5  ;;  %v1439_v38 = vrot.slane %v1438_v27, 4  ;;  %v1453_v55 = vrot.slane %v1452_v39, 4  ;;  %v1729_v63 = vrot.slane %v1652_v51, 5  ;;  %v1355_v0 = vld [vmem:[#allocation2 + $0x38] sm:$0xf] }
  0xed   : > { %9400 = vmatpush3.bf16.msra.mxu1 %v10265_v53  ;;  %v1976_v58 = vrot.slane %v1975_v46, 4  ;;  %v1989_v61 = vor.u32 %v1988_v47, %v1985_v43  ;;  %v1994_v62 = vrot.slane %v1992_v48, 5  ;;  %v1733_v31 = vrot.slane %v1654_v52, 5  ;;  %v10208_v17 = vld [vmem:[#allocation7 + $0x238] sm:$0xff]   ;;  %v10268_v18 = vld [vmem:[#allocation7 + $0x68] sm:$0xff]  }
  0xee   : > { %9944 = vmatpush3.bf16.msra.mxu0 %v10200_v56  ;;  %v1444_v54 = vsel %vm10778_vm11, %v1439_v38, %v1443_v19  ;;  %v1653_v56 = vld [vmem:[#allocation2 + $0x40] sm:$0xe]  ;;  %9401 = vmatprep.subr.bf16.mxu1 %v10266_v60  ;;  %v1458_v2 = vsel %vm10778_vm11, %v1453_v55, %v1457_v35  ;;  %v1730_v10 = vsel %vm10767_vm10, %v8663_v59, %v1729_v63  ;;  %v1460_v14 = vshrl.u32 %v1355_v0, 16  ;;  %v1893_v23 = vld [vmem:[#allocation2 + $0x44] sm:$0x1]  ;;  %v10269_v36 = vld [vmem:[#allocation7 + $0x28] sm:$0xff]  }
  0xef   : > { %9945 = vmatprep.subr.bf16.mxu0 %v10202_v4  ;;  %v8664_v3 = vrot.slane %v1653_v56, 9  ;;  %v8651_v6 = vcombine.low %v1444_v54, %v1458_v2  ;;  %v1990_v7 = vrot.slane %v1989_v61, 4  ;;  %v1463_v15 = vshll.u32 %v1355_v0, 16  ;;  %v1892_v22 = vld [vmem:[#allocation2 + $0x40] sm:$0xf]  ;;  %v10272_v2 = vld [vmem:[#allocation7 + $0x78] sm:$0xff]  }
  0xf0   : > { %v1469_v16 = vshll.u32 %v1356_v5, 16  ;;  %v1474_v57 = vshrl.u32 %v1357_v45, 16  ;;  %v1477_v49 = vshll.u32 %v1357_v45, 16  ;;  %v1462_v25 = vrot.slane %v1460_v14, 4  ;;  %v1894_v28 = vld [vmem:[#allocation2 + $0x48] sm:$0xf] }
  0xf1   : > { %9402 = vmatpush3.bf16.msra.mxu1 %v10267_v12  ;;  %v1734_v13 = vsel %vm10767_vm10, %v8664_v3, %v1733_v31  ;;  %3097 = vmatmul.mubr.bf16.gmra.mrb[40].mxu0 %v8651_v6  ;;  %v1995_v19 = vsel %vm10778_vm11, %v1990_v7, %v1994_v62  ;;  %v1465_v26 = vrot.slane %v1463_v15, 5  ;;  %v1895_v35 = vld [vmem:[#allocation2 + $0x4c] sm:$0x1]  ;;  %v1997_v33 = vshrl.u32 %v1892_v22, 16  ;;  %v10270_v54 = vld [vmem:[#allocation7 + $0x70] sm:$0xff]   ;;  %v10273_v7 = vld [vmem:[#allocation7 + $0xc0] sm:$0xff]  }
  0xf2   : > { %9946 = vmatpush3.bf16.msra.mxu0 %v10202_v4  ;;  %v1981_v4 = vsel %vm10778_vm11, %v1976_v58, %v1980_v40  ;;  %9403 = vmatprep.subr.bf16.mxu1 %v10268_v18  ;;  %v8676_v20 = vcombine.low %v1730_v10, %v1734_v13  ;;  %v1471_v27 = vrot.slane %v1469_v16, 5  ;;  %v1476_v29 = vrot.slane %v1474_v57, 4  ;;  %v1655_v60 = vld [vmem:[#allocation2 + $0x48] sm:$0xe]  ;;  %v10271_v58 = vld [vmem:[#allocation7 + $0x30] sm:$0xff]  }
  0xf3   : > { %9947 = vmatprep.subr.bf16.mxu0 %v10204_v32  ;;  %v8691_v24 = vcombine.low %v1981_v4, %v1995_v19  ;;  %v1479_v30 = vrot.slane %v1477_v49, 5  ;;  %v1466_v37 = vor.u32 %v1465_v26, %v1462_v25  ;;  %v2000_v38 = vshll.u32 %v1892_v22, 16  ;;  %v1656_v63 = vld [vmem:[#allocation2 + $0x4c] sm:$0x1]  ;;  %v1657_v0 = vld [vmem:[#allocation2 + $0x50] sm:$0xe] }
  0xf4   : > { %3104 = vmatprep.mubr.bf16.mxu0 %v8676_v20  ;;  %v2006_v39 = vshll.u32 %v1893_v23, 16  ;;  %v2011_v40 = vshrl.u32 %v1894_v28, 16  ;;  %v1999_v46 = vrot.slane %v1997_v33, 4  ;;  %v2014_v47 = vshll.u32 %v1894_v28, 16  ;;  %v1359_v6 = vld [vmem:[#allocation2 + $0x48] sm:$0xf] }
  0xf5   : > { %9404 = vmatpush3.bf16.msra.mxu1 %v10269_v36  ;;  %3193 = vmatprep.mubr.bf16.mxu1 %v8691_v24  ;;  %v1480_v43 = vor.u32 %v1479_v30, %v1476_v29  ;;  %v593_v48 = vrot.slane %v10935_v8, 4  ;;  %v1467_v50 = vrot.slane %v1466_v37, 4  ;;  %v2002_v51 = vrot.slane %v2000_v38, 5  ;;  %v1360_v4 = vld [vmem:[#allocation2 + $0x4c] sm:$0x1]  ;;  %v10275_v24 = vld [vmem:[#allocation7 + $0x140] sm:$0xff]  }
  0xf6   : > { %9948 = vmatpush3.bf16.msra.mxu0 %v10204_v32  ;;  %v1483_v32 = vshll.u32 %v1358_v11, 16  ;;  %3194 = vmatmul.mubr.bf16.gmra.mrb[40].mxu1 %v10199_v9  ;;  %v2013_v53 = vrot.slane %v2011_v40, 4  ;;  %v2008_v56 = vrot.slane %v2006_v39, 5  ;;  %v2016_v52 = vrot.slane %v2014_v47, 5  ;;  %v1361_v13 = vld [vmem:[#allocation2 + $0x50] sm:$0xf] }
  0xf7   : > { %9949 = vmatprep.subr.bf16.mxu0 %v10206_v1  ;;  %9405 = vmatprep.subr.bf16.mxu1 %v10270_v54  ;;  %v1481_v55 = vrot.slane %v1480_v43, 4  ;;  %v2020_v59 = vshll.u32 %v1895_v35, 16  ;;  %v1472_v61 = vsel %vm10778_vm11, %v1467_v50, %v1471_v27  ;;  %v2003_v62 = vor.u32 %v2002_v51, %v1999_v46  ;;  %v10201_v15 = vld [vmem:[#allocation2 + $0x40] ss:$8 sps:$4 sm:$0xff]   ;;  %v1896_v29 = vld [vmem:[#allocation2 + $0x50] sm:$0xf] }
  0xf8   : > { %v1485_v44 = vrot.slane %v1483_v32, 5  ;;  %v2017_v31 = vor.u32 %v2016_v52, %v2013_v53  ;;  %v8665_v45 = vrot.slane %v1655_v60, 9  ;;  %v1737_v11 = vrot.slane %v1656_v63, 5  ;;  %v10274_v20 = vld [vmem:[#allocation7 + $0x38] sm:$0xff]   ;;  %v1897_v30 = vld [vmem:[#allocation2 + $0x54] sm:$0x1] }
  0xf9   : > { %9406 = vmatpush3.bf16.msra.mxu1 %v10271_v58  ;;  %v2022_v5 = vrot.slane %v2020_v59, 5  ;;  %v2004_v10 = vrot.slane %v2003_v62, 4  ;;  %v8666_v12 = vrot.slane %v1657_v0, 9  ;;  %v1488_v18 = vshrl.u32 %v1359_v6, 16  ;;  %v1898_v37 = vld [vmem:[#allocation2 + $0x58] sm:$0xf] }
  0xfa   : > { %9950 = vmatpush3.bf16.msra.mxu0 %v10206_v1  ;;  %v1658_v1 = vld [vmem:[#allocation2 + $0x54] sm:$0x1]  ;;  %9407 = vmatprep.subr.bf16.mxu1 %v10272_v2  ;;  %v1486_v3 = vsel %vm10778_vm11, %v1481_v55, %v1485_v44  ;;  %v2018_v14 = vrot.slane %v2017_v31, 4  ;;  %v1491_v19 = vshll.u32 %v1359_v6, 16  ;;  %v1738_v49 = vsel %vm10767_vm10, %v8665_v45, %v1737_v11  ;;  %v1899_v38 = vld [vmem:[#allocation2 + $0x5c] sm:$0x1] }
  0xfb   : > { %9951 = vmatprep.subr.bf16.mxu0 %v10208_v17  ;;  %v8652_v9 = vcombine.low %v1472_v61, %v1486_v3  ;;  %v1741_v16 = vrot.slane %v1658_v1, 5  ;;  %v2009_v57 = vsel %vm10778_vm11, %v2004_v10, %v2008_v56  ;;  %v1497_v22 = vshll.u32 %v1360_v4, 16  ;;  %v1659_v61 = vld [vmem:[#allocation2 + $0x58] sm:$0xe]  ;;  %v1660_v1 = vld [vmem:[#allocation2 + $0x5c] sm:$0x1] }
  0xfc   : > { %v1502_v23 = vshrl.u32 %v1361_v13, 16  ;;  %v2023_v25 = vsel %vm10778_vm11, %v2018_v14, %v2022_v5  ;;  %v1490_v27 = vrot.slane %v1488_v18, 4  ;;  %v1493_v28 = vrot.slane %v1491_v19, 5  ;;  %v1661_v2 = vld [vmem:[#allocation2 + $0x60] sm:$0xe] }
  0xfd   : > { %9408 = vmatpush3.bf16.msra.mxu1 %v10274_v20  ;;  %3105 = vmatmul.mubr.bf16.gmra.mrb[44].mxu0 %v8652_v9  ;;  %v1742_v26 = vsel %vm10767_vm10, %v8666_v12, %v1741_v16  ;;  %v8692_v32 = vcombine.low %v2009_v57, %v2023_v25  ;;  %v1499_v33 = vrot.slane %v1497_v22, 5  ;;  %v1505_v40 = vshll.u32 %v1361_v13, 16  ;;  %v1662_v45 = vld [vmem:[#allocation2 + $0x64] sm:$0x1]  ;;  %v1364_v12 = vld [vmem:[#allocation2 + $0x5c] sm:$0x1] }
  0xfe   : > { %9952 = vmatpush3.bf16.msra.mxu0 %v10208_v17  ;;  %v1362_v17 = vld [vmem:[#allocation2 + $0x54] sm:$0x1]  ;;  %9521 = vmatprep.subr.bf16.mxu1 %v10275_v24  ;;  %v8677_v35 = vcombine.low %v1738_v49, %v1742_v26  ;;  %v1504_v36 = vrot.slane %v1502_v23, 4  ;;  %v1494_v39 = vor.u32 %v1493_v28, %v1490_v27  ;;  %v2025_v44 = vshrl.u32 %v1896_v29, 16  ;;  %v10203_v16 = vld [vmem:[#allocation2 + $0x50] ss:$8 sps:$4 sm:$0xff]  }
  0xff   : > { %9457 = vmatprep.subr.bf16.mxu0 %v10273_v7  ;;  %v1511_v43 = vshll.u32 %v1362_v17, 16  ;;  %3201 = vmatprep.mubr.bf16.mxu1 %v8692_v32  ;;  %v2028_v46 = vshll.u32 %v1896_v29, 16  ;;  %v2034_v47 = vshll.u32 %v1897_v30, 16  ;;  %v2039_v50 = vshrl.u32 %v1898_v37, 16  ;;  %v1363_v7 = vld [vmem:[#allocation2 + $0x58] sm:$0xf] }
 0x100   : > { %3112 = vmatprep.mubr.bf16.mxu0 %v8677_v35  ;;  %v2042_v51 = vshll.u32 %v1898_v37, 16  ;;  %3202 = vmatmul.mubr.bf16.gmra.mrb[44].mxu1 %v10201_v15  ;;  %v1495_v53 = vrot.slane %v1494_v39, 4  ;;  %v1507_v54 = vrot.slane %v1505_v40, 5  ;;  %v2027_v56 = vrot.slane %v2025_v44, 4  ;;  %v1365_v18 = vld [vmem:[#allocation2 + $0x60] sm:$0xf] }
 0x101   : > { %v1513_v55 = vrot.slane %v1511_v43, 5  ;;  %v2030_v52 = vrot.slane %v2028_v46, 5  ;;  %v2036_v59 = vrot.slane %v2034_v47, 5  ;;  %v2041_v60 = vrot.slane %v2039_v50, 4  ;;  %v1366_v19 = vld [vmem:[#allocation2 + $0x64] sm:$0x1] }
 0x102   : > { %v2044_v58 = vrot.slane %v2042_v51, 5  ;;  %v1500_v62 = vsel %vm10778_vm11, %v1495_v53, %v1499_v33  ;;  %v1508_v63 = vor.u32 %v1507_v54, %v1504_v36  ;;  %v2048_v0 = vshll.u32 %v1899_v38, 16  ;;  %v1900_v27 = vld [vmem:[#allocation2 + $0x60] sm:$0xf]  ;;  %v1901_v28 = vld [vmem:[#allocation2 + $0x64] sm:$0x1] }
 0x103   : > { %v8667_v3 = vrot.slane %v1659_v61, 9  ;;  %v2031_v31 = vor.u32 %v2030_v52, %v2027_v56  ;;  %v1745_v6 = vrot.slane %v1660_v1, 5  ;;  %v8668_v4 = vrot.slane %v1661_v2, 9  ;;  %v1902_v29 = vld [vmem:[#allocation2 + $0x68] sm:$0xf] }
 0x104   : > { %v2045_v5 = vor.u32 %v2044_v58, %v2041_v60  ;;  %v1509_v9 = vrot.slane %v1508_v63, 4  ;;  %v2050_v10 = vrot.slane %v2048_v0, 5  ;;  %v1749_v11 = vrot.slane %v1662_v45, 5  ;;  %v1903_v36 = vld [vmem:[#allocation2 + $0x6c] sm:$0x1] }
 0x105   : > { %v1516_v13 = vshrl.u32 %v1363_v7, 16  ;;  %v2032_v14 = vrot.slane %v2031_v31, 4  ;;  %v1746_v17 = vsel %vm10767_vm10, %v8667_v3, %v1745_v6  ;;  %v1519_v22 = vshll.u32 %v1363_v7, 16  ;;  %v1663_v60 = vld [vmem:[#allocation2 + $0x68] sm:$0xe] }
 0x106   : > { %v2046_v15 = vrot.slane %v2045_v5, 4  ;;  %v1514_v20 = vsel %vm10778_vm11, %v1509_v9, %v1513_v55  ;;  %v1750_v57 = vsel %vm10767_vm10, %v8668_v4, %v1749_v11  ;;  %v1525_v35 = vshll.u32 %v1364_v12, 16  ;;  %v1664_v63 = vld [vmem:[#allocation2 + $0x6c] sm:$0x1]  ;;  %v1665_v0 = vld [vmem:[#allocation2 + $0x70] sm:$0xe] }
 0x107   : > { %v1518_v49 = vrot.slane %v1516_v13, 4  ;;  %v8653_v23 = vcombine.low %v1500_v62, %v1514_v20  ;;  %v2037_v24 = vsel %vm10778_vm11, %v2032_v14, %v2036_v59  ;;  %v8678_v26 = vcombine.low %v1746_v17, %v1750_v57  ;;  %v1666_v5 = vld [vmem:[#allocation2 + $0x74] sm:$0x1]  ;;  %v1368_v14 = vld [vmem:[#allocation2 + $0x6c] sm:$0x1] }
 0x108   : > { %v2051_v25 = vsel %vm10778_vm11, %v2046_v15, %v2050_v10  ;;  %v1521_v32 = vrot.slane %v1519_v22, 5  ;;  %v1530_v33 = vshrl.u32 %v1365_v18, 16  ;;  %v1533_v37 = vshll.u32 %v1365_v18, 16  ;;  %v1367_v10 = vld [vmem:[#allocation2 + $0x68] sm:$0xf] }
 0x109   : > { %v8693_v30 = vcombine.low %v2037_v24, %v2051_v25  ;;  %3113 = vmatmul.mubr.bf16.gmra.mrb[48].mxu0 %v8653_v23  ;;  %v1539_v38 = vshll.u32 %v1366_v19, 16  ;;  %v2053_v39 = vshrl.u32 %v1900_v27, 16  ;;  %v2056_v40 = vshll.u32 %v1900_v27, 16  ;;  %v1369_v15 = vld [vmem:[#allocation2 + $0x70] sm:$0xf] }
 0x10a   : > { %3120 = vmatprep.mubr.bf16.mxu0 %v8678_v26  ;;  %v1522_v43 = vor.u32 %v1521_v32, %v1518_v49  ;;  %v1527_v44 = vrot.slane %v1525_v35, 5  ;;  %v1532_v46 = vrot.slane %v1530_v33, 4  ;;  %v2062_v47 = vshll.u32 %v1901_v28, 16  ;;  %v1370_v19 = vld [vmem:[#allocation2 + $0x74] sm:$0x1] }
 0x10b   : > { %3209 = vmatprep.mubr.bf16.mxu1 %v8693_v30  ;;  %v1535_v50 = vrot.slane %v1533_v37, 5  ;;  %v1541_v51 = vrot.slane %v1539_v38, 5  ;;  %v2055_v53 = vrot.slane %v2053_v39, 4  ;;  %v2058_v54 = vrot.slane %v2056_v40, 5  ;;  %v10205_v23 = vld [vmem:[#allocation2 + $0x60] ss:$8 sps:$4 sm:$0xff]  }
 0x10c   : > { %3210 = vmatmul.mubr.bf16.gmra.mrb[48].mxu1 %v10203_v16  ;;  %v1523_v55 = vrot.slane %v1522_v43, 4  ;;  %v2064_v56 = vrot.slane %v2062_v47, 5  ;;  %v2067_v52 = vshrl.u32 %v1902_v29, 16  ;;  %v2070_v59 = vshll.u32 %v1902_v29, 16  ;;  %v1904_v26 = vld [vmem:[#allocation2 + $0x70] sm:$0xf] }
 0x10d   : > { %v1536_v58 = vor.u32 %v1535_v50, %v1532_v46  ;;  %v2059_v61 = vor.u32 %v2058_v54, %v2055_v53  ;;  %v2076_v62 = vshll.u32 %v1903_v36, 16  ;;  %v8669_v1 = vrot.slane %v1663_v60, 9  ;;  %v1905_v32 = vld [vmem:[#allocation2 + $0x74] sm:$0x1]  ;;  %v1906_v37 = vld [vmem:[#allocation2 + $0x78] sm:$0xf] }
 0x10e   : > { %v1528_v2 = vsel %vm10778_vm11, %v1523_v55, %v1527_v44  ;;  %v2069_v3 = vrot.slane %v2067_v52, 4  ;;  %v2072_v31 = vrot.slane %v2070_v59, 5  ;;  %v1753_v45 = vrot.slane %v1664_v63, 5  ;;  %v1907_v38 = vld [vmem:[#allocation2 + $0x7c] sm:$0x1] }
 0x10f   : > { %v1537_v6 = vrot.slane %v1536_v58, 4  ;;  %v2060_v4 = vrot.slane %v2059_v61, 4  ;;  %v2078_v7 = vrot.slane %v2076_v62, 5  ;;  %v8670_v9 = vrot.slane %v1665_v0, 9  ;;  %v726_v52 = vld [vmem:[#allocation2 + $0x84] sm:$0x1] }
 0x110   : > { %v2073_v11 = vor.u32 %v2072_v31, %v2069_v3  ;;  %v1754_v12 = vsel %vm10767_vm10, %v8669_v1, %v1753_v45  ;;  %v1757_v13 = vrot.slane %v1666_v5, 5  ;;  %v1544_v16 = vshrl.u32 %v1367_v10, 16  ;;  %v1667_v62 = vld [vmem:[#allocation2 + $0x78] sm:$0xe]  ;;  %v1668_v3 = vld [vmem:[#allocation2 + $0x7c] sm:$0x1] }
 0x111   : > { %v1542_v17 = vsel %vm10778_vm11, %v1537_v6, %v1541_v51  ;;  %v2065_v18 = vsel %vm10778_vm11, %v2060_v4, %v2064_v56  ;;  %v1547_v20 = vshll.u32 %v1367_v10, 16  ;;  %v1553_v57 = vshll.u32 %v1368_v14, 16  ;;  %v1669_v31 = vld [vmem:[#allocation2 + $0x80] sm:$0xe] }
 0x112   : > { %v8654_v49 = vcombine.low %v1528_v2, %v1542_v17  ;;  %v2074_v22 = vrot.slane %v2073_v11, 4  ;;  %v1758_v24 = vsel %vm10767_vm10, %v8670_v9, %v1757_v13  ;;  %v1546_v25 = vrot.slane %v1544_v16, 4  ;;  %v1373_v13 = vld [vmem:[#allocation2 + $0x80] sm:$0xf] }
 0x113   : > { %v8679_v27 = vcombine.low %v1754_v12, %v1758_v24  ;;  %v1549_v28 = vrot.slane %v1547_v20, 5  ;;  %v1555_v29 = vrot.slane %v1553_v57, 5  ;;  %v1558_v30 = vshrl.u32 %v1369_v15, 16  ;;  %v1372_v12 = vld [vmem:[#allocation2 + $0x7c] sm:$0x1] }
 0x114   : > { %3121 = vmatmul.mubr.bf16.gmra.mrb[52].mxu0 %v8654_v49  ;;  %v2079_v35 = vsel %vm10778_vm11, %v2074_v22, %v2078_v7  ;;  %v1561_v33 = vshll.u32 %v1369_v15, 16  ;;  %v1567_v36 = vshll.u32 %v1370_v19, 16  ;;  %v2081_v44 = vshrl.u32 %v1904_v26, 16  ;;  %v1371_v7 = vld [vmem:[#allocation2 + $0x78] sm:$0xf] }
 0x115   : > { %v8694_v39 = vcombine.low %v2065_v18, %v2079_v35  ;;  %3128 = vmatprep.mubr.bf16.mxu0 %v8679_v27  ;;  %v1550_v40 = vor.u32 %v1549_v28, %v1546_v25  ;;  %v1560_v43 = vrot.slane %v1558_v30, 4  ;;  %v2084_v50 = vshll.u32 %v1904_v26, 16  ;;  %v1908_v19 = vld [vmem:[#allocation2 + $0x80] sm:$0xf]  ;;  %v10207_v57 = vld [vmem:[#allocation2 + $0x70] ss:$8 sps:$4 sm:$0xff]  }
 0x116   : > { %v1563_v46 = vrot.slane %v1561_v33, 5  ;;  %v1569_v47 = vrot.slane %v1567_v36, 5  ;;  %v2090_v51 = vshll.u32 %v1905_v32, 16  ;;  %v2083_v54 = vrot.slane %v2081_v44, 4  ;;  %v1910_v27 = vld [vmem:[#allocation2 + $0x88] sm:$0xf] }
 0x117   : > { %3217 = vmatprep.mubr.bf16.mxu1 %v8694_v39  ;;  %v1551_v53 = vrot.slane %v1550_v40, 4  ;;  %v2095_v55 = vshrl.u32 %v1906_v37, 16  ;;  %v2098_v56 = vshll.u32 %v1906_v37, 16  ;;  %v2086_v60 = vrot.slane %v2084_v50, 5 }
 0x118   : > { %3218 = vmatmul.mubr.bf16.gmra.mrb[52].mxu1 %v10205_v23  ;;  %v1564_v59 = vor.u32 %v1563_v46, %v1560_v43  ;;  %v2092_v58 = vrot.slane %v2090_v51, 5  ;;  %v2104_v61 = vshll.u32 %v1907_v38, 16  ;;  %v727_v2 = vsel %vm10742_vm5, %v593_v48, %v726_v52  ;;  %v1911_v51 = vld [vmem:[#allocation2 + $0x8c] sm:$0x1] }
 0x119   : > { %v1556_v63 = vsel %vm10778_vm11, %v1551_v53, %v1555_v29  ;;  %v2097_v0 = vrot.slane %v2095_v55, 4  ;;  %v2100_v1 = vrot.slane %v2098_v56, 5  ;;  %v2087_v45 = vor.u32 %v2086_v60, %v2083_v54  ;;  %728 = vst [vmem:[#allocation2 + $0x84] sm:$0x1] %v727_v2  ;;  %v2178_v2 = vld [vmem:[#allocation2 + $0x18] sm:$0xe] }
 0x11a   : > { %v1565_v5 = vrot.slane %v1564_v59, 4  ;;  %v2106_v6 = vrot.slane %v2104_v61, 5  ;;  %v8671_v4 = vrot.slane %v1667_v62, 9  ;;  %v1761_v10 = vrot.slane %v1668_v3, 5  ;;  %v2177_v61 = vld [vmem:[#allocation2 + $0x14] sm:$0x1] }
 0x11b   : > { %v2101_v9 = vor.u32 %v2100_v1, %v2097_v0  ;;  %v8672_v11 = vrot.slane %v1669_v31, 9  ;;  %v2088_v8 = vrot.slane %v2087_v45, 4  ;;  %v1572_v15 = vshrl.u32 %v1371_v7, 16  ;;  %v2179_v45 = vld [vmem:[#allocation2 + $0x1c] sm:$0x1] }
 0x11c   : > { %v1570_v14 = vsel %vm10778_vm11, %v1565_v5, %v1569_v47  ;;  %v1575_v16 = vshll.u32 %v1371_v7, 16  ;;  %v1581_v18 = vshll.u32 %v1372_v12, 16  ;;  %v1586_v23 = vshrl.u32 %v1373_v13, 16 }
 0x11d   : > { %v8655_v48 = vcombine.low %v1556_v63, %v1570_v14  ;;  %v2102_v17 = vrot.slane %v2101_v9, 4  ;;  %v2093_v20 = vsel %vm10778_vm11, %v2088_v8, %v2092_v58  ;;  %v1574_v49 = vrot.slane %v1572_v15, 4  ;;  %v2176_v58 = vld [vmem:[#allocation2 + $0x10] sm:$0xe]  ;;  %v2181_v15 = vld [vmem:[#allocation2 + $0x24] sm:$0x1] }
 0x11e   : > { %v1577_v22 = vrot.slane %v1575_v16, 5  ;;  %v1583_v25 = vrot.slane %v1581_v18, 5  ;;  %v1589_v26 = vshll.u32 %v1373_v13, 16  ;;  %v2109_v28 = vshrl.u32 %v1908_v19, 16  ;;  %v2182_v16 = vld [vmem:[#allocation2 + $0x28] sm:$0xe] }
 0x11f   : > { %3129 = vmatmul.mubr.bf16.gmra.mrb[56].mxu0 %v8655_v48  ;;  %v2107_v24 = vsel %vm10778_vm11, %v2102_v17, %v2106_v6  ;;  %v1588_v32 = vrot.slane %v1586_v23, 4  ;;  %v2112_v35 = vshll.u32 %v1908_v19, 16  ;;  %v1762_v36 = vsel %vm10767_vm10, %v8671_v4, %v1761_v10  ;;  %v2183_v18 = vld [vmem:[#allocation2 + $0x2c] sm:$0x1] }
 0x120   : > { %v8695_v29 = vcombine.low %v2093_v20, %v2107_v24  ;;  %v1578_v30 = vor.u32 %v1577_v22, %v1574_v49  ;;  %v1670_v33 = vld [vmem:[#allocation2 + $0x84] sm:$0x1]  ;;  %v1591_v38 = vrot.slane %v1589_v26, 5  ;;  %v2111_v39 = vrot.slane %v2109_v28, 4  ;;  %v10209_v22 = vld [vmem:[#allocation2 + $0x80] ss:$8 sps:$4 sm:$0xff]  }
 0x121   : > { %v1374_v37 = vld [vmem:[#allocation2 + $0x84] sm:$0x1]  ;;  %v1765_v40 = vrot.slane %v1670_v33, 5  ;;  %v2114_v47 = vrot.slane %v2112_v35, 5  ;;  %v2123_v54 = vshrl.u32 %v1910_v27, 16  ;;  %v2126_v55 = vshll.u32 %v1910_v27, 16 }
 0x122   : > { %3225 = vmatprep.mubr.bf16.mxu1 %v8695_v29  ;;  %v1579_v43 = vrot.slane %v1578_v30, 4  ;;  %v1595_v44 = vshll.u32 %v1374_v37, 16  ;;  %v1909_v46 = vld [vmem:[#allocation2 + $0x84] sm:$0x1]  ;;  %v1592_v50 = vor.u32 %v1591_v38, %v1588_v32  ;;  %v2132_v5 = vshll.u32 %v1911_v51, 16 }
 0x123   : > { %3226 = vmatmul.mubr.bf16.gmra.mrb[56].mxu1 %v10207_v57  ;;  %v2118_v53 = vshll.u32 %v1909_v46, 16  ;;  %v1766_v56 = vsel %vm10767_vm10, %v8672_v11, %v1765_v40  ;;  %v2115_v60 = vor.u32 %v2114_v47, %v2111_v39  ;;  %v2125_v1 = vrot.slane %v2123_v54, 4  ;;  %v2180_v11 = vld [vmem:[#allocation2 + $0x20] sm:$0xe]  ;;  %v2184_v57 = vld [vmem:[#allocation2 + $0x30] sm:$0xe] }
 0x124   : > { %v1584_v52 = vsel %vm10778_vm11, %v1579_v43, %v1583_v25  ;;  %v1597_v59 = vrot.slane %v1595_v44, 5  ;;  %v8680_v62 = vcombine.low %v1762_v36, %v1766_v56  ;;  %v1593_v63 = vrot.slane %v1592_v50, 4  ;;  %v2185_v26 = vld [vmem:[#allocation2 + $0x34] sm:$0x1]  ;;  %v2186_v28 = vld [vmem:[#allocation2 + $0x38] sm:$0xe] }
 0x125   : > { %v2120_v0 = vrot.slane %v2118_v53, 5  ;;  %v2116_v3 = vrot.slane %v2115_v60, 4  ;;  %v2128_v31 = vrot.slane %v2126_v55, 5  ;;  %v8697_v6 = vrot.slane %v2176_v58, 9  ;;  %v2187_v29 = vld [vmem:[#allocation2 + $0x3c] sm:$0x1] }
 0x126   : > { %3136 = vmatprep.mubr.bf16.mxu0 %v8680_v62  ;;  %v1598_v4 = vsel %vm10778_vm11, %v1593_v63, %v1597_v59  ;;  %v2242_v7 = vrot.slane %v2177_v61, 5  ;;  %v8698_v9 = vrot.slane %v2178_v2, 9  ;;  %v2246_v10 = vrot.slane %v2179_v45, 5  ;;  %v2188_v38 = vld [vmem:[#allocation2 + $0x40] sm:$0xe] }
 0x127   : > { %v8656_v12 = vcombine.low %v1584_v52, %v1598_v4  ;;  %v2121_v13 = vsel %vm10778_vm11, %v2116_v3, %v2120_v0  ;;  %v2129_v14 = vor.u32 %v2128_v31, %v2125_v1  ;;  %v2134_v8 = vrot.slane %v2132_v5, 5  ;;  %v2189_v39 = vld [vmem:[#allocation2 + $0x44] sm:$0x1]  ;;  %v2190_v46 = vld [vmem:[#allocation2 + $0x48] sm:$0xe] }
 0x128   : > { %v2243_v48 = vsel %vm10767_vm10, %v8697_v6, %v2242_v7  ;;  %v2247_v17 = vsel %vm10767_vm10, %v8698_v9, %v2246_v10  ;;  %v8699_v19 = vrot.slane %v2180_v11, 9  ;;  %v2250_v20 = vrot.slane %v2181_v15, 5  ;;  %v2191_v47 = vld [vmem:[#allocation2 + $0x4c] sm:$0x1]  ;;  %v2192_v56 = vld [vmem:[#allocation2 + $0x50] sm:$0xe] }
 0x129   : > { %3137 = vmatmul.mubr.bf16.gmra.mrb[60].mxu0 %v8656_v12  ;;  %v2130_v49 = vrot.slane %v2129_v14, 4  ;;  %v8713_v23 = vcombine.low %v2243_v48, %v2247_v17  ;;  %v8700_v24 = vrot.slane %v2182_v16, 9  ;;  %v2254_v25 = vrot.slane %v2183_v18, 5  ;;  %v2193_v59 = vld [vmem:[#allocation2 + $0x54] sm:$0x1]  ;;  %v10277_v11 = vld [vmem:[#allocation7 + $0xc8] sm:$0xff]  }
 0x12a   : > { %v2251_v27 = vsel %vm10767_vm10, %v8699_v19, %v2250_v20  ;;  %v8701_v30 = vrot.slane %v2184_v57, 9  ;;  %v2258_v32 = vrot.slane %v2185_v26, 5  ;;  %v8702_v36 = vrot.slane %v2186_v28, 9  ;;  %v2194_v60 = vld [vmem:[#allocation2 + $0x58] sm:$0xe]  ;;  %v10276_v6 = vld [vmem:[#allocation7 + $0x80] sm:$0xff]  }
 0x12b   : > { %v2135_v35 = vsel %vm10778_vm11, %v2130_v49, %v2134_v8  ;;  %9953 = vmatprep.mubr.bf16.mxu0 %v8713_v23  ;;  %v2255_v33 = vsel %vm10767_vm10, %v8700_v24, %v2254_v25  ;;  %v2262_v37 = vrot.slane %v2187_v29, 5  ;;  %v8703_v50 = vrot.slane %v2188_v38, 9  ;;  %v2195_v58 = vld [vmem:[#allocation2 + $0x5c] sm:$0x1]  ;;  %v2196_v3 = vld [vmem:[#allocation2 + $0x60] sm:$0xe] }
 0x12c   : > { %v8696_v40 = vcombine.low %v2121_v13, %v2135_v35  ;;  %v8714_v43 = vcombine.low %v2251_v27, %v2255_v33  ;;  %v2259_v44 = vsel %vm10767_vm10, %v8701_v30, %v2258_v32  ;;  %v2266_v53 = vrot.slane %v2189_v39, 5  ;;  %v2197_v31 = vld [vmem:[#allocation2 + $0x64] sm:$0x1]  ;;  %v2198_v5 = vld [vmem:[#allocation2 + $0x68] sm:$0xe]  ;;  %v10278_v20 = vld [vmem:[#allocation7 + $0x88] sm:$0xff]  }
 0x12d   : > { %v2263_v51 = vsel %vm10767_vm10, %v8702_v36, %v2262_v37  ;;  %v8704_v54 = vrot.slane %v2190_v46, 9  ;;  %v2270_v55 = vrot.slane %v2191_v47, 5  ;;  %v8705_v61 = vrot.slane %v2192_v56, 9  ;;  %v2199_v45 = vld [vmem:[#allocation2 + $0x6c] sm:$0x1]  ;;  %v10280_v26 = vld [vmem:[#allocation7 + $0x90] sm:$0xff]  }
 0x12e   : > { %3233 = vmatprep.mubr.bf16.mxu1 %v8696_v40  ;;  %v8715_v52 = vcombine.low %v2259_v44, %v2263_v51  ;;  %v2274_v62 = vrot.slane %v2193_v59, 5  ;;  %v8706_v63 = vrot.slane %v2194_v60, 9  ;;  %v2278_v0 = vrot.slane %v2195_v58, 5  ;;  %v2200_v9 = vld [vmem:[#allocation2 + $0x70] sm:$0xe]  ;;  %v10281_v35 = vld [vmem:[#allocation7 + $0xd8] sm:$0xff]  }
 0x12f   : > { %3234 = vmatmul.mubr.bf16.gmra.mrb[60].mxu1 %v10209_v22  ;;  %v2267_v1 = vsel %vm10767_vm10, %v8703_v50, %v2266_v53  ;;  %v2271_v2 = vsel %vm10767_vm10, %v8704_v54, %v2270_v55  ;;  %v2201_v10 = vld [vmem:[#allocation2 + $0x74] sm:$0x1]  ;;  %v2202_v13 = vld [vmem:[#allocation2 + $0x78] sm:$0xe]  ;;  %v2203_v14 = vld [vmem:[#allocation2 + $0x7c] sm:$0x1] }
 0x130   : > { %v2275_v4 = vsel %vm10767_vm10, %v8705_v61, %v2274_v62  ;;  %v2279_v7 = vsel %vm10767_vm10, %v8706_v63, %v2278_v0  ;;  %v8716_v12 = vcombine.low %v2267_v1, %v2271_v2  ;;  %v8707_v8 = vrot.slane %v2196_v3, 9  ;;  %v10279_v22 = vld [vmem:[#allocation7 + $0xd0] sm:$0xff]   ;;  %v2206_v30 = vld [vmem:[#allocation2 + $0x88] sm:$0xe]  ;;  %v2207_v32 = vld [vmem:[#allocation2 + $0x8c] sm:$0x1] }
 0x131   : > { %9954 = vmatmul.mubr.bf16.vlgmr.msra.gmra.mrb[64].mxu0 %v8714_v43  ;;  %v2282_v15 = vrot.slane %v2197_v31, 5  ;;  %v8708_v16 = vrot.slane %v2198_v5, 9  ;;  %v2286_v48 = vrot.slane %v2199_v45, 5  ;;  %v8717_v17 = vcombine.low %v2275_v4, %v2279_v7  ;;  %v2204_v25 = vld [vmem:[#allocation2 + $0x80] sm:$0xe]  ;;  %v10282_v43 = vld [vmem:[#allocation7 + $0x98] sm:$0xff]  }
 0x132   : > { %9957 = vmatprep.mubr.bf16.mxu0 %v8715_v52  ;;  %9458 = vmatpush3.bf16.msra.mxu0 %v10276_v6  ;;  %v8709_v18 = vrot.slane %v2200_v9, 9  ;;  %v2290_v19 = vrot.slane %v2201_v10, 5  ;;  %v8710_v57 = vrot.slane %v2202_v13, 9  ;;  %v2294_v49 = vrot.slane %v2203_v14, 5  ;;  %v2205_v29 = vld [vmem:[#allocation2 + $0x84] sm:$0x1] }
 0x133   : > { %9459 = vmatprep.subr.bf16.mxu0 %v10277_v11  ;;  %v2283_v23 = vsel %vm10767_vm10, %v8707_v8, %v2282_v15  ;;  %v2287_v24 = vsel %vm10767_vm10, %v8708_v16, %v2286_v48  ;;  %v8711_v36 = vrot.slane %v2204_v25, 9  ;;  %v2298_v38 = vrot.slane %v2205_v29, 5  ;;  %v10283_v44 = vld [vmem:[#allocation7 + $0xe0] sm:$0xff]   ;;  %v10285_v53 = vld [vmem:[#allocation7 + $0xe8] sm:$0xff]   ;;  %v10287_v62 = vld [vmem:[#allocation7 + $0xf0] sm:$0xff]  }
 0x134   : > { %v2291_v27 = vsel %vm10767_vm10, %v8709_v18, %v2290_v19  ;;  %v2295_v28 = vsel %vm10767_vm10, %v8710_v57, %v2294_v49  ;;  %v8718_v33 = vcombine.low %v2283_v23, %v2287_v24  ;;  %v8712_v39 = vrot.slane %v2206_v30, 9  ;;  %v10284_v50 = vld [vmem:[#allocation7 + $0xa0] sm:$0xff]   ;;  %v10286_v60 = vld [vmem:[#allocation7 + $0xa8] sm:$0xff]   ;;  %v11091_v63 = vld [vmem:[%s12536_s2] ss:$0 sm:$0xff] }
 0x135   : > { %v8719_v37 = vcombine.low %v2291_v27, %v2295_v28  ;;  %v2302_v40 = vrot.slane %v2207_v32, 5  ;;  %v2299_v46 = vsel %vm10767_vm10, %v8711_v36, %v2298_v38  ;;  %v10288_v31 = vld [vmem:[#allocation7 + $0xb0] sm:$0xff]   ;;  %v10289_v6 = vld [vmem:[#allocation7 + $0xf8] sm:$0xff]   ;;  %v10291_v16 = vld [vmem:[#allocation7 + $0x1c0] sm:$0xff]  }
 0x136   : > { %9460 = vmatpush3.bf16.msra.mxu0 %v10278_v20  ;;  %v10290_v13 = vld [vmem:[#allocation7 + $0xb8] sm:$0xff]  }
 0x137   : > { %9461 = vmatprep.subr.bf16.mxu0 %v10279_v22  ;;  %v2303_v47 = vsel %vm10767_vm10, %v8712_v39, %v2302_v40 }
 0x138   : > { %v8720_v55 = vcombine.low %v2299_v46, %v2303_v47 }
 0x139   : > { %9958 = vmatmul.mubr.bf16.gmra.mrb[68].mxu0 %v8716_v12 }
 0x13a   : > { %9961 = vmatprep.mubr.bf16.mxu0 %v8717_v17  ;;  %9462 = vmatpush3.bf16.msra.mxu0 %v10280_v26 }
 0x13b   : > { %9463 = vmatprep.subr.bf16.mxu0 %v10281_v35 }
 0x13e   : > { %9464 = vmatpush3.bf16.msra.mxu0 %v10282_v43 }
 0x13f   : > { %9465 = vmatprep.subr.bf16.mxu0 %v10283_v44 }
 0x141   : > { %9962 = vmatmul.mubr.bf16.gmra.mrb[72].mxu0 %v8718_v33 }
 0x142   : > { %9965 = vmatprep.mubr.bf16.mxu0 %v8719_v37  ;;  %9466 = vmatpush3.bf16.msra.mxu0 %v10284_v50 }
 0x143   : > { %9467 = vmatprep.subr.bf16.mxu0 %v10285_v53 }
 0x146   : > { %9468 = vmatpush3.bf16.msra.mxu0 %v10286_v60 }
 0x147   : > { %9469 = vmatprep.subr.bf16.mxu0 %v10287_v62 }
 0x149   : > { %9966 = vmatmul.mubr.bf16.gmra.mrb[76].mxu0 %v8720_v55 }
 0x14a   : > { %9470 = vmatpush3.bf16.msra.mxu0 %v10288_v31 }
 0x14b   : > { %9471 = vmatprep.subr.bf16.mxu0 %v10289_v6 }
 0x14e   : > { %9472 = vmatpush3.bf16.msra.mxu0 %v10290_v13 }
 0x14f   : > { %9585 = vmatprep.subr.bf16.mxu0 %v10291_v16 }
 0x156   : > { %v9201_v51 = vpop.f32.mrb[0].mxu1 }
 0x157   : > { %v9202_v54 = vpop.f32.mrb[1].mxu1 }
 0x158   : > { %v9203_v56 = vadd.f32 %v9202_v54, %v9201_v51  ;;  %v9204_v52 = vpop.f32.mrb[2].mxu1 }
 0x159   : > { %v9205_v59 = vpop.f32.mrb[3].mxu1 }
 0x15a   : > { %v9206_v61 = vadd.f32 %v9205_v59, %v9204_v52 }
 0x15b   : > { %v9137_v58 = vpop.f32.mrb[0].mxu0 }
 0x15c   : > { %v9138_v0 = vpop.f32.mrb[1].mxu0 }
 0x15d   : > { %v9139_v1 = vadd.f32 %v9138_v0, %v9137_v58  ;;  %v9140_v2 = vpop.f32.mrb[2].mxu0 }
 0x15e   : > { %v9141_v3 = vpop.f32.mrb[3].mxu0  ;;  %v9207_v4 = vpop.f32.mrb[4].mxu1 }
 0x15f   : > { %v2889_v5 = vadd.f32 %v9139_v1, %v11091_v63  ;;  %v9142_v45 = vadd.f32 %v9141_v3, %v9140_v2  ;;  %v9208_v10 = vpop.f32.mrb[5].mxu1 }
 0x160   : > { %v9209_v11 = vadd.f32 %v9208_v10, %v9207_v4  ;;  %v9210_v12 = vpop.f32.mrb[6].mxu1 }
 0x161   : > { %v2892_v7 = vadd.f32 %v9142_v45, %v11091_v63  ;;  %v11095_v9 = vadd.f32 %v9203_v56, %v2889_v5  ;;  %v9211_v15 = vpop.f32.mrb[7].mxu1 }
 0x162   : > { %v9212_v17 = vadd.f32 %v9211_v15, %v9210_v12 }
 0x163   : > { %v11097_v14 = vadd.f32 %v9206_v61, %v2892_v7  ;;  %v9143_v8 = vpop.f32.mrb[4].mxu0 }
 0x164   : > { %v9144_v48 = vpop.f32.mrb[5].mxu0 }
 0x165   : > { %v9145_v18 = vadd.f32 %v9144_v48, %v9143_v8  ;;  %v9146_v19 = vpop.f32.mrb[6].mxu0 }
 0x166   : > { %v9147_v20 = vpop.f32.mrb[7].mxu0 }
 0x167   : > { %v2897_v57 = vadd.f32 %v9145_v18, %v11091_v63  ;;  %v9148_v49 = vadd.f32 %v9147_v20, %v9146_v19 }
 0x169   : > { %v2900_v22 = vadd.f32 %v9148_v49, %v11091_v63  ;;  %v11101_v23 = vadd.f32 %v9209_v11, %v2897_v57 }
 0x16b   : > { %v11103_v24 = vadd.f32 %v9212_v17, %v2900_v22 }
 0x16d   : > { %v9149_v25 = vpop.f32.mrb[8].mxu0 }
 0x16e   : > { %v9213_v26 = vpop.f32.mrb[8].mxu1  ;;  %v9150_v27 = vpop.f32.mrb[9].mxu0 }
 0x16f   : > { %v9214_v28 = vpop.f32.mrb[9].mxu1  ;;  %v9151_v29 = vadd.f32 %v9150_v27, %v9149_v25  ;;  %v9152_v30 = vpop.f32.mrb[10].mxu0 }
 0x170   : > { %v9215_v32 = vadd.f32 %v9214_v28, %v9213_v26  ;;  %v9216_v35 = vpop.f32.mrb[10].mxu1  ;;  %v9153_v33 = vpop.f32.mrb[11].mxu0 }
 0x171   : > { %v9217_v36 = vpop.f32.mrb[11].mxu1  ;;  %v2905_v37 = vadd.f32 %v9151_v29, %v11091_v63  ;;  %v9154_v38 = vadd.f32 %v9153_v33, %v9152_v30 }
 0x172   : > { %v9218_v39 = vadd.f32 %v9217_v36, %v9216_v35 }
 0x173   : > { %v2908_v40 = vadd.f32 %v9154_v38, %v11091_v63  ;;  %v11107_v43 = vadd.f32 %v9215_v32, %v2905_v37 }
 0x175   : > { %v11109_v44 = vadd.f32 %v9218_v39, %v2908_v40 }
 0x178   : > { %v9219_v46 = vpop.f32.mrb[12].mxu1 }
 0x179   : > { %v9220_v47 = vpop.f32.mrb[13].mxu1 }
 0x17a   : > { %v9221_v50 = vadd.f32 %v9220_v47, %v9219_v46  ;;  %v9222_v51 = vpop.f32.mrb[14].mxu1 }
 0x17b   : > { %v9223_v54 = vpop.f32.mrb[15].mxu1 }
 0x17c   : > { %v9155_v53 = vpop.f32.mrb[12].mxu0  ;;  %v9224_v56 = vadd.f32 %v9223_v54, %v9222_v51 }
 0x17d   : > { %v9156_v55 = vpop.f32.mrb[13].mxu0 }
 0x17e   : > { %v9157_v52 = vadd.f32 %v9156_v55, %v9155_v53  ;;  %v9158_v59 = vpop.f32.mrb[14].mxu0 }
 0x17f   : > { %v9159_v60 = vpop.f32.mrb[15].mxu0 }
 0x180   : > { %v2913_v58 = vadd.f32 %v9157_v52, %v11091_v63  ;;  %v9160_v61 = vadd.f32 %v9159_v60, %v9158_v59  ;;  %v9225_v62 = vpop.f32.mrb[16].mxu1 }
 0x181   : > { %v9226_v2 = vpop.f32.mrb[17].mxu1 }
 0x182   : > { %v2916_v0 = vadd.f32 %v9160_v61, %v11091_v63  ;;  %v11113_v1 = vadd.f32 %v9221_v50, %v2913_v58  ;;  %v9227_v3 = vadd.f32 %v9226_v2, %v9225_v62  ;;  %v9228_v31 = vpop.f32.mrb[18].mxu1 }
 0x183   : > { %v9229_v6 = vpop.f32.mrb[19].mxu1 }
 0x184   : > { %v11115_v5 = vadd.f32 %v9224_v56, %v2916_v0  ;;  %v9161_v45 = vpop.f32.mrb[16].mxu0  ;;  %v9230_v7 = vadd.f32 %v9229_v6, %v9228_v31 }
 0x185   : > { %v9162_v4 = vpop.f32.mrb[17].mxu0 }
 0x186   : > { %v9163_v10 = vadd.f32 %v9162_v4, %v9161_v45  ;;  %v9164_v11 = vpop.f32.mrb[18].mxu0 }
 0x187   : > { %v9165_v12 = vpop.f32.mrb[19].mxu0 }
 0x188   : > { %v2921_v13 = vadd.f32 %v9163_v10, %v11091_v63  ;;  %v9166_v8 = vadd.f32 %v9165_v12, %v9164_v11 }
 0x18a   : > { %v2924_v15 = vadd.f32 %v9166_v8, %v11091_v63  ;;  %v11119_v16 = vadd.f32 %v9227_v3, %v2921_v13 }
 0x18c   : > { %v11121_v48 = vadd.f32 %v9230_v7, %v2924_v15 }
 0x18e   : > { %v9231_v17 = vpop.f32.mrb[20].mxu1 }
 0x18f   : > { %v9232_v18 = vpop.f32.mrb[21].mxu1 }
 0x190   : > { %v9233_v19 = vadd.f32 %v9232_v18, %v9231_v17  ;;  %v9234_v20 = vpop.f32.mrb[22].mxu1 }
 0x191   : > { %v9235_v49 = vpop.f32.mrb[23].mxu1 }
 0x192   : > { %v9236_v25 = vadd.f32 %v9235_v49, %v9234_v20 }
 0x194   : > { %v9167_v57 = vpop.f32.mrb[20].mxu0 }
 0x195   : > { %v9168_v22 = vpop.f32.mrb[21].mxu0 }
 0x196   : > { %v9169_v26 = vadd.f32 %v9168_v22, %v9167_v57  ;;  %v9170_v27 = vpop.f32.mrb[22].mxu0 }
 0x197   : > { %v9171_v28 = vpop.f32.mrb[23].mxu0  ;;  %v9237_v40 = vpop.f32.mrb[24].mxu1 }
 0x198   : > { %v2929_v29 = vadd.f32 %v9169_v26, %v11091_v63  ;;  %v9172_v30 = vadd.f32 %v9171_v28, %v9170_v27  ;;  %v9238_v47 = vpop.f32.mrb[25].mxu1 }
 0x199   : > { %v9239_v53 = vadd.f32 %v9238_v47, %v9237_v40  ;;  %v9240_v54 = vpop.f32.mrb[26].mxu1 }
 0x19a   : > { %v2932_v32 = vadd.f32 %v9172_v30, %v11091_v63  ;;  %v11125_v35 = vadd.f32 %v9233_v19, %v2929_v29  ;;  %v9241_v55 = vpop.f32.mrb[27].mxu1 }
 0x19b   : > { %v9242_v59 = vadd.f32 %v9241_v55, %v9240_v54 }
 0x19c   : > { %v11127_v33 = vadd.f32 %v9236_v25, %v2932_v32  ;;  %v9173_v36 = vpop.f32.mrb[24].mxu0 }
 0x19d   : > { %v9174_v37 = vpop.f32.mrb[25].mxu0 }
 0x19e   : > { %v9175_v38 = vadd.f32 %v9174_v37, %v9173_v36  ;;  %v9176_v39 = vpop.f32.mrb[26].mxu0 }
 0x19f   : > { %v9177_v46 = vpop.f32.mrb[27].mxu0 }
 0x1a0   : > { %v2937_v50 = vadd.f32 %v9175_v38, %v11091_v63  ;;  %v9178_v51 = vadd.f32 %v9177_v46, %v9176_v39 }
 0x1a2   : > { %v2940_v56 = vadd.f32 %v9178_v51, %v11091_v63  ;;  %v11131_v52 = vadd.f32 %v9239_v53, %v2937_v50 }
 0x1a4   : > { %v11133_v60 = vadd.f32 %v9242_v59, %v2940_v56 }
 0x1a7   : > { %v9243_v58 = vpop.f32.mrb[28].mxu1 }
 0x1a8   : > { %v9244_v61 = vpop.f32.mrb[29].mxu1 }
 0x1a9   : > { %v9245_v62 = vadd.f32 %v9244_v61, %v9243_v58  ;;  %v9246_v0 = vpop.f32.mrb[30].mxu1 }
 0x1aa   : > { %v9247_v2 = vpop.f32.mrb[31].mxu1 }
 0x1ab   : > { %v9248_v31 = vadd.f32 %v9247_v2, %v9246_v0 }
 0x1ac   : > { %v9179_v3 = vpop.f32.mrb[28].mxu0 }
 0x1ad   : > { %v9180_v45 = vpop.f32.mrb[29].mxu0 }
 0x1ae   : > { %v9181_v6 = vadd.f32 %v9180_v45, %v9179_v3  ;;  %v9182_v4 = vpop.f32.mrb[30].mxu0 }
 0x1af   : > { %v9183_v7 = vpop.f32.mrb[31].mxu0 }
 0x1b0   : > { %v2945_v10 = vadd.f32 %v9181_v6, %v11091_v63  ;;  %v9184_v11 = vadd.f32 %v9183_v7, %v9182_v4 }
 0x1b2   : > { %v2948_v12 = vadd.f32 %v9184_v11, %v11091_v63  ;;  %v11137_v13 = vadd.f32 %v9245_v62, %v2945_v10  ;;  %v9329_v20 = vpop.f32.mrb[32].mxu1 }
 0x1b3   : > { %v9330_v25 = vpop.f32.mrb[33].mxu1 }
 0x1b4   : > { %v11139_v8 = vadd.f32 %v9248_v31, %v2948_v12  ;;  %v9265_v15 = vpop.f32.mrb[32].mxu0  ;;  %v9331_v26 = vadd.f32 %v9330_v25, %v9329_v20  ;;  %v9332_v27 = vpop.f32.mrb[34].mxu1 }
 0x1b5   : > { %v9266_v17 = vpop.f32.mrb[33].mxu0  ;;  %v9333_v29 = vpop.f32.mrb[35].mxu1 }
 0x1b6   : > { %v9267_v18 = vadd.f32 %v9266_v17, %v9265_v15  ;;  %v9268_v19 = vpop.f32.mrb[34].mxu0  ;;  %v9334_v63 = vadd.f32 %v9333_v29, %v9332_v27 }
 0x1b7   : > { %v9269_v57 = vpop.f32.mrb[35].mxu0 }
 0x1b8   : > { %v3083_v49 = vadd.f32 %v9267_v18, %v11095_v9  ;;  %v9270_v22 = vadd.f32 %v9269_v57, %v9268_v19 }
 0x1ba   : > { %v3086_v28 = vadd.f32 %v9270_v22, %v11097_v14  ;;  %v11143_v30 = vadd.f32 %v9331_v26, %v3083_v49 }
 0x1bc   : > { %v11145_v32 = vadd.f32 %v9334_v63, %v3086_v28  ;;  %v9271_v36 = vpop.f32.mrb[36].mxu0 }
 0x1bd   : > { %v9272_v37 = vpop.f32.mrb[37].mxu0 }
 0x1be   : > { %v9273_v38 = vadd.f32 %v9272_v37, %v9271_v36  ;;  %v9274_v39 = vpop.f32.mrb[38].mxu0 }
 0x1bf   : > { %v9275_v40 = vpop.f32.mrb[39].mxu0  ;;  %v9335_v9 = vpop.f32.mrb[36].mxu1 }
 0x1c0   : > { %v3091_v46 = vadd.f32 %v9273_v38, %v11101_v23  ;;  %v9276_v47 = vadd.f32 %v9275_v40, %v9274_v39  ;;  %v9336_v50 = vpop.f32.mrb[37].mxu1 }
 0x1c1   : > { %v9337_v53 = vadd.f32 %v9336_v50, %v9335_v9  ;;  %v9338_v14 = vpop.f32.mrb[38].mxu1 }
 0x1c2   : > { %v3094_v51 = vadd.f32 %v9276_v47, %v11103_v24  ;;  %v9339_v54 = vpop.f32.mrb[39].mxu1 }
 0x1c3   : > { %v9340_v55 = vadd.f32 %v9339_v54, %v9338_v14  ;;  %v11149_v56 = vadd.f32 %v9337_v53, %v3091_v46 }
 0x1c4   : > { %v9277_v58 = vpop.f32.mrb[40].mxu0 }
 0x1c5   : > { %v11151_v59 = vadd.f32 %v9340_v55, %v3094_v51  ;;  %v9278_v61 = vpop.f32.mrb[41].mxu0 }
 0x1c6   : > { %v9279_v62 = vadd.f32 %v9278_v61, %v9277_v58  ;;  %v9280_v0 = vpop.f32.mrb[42].mxu0 }
 0x1c7   : > { %v9281_v2 = vpop.f32.mrb[43].mxu0 }
 0x1c8   : > { %v3099_v23 = vadd.f32 %v9279_v62, %v11107_v43  ;;  %v9282_v31 = vadd.f32 %v9281_v2, %v9280_v0 }
 0x1c9   : > { %v9341_v3 = vpop.f32.mrb[40].mxu1 }
 0x1ca   : > { %v9342_v45 = vpop.f32.mrb[41].mxu1  ;;  %v3102_v24 = vadd.f32 %v9282_v31, %v11109_v44 }
 0x1cb   : > { %v9343_v6 = vadd.f32 %v9342_v45, %v9341_v3  ;;  %v9344_v4 = vpop.f32.mrb[42].mxu1 }
 0x1cc   : > { %v9345_v7 = vpop.f32.mrb[43].mxu1 }
 0x1cd   : > { %v9346_v10 = vadd.f32 %v9345_v7, %v9344_v4  ;;  %v11155_v11 = vadd.f32 %v9343_v6, %v3099_v23 }
 0x1cf   : > { %v11157_v12 = vadd.f32 %v9346_v10, %v3102_v24 }
 0x1d0   : > { %v9283_v15 = vpop.f32.mrb[44].mxu0 }
 0x1d1   : > { %v9284_v17 = vpop.f32.mrb[45].mxu0 }
 0x1d2   : > { %v9285_v18 = vadd.f32 %v9284_v17, %v9283_v15  ;;  %v9286_v19 = vpop.f32.mrb[46].mxu0 }
 0x1d3   : > { %v9287_v20 = vpop.f32.mrb[47].mxu0  ;;  %v9347_v49 = vpop.f32.mrb[44].mxu1 }
 0x1d4   : > { %v3107_v43 = vadd.f32 %v9285_v18, %v11113_v1  ;;  %v9288_v57 = vadd.f32 %v9287_v20, %v9286_v19  ;;  %v9348_v44 = vpop.f32.mrb[45].mxu1 }
 0x1d5   : > { %v9349_v25 = vadd.f32 %v9348_v44, %v9347_v49  ;;  %v9350_v26 = vpop.f32.mrb[46].mxu1 }
 0x1d6   : > { %v3110_v22 = vadd.f32 %v9288_v57, %v11115_v5  ;;  %v9351_v27 = vpop.f32.mrb[47].mxu1 }
 0x1d7   : > { %v9352_v28 = vadd.f32 %v9351_v27, %v9350_v26  ;;  %v11161_v29 = vadd.f32 %v9349_v25, %v3107_v43 }
 0x1d9   : > { %v11163_v63 = vadd.f32 %v9352_v28, %v3110_v22 }
 0x1dc   : > { %v9289_v36 = vpop.f32.mrb[48].mxu0 }
 0x1dd   : > { %v9290_v37 = vpop.f32.mrb[49].mxu0 }
 0x1de   : > { %v9291_v38 = vadd.f32 %v9290_v37, %v9289_v36  ;;  %v9292_v39 = vpop.f32.mrb[50].mxu0  ;;  %v3731_v36 = vld [vmem:[#allocation2] sm:$0xf] }
 0x1df   : > { %v9353_v40 = vpop.f32.mrb[48].mxu1  ;;  %v9293_v46 = vpop.f32.mrb[51].mxu0 }
 0x1e0   : > { %v9354_v1 = vpop.f32.mrb[49].mxu1  ;;  %v3115_v9 = vadd.f32 %v9291_v38, %v11119_v16  ;;  %v9294_v47 = vadd.f32 %v9293_v46, %v9292_v39  ;;  %v3764_v46 = vshrl.u32 %v3731_v36, 16 }
 0x1e1   : > { %v9355_v5 = vadd.f32 %v9354_v1, %v9353_v40  ;;  %v9356_v50 = vpop.f32.mrb[50].mxu1 }
 0x1e2   : > { %v9357_v51 = vpop.f32.mrb[51].mxu1  ;;  %v3118_v53 = vadd.f32 %v9294_v47, %v11121_v48 }
 0x1e3   : > { %v9358_v14 = vadd.f32 %v9357_v51, %v9356_v50  ;;  %v11167_v54 = vadd.f32 %v9355_v5, %v3115_v9  ;;  %v3732_v50 = vld [vmem:[#allocation2 + $0x4] sm:$0x1]  ;;  %v3766_v51 = vrot.slane %v3764_v46, 4 }
 0x1e5   : > { %v11169_v55 = vadd.f32 %v9358_v14, %v3118_v53 }
 0x1e7   : > { %v9295_v58 = vpop.f32.mrb[52].mxu0 }
 0x1e8   : > { %v9296_v61 = vpop.f32.mrb[53].mxu0 }
 0x1e9   : > { %v9297_v62 = vadd.f32 %v9296_v61, %v9295_v58  ;;  %v9298_v0 = vpop.f32.mrb[54].mxu0 }
 0x1ea   : > { %v9299_v2 = vpop.f32.mrb[55].mxu0 }
 0x1eb   : > { %v3123_v23 = vadd.f32 %v9297_v62, %v11125_v35  ;;  %v9359_v3 = vpop.f32.mrb[52].mxu1  ;;  %v9300_v16 = vadd.f32 %v9299_v2, %v9298_v0 }
 0x1ec   : > { %v9360_v31 = vpop.f32.mrb[53].mxu1 }
 0x1ed   : > { %v3126_v45 = vadd.f32 %v9300_v16, %v11127_v33  ;;  %v9361_v24 = vadd.f32 %v9360_v31, %v9359_v3  ;;  %v9362_v6 = vpop.f32.mrb[54].mxu1  ;;  %v3773_v3 = vshll.u32 %v3732_v50, 16 }
 0x1ee   : > { %v9363_v48 = vpop.f32.mrb[55].mxu1 }
 0x1ef   : > { %v9364_v4 = vadd.f32 %v9363_v48, %v9362_v6  ;;  %v11173_v7 = vadd.f32 %v9361_v24, %v3123_v23  ;;  %v11195_v24 = vld [vmem:[#allocation2 + $0x4] sm:$0x1] }
 0x1f1   : > { %v11175_v10 = vadd.f32 %v9364_v4, %v3126_v45 }
 0x1f2   : > { %v9301_v15 = vpop.f32.mrb[56].mxu0 }
 0x1f3   : > { %v9302_v17 = vpop.f32.mrb[57].mxu0 }
 0x1f4   : > { %v9303_v18 = vadd.f32 %v9302_v17, %v9301_v15  ;;  %v9304_v19 = vpop.f32.mrb[58].mxu0 }
 0x1f5   : > { %v9305_v20 = vpop.f32.mrb[59].mxu0 }
 0x1f6   : > { %v3131_v35 = vadd.f32 %v9303_v18, %v11131_v52  ;;  %v9365_v43 = vpop.f32.mrb[56].mxu1  ;;  %v9306_v57 = vadd.f32 %v9305_v20, %v9304_v19  ;;  %v3767_v52 = vshll.u32 %v3731_v36, 16  ;;  %v3566_v36 = vld [vmem:[#allocation2 + $0xc] sm:$0x1] }
 0x1f7   : > { %v9366_v49 = vpop.f32.mrb[57].mxu1 }
 0x1f8   : > { %v3134_v33 = vadd.f32 %v9306_v57, %v11133_v60  ;;  %v9367_v22 = vadd.f32 %v9366_v49, %v9365_v43  ;;  %v9368_v44 = vpop.f32.mrb[58].mxu1  ;;  %v3769_v53 = vrot.slane %v3767_v52, 5  ;;  %v3575_v43 = vld [vmem:[#allocation2 + $0x18] sm:$0xf] }
 0x1f9   : > { %v9369_v25 = vpop.f32.mrb[59].mxu1 }
 0x1fa   : > { %v9370_v26 = vadd.f32 %v9369_v25, %v9368_v44  ;;  %v11179_v27 = vadd.f32 %v9367_v22, %v3131_v35  ;;  %v3770_v6 = vor.u32 %v3769_v53, %v3766_v51  ;;  %v4093_v35 = vrot.slane %v11195_v24, 5 }
 0x1fc   : > { %v11181_v28 = vadd.f32 %v9370_v26, %v3134_v33  ;;  %v9307_v37 = vpop.f32.mrb[60].mxu0  ;;  %v11215_v33 = vrot.slane %v3770_v6, 4  ;;  %v3563_v26 = vld [vmem:[#allocation2 + $0x8] sm:$0xf] }
 0x1fd   : > { %v9308_v38 = vpop.f32.mrb[61].mxu0 }
 0x1fe   : > { %v9309_v39 = vadd.f32 %v9308_v38, %v9307_v37  ;;  %v9310_v40 = vpop.f32.mrb[62].mxu0 }
 0x1ff   : > { %v9311_v1 = vpop.f32.mrb[63].mxu0 }
 0x200   : > { %v3139_v9 = vadd.f32 %v9309_v39, %v11137_v13  ;;  %v9312_v47 = vadd.f32 %v9311_v1, %v9310_v40 }
 0x202   : > { %v9371_v60 = vpop.f32.mrb[60].mxu1  ;;  %v3142_v5 = vadd.f32 %v9312_v47, %v11139_v8  ;;  %v11193_v8 = vld [vmem:[#allocation2] sm:$0xe] }
 0x203   : > { %v9372_v14 = vpop.f32.mrb[61].mxu1  ;;  %v8826_v20 = vrot.slane %v11193_v8, 9 }
 0x204   : > { %v9373_v58 = vadd.f32 %v9372_v14, %v9371_v60  ;;  %v9374_v61 = vpop.f32.mrb[62].mxu1  ;;  %v9955_v62 = vpop.f32.mrb[64].mxu0  ;;  %v3581_v60 = vld [vmem:[#allocation2 + $0x20] sm:$0xf]  ;;  %v3584_v14 = vld [vmem:[#allocation2 + $0x24] sm:$0x1] }
 0x205   : > { %v9375_v0 = vpop.f32.mrb[63].mxu1  ;;  %v11186_v2 = vadd.f32 %v9955_v62, %v11149_v56  ;;  %v3276_v23 = vpop.f32.mrb[65].mxu0 }
 0x206   : > { %v9376_v16 = vadd.f32 %v9375_v0, %v9374_v61  ;;  %v11189_v13 = vadd.f32 %v3276_v23, %v11143_v30  ;;  %v9956_v31 = vpop.f32.mrb[66].mxu0  ;;  %v11191_v45 = vadd.f32 %v9373_v58, %v3139_v9 }
 0x207   : > { %v9090_v48 = vpack.c.bf16 %v11186_v2, %v11186_v2  ;;  %v11200_v56 = vadd.f32 %v9956_v31, %v11151_v59  ;;  %v3279_v4 = vpop.f32.mrb[67].mxu0  ;;  %v3578_v59 = vld [vmem:[#allocation2 + $0x1c] sm:$0x1]  ;;  %v3569_v31 = vld [vmem:[#allocation2 + $0x10] sm:$0xf] }
 0x208   : > { %v9088_v15 = vpack.c.bf16 %v11189_v13, %v11189_v13  ;;  %v11205_v30 = vadd.f32 %v3279_v4, %v11145_v32  ;;  %v11207_v17 = vadd.f32 %v9376_v16, %v3142_v5  ;;  %v11217_v32 = vrot.slane %v3773_v3, 5 }
 0x209   : > { %v3420_v18 = vshrl.u32 %v9090_v48, 16  ;;  %v9091_v19 = vpack.c.bf16 %v11200_v56, %v11200_v56  ;;  %v3423_v44 = vshll.u32 %v9090_v48, 16 }
 0x20a   : > { %v3404_v57 = vshrl.u32 %v9088_v15, 16  ;;  %v9089_v49 = vpack.c.bf16 %v11205_v30, %v11205_v30  ;;  %v3407_v25 = vshll.u32 %v9088_v15, 16 }
 0x20b   : > { %v3422_v22 = vrot.slane %v3420_v18, 7  ;;  %v3428_v37 = vshrl.u32 %v9091_v19, 16  ;;  %v3431_v39 = vshll.u32 %v9091_v19, 16 }
 0x20c   : > { %v3406_v38 = vrot.slane %v3404_v57, 7  ;;  %v3412_v40 = vshrl.u32 %v9089_v49, 16  ;;  %v3415_v46 = vshll.u32 %v9089_v49, 16  ;;  %v9959_v52 = vpop.f32.mrb[68].mxu0 }
 0x20d   : > { %v3425_v1 = vor.u32 %v3423_v44, %v3422_v22  ;;  %v3426_v9 = vrot.slane %v3422_v22, 4  ;;  %v3430_v47 = vrot.slane %v3428_v37, 7  ;;  %v11220_v5 = vadd.f32 %v9959_v52, %v11161_v29  ;;  %v3292_v50 = vpop.f32.mrb[69].mxu0  ;;  %v3572_v29 = vld [vmem:[#allocation2 + $0x14] sm:$0x1] }
 0x20e   : > { %v3409_v51 = vor.u32 %v3407_v25, %v3406_v38  ;;  %v3410_v53 = vrot.slane %v3406_v38, 4  ;;  %v3414_v58 = vrot.slane %v3412_v40, 7  ;;  %v11223_v61 = vadd.f32 %v3292_v50, %v11155_v11  ;;  %v9960_v62 = vpop.f32.mrb[70].mxu0  ;;  %v3602_v37 = vld [vmem:[#allocation2 + $0x3c] sm:$0x1] }
 0x20f   : > { %v3576_v0 = vsel %vm10738_vm4, %v3425_v1, %v3575_v43  ;;  %v3579_v23 = vsel %vm10742_vm5, %v3426_v9, %v3578_v59  ;;  %v3433_v3 = vor.u32 %v3431_v39, %v3430_v47  ;;  %v3434_v16 = vrot.slane %v3430_v47, 4  ;;  %v3295_v8 = vpop.f32.mrb[71].mxu0  ;;  %v3587_v38 = vld [vmem:[#allocation2 + $0x28] sm:$0xf] }
 0x210   : > { %3580 = vst [vmem:[#allocation2 + $0x1c] sm:$0x1] %v3579_v23  ;;  %3577 = vst [vmem:[#allocation2 + $0x18] sm:$0xf] %v3576_v0  ;;  %v3564_v24 = vsel %vm10738_vm4, %v3409_v51, %v3563_v26  ;;  %v3567_v11 = vsel %vm10742_vm5, %v3410_v53, %v3566_v36  ;;  %v3417_v6 = vor.u32 %v3415_v46, %v3414_v58  ;;  %v3418_v48 = vrot.slane %v3414_v58, 4 }
 0x211   : > { %3568 = vst [vmem:[#allocation2 + $0xc] sm:$0x1] %v3567_v11  ;;  %3565 = vst [vmem:[#allocation2 + $0x8] sm:$0xf] %v3564_v24  ;;  %v3582_v4 = vsel %vm10738_vm4, %v3433_v3, %v3581_v60  ;;  %v3585_v15 = vsel %vm10742_vm5, %v3434_v16, %v3584_v14  ;;  %v9094_v18 = vpack.c.bf16 %v11220_v5, %v11220_v5  ;;  %v3599_v36 = vld [vmem:[#allocation2 + $0x38] sm:$0xf] }
 0x212   : > { %v9092_v19 = vpack.c.bf16 %v11223_v61, %v11223_v61  ;;  %3586 = vst [vmem:[#allocation2 + $0x24] sm:$0x1] %v3585_v15  ;;  %3583 = vst [vmem:[#allocation2 + $0x20] sm:$0xf] %v3582_v4  ;;  %v3570_v43 = vsel %vm10738_vm4, %v3417_v6, %v3569_v31  ;;  %v3573_v59 = vsel %vm10742_vm5, %v3418_v48, %v3572_v29  ;;  %v3605_v23 = vld [vmem:[#allocation2 + $0x40] sm:$0xf] }
 0x213   : > { %v11246_v57 = vadd.f32 %v9960_v62, %v11163_v63  ;;  %v11249_v49 = vadd.f32 %v3295_v8, %v11157_v12  ;;  %3574 = vst [vmem:[#allocation2 + $0x14] sm:$0x1] %v3573_v59  ;;  %3571 = vst [vmem:[#allocation2 + $0x10] sm:$0xf] %v3570_v43  ;;  %v3452_v22 = vshrl.u32 %v9094_v18, 16  ;;  %v11253_v25 = vsel %vm10767_vm10, %v8826_v20, %v4093_v35 }
 0x214   : > { %v3436_v44 = vshrl.u32 %v9092_v19, 16  ;;  %v3455_v26 = vshll.u32 %v9094_v18, 16  ;;  %v9963_v12 = vpop.f32.mrb[72].mxu0  ;;  %v3776_v40 = vsel %vm10778_vm11, %v11215_v33, %v11217_v32  ;;  %v3439_v20 = vshll.u32 %v9092_v19, 16  ;;  %v3590_v35 = vld [vmem:[#allocation2 + $0x2c] sm:$0x1] }
 0x215   : > { %12570 = vst [vmem:[#allocation13_spill] sm:$0xff] %v11246_v57  ;;  %12571 = vst [vmem:[#allocation14_spill] sm:$0xff] %v11249_v49  ;;  %v9095_v39 = vpack.c.bf16 %v11246_v57, %v11246_v57  ;;  %v9093_v63 = vpack.c.bf16 %v11249_v49, %v11249_v49  ;;  %v3454_v46 = vrot.slane %v3452_v22, 7  ;;  %v11264_v1 = vadd.f32 %v9963_v12, %v11173_v7  ;;  %v3308_v9 = vpop.f32.mrb[73].mxu0  ;;  %v3608_v31 = vld [vmem:[#allocation2 + $0x44] sm:$0x1] }
 0x216   : > { %v3438_v52 = vrot.slane %v3436_v44, 7  ;;  %v9964_v53 = vpop.f32.mrb[74].mxu0  ;;  %v11269_v7 = vadd.f32 %v3308_v9, %v11167_v54  ;;  %v3593_v4 = vld [vmem:[#allocation2 + $0x30] sm:$0xf]  ;;  %v3596_v15 = vld [vmem:[#allocation2 + $0x34] sm:$0x1] }
 0x217   : > { %v3460_v47 = vshrl.u32 %v9095_v39, 16  ;;  %v3463_v60 = vshll.u32 %v9095_v39, 16  ;;  %v3444_v50 = vshrl.u32 %v9093_v63, 16  ;;  %v3447_v51 = vshll.u32 %v9093_v63, 16  ;;  %v3311_v3 = vpop.f32.mrb[75].mxu0 }
 0x218   : > { %v3457_v14 = vor.u32 %v3455_v26, %v3454_v46  ;;  %v3458_v58 = vrot.slane %v3454_v46, 4  ;;  %v3441_v62 = vor.u32 %v3439_v20, %v3438_v52  ;;  %v3442_v0 = vrot.slane %v3438_v52, 4 }
 0x219   : > { %v3462_v16 = vrot.slane %v3460_v47, 7  ;;  %v3446_v29 = vrot.slane %v3444_v50, 7  ;;  %v9098_v8 = vpack.c.bf16 %v11264_v1, %v11264_v1  ;;  %v9096_v26 = vpack.c.bf16 %v11269_v7, %v11269_v7  ;;  %v3623_v47 = vld [vmem:[#allocation2 + $0x58] sm:$0xf] }
 0x21a   : > { %v3600_v24 = vsel %vm10738_vm4, %v3457_v14, %v3599_v36  ;;  %v3603_v11 = vsel %vm10742_vm5, %v3458_v58, %v3602_v37  ;;  %v3588_v6 = vsel %vm10738_vm4, %v3441_v62, %v3587_v38  ;;  %v3591_v48 = vsel %vm10742_vm5, %v3442_v0, %v3590_v35  ;;  %v10210_v59 = vld [vmem:[#allocation2 + $0x8] ss:$8 sps:$4 sm:$0xff]  }
 0x21b   : > { %3604 = vst [vmem:[#allocation2 + $0x3c] sm:$0x1] %v3603_v11  ;;  %3601 = vst [vmem:[#allocation2 + $0x38] sm:$0xf] %v3600_v24  ;;  %v3465_v54 = vor.u32 %v3463_v60, %v3462_v16  ;;  %v3466_v18 = vrot.slane %v3462_v16, 4  ;;  %v3449_v19 = vor.u32 %v3447_v51, %v3446_v29  ;;  %v3450_v43 = vrot.slane %v3446_v29, 4  ;;  %5468 = vmatprep.mubr.bf16.mxu0 %v10210_v59 }
 0x21c   : > { %3592 = vst [vmem:[#allocation2 + $0x2c] sm:$0x1] %v3591_v48  ;;  %3589 = vst [vmem:[#allocation2 + $0x28] sm:$0xf] %v3588_v6  ;;  %v3484_v22 = vshrl.u32 %v9098_v8, 16  ;;  %v3487_v44 = vshll.u32 %v9098_v8, 16  ;;  %v11282_v36 = vadd.f32 %v9964_v53, %v11175_v10  ;;  %v11297_v50 = vadd.f32 %v3311_v3, %v11169_v55 }
 0x21d   : > { %v11284_v37 = vld [vmem:[#allocation2 + $0x8] sm:$0xe]  ;;  %v3606_v38 = vsel %vm10738_vm4, %v3465_v54, %v3605_v23  ;;  %v3609_v39 = vsel %vm10742_vm5, %v3466_v18, %v3608_v31  ;;  %v3594_v63 = vsel %vm10738_vm4, %v3449_v19, %v3593_v4  ;;  %v3597_v12 = vsel %vm10742_vm5, %v3450_v43, %v3596_v15  ;;  %v9967_v46 = vpop.f32.mrb[76].mxu0  ;;  %v3626_v60 = vld [vmem:[#allocation2 + $0x5c] sm:$0x1] }
 0x21e   : > { %3610 = vst [vmem:[#allocation2 + $0x44] sm:$0x1] %v3609_v39  ;;  %3607 = vst [vmem:[#allocation2 + $0x40] sm:$0xf] %v3606_v38  ;;  %v3486_v10 = vrot.slane %v3484_v22, 7  ;;  %v3468_v52 = vshrl.u32 %v9096_v26, 16  ;;  %v9099_v35 = vpack.c.bf16 %v11282_v36, %v11282_v36  ;;  %v11300_v51 = vadd.f32 %v9967_v46, %v11191_v45 }
 0x21f   : > { %3598 = vst [vmem:[#allocation2 + $0x34] sm:$0x1] %v3597_v12  ;;  %3595 = vst [vmem:[#allocation2 + $0x30] sm:$0xf] %v3594_v63  ;;  %v3471_v20 = vshll.u32 %v9096_v26, 16  ;;  %v3324_v9 = vpop.f32.mrb[77].mxu0  ;;  %v9097_v55 = vpack.c.bf16 %v11297_v50, %v11297_v50 }
 0x220   : > { %v11303_v53 = vadd.f32 %v3324_v9, %v11179_v27  ;;  %v9968_v14 = vpop.f32.mrb[78].mxu0  ;;  %v8827_v58 = vrot.slane %v11284_v37, 9  ;;  %v3489_v62 = vor.u32 %v3487_v44, %v3486_v10  ;;  %v3490_v0 = vrot.slane %v3486_v10, 4  ;;  %v3611_v29 = vld [vmem:[#allocation2 + $0x48] sm:$0xf] }
 0x221   : > { %v3470_v23 = vrot.slane %v3468_v52, 7  ;;  %v3492_v16 = vshrl.u32 %v9099_v35, 16  ;;  %v11306_v31 = vpop.f32.mrb[79].mxu0  ;;  %v3614_v8 = vld [vmem:[#allocation2 + $0x4c] sm:$0x1]  ;;  %v3495_v24 = vshll.u32 %v9099_v35, 16  ;;  %v9102_v45 = vpack.c.bf16 %v11300_v51, %v11300_v51 }
 0x222   : > { %v9100_v27 = vpack.c.bf16 %v11303_v53, %v11303_v53  ;;  %v3624_v3 = vsel %vm10738_vm4, %v3489_v62, %v3623_v47  ;;  %v3627_v11 = vsel %vm10742_vm5, %v3490_v0, %v3626_v60  ;;  %v3629_v4 = vld [vmem:[#allocation2 + $0x60] sm:$0xf]  ;;  %v3632_v15 = vld [vmem:[#allocation2 + $0x64] sm:$0x1]  ;;  %v4030_v54 = vld [vmem:[#allocation2 + $0xc] sm:$0x1]  ;;  %v11323_v47 = vadd.f32 %v9968_v14, %v11207_v17 }
 0x223   : > { %v3473_v6 = vor.u32 %v3471_v20, %v3470_v23  ;;  %v3474_v48 = vrot.slane %v3470_v23, 4  ;;  %3628 = vst [vmem:[#allocation2 + $0x5c] sm:$0x1] %v3627_v11  ;;  %3625 = vst [vmem:[#allocation2 + $0x58] sm:$0xf] %v3624_v3  ;;  %v3494_v18 = vrot.slane %v3492_v16, 7 }
 0x224   : > { %v3476_v19 = vshrl.u32 %v9097_v55, 16  ;;  %v3479_v43 = vshll.u32 %v9097_v55, 16  ;;  %v3516_v59 = vshrl.u32 %v9102_v45, 16  ;;  %v3617_v26 = vld [vmem:[#allocation2 + $0x50] sm:$0xf]  ;;  %v3519_v38 = vshll.u32 %v9102_v45, 16 }
 0x225   : > { %v3612_v22 = vsel %vm10738_vm4, %v3473_v6, %v3611_v29  ;;  %v3615_v44 = vsel %vm10742_vm5, %v3474_v48, %v3614_v8  ;;  %v3620_v37 = vld [vmem:[#allocation2 + $0x54] sm:$0x1]  ;;  %v3500_v39 = vshrl.u32 %v9100_v27, 16  ;;  %v3497_v63 = vor.u32 %v3495_v24, %v3494_v18  ;;  %v3647_v52 = vld [vmem:[#allocation2 + $0x78] sm:$0xf] }
 0x226   : > { %3616 = vst [vmem:[#allocation2 + $0x4c] sm:$0x1] %v3615_v44  ;;  %3613 = vst [vmem:[#allocation2 + $0x48] sm:$0xf] %v3612_v22  ;;  %v3498_v12 = vrot.slane %v3494_v18, 4  ;;  %v3478_v46 = vrot.slane %v3476_v19, 7  ;;  %v9103_v3 = vpack.c.bf16 %v11323_v47, %v11323_v47 }
 0x227   : > { %v3518_v10 = vrot.slane %v3516_v59, 7  ;;  %v3650_v20 = vld [vmem:[#allocation2 + $0x7c] sm:$0x1]  ;;  %v3502_v35 = vrot.slane %v3500_v39, 7  ;;  %v3503_v9 = vshll.u32 %v9100_v27, 16  ;;  %v4097_v60 = vrot.slane %v4030_v54, 5 }
 0x228   : > { %v3630_v62 = vsel %vm10738_vm4, %v3497_v63, %v3629_v4  ;;  %v3633_v0 = vsel %vm10742_vm5, %v3498_v12, %v3632_v15  ;;  %v3481_v23 = vor.u32 %v3479_v43, %v3478_v46  ;;  %v3482_v16 = vrot.slane %v3478_v46, 4  ;;  %v3635_v29 = vld [vmem:[#allocation2 + $0x68] sm:$0xf]  ;;  %v3638_v8 = vld [vmem:[#allocation2 + $0x6c] sm:$0x1] }
 0x229   : > { %3634 = vst [vmem:[#allocation2 + $0x64] sm:$0x1] %v3633_v0  ;;  %3631 = vst [vmem:[#allocation2 + $0x60] sm:$0xf] %v3630_v62  ;;  %v3521_v24 = vor.u32 %v3519_v38, %v3518_v10  ;;  %v3522_v55 = vrot.slane %v3518_v10, 4  ;;  %v3505_v45 = vor.u32 %v3503_v9, %v3502_v35  ;;  %v3506_v27 = vrot.slane %v3502_v35, 4 }
 0x22a   : > { %v3618_v17 = vsel %vm10738_vm4, %v3481_v23, %v3617_v26  ;;  %v3621_v14 = vsel %vm10742_vm5, %v3482_v16, %v3620_v37  ;;  %v4098_v11 = vsel %vm10767_vm10, %v8827_v58, %v4097_v60  ;;  %v3733_v6 = vld [vmem:[#allocation2 + $0x8] sm:$0xf]  ;;  %v3734_v48 = vld [vmem:[#allocation2 + $0xc] sm:$0x1]  ;;  %v3735_v4 = vld [vmem:[#allocation2 + $0x10] sm:$0xf]  ;;  %v11348_v26 = vadd.f32 %v11306_v31, %v11181_v28 }
 0x22b   : > { %3622 = vst [vmem:[#allocation2 + $0x54] sm:$0x1] %v3621_v14  ;;  %3619 = vst [vmem:[#allocation2 + $0x50] sm:$0xf] %v3618_v17  ;;  %v3648_v15 = vsel %vm10738_vm4, %v3521_v24, %v3647_v52  ;;  %v3651_v54 = vsel %vm10742_vm5, %v3522_v55, %v3650_v20  ;;  %v3636_v18 = vsel %vm10738_vm4, %v3505_v45, %v3635_v29  ;;  %v10211_v43 = vld [vmem:[#allocation2 + $0x18] ss:$8 sps:$4 sm:$0xff]  }
 0x22c   : > { %v3639_v19 = vsel %vm10742_vm5, %v3506_v27, %v3638_v8  ;;  %v3736_v59 = vld [vmem:[#allocation2 + $0x14] sm:$0x1]  ;;  %3652 = vst [vmem:[#allocation2 + $0x7c] sm:$0x1] %v3651_v54  ;;  %3649 = vst [vmem:[#allocation2 + $0x78] sm:$0xf] %v3648_v15  ;;  %v8842_v44 = vcombine.low %v11253_v25, %v4098_v11  ;;  %v9101_v20 = vpack.c.bf16 %v11348_v26, %v11348_v26 }
 0x22d   : > { %3640 = vst [vmem:[#allocation2 + $0x6c] sm:$0x1] %v3639_v19  ;;  %3637 = vst [vmem:[#allocation2 + $0x68] sm:$0xf] %v3636_v18  ;;  %v3524_v58 = vshrl.u32 %v9103_v3, 16  ;;  %v3527_v22 = vshll.u32 %v9103_v3, 16 }
 0x22e   : > { %12572 = vst [vmem:[#allocation15_spill] sm:$0xff] %v11348_v26  ;;  %v3737_v37 = vld [vmem:[#allocation2 + $0x18] sm:$0xf]  ;;  %v3653_v38 = vld [vmem:[#allocation2 + $0x80] sm:$0xf]  ;;  %v3778_v63 = vshrl.u32 %v3733_v6, 16  ;;  %5469 = vmatmul.mubr.bf16.vlgmr.msra.gmra.mrb[80].mxu0 %v8842_v44 }
 0x22f   : > { %v3656_v39 = vld [vmem:[#allocation2 + $0x84] sm:$0x1]  ;;  %v3781_v12 = vshll.u32 %v3733_v6, 16  ;;  %v3787_v46 = vshll.u32 %v3734_v48, 16  ;;  %v3792_v10 = vshrl.u32 %v3735_v4, 16  ;;  %v3526_v52 = vrot.slane %v3524_v58, 7  ;;  %5476 = vmatprep.mubr.bf16.mxu0 %v10211_v43 }
 0x230   : > { %v3795_v35 = vshll.u32 %v3735_v4, 16  ;;  %v3801_v9 = vshll.u32 %v3736_v59, 16  ;;  %v3780_v25 = vrot.slane %v3778_v63, 4  ;;  %v3738_v28 = vld [vmem:[#allocation2 + $0x1c] sm:$0x1]  ;;  %v10292_v0 = vld [vmem:[#allocation7 + $0x180] sm:$0xff]  }
 0x231   : > { %v3783_v60 = vrot.slane %v3781_v12, 5  ;;  %v3789_v62 = vrot.slane %v3787_v46, 5  ;;  %v3794_v31 = vrot.slane %v3792_v10, 4  ;;  %9586 = vmatpush3.bf16.msra.mxu0 %v10292_v0  ;;  %v3529_v23 = vor.u32 %v3527_v22, %v3526_v52  ;;  %v4031_v24 = vld [vmem:[#allocation2 + $0x10] sm:$0xe]  ;;  %v10293_v55 = vld [vmem:[#allocation7 + $0x1c8] sm:$0xff]  }
 0x232   : > { %v3530_v16 = vrot.slane %v3526_v52, 4  ;;  %v3508_v29 = vshrl.u32 %v9101_v20, 16  ;;  %v3511_v8 = vshll.u32 %v9101_v20, 16  ;;  %9587 = vmatprep.subr.bf16.mxu0 %v10293_v55  ;;  %v3641_v45 = vld [vmem:[#allocation2 + $0x70] sm:$0xf]  ;;  %v3797_v14 = vrot.slane %v3795_v35, 5 }
 0x233   : > { %v3644_v27 = vld [vmem:[#allocation2 + $0x74] sm:$0x1]  ;;  %v3784_v17 = vor.u32 %v3783_v60, %v3780_v25  ;;  %v11352_v3 = vrot.slane %v3801_v9, 5  ;;  %v3806_v11 = vshrl.u32 %v3737_v37, 16  ;;  %v3654_v48 = vsel %vm10738_vm4, %v3529_v23, %v3653_v38  ;;  %v4033_v18 = vld [vmem:[#allocation2 + $0x18] sm:$0xe] }
 0x234   : > { %v4032_v6 = vld [vmem:[#allocation2 + $0x14] sm:$0x1]  ;;  %v3657_v4 = vsel %vm10742_vm5, %v3530_v16, %v3656_v39  ;;  %v3510_v15 = vrot.slane %v3508_v29, 7  ;;  %v3809_v54 = vshll.u32 %v3737_v37, 16  ;;  %v4034_v19 = vld [vmem:[#allocation2 + $0x1c] sm:$0x1]  ;;  %v3798_v59 = vor.u32 %v3797_v14, %v3794_v31 }
 0x235   : > { %3658 = vst [vmem:[#allocation2 + $0x84] sm:$0x1] %v3657_v4  ;;  %3655 = vst [vmem:[#allocation2 + $0x80] sm:$0xf] %v3654_v48  ;;  %v3785_v43 = vrot.slane %v3784_v17, 4  ;;  %v3808_v58 = vrot.slane %v3806_v11, 4 }
 0x236   : > { %v3815_v22 = vshll.u32 %v3738_v28, 16  ;;  %v3739_v44 = vld [vmem:[#allocation2 + $0x20] sm:$0xf]  ;;  %v10294_v63 = vld [vmem:[#allocation7 + $0x188] sm:$0xff]   ;;  %v3513_v12 = vor.u32 %v3511_v8, %v3510_v15  ;;  %v3514_v46 = vrot.slane %v3510_v15, 4  ;;  %v3811_v10 = vrot.slane %v3809_v54, 5 }
 0x237   : > { %9588 = vmatpush3.bf16.msra.mxu0 %v10294_v63  ;;  %v8828_v38 = vrot.slane %v4031_v24, 9  ;;  %v3740_v52 = vld [vmem:[#allocation2 + $0x24] sm:$0x1]  ;;  %v3790_v37 = vsel %vm10778_vm11, %v3785_v43, %v3789_v62  ;;  %v10212_v39 = vld [vmem:[#allocation2] ss:$8 sps:$4 sm:$0xff]   ;;  %v3799_v35 = vrot.slane %v3798_v59, 4 }
 0x238   : > { %v10295_v20 = vld [vmem:[#allocation7 + $0x1d0] sm:$0xff]   ;;  %v3817_v9 = vrot.slane %v3815_v22, 5  ;;  %v4101_v25 = vrot.slane %v4032_v6, 5  ;;  %v3741_v60 = vld [vmem:[#allocation2 + $0x28] sm:$0xf]  ;;  %v3642_v28 = vsel %vm10738_vm4, %v3513_v12, %v3641_v45  ;;  %v3645_v31 = vsel %vm10742_vm5, %v3514_v46, %v3644_v27  ;;  %v10299_v63 = vld [vmem:[#allocation7 + $0x148] sm:$0xff]  }
 0x239   : > { %9589 = vmatprep.subr.bf16.mxu0 %v10295_v20  ;;  %v8818_v0 = vcombine.low %v3776_v40, %v3790_v37  ;;  %v3812_v23 = vor.u32 %v3811_v10, %v3808_v58  ;;  %v3742_v16 = vld [vmem:[#allocation2 + $0x2c] sm:$0x1]  ;;  %3646 = vst [vmem:[#allocation2 + $0x74] sm:$0x1] %v3645_v31  ;;  %3643 = vst [vmem:[#allocation2 + $0x70] sm:$0xf] %v3642_v28  ;;  %v3804_v62 = vsel %vm10778_vm11, %v3799_v35, %v11352_v3 }
 0x23a   : > { %v4102_v29 = vsel %vm10767_vm10, %v8828_v38, %v4101_v25  ;;  %v8829_v8 = vrot.slane %v4033_v18, 9  ;;  %v4105_v24 = vrot.slane %v4034_v19, 5  ;;  %v4035_v55 = vld [vmem:[#allocation2 + $0x20] sm:$0xe]  ;;  %v4036_v45 = vld [vmem:[#allocation2 + $0x24] sm:$0x1] }
 0x23b   : > { %v10296_v27 = vld [vmem:[#allocation7 + $0x190] sm:$0xff]   ;;  %5371 = vmatprep.mubr.bf16.mxu1 %v8818_v0  ;;  %v3813_v33 = vrot.slane %v3812_v23, 4  ;;  %v3820_v32 = vshrl.u32 %v3739_v44, 16  ;;  %v3823_v40 = vshll.u32 %v3739_v44, 16  ;;  %v3829_v17 = vshll.u32 %v3740_v52, 16  ;;  %v10297_v14 = vld [vmem:[#allocation7 + $0x1d8] sm:$0xff]  }
 0x23c   : > { %9590 = vmatpush3.bf16.msra.mxu0 %v10296_v27  ;;  %5372 = vmatmul.mubr.bf16.vlgmr.msra.gmra.mrb[64].mxu1 %v10212_v39  ;;  %v4106_v3 = vsel %vm10767_vm10, %v8829_v8, %v4105_v24  ;;  %v10213_v11 = vld [vmem:[#allocation2 + $0x28] ss:$8 sps:$4 sm:$0xff]   ;;  %v3834_v6 = vshrl.u32 %v3741_v60, 16  ;;  %v3837_v48 = vshll.u32 %v3741_v60, 16  ;;  %v3843_v4 = vshll.u32 %v3742_v16, 16 }
 0x23d   : > { %9591 = vmatprep.subr.bf16.mxu0 %v10297_v14  ;;  %v4037_v15 = vld [vmem:[#allocation2 + $0x28] sm:$0xe]  ;;  %v3818_v54 = vsel %vm10778_vm11, %v3813_v33, %v3817_v9  ;;  %v8843_v18 = vcombine.low %v4102_v29, %v4106_v3  ;;  %v10298_v19 = vld [vmem:[#allocation7 + $0x100] sm:$0xff]   ;;  %v3822_v43 = vrot.slane %v3820_v32, 4  ;;  %v3825_v59 = vrot.slane %v3823_v40, 5 }
 0x23e   : > { %9522 = vmatpush3.bf16.msra.mxu1 %v10298_v19  ;;  %v4038_v58 = vld [vmem:[#allocation2 + $0x2c] sm:$0x1]  ;;  %v3743_v22 = vld [vmem:[#allocation2 + $0x30] sm:$0xf]  ;;  %v8819_v44 = vcombine.low %v3804_v62, %v3818_v54  ;;  %v3836_v12 = vrot.slane %v3834_v6, 4  ;;  %v3839_v46 = vrot.slane %v3837_v48, 5 }
 0x23f   : > { %9523 = vmatprep.subr.bf16.mxu1 %v10299_v63  ;;  %v11378_v10 = vld [vmem:[#allocation2 + $0x34] sm:$0x1]  ;;  %v3745_v38 = vld [vmem:[#allocation2 + $0x38] sm:$0xf]  ;;  %v10300_v52 = vld [vmem:[#allocation7 + $0x198] sm:$0xff]   ;;  %5477 = vmatmul.mubr.bf16.gmra.mrb[84].mxu0 %v8843_v18  ;;  %v3826_v20 = vor.u32 %v3825_v59, %v3822_v43  ;;  %v3831_v37 = vrot.slane %v3829_v17, 5 }
 0x240   : > { %9592 = vmatpush3.bf16.msra.mxu0 %v10300_v52  ;;  %v8830_v39 = vrot.slane %v4035_v55, 9  ;;  %v4109_v35 = vrot.slane %v4036_v45, 5  ;;  %v11380_v9 = vld [vmem:[#allocation2 + $0x3c] sm:$0x1]  ;;  %v10301_v25 = vld [vmem:[#allocation7 + $0x1e0] sm:$0xff]   ;;  %5379 = vmatprep.mubr.bf16.mxu1 %v8819_v44  ;;  %v3840_v28 = vor.u32 %v3839_v46, %v3836_v12  ;;  %v8831_v31 = vrot.slane %v4037_v15, 9 }
 0x241   : > { %9593 = vmatprep.subr.bf16.mxu0 %v10301_v25  ;;  %5484 = vmatprep.mubr.bf16.mxu0 %v10213_v11  ;;  %v10214_v60 = vld [vmem:[#allocation2 + $0x10] ss:$8 sps:$4 sm:$0xff]   ;;  %v4113_v0 = vrot.slane %v4038_v58, 5  ;;  %v3848_v23 = vshrl.u32 %v3743_v22, 16  ;;  %v11384_v62 = vld [vmem:[#allocation2 + $0x34] sm:$0x1] }
 0x242   : > { %v11382_v16 = vld [vmem:[#allocation2 + $0x30] sm:$0xe]  ;;  %v3827_v29 = vrot.slane %v3826_v20, 4  ;;  %v3845_v8 = vrot.slane %v3843_v4, 5  ;;  %v4110_v24 = vsel %vm10767_vm10, %v8830_v39, %v4109_v35  ;;  %v10302_v55 = vld [vmem:[#allocation7 + $0x108] sm:$0xff]   ;;  %v3851_v45 = vshll.u32 %v3743_v22, 16 }
 0x243   : > { %9524 = vmatpush3.bf16.msra.mxu1 %v10302_v55  ;;  %v4041_v27 = vld [vmem:[#allocation2 + $0x38] sm:$0xe]  ;;  %v4042_v33 = vld [vmem:[#allocation2 + $0x3c] sm:$0x1]  ;;  %v3841_v32 = vrot.slane %v3840_v28, 4  ;;  %v4114_v40 = vsel %vm10767_vm10, %v8831_v31, %v4113_v0  ;;  %v10303_v17 = vld [vmem:[#allocation7 + $0x150] sm:$0xff]  }
 0x244   : > { %9525 = vmatprep.subr.bf16.mxu1 %v10303_v17  ;;  %v3850_v14 = vrot.slane %v3848_v23, 4  ;;  %v3862_v3 = vshrl.u32 %v3745_v38, 16  ;;  %v3747_v11 = vld [vmem:[#allocation2 + $0x40] sm:$0xf]  ;;  %v10304_v6 = vld [vmem:[#allocation7 + $0x1a0] sm:$0xff]   ;;  %v3832_v48 = vsel %vm10778_vm11, %v3827_v29, %v3831_v37  ;;  %v8844_v4 = vcombine.low %v4110_v24, %v4114_v40  ;;  %v10305_v19 = vld [vmem:[#allocation7 + $0x1e8] sm:$0xff]   ;;  %5380 = vmatmul.mubr.bf16.gmra.mrb[68].mxu1 %v10214_v60 }
 0x245   : > { %9594 = vmatpush3.bf16.msra.mxu0 %v10304_v6  ;;  %v3853_v15 = vrot.slane %v3851_v45, 5  ;;  %v3857_v54 = vshll.u32 %v11378_v10, 16  ;;  %v11393_v18 = vld [vmem:[#allocation2 + $0x44] sm:$0x1]  ;;  %v3846_v43 = vsel %vm10778_vm11, %v3841_v32, %v3845_v8  ;;  %v10215_v59 = vld [vmem:[#allocation2 + $0x38] ss:$8 sps:$4 sm:$0xff]  }
 0x246   : > { %9595 = vmatprep.subr.bf16.mxu0 %v10305_v19  ;;  %v3864_v58 = vrot.slane %v3862_v3, 4  ;;  %v3865_v22 = vshll.u32 %v3745_v38, 16  ;;  %v3871_v44 = vshll.u32 %v11380_v9, 16  ;;  %v8820_v63 = vcombine.low %v3832_v48, %v3846_v43  ;;  %v10306_v10 = vld [vmem:[#allocation7 + $0x110] sm:$0xff]   ;;  %v3749_v20 = vld [vmem:[#allocation2 + $0x48] sm:$0xf] }
 0x247   : > { %v3854_v12 = vor.u32 %v3853_v15, %v3850_v14  ;;  %v8832_v46 = vrot.slane %v11382_v16, 9  ;;  %v4117_v52 = vrot.slane %v11384_v62, 5  ;;  %9526 = vmatpush3.bf16.msra.mxu1 %v10306_v10  ;;  %v8833_v39 = vrot.slane %v4041_v27, 9  ;;  %v10307_v25 = vld [vmem:[#allocation7 + $0x158] sm:$0xff]   ;;  %v10308_v28 = vld [vmem:[#allocation7 + $0x1a8] sm:$0xff]   ;;  %5485 = vmatmul.mubr.bf16.gmra.mrb[88].mxu0 %v8844_v4  ;;  %v10309_v45 = vld [vmem:[#allocation7 + $0x1f0] sm:$0xff]  }
 0x248   : > { %v3867_v37 = vrot.slane %v3865_v22, 5  ;;  %v4121_v35 = vrot.slane %v4042_v33, 5  ;;  %9527 = vmatprep.subr.bf16.mxu1 %v10307_v25  ;;  %v3750_v60 = vld [vmem:[#allocation2 + $0x4c] sm:$0x1]  ;;  %5387 = vmatprep.mubr.bf16.mxu1 %v8820_v63  ;;  %v3859_v9 = vrot.slane %v3857_v54, 5  ;;  %v3876_v31 = vshrl.u32 %v3747_v11, 16 }
 0x249   : > { %9596 = vmatpush3.bf16.msra.mxu0 %v10308_v28  ;;  %v3855_v38 = vrot.slane %v3854_v12, 4  ;;  %v3879_v0 = vshll.u32 %v3747_v11, 16  ;;  %v4043_v23 = vld [vmem:[#allocation2 + $0x40] sm:$0xe]  ;;  %5492 = vmatprep.mubr.bf16.mxu0 %v10215_v59  ;;  %v3873_v29 = vrot.slane %v3871_v44, 5  ;;  %v3885_v8 = vshll.u32 %v11393_v18, 16 }
 0x24a   : > { %v10216_v16 = vld [vmem:[#allocation2 + $0x20] ss:$8 sps:$4 sm:$0xff]   ;;  %v3868_v62 = vor.u32 %v3867_v37, %v3864_v58  ;;  %v3890_v24 = vshrl.u32 %v3749_v20, 16  ;;  %v4044_v55 = vld [vmem:[#allocation2 + $0x44] sm:$0x1]  ;;  %9597 = vmatprep.subr.bf16.mxu0 %v10309_v45  ;;  %v4118_v27 = vsel %vm10767_vm10, %v8832_v46, %v4117_v52  ;;  %v4122_v33 = vsel %vm10767_vm10, %v8833_v39, %v4121_v35  ;;  %v10311_v15 = vld [vmem:[#allocation7 + $0x160] sm:$0xff]  }
 0x24b   : > { %v3878_v32 = vrot.slane %v3876_v31, 4  ;;  %v3881_v40 = vrot.slane %v3879_v0, 5  ;;  %v4045_v17 = vld [vmem:[#allocation2 + $0x48] sm:$0xe]  ;;  %v4046_v14 = vld [vmem:[#allocation2 + $0x4c] sm:$0x1]  ;;  %v3860_v11 = vsel %vm10778_vm11, %v3855_v38, %v3859_v9  ;;  %v8845_v12 = vcombine.low %v4118_v27, %v4122_v33 }
 0x24c   : > { %v10310_v3 = vld [vmem:[#allocation7 + $0x118] sm:$0xff]   ;;  %v3869_v6 = vrot.slane %v3868_v62, 4  ;;  %v3892_v48 = vrot.slane %v3890_v24, 4  ;;  %v3893_v4 = vshll.u32 %v3749_v20, 16  ;;  %v3751_v54 = vld [vmem:[#allocation2 + $0x50] sm:$0xf]  ;;  %5388 = vmatmul.mubr.bf16.gmra.mrb[72].mxu1 %v10216_v16 }
 0x24d   : > { %9528 = vmatpush3.bf16.msra.mxu1 %v10310_v3  ;;  %v10312_v18 = vld [vmem:[#allocation7 + $0x1b0] sm:$0xff]   ;;  %v3882_v19 = vor.u32 %v3881_v40, %v3878_v32  ;;  %v3899_v43 = vshll.u32 %v3750_v60, 16  ;;  %v8834_v59 = vrot.slane %v4043_v23, 9  ;;  %v4125_v58 = vrot.slane %v4044_v55, 5  ;;  %v3752_v22 = vld [vmem:[#allocation2 + $0x54] sm:$0x1] }
 0x24e   : > { %9529 = vmatprep.subr.bf16.mxu1 %v10311_v15  ;;  %9598 = vmatpush3.bf16.msra.mxu0 %v10312_v18  ;;  %v10313_v44 = vld [vmem:[#allocation7 + $0x1f8] sm:$0xff]   ;;  %v3874_v63 = vsel %vm10778_vm11, %v3869_v6, %v3873_v29  ;;  %v3887_v52 = vrot.slane %v3885_v8, 5  ;;  %v3895_v10 = vrot.slane %v3893_v4, 5  ;;  %v3753_v20 = vld [vmem:[#allocation2 + $0x58] sm:$0xf]  ;;  %v8835_v25 = vrot.slane %v4045_v17, 9 }
 0x24f   : > { %9599 = vmatprep.subr.bf16.mxu0 %v10313_v44  ;;  %v10217_v46 = vld [vmem:[#allocation2 + $0x48] ss:$8 sps:$4 sm:$0xff]   ;;  %v3754_v37 = vld [vmem:[#allocation2 + $0x5c] sm:$0x1]  ;;  %v8821_v39 = vcombine.low %v3860_v11, %v3874_v63  ;;  %v3883_v35 = vrot.slane %v3882_v19, 4  ;;  %v4129_v28 = vrot.slane %v4046_v14, 5  ;;  %5493 = vmatmul.mubr.bf16.gmra.mrb[92].mxu0 %v8845_v12  ;;  %v4126_v29 = vsel %vm10767_vm10, %v8834_v59, %v4125_v58 }
 0x250   : > { %v10314_v60 = vld [vmem:[#allocation7 + $0x120] sm:$0xff]   ;;  %v3896_v38 = vor.u32 %v3895_v10, %v3892_v48  ;;  %v3901_v9 = vrot.slane %v3899_v43, 5  ;;  %v3904_v31 = vshrl.u32 %v3751_v54, 16  ;;  %v3907_v0 = vshll.u32 %v3751_v54, 16  ;;  %v10315_v16 = vld [vmem:[#allocation7 + $0x168] sm:$0xff]   ;;  %v10316_v62 = vld [vmem:[#allocation7 + $0x1b8] sm:$0xff]   ;;  %5500 = vmatprep.mubr.bf16.mxu0 %v10217_v46 }
 0x251   : > { %9530 = vmatpush3.bf16.msra.mxu1 %v10314_v60  ;;  %v11409_v23 = vld [vmem:[#allocation2 + $0x50] sm:$0xe]  ;;  %5395 = vmatprep.mubr.bf16.mxu1 %v8821_v39  ;;  %v3913_v8 = vshll.u32 %v3752_v22, 16  ;;  %v3918_v24 = vshrl.u32 %v3753_v20, 16  ;;  %v3921_v33 = vshll.u32 %v3753_v20, 16  ;;  %v3888_v17 = vsel %vm10778_vm11, %v3883_v35, %v3887_v52  ;;  %v10318_v4 = vld [vmem:[#allocation7 + $0x128] sm:$0xff]  }
 0x252   : > { %9531 = vmatprep.subr.bf16.mxu1 %v10315_v16  ;;  %9600 = vmatpush3.bf16.msra.mxu0 %v10316_v62  ;;  %v3897_v55 = vrot.slane %v3896_v38, 4  ;;  %v3906_v45 = vrot.slane %v3904_v31, 4  ;;  %v3909_v27 = vrot.slane %v3907_v0, 5  ;;  %v4048_v32 = vld [vmem:[#allocation2 + $0x54] sm:$0x1]  ;;  %v4130_v14 = vsel %vm10767_vm10, %v8835_v25, %v4129_v28  ;;  %v10319_v58 = vld [vmem:[#allocation7 + $0x170] sm:$0xff]  }
 0x253   : > { %v10317_v40 = vld [vmem:[#allocation7 + $0x40] sm:$0xff]   ;;  %v3920_v3 = vrot.slane %v3918_v24, 4  ;;  %v3927_v11 = vshll.u32 %v3754_v37, 16  ;;  %v11417_v6 = vld [vmem:[#allocation2 + $0x58] sm:$0xe]  ;;  %v3915_v19 = vrot.slane %v3913_v8, 5  ;;  %v8846_v28 = vcombine.low %v4126_v29, %v4130_v14 }
 0x254   : > { %9665 = vmatprep.subr.bf16.mxu0 %v10317_v40  ;;  %v3755_v48 = vld [vmem:[#allocation2 + $0x60] sm:$0xf]  ;;  %v10218_v15 = vld [vmem:[#allocation2 + $0x30] ss:$8 sps:$4 sm:$0xff]   ;;  %v3902_v54 = vsel %vm10778_vm11, %v3897_v55, %v3901_v9  ;;  %v3910_v18 = vor.u32 %v3909_v27, %v3906_v45  ;;  %v3923_v43 = vrot.slane %v3921_v33, 5  ;;  %v8836_v12 = vrot.slane %v11409_v23, 9 }
 0x255   : > { %9532 = vmatpush3.bf16.msra.mxu1 %v10318_v4  ;;  %v3757_v59 = vld [vmem:[#allocation2 + $0x68] sm:$0xf]  ;;  %v8822_v22 = vcombine.low %v3888_v17, %v3902_v54  ;;  %v3929_v44 = vrot.slane %v3927_v11, 5  ;;  %v4050_v63 = vld [vmem:[#allocation2 + $0x5c] sm:$0x1]  ;;  %v4133_v46 = vrot.slane %v4048_v32, 5 }
 0x256   : > { %9533 = vmatprep.subr.bf16.mxu1 %v10319_v58  ;;  %v11422_v52 = vld [vmem:[#allocation2 + $0x64] sm:$0x1]  ;;  %5396 = vmatmul.mubr.bf16.gmra.mrb[76].mxu1 %v10218_v15  ;;  %v10219_v10 = vld [vmem:[#allocation2 + $0x58] ss:$8 sps:$4 sm:$0xff]   ;;  %v3911_v20 = vrot.slane %v3910_v18, 4  ;;  %v3924_v37 = vor.u32 %v3923_v43, %v3920_v3  ;;  %v8837_v39 = vrot.slane %v11417_v6, 9 }
 0x257   : > { %v3758_v35 = vld [vmem:[#allocation2 + $0x6c] sm:$0x1]  ;;  %v3932_v25 = vshrl.u32 %v3755_v48, 16  ;;  %5403 = vmatprep.mubr.bf16.mxu1 %v8822_v22  ;;  %v3935_v60 = vshll.u32 %v3755_v48, 16  ;;  %v3946_v38 = vshrl.u32 %v3757_v59, 16  ;;  %v10320_v0 = vld [vmem:[#allocation7 + $0x130] sm:$0xff]   ;;  %5501 = vmatmul.mubr.bf16.gmra.mrb[96].mxu0 %v8846_v28  ;;  %v4134_v33 = vsel %vm10767_vm10, %v8836_v12, %v4133_v46 }
 0x258   : > { %v11425_v9 = vld [vmem:[#allocation2 + $0x60] sm:$0xe]  ;;  %v11427_v31 = vld [vmem:[#allocation2 + $0x64] sm:$0x1]  ;;  %v3925_v23 = vrot.slane %v3924_v37, 4  ;;  %v10321_v8 = vld [vmem:[#allocation7 + $0x178] sm:$0xff]   ;;  %v3916_v24 = vsel %vm10778_vm11, %v3911_v20, %v3915_v19  ;;  %5508 = vmatprep.mubr.bf16.mxu0 %v10219_v10 }
 0x259   : > { %9534 = vmatpush3.bf16.msra.mxu1 %v10320_v0  ;;  %v3934_v16 = vrot.slane %v3932_v25, 4  ;;  %v4053_v62 = vld [vmem:[#allocation2 + $0x68] sm:$0xe]  ;;  %v3937_v55 = vrot.slane %v3935_v60, 5  ;;  %v3948_v45 = vrot.slane %v3946_v38, 4  ;;  %v3949_v29 = vshll.u32 %v3757_v59, 16 }
 0x25a   : > { %9535 = vmatprep.subr.bf16.mxu1 %v10321_v8  ;;  %v10220_v27 = vld [vmem:[#allocation2 + $0x40] ss:$8 sps:$4 sm:$0xff]   ;;  %v4137_v32 = vrot.slane %v4050_v63, 5  ;;  %v3941_v40 = vshll.u32 %v11422_v52, 16  ;;  %v3955_v17 = vshll.u32 %v3758_v35, 16  ;;  %v3930_v3 = vsel %vm10778_vm11, %v3925_v23, %v3929_v44  ;;  %v11438_v59 = vld [vmem:[#allocation7 + $0x200] sm:$0xff]  }
 0x25b   : > { %v4054_v14 = vld [vmem:[#allocation2 + $0x6c] sm:$0x1]  ;;  %v3938_v11 = vor.u32 %v3937_v55, %v3934_v16  ;;  %v3951_v6 = vrot.slane %v3949_v29, 5  ;;  %v8838_v48 = vrot.slane %v11425_v9, 9  ;;  %v8823_v15 = vcombine.low %v3916_v24, %v3930_v3  ;;  %v3759_v43 = vld [vmem:[#allocation2 + $0x70] sm:$0xf] }
 0x25c   : > { %v10322_v4 = vld [vmem:[#allocation7 + $0x138] sm:$0xff]   ;;  %v3957_v54 = vrot.slane %v3955_v17, 5  ;;  %v4141_v18 = vrot.slane %v11427_v31, 5  ;;  %v8839_v19 = vrot.slane %v4053_v62, 9  ;;  %v4145_v63 = vrot.slane %v4054_v14, 5 }
 0x25d   : > { %9536 = vmatpush3.bf16.msra.mxu1 %v10322_v4  ;;  %v3939_v58 = vrot.slane %v3938_v11, 4  ;;  %v3952_v22 = vor.u32 %v3951_v6, %v3948_v45  ;;  %v3761_v44 = vld [vmem:[#allocation2 + $0x78] sm:$0xf]  ;;  %v3960_v12 = vshrl.u32 %v3759_v43, 16  ;;  %v4138_v46 = vsel %vm10767_vm10, %v8837_v39, %v4137_v32  ;;  %v10221_v52 = vld [vmem:[#allocation2 + $0x68] ss:$8 sps:$4 sm:$0xff]  }
 0x25e   : > { %9969 = vmatprep.subr.bf16.mxu1 %v11438_v59  ;;  %5404 = vmatmul.mubr.bf16.gmra.mrb[80].mxu1 %v10220_v27  ;;  %v3760_v10 = vld [vmem:[#allocation2 + $0x74] sm:$0x1]  ;;  %v3762_v20 = vld [vmem:[#allocation2 + $0x7c] sm:$0x1]  ;;  %v3963_v37 = vshll.u32 %v3759_v43, 16  ;;  %v3974_v35 = vshrl.u32 %v3761_v44, 16  ;;  %v8847_v25 = vcombine.low %v4134_v33, %v4138_v46  ;;  %v4146_v8 = vsel %vm10767_vm10, %v8839_v19, %v4145_v63 }
 0x25f   : > { %5411 = vmatprep.mubr.bf16.mxu1 %v8823_v15  ;;  %v3953_v28 = vrot.slane %v3952_v22, 4  ;;  %v3962_v60 = vrot.slane %v3960_v12, 4  ;;  %v4055_v38 = vld [vmem:[#allocation2 + $0x70] sm:$0xe]  ;;  %v4056_v9 = vld [vmem:[#allocation2 + $0x74] sm:$0x1]  ;;  %v4142_v3 = vsel %vm10767_vm10, %v8838_v48, %v4141_v18 }
 0x260   : > { %v3943_v31 = vrot.slane %v3941_v40, 5  ;;  %v3965_v0 = vrot.slane %v3963_v37, 5  ;;  %v3976_v23 = vrot.slane %v3974_v35, 4  ;;  %v3977_v16 = vshll.u32 %v3761_v44, 16  ;;  %v4057_v62 = vld [vmem:[#allocation2 + $0x78] sm:$0xe]  ;;  %5509 = vmatmul.mubr.bf16.gmra.mrb[100].mxu0 %v8847_v25 }
 0x261   : > { %v3958_v39 = vsel %vm10778_vm11, %v3953_v28, %v3957_v54  ;;  %v3969_v24 = vshll.u32 %v3760_v10, 16  ;;  %v3983_v55 = vshll.u32 %v3762_v20, 16  ;;  %v4058_v45 = vld [vmem:[#allocation2 + $0x7c] sm:$0x1]  ;;  %5516 = vmatprep.mubr.bf16.mxu0 %v10221_v52  ;;  %v10222_v29 = vld [vmem:[#allocation2 + $0x50] ss:$8 sps:$4 sm:$0xff]   ;;  %v8848_v54 = vcombine.low %v4142_v3, %v4146_v8 }
 0x262   : > { %v3966_v27 = vor.u32 %v3965_v0, %v3962_v60  ;;  %v3979_v33 = vrot.slane %v3977_v16, 5  ;;  %v8840_v32 = vrot.slane %v4055_v38, 9  ;;  %v4149_v40 = vrot.slane %v4056_v9, 5  ;;  %v4803_v17 = vld [vmem:[#allocation2 + $0x10] sm:$0xf] }
 0x263   : > { %v3944_v14 = vsel %vm10778_vm11, %v3939_v58, %v3943_v31  ;;  %v8841_v11 = vrot.slane %v4057_v62, 9  ;;  %v4153_v6 = vrot.slane %v4058_v45, 5  ;;  %v4804_v4 = vld [vmem:[#allocation2 + $0x14] sm:$0x1]  ;;  %v4805_v15 = vld [vmem:[#allocation2 + $0x18] sm:$0xf] }
 0x264   : > { %v3980_v19 = vor.u32 %v3979_v33, %v3976_v23  ;;  %v4806_v43 = vld [vmem:[#allocation2 + $0x1c] sm:$0x1]  ;;  %v4836_v22 = vshrl.u32 %v4803_v17, 16  ;;  %v4839_v63 = vshll.u32 %v4803_v17, 16  ;;  %v8824_v44 = vcombine.low %v3944_v14, %v3958_v39  ;;  %v10223_v10 = vld [vmem:[#allocation2 + $0x78] ss:$8 sps:$4 sm:$0xff]  }
 0x265   : > { %v3967_v12 = vrot.slane %v3966_v27, 4  ;;  %v4850_v46 = vshrl.u32 %v4805_v15, 16  ;;  %v4853_v52 = vshll.u32 %v4805_v15, 16  ;;  %v3971_v20 = vrot.slane %v3969_v24, 5  ;;  %v4563_v48 = vld [vmem:[#allocation2 + $0x8] sm:$0xe] }
 0x266   : > { %5412 = vmatmul.mubr.bf16.gmra.mrb[84].mxu1 %v10222_v29  ;;  %v3985_v58 = vrot.slane %v3983_v55, 5  ;;  %v4838_v37 = vrot.slane %v4836_v22, 4  ;;  %v4845_v35 = vshll.u32 %v4804_v4, 16  ;;  %v3981_v18 = vrot.slane %v3980_v19, 4  ;;  %v4564_v38 = vld [vmem:[#allocation2 + $0xc] sm:$0x1] }
 0x267   : > { %5419 = vmatprep.mubr.bf16.mxu1 %v8824_v44  ;;  %v4841_v25 = vrot.slane %v4839_v63, 5  ;;  %v4852_v28 = vrot.slane %v4850_v46, 4  ;;  %v4855_v60 = vrot.slane %v4853_v52, 5  ;;  %v4150_v9 = vsel %vm10767_vm10, %v8840_v32, %v4149_v40  ;;  %v4565_v23 = vld [vmem:[#allocation2 + $0x10] sm:$0xe] }
 0x268   : > { %v4154_v31 = vsel %vm10767_vm10, %v8841_v11, %v4153_v6  ;;  %v4859_v0 = vshll.u32 %v4806_v43, 16  ;;  %v4566_v16 = vld [vmem:[#allocation2 + $0x14] sm:$0x1]  ;;  %v8866_v62 = vrot.slane %v4563_v48, 9  ;;  %5517 = vmatmul.mubr.bf16.gmra.mrb[104].mxu0 %v8848_v54  ;;  %v3972_v39 = vsel %vm10778_vm11, %v3967_v12, %v3971_v20  ;;  %v10224_v45 = vld [vmem:[#allocation2 + $0x60] ss:$8 sps:$4 sm:$0xff]  }
 0x269   : > { %v4842_v8 = vor.u32 %v4841_v25, %v4838_v37  ;;  %v4856_v24 = vor.u32 %v4855_v60, %v4852_v28  ;;  %v4629_v55 = vrot.slane %v4564_v38, 5  ;;  %5524 = vmatprep.mubr.bf16.mxu0 %v10223_v10  ;;  %v4847_v29 = vrot.slane %v4845_v35, 5  ;;  %v4807_v11 = vld [vmem:[#allocation2 + $0x20] sm:$0xf]  ;;  %v4808_v6 = vld [vmem:[#allocation2 + $0x24] sm:$0x1] }
 0x26a   : > { %v4861_v27 = vrot.slane %v4859_v0, 5  ;;  %v8867_v33 = vrot.slane %v4565_v23, 9  ;;  %v4633_v32 = vrot.slane %v4566_v16, 5  ;;  %v3986_v40 = vsel %vm10778_vm11, %v3981_v18, %v3985_v58  ;;  %v4809_v54 = vld [vmem:[#allocation2 + $0x28] sm:$0xf] }
 0x26b   : > { %v8849_v17 = vcombine.low %v4150_v9, %v4154_v31  ;;  %v4843_v14 = vrot.slane %v4842_v8, 4  ;;  %v4857_v3 = vrot.slane %v4856_v24, 4  ;;  %v8825_v4 = vcombine.low %v3972_v39, %v3986_v40  ;;  %v4810_v19 = vld [vmem:[#allocation2 + $0x2c] sm:$0x1]  ;;  %v4267_v52 = vld [vmem:[#allocation2 + $0x8] sm:$0xf] }
 0x26c   : > { %v4630_v15 = vsel %vm10767_vm10, %v8866_v62, %v4629_v55  ;;  %v4864_v43 = vshrl.u32 %v4807_v11, 16  ;;  %v4867_v22 = vshll.u32 %v4807_v11, 16  ;;  %v4634_v12 = vsel %vm10767_vm10, %v8867_v33, %v4633_v32  ;;  %v4268_v10 = vld [vmem:[#allocation2 + $0xc] sm:$0x1]  ;;  %v4269_v48 = vld [vmem:[#allocation2 + $0x10] sm:$0xf] }
 0x26d   : > { %v4848_v63 = vsel %vm10778_vm11, %v4843_v14, %v4847_v29  ;;  %v4862_v44 = vsel %vm10778_vm11, %v4857_v3, %v4861_v27  ;;  %v4873_v46 = vshll.u32 %v4808_v6, 16  ;;  %v4878_v35 = vshrl.u32 %v4809_v54, 16  ;;  %v4270_v60 = vld [vmem:[#allocation2 + $0x14] sm:$0x1]  ;;  %v4567_v16 = vld [vmem:[#allocation2 + $0x18] sm:$0xe] }
 0x26e   : > { %5420 = vmatmul.mubr.bf16.gmra.mrb[88].mxu1 %v10224_v45  ;;  %v8898_v20 = vcombine.low %v4848_v63, %v4862_v44  ;;  %v4866_v58 = vrot.slane %v4864_v43, 4  ;;  %v4869_v37 = vrot.slane %v4867_v22, 5  ;;  %v4881_v25 = vshll.u32 %v4809_v54, 16  ;;  %v4568_v55 = vld [vmem:[#allocation2 + $0x1c] sm:$0x1] }
 0x26f   : > { %5427 = vmatprep.mubr.bf16.mxu1 %v8825_v4  ;;  %v4875_v18 = vrot.slane %v4873_v46, 5  ;;  %v4887_v28 = vshll.u32 %v4810_v19, 16  ;;  %v4300_v38 = vshrl.u32 %v4267_v52, 16  ;;  %v4880_v31 = vrot.slane %v4878_v35, 4  ;;  %v10225_v45 = vld [vmem:[#allocation2 + $0x70] ss:$8 sps:$4 sm:$0xff]  }
 0x270   : > { %v4870_v9 = vor.u32 %v4869_v37, %v4866_v58  ;;  %v4303_v0 = vshll.u32 %v4267_v52, 16  ;;  %v4309_v23 = vshll.u32 %v4268_v10, 16  ;;  %5525 = vmatmul.mubr.bf16.gmra.mrb[108].mxu0 %v8849_v17  ;;  %v4883_v62 = vrot.slane %v4881_v25, 5  ;;  %v4569_v40 = vld [vmem:[#allocation2 + $0x20] sm:$0xe] }
 0x271   : > { %v4889_v39 = vrot.slane %v4887_v28, 5  ;;  %v4302_v8 = vrot.slane %v4300_v38, 4  ;;  %v4314_v24 = vshrl.u32 %v4269_v48, 16  ;;  %5662 = vmatprep.mubr.bf16.mxu0 %v8898_v20  ;;  %v4317_v32 = vshll.u32 %v4269_v48, 16  ;;  %v4570_v6 = vld [vmem:[#allocation2 + $0x24] sm:$0x1] }
 0x272   : > { %v4871_v29 = vrot.slane %v4870_v9, 4  ;;  %v4305_v27 = vrot.slane %v4303_v0, 5  ;;  %v4311_v33 = vrot.slane %v4309_v23, 5  ;;  %v4884_v14 = vor.u32 %v4883_v62, %v4880_v31  ;;  %v10226_v22 = vld [vmem:[#allocation2 + $0x10] ss:$8 sps:$4 sm:$0xff]  }
 0x273   : > { %v4316_v3 = vrot.slane %v4314_v24, 4  ;;  %v4323_v11 = vshll.u32 %v4270_v60, 16  ;;  %v8868_v4 = vrot.slane %v4567_v16, 9  ;;  %v8882_v54 = vcombine.low %v4630_v15, %v4634_v12  ;;  %v4811_v35 = vld [vmem:[#allocation2 + $0x30] sm:$0xf] }
 0x274   : > { %v4306_v19 = vor.u32 %v4305_v27, %v4302_v8  ;;  %v4319_v17 = vrot.slane %v4317_v32, 5  ;;  %v4637_v43 = vrot.slane %v4568_v55, 5  ;;  %v4876_v63 = vsel %vm10778_vm11, %v4871_v29, %v4875_v18  ;;  %v4812_v48 = vld [vmem:[#allocation2 + $0x34] sm:$0x1]  ;;  %v4813_v18 = vld [vmem:[#allocation2 + $0x38] sm:$0xf] }
 0x275   : > { %v4885_v44 = vrot.slane %v4884_v14, 4  ;;  %v8869_v46 = vrot.slane %v4569_v40, 9  ;;  %v4641_v52 = vrot.slane %v4570_v6, 5  ;;  %v4325_v58 = vrot.slane %v4323_v11, 5  ;;  %v4814_v25 = vld [vmem:[#allocation2 + $0x3c] sm:$0x1] }
 0x276   : > { %5428 = vmatmul.mubr.bf16.gmra.mrb[92].mxu1 %v10225_v45  ;;  %v4307_v10 = vrot.slane %v4306_v19, 4  ;;  %v4320_v20 = vor.u32 %v4319_v17, %v4316_v3  ;;  %v4638_v37 = vsel %vm10767_vm10, %v8868_v4, %v4637_v43  ;;  %v4892_v28 = vshrl.u32 %v4811_v35, 16  ;;  %v4271_v23 = vld [vmem:[#allocation2 + $0x18] sm:$0xf]  ;;  %v4273_v27 = vld [vmem:[#allocation2 + $0x20] sm:$0xf] }
 0x277   : > { %5565 = vmatprep.mubr.bf16.mxu1 %v8882_v54  ;;  %v4890_v15 = vsel %vm10778_vm11, %v4885_v44, %v4889_v39  ;;  %v4642_v12 = vsel %vm10767_vm10, %v8869_v46, %v4641_v52  ;;  %v4895_v60 = vshll.u32 %v4811_v35, 16  ;;  %v4901_v8 = vshll.u32 %v4812_v48, 16  ;;  %v4272_v39 = vld [vmem:[#allocation2 + $0x1c] sm:$0x1]  ;;  %v10324_v40 = vld [vmem:[#allocation7] sm:$0xff]  }
 0x278   : > { %v8899_v38 = vcombine.low %v4876_v63, %v4890_v15  ;;  %v4312_v9 = vsel %vm10778_vm11, %v4307_v10, %v4311_v33  ;;  %v4321_v31 = vrot.slane %v4320_v20, 4  ;;  %v8883_v0 = vcombine.low %v4638_v37, %v4642_v12  ;;  %5663 = vmatmul.mubr.bf16.vlgmr.msra.gmra.mrb[112].mxu0 %v10226_v22  ;;  %v4274_v6 = vld [vmem:[#allocation2 + $0x24] sm:$0x1]  ;;  %v4571_v4 = vld [vmem:[#allocation2 + $0x28] sm:$0xe]  ;;  %v10325_v54 = vld [vmem:[#allocation7 + $0x48] sm:$0xff]  }
 0x279   : > { %v4894_v16 = vrot.slane %v4892_v28, 4  ;;  %v4897_v62 = vrot.slane %v4895_v60, 5  ;;  %v4906_v24 = vshrl.u32 %v4813_v18, 16  ;;  %v4909_v45 = vshll.u32 %v4813_v18, 16  ;;  %9666 = vmatpush3.bf16.msra.mxu0 %v10324_v40  ;;  %v4572_v63 = vld [vmem:[#allocation2 + $0x2c] sm:$0x1] }
 0x27a   : > { %5670 = vmatprep.mubr.bf16.mxu0 %v8899_v38  ;;  %v4326_v55 = vsel %vm10778_vm11, %v4321_v31, %v4325_v58  ;;  %v4915_v29 = vshll.u32 %v4814_v25, 16  ;;  %v4328_v32 = vshrl.u32 %v4271_v23, 16  ;;  %v4903_v3 = vrot.slane %v4901_v8, 5  ;;  %9667 = vmatprep.subr.bf16.mxu0 %v10325_v54  ;;  %v10227_v44 = vld [vmem:[#allocation2 + $0x20] ss:$8 sps:$4 sm:$0xff]   ;;  %v10326_v12 = vld [vmem:[#allocation7 + $0x8] sm:$0xff]  }
 0x27b   : > { %v8858_v33 = vcombine.low %v4312_v9, %v4326_v55  ;;  %v4898_v14 = vor.u32 %v4897_v62, %v4894_v16  ;;  %v4908_v11 = vrot.slane %v4906_v24, 4  ;;  %v4911_v19 = vrot.slane %v4909_v45, 5  ;;  %v4573_v58 = vld [vmem:[#allocation2 + $0x30] sm:$0xe]  ;;  %v4574_v15 = vld [vmem:[#allocation2 + $0x34] sm:$0x1] }
 0x27c   : > { %v4917_v17 = vrot.slane %v4915_v29, 5  ;;  %v4330_v43 = vrot.slane %v4328_v32, 4  ;;  %v4331_v22 = vshll.u32 %v4271_v23, 16  ;;  %v4337_v52 = vshll.u32 %v4272_v39, 16  ;;  %v10327_v23 = vld [vmem:[#allocation7 + $0x208] sm:$0xff]   ;;  %v10328_v62 = vld [vmem:[#allocation7 + $0x50] sm:$0xff]  }
 0x27d   : > { %v4899_v46 = vrot.slane %v4898_v14, 4  ;;  %v4342_v10 = vshrl.u32 %v4273_v27, 16  ;;  %v4345_v20 = vshll.u32 %v4273_v27, 16  ;;  %v4912_v37 = vor.u32 %v4911_v19, %v4908_v11  ;;  %9668 = vmatpush3.bf16.msra.mxu0 %v10326_v12  ;;  %v4815_v39 = vld [vmem:[#allocation2 + $0x40] sm:$0xf]  ;;  %v10330_v54 = vld [vmem:[#allocation7 + $0x58] sm:$0xff]  }
 0x27e   : > { %5566 = vmatmul.mubr.bf16.vlgmr.msra.gmra.mrb[96].mxu1 %v8858_v33  ;;  %v4333_v35 = vrot.slane %v4331_v22, 5  ;;  %v4351_v48 = vshll.u32 %v4274_v6, 16  ;;  %v8870_v60 = vrot.slane %v4571_v4, 9  ;;  %v4339_v31 = vrot.slane %v4337_v52, 5  ;;  %9669 = vmatprep.subr.bf16.mxu0 %v10328_v62  ;;  %v4817_v27 = vld [vmem:[#allocation2 + $0x48] sm:$0xf] }
 0x27f   : > { %5573 = vmatprep.mubr.bf16.mxu1 %v8883_v0  ;;  %9970 = vmatpush3.bf16.msra.mxu1 %v11438_v59  ;;  %v4904_v18 = vsel %vm10778_vm11, %v4899_v46, %v4903_v3  ;;  %v4344_v25 = vrot.slane %v4342_v10, 4  ;;  %v4347_v28 = vrot.slane %v4345_v20, 5  ;;  %v4913_v38 = vrot.slane %v4912_v37, 4  ;;  %v4816_v59 = vld [vmem:[#allocation2 + $0x44] sm:$0x1]  ;;  %v10333_v62 = vld [vmem:[#allocation7 + $0x60] sm:$0xff]  }
 0x280   : > { %v4334_v9 = vor.u32 %v4333_v35, %v4330_v43  ;;  %9971 = vmatprep.subr.bf16.mxu1 %v10327_v23  ;;  %v4645_v16 = vrot.slane %v4572_v63, 5  ;;  %5671 = vmatmul.mubr.bf16.gmra.mrb[116].mxu0 %v10227_v44  ;;  %v8871_v24 = vrot.slane %v4573_v58, 9  ;;  %v4649_v0 = vrot.slane %v4574_v15, 5  ;;  %v10329_v40 = vld [vmem:[#allocation7 + $0x10] sm:$0xff]   ;;  %v4818_v11 = vld [vmem:[#allocation2 + $0x4c] sm:$0x1] }
 0x281   : > { %v4348_v8 = vor.u32 %v4347_v28, %v4344_v25  ;;  %v4918_v55 = vsel %vm10778_vm11, %v4913_v38, %v4917_v17  ;;  %v4353_v29 = vrot.slane %v4351_v48, 5  ;;  %v4920_v32 = vshrl.u32 %v4815_v39, 16  ;;  %9670 = vmatpush3.bf16.msra.mxu0 %v10329_v40  ;;  %v4275_v4 = vld [vmem:[#allocation2 + $0x28] sm:$0xf]  ;;  %v4276_v63 = vld [vmem:[#allocation2 + $0x2c] sm:$0x1] }
 0x282   : > { %v4335_v45 = vrot.slane %v4334_v9, 4  ;;  %v8900_v33 = vcombine.low %v4904_v18, %v4918_v55  ;;  %v4650_v3 = vsel %vm10767_vm10, %v8871_v24, %v4649_v0  ;;  %v4923_v6 = vshll.u32 %v4815_v39, 16  ;;  %9671 = vmatprep.subr.bf16.mxu0 %v10330_v54  ;;  %v10331_v44 = vld [vmem:[#allocation7 + $0x210] sm:$0xff]   ;;  %v10228_v52 = vld [vmem:[#allocation2 + $0x30] ss:$8 sps:$4 sm:$0xff]   ;;  %v10332_v28 = vld [vmem:[#allocation7 + $0x18] sm:$0xff]  }
 0x283   : > { %v4349_v14 = vrot.slane %v4348_v8, 4  ;;  %9972 = vmatpush3.bf16.msra.mxu1 %v10327_v23  ;;  %v4646_v17 = vsel %vm10767_vm10, %v8870_v60, %v4645_v16  ;;  %v4922_v43 = vrot.slane %v4920_v32, 4  ;;  %v4929_v22 = vshll.u32 %v4816_v59, 16  ;;  %v4277_v37 = vld [vmem:[#allocation2 + $0x30] sm:$0xf]  ;;  %v10334_v55 = vld [vmem:[#allocation7 + $0x218] sm:$0xff]  }
 0x284   : > { %v4340_v19 = vsel %vm10778_vm11, %v4335_v45, %v4339_v31  ;;  %9973 = vmatprep.subr.bf16.mxu1 %v10331_v44  ;;  %5678 = vmatprep.mubr.bf16.mxu0 %v8900_v33  ;;  %v4925_v10 = vrot.slane %v4923_v6, 5  ;;  %v4934_v20 = vshrl.u32 %v4817_v27, 16  ;;  %v4937_v58 = vshll.u32 %v4817_v27, 16  ;;  %v4278_v12 = vld [vmem:[#allocation2 + $0x34] sm:$0x1] }
 0x285   : > { %v4354_v46 = vsel %vm10778_vm11, %v4349_v14, %v4353_v29  ;;  %v8884_v48 = vcombine.low %v4646_v17, %v4650_v3  ;;  %v4943_v15 = vshll.u32 %v4818_v11, 16  ;;  %v4356_v18 = vshrl.u32 %v4275_v4, 16  ;;  %v4575_v25 = vld [vmem:[#allocation2 + $0x38] sm:$0xe]  ;;  %9672 = vmatpush3.bf16.msra.mxu0 %v10332_v28  ;;  %v4576_v23 = vld [vmem:[#allocation2 + $0x3c] sm:$0x1] }
 0x286   : > { %v8859_v35 = vcombine.low %v4340_v19, %v4354_v46  ;;  %v4926_v60 = vor.u32 %v4925_v10, %v4922_v43  ;;  %v4936_v38 = vrot.slane %v4934_v20, 4  ;;  %v4939_v9 = vrot.slane %v4937_v58, 5  ;;  %v4577_v16 = vld [vmem:[#allocation2 + $0x40] sm:$0xe]  ;;  %9673 = vmatprep.subr.bf16.mxu0 %v10333_v62  ;;  %v4578_v59 = vld [vmem:[#allocation2 + $0x44] sm:$0x1] }
 0x287   : > { %v4359_v31 = vshll.u32 %v4275_v4, 16  ;;  %9974 = vmatpush3.bf16.msra.mxu1 %v10331_v44  ;;  %v4931_v8 = vrot.slane %v4929_v22, 5  ;;  %v4358_v24 = vrot.slane %v4356_v18, 4  ;;  %v4365_v0 = vshll.u32 %v4276_v63, 16  ;;  %v10335_v11 = vld [vmem:[#allocation7 + $0x20] sm:$0xff]   ;;  %v10336_v43 = vld [vmem:[#allocation7 + $0x68] sm:$0xff]  }
 0x288   : > { %5574 = vmatmul.mubr.bf16.gmra.mrb[100].mxu1 %v8859_v35  ;;  %v4370_v39 = vshrl.u32 %v4277_v37, 16  ;;  %9975 = vmatprep.subr.bf16.mxu1 %v10334_v55  ;;  %v4927_v45 = vrot.slane %v4926_v60, 4  ;;  %v4940_v29 = vor.u32 %v4939_v9, %v4936_v38  ;;  %v4373_v32 = vshll.u32 %v4277_v37, 16  ;;  %v4819_v17 = vld [vmem:[#allocation2 + $0x50] sm:$0xf]  ;;  %v10338_v38 = vld [vmem:[#allocation7 + $0x28] sm:$0xff]  }
 0x289   : > { %5581 = vmatprep.mubr.bf16.mxu1 %v8884_v48  ;;  %5679 = vmatmul.mubr.bf16.gmra.mrb[120].mxu0 %v10228_v52  ;;  %v4361_v27 = vrot.slane %v4359_v31, 5  ;;  %v4945_v40 = vrot.slane %v4943_v15, 5  ;;  %v4379_v14 = vshll.u32 %v4278_v12, 16  ;;  %v8872_v3 = vrot.slane %v4575_v25, 9  ;;  %v10337_v52 = vld [vmem:[#allocation7 + $0x220] sm:$0xff]  }
 0x28a   : > { %v4372_v33 = vrot.slane %v4370_v39, 4  ;;  %9674 = vmatpush3.bf16.msra.mxu0 %v10335_v11  ;;  %v4941_v6 = vrot.slane %v4940_v29, 4  ;;  %v4367_v54 = vrot.slane %v4365_v0, 5  ;;  %v4375_v19 = vrot.slane %v4373_v32, 5  ;;  %v4820_v37 = vld [vmem:[#allocation2 + $0x54] sm:$0x1] }
 0x28b   : > { %v4362_v4 = vor.u32 %v4361_v27, %v4358_v24  ;;  %9976 = vmatpush3.bf16.msra.mxu1 %v10334_v55  ;;  %9675 = vmatprep.subr.bf16.mxu0 %v10336_v43  ;;  %v4932_v22 = vsel %vm10778_vm11, %v4927_v45, %v4931_v8  ;;  %v4653_v63 = vrot.slane %v4576_v23, 5  ;;  %v8873_v44 = vrot.slane %v4577_v16, 9  ;;  %v4821_v35 = vld [vmem:[#allocation2 + $0x58] sm:$0xf]  ;;  %v4822_v25 = vld [vmem:[#allocation2 + $0x5c] sm:$0x1] }
 0x28c   : > { %v4657_v46 = vrot.slane %v4578_v59, 5  ;;  %9977 = vmatprep.subr.bf16.mxu1 %v10337_v52  ;;  %v4946_v10 = vsel %vm10778_vm11, %v4941_v6, %v4945_v40  ;;  %v4376_v58 = vor.u32 %v4375_v19, %v4372_v33  ;;  %v4948_v48 = vshrl.u32 %v4819_v17, 16  ;;  %v4279_v60 = vld [vmem:[#allocation2 + $0x38] sm:$0xf]  ;;  %v10229_v16 = vld [vmem:[#allocation2 + $0x40] ss:$8 sps:$4 sm:$0xff]  }
 0x28d   : > { %v4363_v20 = vrot.slane %v4362_v4, 4  ;;  %v8901_v15 = vcombine.low %v4932_v22, %v4946_v10  ;;  %v4381_v12 = vrot.slane %v4379_v14, 5  ;;  %v4654_v18 = vsel %vm10767_vm10, %v8872_v3, %v4653_v63  ;;  %v4280_v8 = vld [vmem:[#allocation2 + $0x3c] sm:$0x1]  ;;  %v10339_v24 = vld [vmem:[#allocation7 + $0x70] sm:$0xff]  }
 0x28e   : > { %v4951_v28 = vshll.u32 %v4819_v17, 16  ;;  %9676 = vmatpush3.bf16.msra.mxu0 %v10338_v38  ;;  %v4377_v31 = vrot.slane %v4376_v58, 4  ;;  %v4658_v23 = vsel %vm10767_vm10, %v8873_v44, %v4657_v46  ;;  %v4950_v62 = vrot.slane %v4948_v48, 4  ;;  %v4281_v45 = vld [vmem:[#allocation2 + $0x40] sm:$0xf]  ;;  %v10340_v29 = vld [vmem:[#allocation7 + $0x228] sm:$0xff]  }
 0x28f   : > { %v4368_v9 = vsel %vm10778_vm11, %v4363_v20, %v4367_v54  ;;  %9978 = vmatpush3.bf16.msra.mxu1 %v10337_v52  ;;  %9677 = vmatprep.subr.bf16.mxu0 %v10339_v24  ;;  %v4957_v39 = vshll.u32 %v4820_v37, 16  ;;  %v4962_v59 = vshrl.u32 %v4821_v35, 16  ;;  %v4965_v55 = vshll.u32 %v4821_v35, 16  ;;  %v4282_v40 = vld [vmem:[#allocation2 + $0x44] sm:$0x1]  ;;  %v10342_v52 = vld [vmem:[#allocation7 + $0x78] sm:$0xff]  }
 0x290   : > { %5686 = vmatprep.mubr.bf16.mxu0 %v8901_v15  ;;  %v4953_v0 = vrot.slane %v4951_v28, 5  ;;  %9979 = vmatprep.subr.bf16.mxu1 %v10340_v29  ;;  %v4382_v27 = vsel %vm10778_vm11, %v4377_v31, %v4381_v12  ;;  %v4971_v32 = vshll.u32 %v4822_v25, 16  ;;  %v4384_v33 = vshrl.u32 %v4279_v60, 16  ;;  %v4579_v54 = vld [vmem:[#allocation2 + $0x48] sm:$0xe]  ;;  %v10341_v17 = vld [vmem:[#allocation7 + $0x30] sm:$0xff]  }
 0x291   : > { %5687 = vmatmul.mubr.bf16.gmra.mrb[124].mxu0 %v10229_v16  ;;  %v4387_v14 = vshll.u32 %v4279_v60, 16  ;;  %v8860_v3 = vcombine.low %v4368_v9, %v4382_v27  ;;  %v8885_v11 = vcombine.low %v4654_v18, %v4658_v23  ;;  %v4964_v4 = vrot.slane %v4962_v59, 4  ;;  %v4580_v19 = vld [vmem:[#allocation2 + $0x4c] sm:$0x1]  ;;  %v4581_v46 = vld [vmem:[#allocation2 + $0x50] sm:$0xe] }
 0x292   : > { %v4954_v6 = vor.u32 %v4953_v0, %v4950_v62  ;;  %9678 = vmatpush3.bf16.msra.mxu0 %v10341_v17  ;;  %v4959_v43 = vrot.slane %v4957_v39, 5  ;;  %v4967_v22 = vrot.slane %v4965_v55, 5  ;;  %v4386_v63 = vrot.slane %v4384_v33, 4  ;;  %v10343_v35 = vld [vmem:[#allocation7 + $0x230] sm:$0xff]   ;;  %v4582_v25 = vld [vmem:[#allocation2 + $0x54] sm:$0x1] }
 0x293   : > { %v4389_v44 = vrot.slane %v4387_v14, 5  ;;  %9980 = vmatpush3.bf16.msra.mxu1 %v10340_v29  ;;  %9679 = vmatprep.subr.bf16.mxu0 %v10342_v52  ;;  %v4393_v20 = vshll.u32 %v4280_v8, 16  ;;  %v4398_v58 = vshrl.u32 %v4281_v45, 16  ;;  %v4401_v37 = vshll.u32 %v4281_v45, 16  ;;  %v4823_v28 = vld [vmem:[#allocation2 + $0x60] sm:$0xf] }
 0x294   : > { %5582 = vmatmul.mubr.bf16.gmra.mrb[104].mxu1 %v8860_v3  ;;  %v4955_v10 = vrot.slane %v4954_v6, 4  ;;  %9981 = vmatprep.subr.bf16.mxu1 %v10343_v35  ;;  %v4968_v48 = vor.u32 %v4967_v22, %v4964_v4  ;;  %v4973_v15 = vrot.slane %v4971_v32, 5  ;;  %v4407_v18 = vshll.u32 %v4282_v40, 16  ;;  %v10344_v23 = vld [vmem:[#allocation7 + $0x38] sm:$0xff]   ;;  %v4824_v0 = vld [vmem:[#allocation2 + $0x64] sm:$0x1] }
 0x295   : > { %5589 = vmatprep.mubr.bf16.mxu1 %v8885_v11  ;;  %v4390_v12 = vor.u32 %v4389_v44, %v4386_v63  ;;  %v4400_v38 = vrot.slane %v4398_v58, 4  ;;  %v4403_v9 = vrot.slane %v4401_v37, 5  ;;  %v8874_v31 = vrot.slane %v4579_v54, 9  ;;  %v10345_v39 = vld [vmem:[#allocation7 + $0x140] sm:$0xff]   ;;  %v4825_v29 = vld [vmem:[#allocation2 + $0x68] sm:$0xf] }
 0x296   : > { %v4960_v60 = vsel %vm10778_vm11, %v4955_v10, %v4959_v43  ;;  %9680 = vmatpush3.bf16.msra.mxu0 %v10344_v23  ;;  %v4969_v16 = vrot.slane %v4968_v48, 4  ;;  %v4395_v8 = vrot.slane %v4393_v20, 5  ;;  %v4661_v24 = vrot.slane %v4580_v19, 5  ;;  %v10346_v32 = vld [vmem:[#allocation7 + $0x238] sm:$0xff]   ;;  %v10230_v19 = vld [vmem:[#allocation2 + $0x50] ss:$8 sps:$4 sm:$0xff]  }
 0x297   : > { %v4391_v62 = vrot.slane %v4390_v12, 4  ;;  %9982 = vmatpush3.bf16.msra.mxu1 %v10343_v35  ;;  %9793 = vmatprep.subr.bf16.mxu0 %v10345_v39  ;;  %v4404_v59 = vor.u32 %v4403_v9, %v4400_v38  ;;  %v8875_v55 = vrot.slane %v4581_v46, 9  ;;  %v4665_v45 = vrot.slane %v4582_v25, 5  ;;  %v4283_v11 = vld [vmem:[#allocation2 + $0x48] sm:$0xf] }
 0x298   : > { %v4976_v27 = vshrl.u32 %v4823_v28, 16  ;;  %9983 = vmatprep.subr.bf16.mxu1 %v10346_v32  ;;  %v4974_v40 = vsel %vm10778_vm11, %v4969_v16, %v4973_v15  ;;  %v4409_v14 = vrot.slane %v4407_v18, 5  ;;  %v4979_v3 = vshll.u32 %v4823_v28, 16  ;;  %v4826_v17 = vld [vmem:[#allocation2 + $0x6c] sm:$0x1]  ;;  %v10347_v15 = vld [vmem:[#allocation7 + $0xc0] sm:$0xff]  }
 0x299   : > { %v4396_v33 = vsel %vm10778_vm11, %v4391_v62, %v4395_v8  ;;  %v8902_v6 = vcombine.low %v4960_v60, %v4974_v40  ;;  %v4405_v4 = vrot.slane %v4404_v59, 4  ;;  %v4666_v54 = vsel %vm10767_vm10, %v8875_v55, %v4665_v45  ;;  %v4284_v52 = vld [vmem:[#allocation2 + $0x4c] sm:$0x1]  ;;  %v4285_v37 = vld [vmem:[#allocation2 + $0x50] sm:$0xf] }
 0x29a   : > { %v4978_v43 = vrot.slane %v4976_v27, 4  ;;  %v4662_v22 = vsel %vm10767_vm10, %v8874_v31, %v4661_v24  ;;  %v4981_v63 = vrot.slane %v4979_v3, 5  ;;  %v4985_v44 = vshll.u32 %v4824_v0, 16  ;;  %v4286_v35 = vld [vmem:[#allocation2 + $0x54] sm:$0x1] }
 0x29b   : > { %v4990_v46 = vshrl.u32 %v4825_v29, 16  ;;  %9984 = vmatpush3.bf16.msra.mxu1 %v10346_v32  ;;  %5694 = vmatprep.mubr.bf16.mxu0 %v8902_v6  ;;  %v4410_v10 = vsel %vm10778_vm11, %v4405_v4, %v4409_v14  ;;  %v8886_v20 = vcombine.low %v4662_v22, %v4666_v54  ;;  %v4993_v58 = vshll.u32 %v4825_v29, 16  ;;  %v4583_v60 = vld [vmem:[#allocation2 + $0x58] sm:$0xe]  ;;  %v4584_v38 = vld [vmem:[#allocation2 + $0x5c] sm:$0x1] }
 0x29c   : > { %v4412_v48 = vshrl.u32 %v4283_v11, 16  ;;  %9729 = vmatprep.subr.bf16.mxu1 %v10347_v15  ;;  %v8861_v12 = vcombine.low %v4396_v33, %v4410_v10  ;;  %5695 = vmatmul.mubr.bf16.gmra.mrb[128].mxu0 %v10230_v19  ;;  %v4982_v18 = vor.u32 %v4981_v63, %v4978_v43  ;;  %v4999_v28 = vshll.u32 %v4826_v17, 16  ;;  %v4585_v45 = vld [vmem:[#allocation2 + $0x60] sm:$0xe]  ;;  %v4586_v29 = vld [vmem:[#allocation2 + $0x64] sm:$0x1] }
 0x29d   : > { %v4992_v25 = vrot.slane %v4990_v46, 4  ;;  %v4987_v9 = vrot.slane %v4985_v44, 5  ;;  %v4995_v31 = vrot.slane %v4993_v58, 5  ;;  %v4415_v16 = vshll.u32 %v4283_v11, 16  ;;  %v4827_v14 = vld [vmem:[#allocation2 + $0x70] sm:$0xf] }
 0x29e   : > { %v4414_v23 = vrot.slane %v4412_v48, 4  ;;  %5590 = vmatmul.mubr.bf16.gmra.mrb[108].mxu1 %v8861_v12  ;;  %v4983_v62 = vrot.slane %v4982_v18, 4  ;;  %v4421_v8 = vshll.u32 %v4284_v52, 16  ;;  %v4426_v24 = vshrl.u32 %v4285_v37, 16  ;;  %v4828_v22 = vld [vmem:[#allocation2 + $0x74] sm:$0x1] }
 0x29f   : > { %v4429_v0 = vshll.u32 %v4285_v37, 16  ;;  %5597 = vmatprep.mubr.bf16.mxu1 %v8886_v20  ;;  %v4996_v39 = vor.u32 %v4995_v31, %v4992_v25  ;;  %v4417_v59 = vrot.slane %v4415_v16, 5  ;;  %v4435_v55 = vshll.u32 %v4286_v35, 16  ;;  %v4829_v52 = vld [vmem:[#allocation2 + $0x78] sm:$0xf] }
 0x2a0   : > { %v5001_v27 = vrot.slane %v4999_v28, 5  ;;  %v4428_v32 = vrot.slane %v4426_v24, 4  ;;  %v8876_v33 = vrot.slane %v4583_v60, 9  ;;  %v4988_v3 = vsel %vm10778_vm11, %v4983_v62, %v4987_v9  ;;  %v4830_v35 = vld [vmem:[#allocation2 + $0x7c] sm:$0x1] }
 0x2a1   : > { %v4431_v40 = vrot.slane %v4429_v0, 5  ;;  %v4997_v11 = vrot.slane %v4996_v39, 4  ;;  %v4418_v6 = vor.u32 %v4417_v59, %v4414_v23  ;;  %v4669_v4 = vrot.slane %v4584_v38, 5  ;;  %v4287_v15 = vld [vmem:[#allocation2 + $0x58] sm:$0xf] }
 0x2a2   : > { %v4423_v54 = vrot.slane %v4421_v8, 5  ;;  %v8877_v17 = vrot.slane %v4585_v45, 9  ;;  %v4673_v43 = vrot.slane %v4586_v29, 5  ;;  %v4437_v46 = vrot.slane %v4435_v55, 5  ;;  %v10231_v25 = vld [vmem:[#allocation2 + $0x60] ss:$8 sps:$4 sm:$0xff]  }
 0x2a3   : > { %v4432_v19 = vor.u32 %v4431_v40, %v4428_v32  ;;  %v5002_v63 = vsel %vm10778_vm11, %v4997_v11, %v5001_v27  ;;  %v4419_v44 = vrot.slane %v4418_v6, 4  ;;  %v5004_v10 = vshrl.u32 %v4827_v14, 16  ;;  %v4288_v38 = vld [vmem:[#allocation2 + $0x5c] sm:$0x1]  ;;  %v4289_v62 = vld [vmem:[#allocation2 + $0x60] sm:$0xf] }
 0x2a4   : > { %v8903_v20 = vcombine.low %v4988_v3, %v5002_v63  ;;  %v4674_v37 = vsel %vm10767_vm10, %v8877_v17, %v4673_v43  ;;  %v5007_v48 = vshll.u32 %v4827_v14, 16  ;;  %v4670_v18 = vsel %vm10767_vm10, %v8876_v33, %v4669_v4  ;;  %v4290_v39 = vld [vmem:[#allocation2 + $0x64] sm:$0x1]  ;;  %v4587_v32 = vld [vmem:[#allocation2 + $0x68] sm:$0xe] }
 0x2a5   : > { %v4433_v58 = vrot.slane %v4432_v19, 4  ;;  %v4424_v12 = vsel %vm10778_vm11, %v4419_v44, %v4423_v54  ;;  %v5006_v28 = vrot.slane %v5004_v10, 4  ;;  %v5013_v60 = vshll.u32 %v4828_v22, 16  ;;  %v4589_v40 = vld [vmem:[#allocation2 + $0x70] sm:$0xe] }
 0x2a6   : > { %5702 = vmatprep.mubr.bf16.mxu0 %v8903_v20  ;;  %v5009_v31 = vrot.slane %v5007_v48, 5  ;;  %v5018_v23 = vshrl.u32 %v4829_v52, 16  ;;  %v5021_v16 = vshll.u32 %v4829_v52, 16  ;;  %v8887_v24 = vcombine.low %v4670_v18, %v4674_v37  ;;  %v4590_v17 = vld [vmem:[#allocation2 + $0x74] sm:$0x1] }
 0x2a7   : > { %v4438_v9 = vsel %vm10778_vm11, %v4433_v58, %v4437_v46  ;;  %5703 = vmatmul.mubr.bf16.gmra.mrb[132].mxu0 %v10231_v25  ;;  %v5027_v0 = vshll.u32 %v4830_v35, 16  ;;  %v4440_v59 = vshrl.u32 %v4287_v15, 16  ;;  %v4443_v27 = vshll.u32 %v4287_v15, 16  ;;  %v4831_v46 = vld [vmem:[#allocation2 + $0x80] sm:$0xf] }
 0x2a8   : > { %v8862_v8 = vcombine.low %v4424_v12, %v4438_v9  ;;  %v5010_v55 = vor.u32 %v5009_v31, %v5006_v28  ;;  %v5020_v45 = vrot.slane %v5018_v23, 4  ;;  %v5023_v29 = vrot.slane %v5021_v16, 5  ;;  %v4588_v37 = vld [vmem:[#allocation2 + $0x6c] sm:$0x1]  ;;  %v6142_v49 = vld [vmem:[#allocation2 + $0x70] sm:$0xf] }
 0x2a9   : > { %v5015_v33 = vrot.slane %v5013_v60, 5  ;;  %v4442_v14 = vrot.slane %v4440_v59, 4  ;;  %v4449_v3 = vshll.u32 %v4288_v38, 16  ;;  %v4454_v11 = vshrl.u32 %v4289_v62, 16  ;;  %v4832_v60 = vld [vmem:[#allocation2 + $0x84] sm:$0x1] }
 0x2aa   : > { %5598 = vmatmul.mubr.bf16.gmra.mrb[112].mxu1 %v8862_v8  ;;  %v5011_v6 = vrot.slane %v5010_v55, 4  ;;  %v5024_v4 = vor.u32 %v5023_v29, %v5020_v45  ;;  %v4445_v54 = vrot.slane %v4443_v27, 5  ;;  %v4457_v19 = vshll.u32 %v4289_v62, 16  ;;  %v4833_v38 = vld [vmem:[#allocation2 + $0x88] sm:$0xf] }
 0x2ab   : > { %5605 = vmatprep.mubr.bf16.mxu1 %v8887_v24  ;;  %v5029_v43 = vrot.slane %v5027_v0, 5  ;;  %v4451_v22 = vrot.slane %v4449_v3, 5  ;;  %v4456_v63 = vrot.slane %v4454_v11, 4  ;;  %v4463_v44 = vshll.u32 %v4290_v39, 16  ;;  %v4834_v16 = vld [vmem:[#allocation2 + $0x8c] sm:$0x1] }
 0x2ac   : > { %v5016_v52 = vsel %vm10778_vm11, %v5011_v6, %v5015_v33  ;;  %v5025_v10 = vrot.slane %v5024_v4, 4  ;;  %v4446_v20 = vor.u32 %v4445_v54, %v4442_v14  ;;  %v4459_v58 = vrot.slane %v4457_v19, 5  ;;  %v4291_v8 = vld [vmem:[#allocation2 + $0x68] sm:$0xf]  ;;  %v10232_v59 = vld [vmem:[#allocation2 + $0x70] ss:$8 sps:$4 sm:$0xff]  }
 0x2ad   : > { %v4465_v35 = vrot.slane %v4463_v44, 5  ;;  %v8878_v48 = vrot.slane %v4587_v32, 9  ;;  %v8879_v15 = vrot.slane %v4589_v40, 9  ;;  %v4681_v12 = vrot.slane %v4590_v17, 5  ;;  %v4292_v40 = vld [vmem:[#allocation2 + $0x6c] sm:$0x1] }
 0x2ae   : > { %v5030_v18 = vsel %vm10778_vm11, %v5025_v10, %v5029_v43  ;;  %v4447_v25 = vrot.slane %v4446_v20, 4  ;;  %v4460_v28 = vor.u32 %v4459_v58, %v4456_v63  ;;  %v5032_v9 = vshrl.u32 %v4831_v46, 16  ;;  %v4293_v3 = vld [vmem:[#allocation2 + $0x70] sm:$0xf]  ;;  %v4294_v43 = vld [vmem:[#allocation2 + $0x74] sm:$0x1] }
 0x2af   : > { %v8904_v31 = vcombine.low %v5016_v52, %v5030_v18  ;;  %v4677_v23 = vrot.slane %v4588_v37, 5  ;;  %v5035_v62 = vshll.u32 %v4831_v46, 16  ;;  %v4682_v39 = vsel %vm10767_vm10, %v8879_v15, %v4681_v12  ;;  %v4591_v52 = vld [vmem:[#allocation2 + $0x78] sm:$0xe] }
 0x2b0   : > { %v4452_v24 = vsel %vm10778_vm11, %v4447_v25, %v4451_v22  ;;  %v4461_v0 = vrot.slane %v4460_v28, 4  ;;  %v5034_v55 = vrot.slane %v5032_v9, 4  ;;  %v5041_v29 = vshll.u32 %v4832_v60, 16  ;;  %v4295_v28 = vld [vmem:[#allocation2 + $0x78] sm:$0xf] }
 0x2b1   : > { %5710 = vmatprep.mubr.bf16.mxu0 %v8904_v31  ;;  %v5037_v45 = vrot.slane %v5035_v62, 5  ;;  %v5046_v27 = vshrl.u32 %v4833_v38, 16  ;;  %v5049_v32 = vshll.u32 %v4833_v38, 16  ;;  %v5055_v14 = vshll.u32 %v4834_v16, 16  ;;  %v4592_v31 = vld [vmem:[#allocation2 + $0x7c] sm:$0x1] }
 0x2b2   : > { %v4466_v33 = vsel %vm10778_vm11, %v4461_v0, %v4465_v35  ;;  %5711 = vmatmul.mubr.bf16.gmra.mrb[136].mxu0 %v10232_v59  ;;  %v4468_v11 = vshrl.u32 %v4291_v8, 16  ;;  %v4471_v6 = vshll.u32 %v4291_v8, 16  ;;  %v4678_v54 = vsel %vm10767_vm10, %v8878_v48, %v4677_v23  ;;  %v4593_v35 = vld [vmem:[#allocation2 + $0x80] sm:$0xe]  ;;  %v4594_v48 = vld [vmem:[#allocation2 + $0x84] sm:$0x1] }
 0x2b3   : > { %v8863_v4 = vcombine.low %v4452_v24, %v4466_v33  ;;  %v5038_v19 = vor.u32 %v5037_v45, %v5034_v55  ;;  %v5048_v17 = vrot.slane %v5046_v27, 4  ;;  %v8888_v22 = vcombine.low %v4678_v54, %v4682_v39  ;;  %v4297_v59 = vld [vmem:[#allocation2 + $0x80] sm:$0xf]  ;;  %v4298_v54 = vld [vmem:[#allocation2 + $0x84] sm:$0x1] }
 0x2b4   : > { %v5051_v63 = vrot.slane %v5049_v32, 5  ;;  %v4470_v44 = vrot.slane %v4468_v11, 4  ;;  %v4473_v46 = vrot.slane %v4471_v6, 5  ;;  %v5043_v20 = vrot.slane %v5041_v29, 5 }
 0x2b5   : > { %5606 = vmatmul.mubr.bf16.gmra.mrb[116].mxu1 %v8863_v4  ;;  %v5039_v10 = vrot.slane %v5038_v19, 4  ;;  %v4482_v58 = vshrl.u32 %v4293_v3, 16  ;;  %v4485_v37 = vshll.u32 %v4293_v3, 16  ;;  %v5057_v12 = vrot.slane %v5055_v14, 5  ;;  %v10233_v3 = vld [vmem:[#allocation2 + $0x80] ss:$8 sps:$4 sm:$0xff]  }
 0x2b6   : > { %5613 = vmatprep.mubr.bf16.mxu1 %v8888_v22  ;;  %v5052_v15 = vor.u32 %v5051_v63, %v5048_v17  ;;  %v4474_v18 = vor.u32 %v4473_v46, %v4470_v44  ;;  %v4477_v25 = vshll.u32 %v4292_v40, 16  ;;  %v4491_v9 = vshll.u32 %v4294_v43, 16  ;;  %v4296_v4 = vld [vmem:[#allocation2 + $0x7c] sm:$0x1]  ;;  %v5099_v44 = vld [vmem:[#allocation2 + $0x10] sm:$0xe] }
 0x2b7   : > { %v4484_v60 = vrot.slane %v4482_v58, 4  ;;  %v4487_v38 = vrot.slane %v4485_v37, 5  ;;  %v5044_v23 = vsel %vm10778_vm11, %v5039_v10, %v5043_v20  ;;  %v8880_v8 = vrot.slane %v4591_v52, 9  ;;  %v5100_v46 = vld [vmem:[#allocation2 + $0x14] sm:$0x1] }
 0x2b8   : > { %v5053_v16 = vrot.slane %v5052_v15, 4  ;;  %v4475_v62 = vrot.slane %v4474_v18, 4  ;;  %v8881_v0 = vrot.slane %v4593_v35, 9  ;;  %v4689_v39 = vrot.slane %v4594_v48, 5  ;;  %v5101_v37 = vld [vmem:[#allocation2 + $0x18] sm:$0xe] }
 0x2b9   : > { %v4488_v24 = vor.u32 %v4487_v38, %v4484_v60  ;;  %v4496_v55 = vshrl.u32 %v4295_v28, 16  ;;  %v4479_v29 = vrot.slane %v4477_v25, 5  ;;  %v4685_v27 = vrot.slane %v4592_v31, 5  ;;  %v5102_v25 = vld [vmem:[#allocation2 + $0x1c] sm:$0x1] }
 0x2ba   : > { %v5058_v45 = vsel %vm10778_vm11, %v5053_v16, %v5057_v12  ;;  %v4499_v32 = vshll.u32 %v4295_v28, 16  ;;  %v4493_v14 = vrot.slane %v4491_v9, 5  ;;  %v4690_v6 = vsel %vm10767_vm10, %v8881_v0, %v4689_v39  ;;  %v5106_v0 = vld [vmem:[#allocation2 + $0x2c] sm:$0x1] }
 0x2bb   : > { %v8905_v40 = vcombine.low %v5044_v23, %v5058_v45  ;;  %v4489_v33 = vrot.slane %v4488_v24, 4  ;;  %v4498_v11 = vrot.slane %v4496_v55, 4  ;;  %v4510_v17 = vshrl.u32 %v4297_v59, 16  ;;  %v5105_v24 = vld [vmem:[#allocation2 + $0x28] sm:$0xe] }
 0x2bc   : > { %v4501_v19 = vrot.slane %v4499_v32, 5  ;;  %v4480_v43 = vsel %vm10778_vm11, %v4475_v62, %v4479_v29  ;;  %v4513_v63 = vshll.u32 %v4297_v59, 16  ;;  %v4686_v10 = vsel %vm10767_vm10, %v8880_v8, %v4685_v27  ;;  %v5107_v55 = vld [vmem:[#allocation2 + $0x30] sm:$0xe]  ;;  %v5108_v45 = vld [vmem:[#allocation2 + $0x34] sm:$0x1] }
 0x2bd   : > { %5718 = vmatprep.mubr.bf16.mxu0 %v8905_v40  ;;  %v4494_v22 = vsel %vm10778_vm11, %v4489_v33, %v4493_v14  ;;  %v4512_v58 = vrot.slane %v4510_v17, 4  ;;  %v8889_v35 = vcombine.low %v4686_v10, %v4690_v6  ;;  %v4505_v15 = vshll.u32 %v4296_v4, 16  ;;  %v5103_v32 = vld [vmem:[#allocation2 + $0x20] sm:$0xe]  ;;  %v5104_v40 = vld [vmem:[#allocation2 + $0x24] sm:$0x1] }
 0x2be   : > { %v8864_v52 = vcombine.low %v4480_v43, %v4494_v22  ;;  %5719 = vmatmul.mubr.bf16.gmra.mrb[140].mxu0 %v10233_v3  ;;  %v4502_v20 = vor.u32 %v4501_v19, %v4498_v11  ;;  %v4515_v12 = vrot.slane %v4513_v63, 5  ;;  %v4519_v18 = vshll.u32 %v4298_v54, 16  ;;  %v5109_v11 = vld [vmem:[#allocation2 + $0x38] sm:$0xe]  ;;  %v5110_v6 = vld [vmem:[#allocation2 + $0x3c] sm:$0x1] }
 0x2bf   : > { %v8906_v48 = vrot.slane %v5099_v44, 9  ;;  %v5165_v28 = vrot.slane %v5100_v46, 5  ;;  %v8907_v9 = vrot.slane %v5101_v37, 9  ;;  %v5169_v31 = vrot.slane %v5102_v25, 5  ;;  %v5113_v46 = vld [vmem:[#allocation2 + $0x48] sm:$0xe] }
 0x2c0   : > { %5614 = vmatmul.mubr.bf16.gmra.mrb[120].mxu1 %v8864_v52  ;;  %v4503_v60 = vrot.slane %v4502_v20, 4  ;;  %v4516_v38 = vor.u32 %v4515_v12, %v4512_v58  ;;  %v4507_v23 = vrot.slane %v4505_v15, 5  ;;  %v4521_v62 = vrot.slane %v4519_v18, 5  ;;  %v5114_v52 = vld [vmem:[#allocation2 + $0x4c] sm:$0x1] }
 0x2c1   : > { %5621 = vmatprep.mubr.bf16.mxu1 %v8889_v35  ;;  %v5166_v8 = vsel %vm10767_vm10, %v8906_v48, %v5165_v28  ;;  %v5170_v27 = vsel %vm10767_vm10, %v8907_v9, %v5169_v31  ;;  %v8909_v14 = vrot.slane %v5105_v24, 9  ;;  %v5177_v3 = vrot.slane %v5106_v0, 5  ;;  %v5115_v20 = vld [vmem:[#allocation2 + $0x50] sm:$0xe]  ;;  %v5116_v58 = vld [vmem:[#allocation2 + $0x54] sm:$0x1] }
 0x2c2   : > { %v4517_v16 = vrot.slane %v4516_v38, 4  ;;  %v4508_v39 = vsel %vm10778_vm11, %v4503_v60, %v4507_v23  ;;  %v8922_v33 = vcombine.low %v5166_v8, %v5170_v27  ;;  %v8910_v4 = vrot.slane %v5107_v55, 9  ;;  %v5111_v15 = vld [vmem:[#allocation2 + $0x40] sm:$0xe]  ;;  %v5112_v12 = vld [vmem:[#allocation2 + $0x44] sm:$0x1] }
 0x2c3   : > { %v5181_v54 = vrot.slane %v5108_v45, 5  ;;  %v8908_v19 = vrot.slane %v5103_v32, 9  ;;  %v5173_v17 = vrot.slane %v5104_v40, 5  ;;  %v8911_v43 = vrot.slane %v5109_v11, 9  ;;  %v5117_v28 = vld [vmem:[#allocation2 + $0x58] sm:$0xe] }
 0x2c4   : > { %v4522_v59 = vsel %vm10778_vm11, %v4517_v16, %v4521_v62  ;;  %v5185_v22 = vrot.slane %v5110_v6, 5  ;;  %v5178_v63 = vsel %vm10767_vm10, %v8909_v14, %v5177_v3  ;;  %v8913_v25 = vrot.slane %v5113_v46, 9  ;;  %v5118_v60 = vld [vmem:[#allocation2 + $0x5c] sm:$0x1]  ;;  %v10348_v16 = vld [vmem:[#allocation7 + $0x80] sm:$0xff]   ;;  %v10351_v11 = vld [vmem:[#allocation7 + $0xd0] sm:$0xff]  }
 0x2c5   : > { %v8865_v29 = vcombine.low %v4508_v39, %v4522_v59  ;;  %v5182_v44 = vsel %vm10767_vm10, %v8910_v4, %v5181_v54  ;;  %v5174_v10 = vsel %vm10767_vm10, %v8908_v19, %v5173_v17  ;;  %v5193_v48 = vrot.slane %v5114_v52, 5  ;;  %v10349_v24 = vld [vmem:[#allocation7 + $0xc8] sm:$0xff]   ;;  %v5121_v59 = vld [vmem:[#allocation2 + $0x68] sm:$0xe]  ;;  %v5122_v55 = vld [vmem:[#allocation2 + $0x6c] sm:$0x1] }
 0x2c6   : > { %v8923_v37 = vcombine.low %v5174_v10, %v5178_v63  ;;  %v5186_v35 = vsel %vm10767_vm10, %v8911_v43, %v5185_v22  ;;  %v8914_v38 = vrot.slane %v5115_v20, 9  ;;  %v5197_v9 = vrot.slane %v5116_v58, 5  ;;  %v5124_v27 = vld [vmem:[#allocation2 + $0x74] sm:$0x1]  ;;  %v10350_v32 = vld [vmem:[#allocation7 + $0x88] sm:$0xff]   ;;  %v10352_v46 = vld [vmem:[#allocation7 + $0x90] sm:$0xff]  }
 0x2c7   : > { %v8924_v18 = vcombine.low %v5182_v44, %v5186_v35  ;;  %v8912_v31 = vrot.slane %v5111_v15, 9  ;;  %v5189_v23 = vrot.slane %v5112_v12, 5  ;;  %v8915_v62 = vrot.slane %v5117_v28, 9  ;;  %v5119_v14 = vld [vmem:[#allocation2 + $0x60] sm:$0xe]  ;;  %v10353_v20 = vld [vmem:[#allocation7 + $0xd8] sm:$0xff]  }
 0x2c8   : > { %5622 = vmatmul.mubr.bf16.gmra.mrb[124].mxu1 %v8865_v29  ;;  %v5201_v8 = vrot.slane %v5118_v60, 5  ;;  %v5194_v0 = vsel %vm10767_vm10, %v8913_v25, %v5193_v48  ;;  %v5198_v39 = vsel %vm10767_vm10, %v8914_v38, %v5197_v9  ;;  %v5123_v29 = vld [vmem:[#allocation2 + $0x70] sm:$0xe]  ;;  %v5120_v3 = vld [vmem:[#allocation2 + $0x64] sm:$0x1]  ;;  %v8917_v4 = vrot.slane %v5121_v59, 9 }
 0x2c9   : > { %9985 = vmatprep.mubr.bf16.mxu1 %v8922_v33  ;;  %v5190_v45 = vsel %vm10767_vm10, %v8912_v31, %v5189_v23  ;;  %v5209_v54 = vrot.slane %v5122_v55, 5  ;;  %v5125_v19 = vld [vmem:[#allocation2 + $0x78] sm:$0xe]  ;;  %v5126_v17 = vld [vmem:[#allocation2 + $0x7c] sm:$0x1]  ;;  %v8918_v43 = vrot.slane %v5123_v29, 9 }
 0x2ca   : > { %v8925_v40 = vcombine.low %v5190_v45, %v5194_v0  ;;  %v5202_v33 = vsel %vm10767_vm10, %v8915_v62, %v5201_v8  ;;  %v5213_v22 = vrot.slane %v5124_v27, 5  ;;  %v8916_v63 = vrot.slane %v5119_v14, 9  ;;  %v5128_v15 = vld [vmem:[#allocation2 + $0x84] sm:$0x1]  ;;  %v5129_v12 = vld [vmem:[#allocation2 + $0x88] sm:$0xe] }
 0x2cb   : > { %v8926_v6 = vcombine.low %v5198_v39, %v5202_v33  ;;  %v5205_v44 = vrot.slane %v5120_v3, 5  ;;  %v8919_v52 = vrot.slane %v5125_v19, 9  ;;  %v5217_v10 = vrot.slane %v5126_v17, 5  ;;  %v10354_v48 = vld [vmem:[#allocation7 + $0x98] sm:$0xff]   ;;  %v10355_v9 = vld [vmem:[#allocation7 + $0xe0] sm:$0xff]   ;;  %v10358_v59 = vld [vmem:[#allocation7 + $0xa8] sm:$0xff]  }
 0x2cc   : > { %v5210_v58 = vsel %vm10767_vm10, %v8917_v4, %v5209_v54  ;;  %v5214_v35 = vsel %vm10767_vm10, %v8918_v43, %v5213_v22  ;;  %v5221_v23 = vrot.slane %v5128_v15, 5  ;;  %v10356_v8 = vld [vmem:[#allocation7 + $0xa0] sm:$0xff]   ;;  %v10359_v45 = vld [vmem:[#allocation7 + $0xf0] sm:$0xff]   ;;  %v10361_v27 = vld [vmem:[#allocation7 + $0xf8] sm:$0xff]  }
 0x2cd   : > { %v5206_v25 = vsel %vm10767_vm10, %v8916_v63, %v5205_v44  ;;  %v5218_v60 = vsel %vm10767_vm10, %v8919_v52, %v5217_v10  ;;  %v10360_v29 = vld [vmem:[#allocation7 + $0xb0] sm:$0xff]  }
 0x2ce   : > { %v8927_v28 = vcombine.low %v5206_v25, %v5210_v58  ;;  %v8928_v31 = vcombine.low %v5214_v35, %v5218_v60  ;;  %v11591_v44 = vld [vmem:[%s12536_s2] ss:$0 sm:$0xff] }
 0x2d0   : > { %9986 = vmatmul.mubr.bf16.vlgmr.msra.gmra.mrb[128].mxu1 %v8923_v37  ;;  %v5127_v37 = vld [vmem:[#allocation2 + $0x80] sm:$0xe] }
 0x2d1   : > { %9989 = vmatprep.mubr.bf16.mxu1 %v8924_v18  ;;  %9730 = vmatpush3.bf16.msra.mxu1 %v10348_v16  ;;  %v5130_v18 = vld [vmem:[#allocation2 + $0x8c] sm:$0x1]  ;;  %v8920_v38 = vrot.slane %v5127_v37, 9  ;;  %v8921_v16 = vrot.slane %v5129_v12, 9 }
 0x2d2   : > { %9731 = vmatprep.subr.bf16.mxu1 %v10349_v24  ;;  %v5225_v62 = vrot.slane %v5130_v18, 5  ;;  %v10357_v24 = vld [vmem:[#allocation7 + $0xe8] sm:$0xff]  }
 0x2d3   : > { %v5222_v0 = vsel %vm10767_vm10, %v8920_v38, %v5221_v23 }
 0x2d4   : > { %v5226_v39 = vsel %vm10767_vm10, %v8921_v16, %v5225_v62 }
 0x2d5   : > { %9732 = vmatpush3.bf16.msra.mxu1 %v10350_v32  ;;  %v8929_v55 = vcombine.low %v5222_v0, %v5226_v39  ;;  %v10362_v32 = vld [vmem:[#allocation7 + $0xb8] sm:$0xff]  }
 0x2d6   : > { %9733 = vmatprep.subr.bf16.mxu1 %v10351_v11 }
 0x2d8   : > { %9990 = vmatmul.mubr.bf16.gmra.mrb[132].mxu1 %v8925_v40  ;;  %v10363_v40 = vld [vmem:[#allocation7 + $0x1c0] sm:$0xff]  }
 0x2d9   : > { %9993 = vmatprep.mubr.bf16.mxu1 %v8926_v6  ;;  %9734 = vmatpush3.bf16.msra.mxu1 %v10352_v46 }
 0x2da   : > { %9735 = vmatprep.subr.bf16.mxu1 %v10353_v20 }
 0x2dd   : > { %9736 = vmatpush3.bf16.msra.mxu1 %v10354_v48 }
 0x2de   : > { %9737 = vmatprep.subr.bf16.mxu1 %v10355_v9 }
 0x2e0   : > { %9994 = vmatmul.mubr.bf16.gmra.mrb[136].mxu1 %v8927_v28 }
 0x2e1   : > { %9997 = vmatprep.mubr.bf16.mxu1 %v8928_v31  ;;  %9738 = vmatpush3.bf16.msra.mxu1 %v10356_v8 }
 0x2e2   : > { %9739 = vmatprep.subr.bf16.mxu1 %v10357_v24 }
 0x2e5   : > { %9740 = vmatpush3.bf16.msra.mxu1 %v10358_v59 }
 0x2e6   : > { %9741 = vmatprep.subr.bf16.mxu1 %v10359_v45 }
 0x2e8   : > { %9998 = vmatmul.mubr.bf16.gmra.mrb[140].mxu1 %v8929_v55 }
 0x2e9   : > { %9742 = vmatpush3.bf16.msra.mxu1 %v10360_v29 }
 0x2ea   : > { %9743 = vmatprep.subr.bf16.mxu1 %v10361_v27 }
 0x2ed   : > { %9744 = vmatpush3.bf16.msra.mxu1 %v10362_v32 }
 0x2ee   : > { %9857 = vmatprep.subr.bf16.mxu1 %v10363_v40 }
 0x301   : > { %v9473_v33 = vpop.f32.mrb[80].mxu0 }
 0x302   : > { %v9474_v14 = vpop.f32.mrb[81].mxu0 }
 0x303   : > { %v9475_v3 = vadd.f32 %v9474_v14, %v9473_v33  ;;  %v9476_v11 = vpop.f32.mrb[82].mxu0 }
 0x304   : > { %v9477_v6 = vpop.f32.mrb[83].mxu0 }
 0x305   : > { %v9478_v4 = vadd.f32 %v9477_v6, %v9476_v11 }
 0x30f   : > { %v9409_v54 = vpop.f32.mrb[64].mxu1 }
 0x310   : > { %v9410_v19 = vpop.f32.mrb[65].mxu1 }
 0x311   : > { %v9411_v17 = vadd.f32 %v9410_v19, %v9409_v54  ;;  %v9412_v43 = vpop.f32.mrb[66].mxu1 }
 0x312   : > { %v9479_v22 = vpop.f32.mrb[84].mxu0  ;;  %v9413_v63 = vpop.f32.mrb[67].mxu1 }
 0x313   : > { %v5374_v46 = vadd.f32 %v11591_v44, %v9411_v17  ;;  %v9480_v52 = vpop.f32.mrb[85].mxu0  ;;  %v9414_v10 = vadd.f32 %v9413_v63, %v9412_v43 }
 0x314   : > { %v9481_v20 = vadd.f32 %v9480_v52, %v9479_v22  ;;  %v9482_v58 = vpop.f32.mrb[86].mxu0 }
 0x315   : > { %v5377_v37 = vadd.f32 %v11591_v44, %v9414_v10  ;;  %v9483_v35 = vpop.f32.mrb[87].mxu0  ;;  %v11595_v15 = vadd.f32 %v9475_v3, %v5374_v46 }
 0x316   : > { %v9484_v12 = vadd.f32 %v9483_v35, %v9482_v58 }
 0x317   : > { %v9415_v18 = vpop.f32.mrb[68].mxu1  ;;  %v11597_v25 = vadd.f32 %v9478_v4, %v5377_v37 }
 0x318   : > { %v9416_v48 = vpop.f32.mrb[69].mxu1 }
 0x319   : > { %v9417_v28 = vadd.f32 %v9416_v48, %v9415_v18  ;;  %v9418_v60 = vpop.f32.mrb[70].mxu1 }
 0x31a   : > { %v9485_v38 = vpop.f32.mrb[88].mxu0  ;;  %v9419_v9 = vpop.f32.mrb[71].mxu1 }
 0x31b   : > { %v5382_v31 = vadd.f32 %v11591_v44, %v9417_v28  ;;  %v9486_v23 = vpop.f32.mrb[89].mxu0  ;;  %v9420_v16 = vadd.f32 %v9419_v9, %v9418_v60 }
 0x31c   : > { %v9487_v62 = vadd.f32 %v9486_v23, %v9485_v38  ;;  %v9488_v8 = vpop.f32.mrb[90].mxu0 }
 0x31d   : > { %v5385_v24 = vadd.f32 %v11591_v44, %v9420_v16  ;;  %v9489_v0 = vpop.f32.mrb[91].mxu0  ;;  %v11601_v39 = vadd.f32 %v9481_v20, %v5382_v31 }
 0x31e   : > { %v9490_v59 = vadd.f32 %v9489_v0, %v9488_v8 }
 0x31f   : > { %v9421_v55 = vpop.f32.mrb[72].mxu1  ;;  %v11603_v45 = vadd.f32 %v9484_v12, %v5385_v24 }
 0x320   : > { %v9422_v29 = vpop.f32.mrb[73].mxu1 }
 0x321   : > { %v9423_v27 = vadd.f32 %v9422_v29, %v9421_v55  ;;  %v9424_v32 = vpop.f32.mrb[74].mxu1 }
 0x322   : > { %v9491_v40 = vpop.f32.mrb[92].mxu0  ;;  %v9425_v33 = vpop.f32.mrb[75].mxu1 }
 0x323   : > { %v5390_v14 = vadd.f32 %v11591_v44, %v9423_v27  ;;  %v9492_v3 = vpop.f32.mrb[93].mxu0  ;;  %v9426_v11 = vadd.f32 %v9425_v33, %v9424_v32 }
 0x324   : > { %v9493_v6 = vadd.f32 %v9492_v3, %v9491_v40  ;;  %v9494_v4 = vpop.f32.mrb[94].mxu0 }
 0x325   : > { %v5393_v54 = vadd.f32 %v11591_v44, %v9426_v11  ;;  %v9495_v19 = vpop.f32.mrb[95].mxu0  ;;  %v11607_v17 = vadd.f32 %v9487_v62, %v5390_v14 }
 0x326   : > { %v9496_v43 = vadd.f32 %v9495_v19, %v9494_v4 }
 0x327   : > { %v11609_v63 = vadd.f32 %v9490_v59, %v5393_v54 }
 0x329   : > { %v9427_v22 = vpop.f32.mrb[76].mxu1 }
 0x32a   : > { %v9428_v46 = vpop.f32.mrb[77].mxu1  ;;  %v9497_v20 = vpop.f32.mrb[96].mxu0 }
 0x32b   : > { %v9429_v52 = vadd.f32 %v9428_v46, %v9427_v22  ;;  %v9430_v10 = vpop.f32.mrb[78].mxu1  ;;  %v9498_v35 = vpop.f32.mrb[97].mxu0 }
 0x32c   : > { %v9431_v58 = vpop.f32.mrb[79].mxu1  ;;  %v9499_v18 = vadd.f32 %v9498_v35, %v9497_v20  ;;  %v9500_v48 = vpop.f32.mrb[98].mxu0 }
 0x32d   : > { %v5398_v37 = vadd.f32 %v11591_v44, %v9429_v52  ;;  %v9432_v12 = vadd.f32 %v9431_v58, %v9430_v10  ;;  %v9501_v60 = vpop.f32.mrb[99].mxu0 }
 0x32e   : > { %v9502_v9 = vadd.f32 %v9501_v60, %v9500_v48 }
 0x32f   : > { %v5401_v28 = vadd.f32 %v11591_v44, %v9432_v12  ;;  %v11613_v38 = vadd.f32 %v9493_v6, %v5398_v37 }
 0x331   : > { %v9433_v31 = vpop.f32.mrb[80].mxu1  ;;  %v11615_v23 = vadd.f32 %v9496_v43, %v5401_v28 }
 0x332   : > { %v9434_v16 = vpop.f32.mrb[81].mxu1 }
 0x333   : > { %v9435_v62 = vadd.f32 %v9434_v16, %v9433_v31  ;;  %v9436_v8 = vpop.f32.mrb[82].mxu1  ;;  %v9503_v24 = vpop.f32.mrb[100].mxu0 }
 0x334   : > { %v9437_v0 = vpop.f32.mrb[83].mxu1  ;;  %v9504_v55 = vpop.f32.mrb[101].mxu0 }
 0x335   : > { %v5406_v59 = vadd.f32 %v11591_v44, %v9435_v62  ;;  %v9438_v29 = vadd.f32 %v9437_v0, %v9436_v8  ;;  %v9505_v27 = vadd.f32 %v9504_v55, %v9503_v24  ;;  %v9506_v32 = vpop.f32.mrb[102].mxu0 }
 0x336   : > { %v9507_v33 = vpop.f32.mrb[103].mxu0 }
 0x337   : > { %v5409_v40 = vadd.f32 %v11591_v44, %v9438_v29  ;;  %v11619_v14 = vadd.f32 %v9499_v18, %v5406_v59  ;;  %v9508_v3 = vadd.f32 %v9507_v33, %v9506_v32 }
 0x339   : > { %v9439_v11 = vpop.f32.mrb[84].mxu1  ;;  %v11621_v6 = vadd.f32 %v9502_v9, %v5409_v40 }
 0x33a   : > { %v9440_v4 = vpop.f32.mrb[85].mxu1 }
 0x33b   : > { %v9441_v54 = vadd.f32 %v9440_v4, %v9439_v11  ;;  %v9442_v19 = vpop.f32.mrb[86].mxu1  ;;  %v9509_v43 = vpop.f32.mrb[104].mxu0 }
 0x33c   : > { %v9443_v22 = vpop.f32.mrb[87].mxu1  ;;  %v9510_v52 = vpop.f32.mrb[105].mxu0 }
 0x33d   : > { %v5414_v46 = vadd.f32 %v11591_v44, %v9441_v54  ;;  %v9444_v10 = vadd.f32 %v9443_v22, %v9442_v19  ;;  %v9511_v20 = vadd.f32 %v9510_v52, %v9509_v43  ;;  %v9512_v58 = vpop.f32.mrb[106].mxu0 }
 0x33e   : > { %v9513_v35 = vpop.f32.mrb[107].mxu0 }
 0x33f   : > { %v5417_v37 = vadd.f32 %v11591_v44, %v9444_v10  ;;  %v11625_v12 = vadd.f32 %v9505_v27, %v5414_v46  ;;  %v9514_v18 = vadd.f32 %v9513_v35, %v9512_v58 }
 0x341   : > { %v9445_v48 = vpop.f32.mrb[88].mxu1  ;;  %v11627_v28 = vadd.f32 %v9508_v3, %v5417_v37 }
 0x342   : > { %v9446_v60 = vpop.f32.mrb[89].mxu1 }
 0x343   : > { %v9447_v9 = vadd.f32 %v9446_v60, %v9445_v48  ;;  %v9448_v31 = vpop.f32.mrb[90].mxu1  ;;  %v9515_v16 = vpop.f32.mrb[108].mxu0 }
 0x344   : > { %v9449_v62 = vpop.f32.mrb[91].mxu1  ;;  %v9516_v24 = vpop.f32.mrb[109].mxu0 }
 0x345   : > { %v5422_v8 = vadd.f32 %v11591_v44, %v9447_v9  ;;  %v9450_v0 = vadd.f32 %v9449_v62, %v9448_v31  ;;  %v9517_v59 = vadd.f32 %v9516_v24, %v9515_v16  ;;  %v9518_v55 = vpop.f32.mrb[110].mxu0 }
 0x346   : > { %v9519_v32 = vpop.f32.mrb[111].mxu0 }
 0x347   : > { %v5425_v29 = vadd.f32 %v11591_v44, %v9450_v0  ;;  %v11631_v27 = vadd.f32 %v9511_v20, %v5422_v8  ;;  %v9520_v40 = vadd.f32 %v9519_v32, %v9518_v55 }
 0x349   : > { %v9451_v33 = vpop.f32.mrb[92].mxu1  ;;  %v11633_v3 = vadd.f32 %v9514_v18, %v5425_v29 }
 0x34a   : > { %v9452_v11 = vpop.f32.mrb[93].mxu1 }
 0x34b   : > { %v9453_v4 = vadd.f32 %v9452_v11, %v9451_v33  ;;  %v9454_v54 = vpop.f32.mrb[94].mxu1  ;;  %v9601_v19 = vpop.f32.mrb[112].mxu0 }
 0x34c   : > { %v9455_v43 = vpop.f32.mrb[95].mxu1  ;;  %v9602_v46 = vpop.f32.mrb[113].mxu0 }
 0x34d   : > { %v5430_v22 = vadd.f32 %v11591_v44, %v9453_v4  ;;  %v9456_v52 = vadd.f32 %v9455_v43, %v9454_v54  ;;  %v9603_v10 = vadd.f32 %v9602_v46, %v9601_v19  ;;  %v9604_v58 = vpop.f32.mrb[114].mxu0 }
 0x34e   : > { %v9605_v35 = vpop.f32.mrb[115].mxu0 }
 0x34f   : > { %v5433_v37 = vadd.f32 %v11591_v44, %v9456_v52  ;;  %v11637_v20 = vadd.f32 %v9517_v59, %v5430_v22  ;;  %v9606_v48 = vadd.f32 %v9605_v35, %v9604_v58 }
 0x351   : > { %v9537_v60 = vpop.f32.mrb[96].mxu1  ;;  %v11639_v18 = vadd.f32 %v9520_v40, %v5433_v37 }
 0x352   : > { %v9538_v9 = vpop.f32.mrb[97].mxu1 }
 0x353   : > { %v9539_v31 = vadd.f32 %v9538_v9, %v9537_v60  ;;  %v9540_v16 = vpop.f32.mrb[98].mxu1  ;;  %v9607_v62 = vpop.f32.mrb[116].mxu0 }
 0x354   : > { %v9541_v8 = vpop.f32.mrb[99].mxu1  ;;  %v9608_v0 = vpop.f32.mrb[117].mxu0 }
 0x355   : > { %v5568_v24 = vadd.f32 %v9539_v31, %v11595_v15  ;;  %v9542_v55 = vadd.f32 %v9541_v8, %v9540_v16  ;;  %v9609_v29 = vadd.f32 %v9608_v0, %v9607_v62  ;;  %v9610_v32 = vpop.f32.mrb[118].mxu0 }
 0x356   : > { %v9611_v33 = vpop.f32.mrb[119].mxu0 }
 0x357   : > { %v5571_v44 = vadd.f32 %v9542_v55, %v11597_v25  ;;  %v11643_v59 = vadd.f32 %v9603_v10, %v5568_v24  ;;  %v9612_v11 = vadd.f32 %v9611_v33, %v9610_v32 }
 0x359   : > { %v11645_v4 = vadd.f32 %v9606_v48, %v5571_v44 }
 0x35b   : > { %v9543_v40 = vpop.f32.mrb[100].mxu1 }
 0x35c   : > { %v9544_v54 = vpop.f32.mrb[101].mxu1  ;;  %v9613_v19 = vpop.f32.mrb[120].mxu0 }
 0x35d   : > { %v9545_v43 = vadd.f32 %v9544_v54, %v9543_v40  ;;  %v9546_v22 = vpop.f32.mrb[102].mxu1  ;;  %v9614_v46 = vpop.f32.mrb[121].mxu0 }
 0x35e   : > { %v9615_v52 = vadd.f32 %v9614_v46, %v9613_v19  ;;  %v9547_v15 = vpop.f32.mrb[103].mxu1  ;;  %v9616_v58 = vpop.f32.mrb[122].mxu0 }
 0x35f   : > { %v5576_v37 = vadd.f32 %v9545_v43, %v11601_v39  ;;  %v9548_v35 = vadd.f32 %v9547_v15, %v9546_v22  ;;  %v9617_v60 = vpop.f32.mrb[123].mxu0 }
 0x360   : > { %v9618_v25 = vadd.f32 %v9617_v60, %v9616_v58 }
 0x361   : > { %v5579_v10 = vadd.f32 %v9548_v35, %v11603_v45  ;;  %v11649_v9 = vadd.f32 %v9609_v29, %v5576_v37 }
 0x363   : > { %v11651_v48 = vadd.f32 %v9612_v11, %v5579_v10 }
 0x364   : > { %v9619_v31 = vpop.f32.mrb[124].mxu0 }
 0x365   : > { %v9620_v16 = vpop.f32.mrb[125].mxu0 }
 0x366   : > { %v9621_v62 = vadd.f32 %v9620_v16, %v9619_v31  ;;  %v9622_v8 = vpop.f32.mrb[126].mxu0 }
 0x367   : > { %v9549_v24 = vpop.f32.mrb[104].mxu1  ;;  %v9623_v0 = vpop.f32.mrb[127].mxu0 }
 0x368   : > { %v9550_v55 = vpop.f32.mrb[105].mxu1  ;;  %v9624_v32 = vadd.f32 %v9623_v0, %v9622_v8 }
 0x369   : > { %v9551_v44 = vadd.f32 %v9550_v55, %v9549_v24  ;;  %v9552_v33 = vpop.f32.mrb[106].mxu1 }
 0x36a   : > { %v9553_v39 = vpop.f32.mrb[107].mxu1 }
 0x36b   : > { %v5584_v40 = vadd.f32 %v9551_v44, %v11607_v17  ;;  %v9554_v54 = vadd.f32 %v9553_v39, %v9552_v33 }
 0x36d   : > { %v5587_v45 = vadd.f32 %v9554_v54, %v11609_v63  ;;  %v11655_v29 = vadd.f32 %v9615_v52, %v5584_v40 }
 0x36f   : > { %v11657_v11 = vadd.f32 %v9618_v25, %v5587_v45  ;;  %v9625_v19 = vpop.f32.mrb[128].mxu0 }
 0x370   : > { %v9626_v43 = vpop.f32.mrb[129].mxu0 }
 0x371   : > { %v9555_v22 = vpop.f32.mrb[108].mxu1  ;;  %v9627_v46 = vadd.f32 %v9626_v43, %v9625_v19  ;;  %v9628_v15 = vpop.f32.mrb[130].mxu0 }
 0x372   : > { %v9556_v58 = vpop.f32.mrb[109].mxu1  ;;  %v9629_v37 = vpop.f32.mrb[131].mxu0 }
 0x373   : > { %v9557_v35 = vadd.f32 %v9556_v58, %v9555_v22  ;;  %v9558_v60 = vpop.f32.mrb[110].mxu1  ;;  %v9630_v10 = vadd.f32 %v9629_v37, %v9628_v15 }
 0x374   : > { %v9559_v31 = vpop.f32.mrb[111].mxu1 }
 0x375   : > { %v5592_v17 = vadd.f32 %v9557_v35, %v11613_v38  ;;  %v9560_v16 = vadd.f32 %v9559_v31, %v9558_v60 }
 0x377   : > { %v5595_v63 = vadd.f32 %v9560_v16, %v11615_v23  ;;  %v11661_v52 = vadd.f32 %v9621_v62, %v5592_v17 }
 0x379   : > { %v11663_v25 = vadd.f32 %v9624_v32, %v5595_v63 }
 0x37a   : > { %v9631_v8 = vpop.f32.mrb[132].mxu0 }
 0x37b   : > { %v9632_v24 = vpop.f32.mrb[133].mxu0 }
 0x37c   : > { %v9633_v55 = vadd.f32 %v9632_v24, %v9631_v8  ;;  %v9634_v44 = vpop.f32.mrb[134].mxu0 }
 0x37d   : > { %v9561_v0 = vpop.f32.mrb[112].mxu1  ;;  %v9635_v39 = vpop.f32.mrb[135].mxu0 }
 0x37e   : > { %v9562_v33 = vpop.f32.mrb[113].mxu1  ;;  %v9636_v45 = vadd.f32 %v9635_v39, %v9634_v44 }
 0x37f   : > { %v9563_v40 = vadd.f32 %v9562_v33, %v9561_v0  ;;  %v9564_v54 = vpop.f32.mrb[114].mxu1 }
 0x380   : > { %v9565_v19 = vpop.f32.mrb[115].mxu1 }
 0x381   : > { %v5600_v38 = vadd.f32 %v9563_v40, %v11619_v14  ;;  %v9566_v43 = vadd.f32 %v9565_v19, %v9564_v54 }
 0x383   : > { %v5603_v23 = vadd.f32 %v9566_v43, %v11621_v6  ;;  %v11667_v62 = vadd.f32 %v9627_v46, %v5600_v38 }
 0x385   : > { %v11669_v32 = vadd.f32 %v9630_v10, %v5603_v23  ;;  %v9637_v22 = vpop.f32.mrb[136].mxu0 }
 0x386   : > { %v9638_v15 = vpop.f32.mrb[137].mxu0 }
 0x387   : > { %v9639_v58 = vadd.f32 %v9638_v15, %v9637_v22  ;;  %v9640_v37 = vpop.f32.mrb[138].mxu0 }
 0x388   : > { %v9567_v35 = vpop.f32.mrb[116].mxu1  ;;  %v9641_v60 = vpop.f32.mrb[139].mxu0 }
 0x389   : > { %v9568_v31 = vpop.f32.mrb[117].mxu1  ;;  %v9642_v17 = vadd.f32 %v9641_v60, %v9640_v37 }
 0x38a   : > { %v9569_v16 = vadd.f32 %v9568_v31, %v9567_v35  ;;  %v9570_v63 = vpop.f32.mrb[118].mxu1 }
 0x38b   : > { %v9571_v8 = vpop.f32.mrb[119].mxu1 }
 0x38c   : > { %v5608_v14 = vadd.f32 %v9569_v16, %v11625_v12  ;;  %v9572_v24 = vadd.f32 %v9571_v8, %v9570_v63 }
 0x38e   : > { %v5611_v6 = vadd.f32 %v9572_v24, %v11627_v28  ;;  %v11673_v46 = vadd.f32 %v9633_v55, %v5608_v14 }
 0x390   : > { %v11675_v10 = vadd.f32 %v9636_v45, %v5611_v6 }
 0x391   : > { %v9643_v0 = vpop.f32.mrb[140].mxu0 }
 0x392   : > { %v9644_v44 = vpop.f32.mrb[141].mxu0 }
 0x393   : > { %v9573_v33 = vpop.f32.mrb[120].mxu1  ;;  %v9645_v39 = vadd.f32 %v9644_v44, %v9643_v0  ;;  %v9646_v40 = vpop.f32.mrb[142].mxu0 }
 0x394   : > { %v9574_v54 = vpop.f32.mrb[121].mxu1  ;;  %v9647_v19 = vpop.f32.mrb[143].mxu0 }
 0x395   : > { %v9575_v38 = vadd.f32 %v9574_v54, %v9573_v33  ;;  %v9576_v43 = vpop.f32.mrb[122].mxu1  ;;  %v9648_v23 = vadd.f32 %v9647_v19, %v9646_v40 }
 0x396   : > { %v9577_v22 = vpop.f32.mrb[123].mxu1 }
 0x397   : > { %v5616_v12 = vadd.f32 %v9575_v38, %v11631_v27  ;;  %v9578_v15 = vadd.f32 %v9577_v22, %v9576_v43  ;;  %v6079_v22 = vld [vmem:[#allocation2 + $0x1c] sm:$0x1] }
 0x399   : > { %v5619_v28 = vadd.f32 %v9578_v15, %v11633_v3  ;;  %v11679_v55 = vadd.f32 %v9639_v58, %v5616_v12 }
 0x39b   : > { %v9579_v45 = vpop.f32.mrb[124].mxu1  ;;  %v11681_v37 = vadd.f32 %v9642_v17, %v5619_v28 }
 0x39c   : > { %v9580_v35 = vpop.f32.mrb[125].mxu1 }
 0x39d   : > { %v9581_v60 = vadd.f32 %v9580_v35, %v9579_v45  ;;  %v9582_v31 = vpop.f32.mrb[126].mxu1 }
 0x39e   : > { %v9583_v16 = vpop.f32.mrb[127].mxu1 }
 0x39f   : > { %v5624_v63 = vadd.f32 %v9581_v60, %v11637_v20  ;;  %v9584_v8 = vadd.f32 %v9583_v16, %v9582_v31  ;;  %v6064_v31 = vld [vmem:[#allocation2 + $0x8] sm:$0xf]  ;;  %v6067_v16 = vld [vmem:[#allocation2 + $0xc] sm:$0x1] }
 0x3a1   : > { %v5627_v14 = vadd.f32 %v9584_v8, %v11639_v18  ;;  %v11685_v24 = vadd.f32 %v9645_v39, %v5624_v63 }
 0x3a3   : > { %v9987_v27 = vpop.f32.mrb[128].mxu1  ;;  %v11687_v6 = vadd.f32 %v9648_v23, %v5627_v14  ;;  %v6076_v23 = vld [vmem:[#allocation2 + $0x18] sm:$0xf] }
 0x3a4   : > { %v11690_v3 = vadd.f32 %v9987_v27, %v11649_v9  ;;  %v5761_v58 = vpop.f32.mrb[129].mxu1 }
 0x3a5   : > { %v11693_v17 = vadd.f32 %v5761_v58, %v11643_v59  ;;  %v9988_v0 = vpop.f32.mrb[130].mxu1 }
 0x3a6   : > { %v9106_v44 = vpack.c.bf16 %v11690_v3, %v11690_v3  ;;  %v11698_v20 = vadd.f32 %v9988_v0, %v11651_v48  ;;  %v5764_v18 = vpop.f32.mrb[131].mxu1  ;;  %v6082_v0 = vld [vmem:[#allocation2 + $0x20] sm:$0xf] }
 0x3a7   : > { %v9104_v33 = vpack.c.bf16 %v11693_v17, %v11693_v17  ;;  %v11703_v39 = vadd.f32 %v5764_v18, %v11645_v4 }
 0x3a8   : > { %v5921_v9 = vshrl.u32 %v9106_v44, 16  ;;  %v9107_v40 = vpack.c.bf16 %v11698_v20, %v11698_v20  ;;  %v5924_v38 = vshll.u32 %v9106_v44, 16 }
 0x3a9   : > { %v5905_v59 = vshrl.u32 %v9104_v33, 16  ;;  %v9105_v54 = vpack.c.bf16 %v11703_v39, %v11703_v39  ;;  %v5908_v43 = vshll.u32 %v9104_v33, 16 }
 0x3aa   : > { %v5923_v19 = vrot.slane %v5921_v9, 7  ;;  %v5929_v48 = vshrl.u32 %v9107_v40, 16  ;;  %v5932_v15 = vshll.u32 %v9107_v40, 16 }
 0x3ab   : > { %v5907_v12 = vrot.slane %v5905_v59, 7  ;;  %v5913_v28 = vshrl.u32 %v9105_v54, 16  ;;  %v5916_v45 = vshll.u32 %v9105_v54, 16  ;;  %v9991_v4 = vpop.f32.mrb[132].mxu1 }
 0x3ac   : > { %v5926_v35 = vor.u32 %v5924_v38, %v5923_v19  ;;  %v5927_v60 = vrot.slane %v5923_v19, 4  ;;  %v5931_v63 = vrot.slane %v5929_v48, 7  ;;  %v11710_v8 = vadd.f32 %v9991_v4, %v11661_v52  ;;  %v5777_v14 = vpop.f32.mrb[133].mxu1  ;;  %v6085_v19 = vld [vmem:[#allocation2 + $0x24] sm:$0x1] }
 0x3ad   : > { %v5910_v27 = vor.u32 %v5908_v43, %v5907_v12  ;;  %v5911_v58 = vrot.slane %v5907_v12, 4  ;;  %v5915_v44 = vrot.slane %v5913_v28, 7  ;;  %v11713_v18 = vadd.f32 %v5777_v14, %v11655_v29  ;;  %v9992_v33 = vpop.f32.mrb[134].mxu1  ;;  %v11719_v38 = vld [vmem:[#allocation2] sm:$0xe] }
 0x3ae   : > { %v6077_v9 = vsel %vm10738_vm4, %v5926_v35, %v6076_v23  ;;  %v6080_v40 = vsel %vm10742_vm5, %v5927_v60, %v6079_v22  ;;  %v5934_v59 = vor.u32 %v5932_v15, %v5931_v63  ;;  %v5935_v54 = vrot.slane %v5931_v63, 4  ;;  %v5780_v52 = vpop.f32.mrb[135].mxu1  ;;  %v6070_v23 = vld [vmem:[#allocation2 + $0x10] sm:$0xf]  ;;  %v11725_v28 = vld [vmem:[#allocation2] sm:$0xf] }
 0x3af   : > { %6078 = vst [vmem:[#allocation2 + $0x18] sm:$0xf] %v6077_v9  ;;  %6081 = vst [vmem:[#allocation2 + $0x1c] sm:$0x1] %v6080_v40  ;;  %v6065_v43 = vsel %vm10738_vm4, %v5910_v27, %v6064_v31  ;;  %v6068_v29 = vsel %vm10742_vm5, %v5911_v58, %v6067_v16  ;;  %v5918_v48 = vor.u32 %v5916_v45, %v5915_v44  ;;  %v5919_v12 = vrot.slane %v5915_v44, 4 }
 0x3b0   : > { %6066 = vst [vmem:[#allocation2 + $0x8] sm:$0xf] %v6065_v43  ;;  %6069 = vst [vmem:[#allocation2 + $0xc] sm:$0x1] %v6068_v29  ;;  %v6083_v22 = vsel %vm10738_vm4, %v5934_v59, %v6082_v0  ;;  %v6086_v15 = vsel %vm10742_vm5, %v5935_v54, %v6085_v19  ;;  %v6073_v4 = vld [vmem:[#allocation2 + $0x14] sm:$0x1]  ;;  %v9110_v35 = vpack.c.bf16 %v11710_v8, %v11710_v8 }
 0x3b1   : > { %v11733_v60 = vld [vmem:[#allocation2 + $0x4] sm:$0x1]  ;;  %6084 = vst [vmem:[#allocation2 + $0x20] sm:$0xf] %v6083_v22  ;;  %6087 = vst [vmem:[#allocation2 + $0x24] sm:$0x1] %v6086_v15  ;;  %v6071_v45 = vsel %vm10738_vm4, %v5918_v48, %v6070_v23  ;;  %v6074_v16 = vsel %vm10742_vm5, %v5919_v12, %v6073_v4  ;;  %v9108_v63 = vpack.c.bf16 %v11713_v18, %v11713_v18 }
 0x3b2   : > { %v11735_v31 = vld [vmem:[#allocation2 + $0x4] sm:$0x1]  ;;  %6072 = vst [vmem:[#allocation2 + $0x10] sm:$0xf] %v6071_v45  ;;  %6075 = vst [vmem:[#allocation2 + $0x14] sm:$0x1] %v6074_v16  ;;  %v11745_v58 = vadd.f32 %v9992_v33, %v11663_v25  ;;  %v11748_v0 = vadd.f32 %v5780_v52, %v11657_v11 }
 0x3b3   : > { %v5953_v27 = vshrl.u32 %v9110_v35, 16  ;;  %v6265_v44 = vshrl.u32 %v11725_v28, 16  ;;  %v5937_v9 = vshrl.u32 %v9108_v63, 16  ;;  %v9995_v40 = vpop.f32.mrb[136].mxu1  ;;  %v6268_v54 = vshll.u32 %v11725_v28, 16 }
 0x3b4   : > { %12573 = vst [vmem:[#allocation16_spill] sm:$0xff] %v11745_v58  ;;  %12574 = vst [vmem:[#allocation17_spill] sm:$0xff] %v11748_v0  ;;  %v5956_v29 = vshll.u32 %v9110_v35, 16  ;;  %v5940_v48 = vshll.u32 %v9108_v63, 16  ;;  %v9111_v25 = vpack.c.bf16 %v11745_v58, %v11745_v58  ;;  %v5793_v33 = vpop.f32.mrb[137].mxu1  ;;  %v9109_v23 = vpack.c.bf16 %v11748_v0, %v11748_v0 }
 0x3b5   : > { %v5955_v43 = vrot.slane %v5953_v27, 7  ;;  %v6100_v12 = vld [vmem:[#allocation2 + $0x38] sm:$0xf]  ;;  %v6103_v11 = vld [vmem:[#allocation2 + $0x3c] sm:$0x1]  ;;  %v5939_v52 = vrot.slane %v5937_v9, 7  ;;  %v11759_v22 = vadd.f32 %v9995_v40, %v11673_v46  ;;  %v11762_v28 = vadd.f32 %v5793_v33, %v11667_v62 }
 0x3b6   : > { %v9996_v15 = vpop.f32.mrb[138].mxu1  ;;  %v5961_v45 = vshrl.u32 %v9111_v25, 16  ;;  %v11764_v63 = vrot.slane %v6265_v44, 4  ;;  %v5964_v14 = vshll.u32 %v9111_v25, 16  ;;  %v5945_v9 = vshrl.u32 %v9109_v23, 16 }
 0x3b7   : > { %v5958_v4 = vor.u32 %v5956_v29, %v5955_v43  ;;  %v5959_v35 = vrot.slane %v5955_v43, 4  ;;  %v5796_v16 = vpop.f32.mrb[139].mxu1  ;;  %v5942_v27 = vor.u32 %v5940_v48, %v5939_v52  ;;  %v5943_v19 = vrot.slane %v5939_v52, 4  ;;  %v6088_v40 = vld [vmem:[#allocation2 + $0x28] sm:$0xf] }
 0x3b8   : > { %v6091_v62 = vld [vmem:[#allocation2 + $0x2c] sm:$0x1]  ;;  %v5963_v33 = vrot.slane %v5961_v45, 7  ;;  %v5948_v0 = vshll.u32 %v9109_v23, 16  ;;  %v6106_v29 = vld [vmem:[#allocation2 + $0x40] sm:$0xf]  ;;  %v9114_v25 = vpack.c.bf16 %v11759_v22, %v11759_v22 }
 0x3b9   : > { %v6101_v59 = vsel %vm10738_vm4, %v5958_v4, %v6100_v12  ;;  %v6104_v46 = vsel %vm10742_vm5, %v5959_v35, %v6103_v11  ;;  %v6089_v44 = vsel %vm10738_vm4, %v5942_v27, %v6088_v40  ;;  %v6092_v43 = vsel %vm10742_vm5, %v5943_v19, %v6091_v62  ;;  %v10234_v12 = vld [vmem:[#allocation2 + $0x8] ss:$8 sps:$4 sm:$0xff]   ;;  %v6109_v4 = vld [vmem:[#allocation2 + $0x44] sm:$0x1] }
 0x3ba   : > { %6102 = vst [vmem:[#allocation2 + $0x38] sm:$0xf] %v6101_v59  ;;  %6105 = vst [vmem:[#allocation2 + $0x3c] sm:$0x1] %v6104_v46  ;;  %v5947_v48 = vrot.slane %v5945_v9, 7  ;;  %v5966_v11 = vor.u32 %v5964_v14, %v5963_v33  ;;  %v5967_v52 = vrot.slane %v5963_v33, 4  ;;  %v9112_v59 = vpack.c.bf16 %v11762_v28, %v11762_v28  ;;  %7969 = vmatprep.mubr.bf16.mxu1 %v10234_v12 }
 0x3bb   : > { %6090 = vst [vmem:[#allocation2 + $0x28] sm:$0xf] %v6089_v44  ;;  %6093 = vst [vmem:[#allocation2 + $0x2c] sm:$0x1] %v6092_v43  ;;  %v6270_v23 = vrot.slane %v6268_v54, 5  ;;  %v5985_v46 = vshrl.u32 %v9114_v25, 16 }
 0x3bc   : > { %v5950_v35 = vor.u32 %v5948_v0, %v5947_v48  ;;  %v5951_v45 = vrot.slane %v5947_v48, 4  ;;  %v6094_v27 = vld [vmem:[#allocation2 + $0x30] sm:$0xf]  ;;  %v5988_v19 = vshll.u32 %v9114_v25, 16  ;;  %v9999_v40 = vpop.f32.mrb[140].mxu1  ;;  %v6107_v9 = vsel %vm10738_vm4, %v5966_v11, %v6106_v29 }
 0x3bd   : > { %v6110_v62 = vsel %vm10742_vm5, %v5967_v52, %v6109_v4  ;;  %v6097_v14 = vld [vmem:[#allocation2 + $0x34] sm:$0x1]  ;;  %v5969_v33 = vshrl.u32 %v9112_v59, 16  ;;  %v5972_v44 = vshll.u32 %v9112_v59, 16  ;;  %v5809_v43 = vpop.f32.mrb[141].mxu1  ;;  %v5987_v48 = vrot.slane %v5985_v46, 7 }
 0x3be   : > { %6108 = vst [vmem:[#allocation2 + $0x40] sm:$0xf] %v6107_v9  ;;  %6111 = vst [vmem:[#allocation2 + $0x44] sm:$0x1] %v6110_v62  ;;  %v6095_v0 = vsel %vm10738_vm4, %v5950_v35, %v6094_v27  ;;  %v6098_v54 = vsel %vm10742_vm5, %v5951_v45, %v6097_v14  ;;  %v11787_v25 = vadd.f32 %v9996_v15, %v11675_v10  ;;  %v10000_v29 = vpop.f32.mrb[142].mxu1 }
 0x3bf   : > { %6096 = vst [vmem:[#allocation2 + $0x30] sm:$0xf] %v6095_v0  ;;  %6099 = vst [vmem:[#allocation2 + $0x34] sm:$0x1] %v6098_v54  ;;  %v5971_v12 = vrot.slane %v5969_v33, 7  ;;  %v11790_v11 = vadd.f32 %v5796_v16, %v11669_v32  ;;  %v11793_v52 = vadd.f32 %v9999_v40, %v11685_v24  ;;  %v11796_v4 = vadd.f32 %v5809_v43, %v11679_v55  ;;  %v11798_v59 = vpop.f32.mrb[143].mxu1 }
 0x3c0   : > { %v5990_v35 = vor.u32 %v5988_v19, %v5987_v48  ;;  %v5991_v45 = vrot.slane %v5987_v48, 4  ;;  %v6124_v27 = vld [vmem:[#allocation2 + $0x58] sm:$0xf]  ;;  %v9115_v10 = vpack.c.bf16 %v11787_v25, %v11787_v25  ;;  %v6271_v15 = vor.u32 %v6270_v23, %v11764_v63  ;;  %v6127_v46 = vld [vmem:[#allocation2 + $0x5c] sm:$0x1] }
 0x3c1   : > { %v5974_v9 = vor.u32 %v5972_v44, %v5971_v12  ;;  %v5975_v32 = vrot.slane %v5971_v12, 4  ;;  %v6112_v16 = vld [vmem:[#allocation2 + $0x48] sm:$0xf]  ;;  %v9113_v24 = vpack.c.bf16 %v11790_v11, %v11790_v11  ;;  %v6115_v40 = vld [vmem:[#allocation2 + $0x4c] sm:$0x1]  ;;  %v12575_v33 = vrot.slane %v11733_v60, 5 }
 0x3c2   : > { %v6125_v55 = vsel %vm10738_vm4, %v5990_v35, %v6124_v27  ;;  %v6128_v19 = vsel %vm10742_vm5, %v5991_v45, %v6127_v46  ;;  %v5993_v62 = vshrl.u32 %v9115_v10, 16  ;;  %v11809_v14 = vld [vmem:[#allocation2 + $0x8] sm:$0xe]  ;;  %v12576_v63 = vrot.slane %v11719_v38, 9  ;;  %v6130_v45 = vld [vmem:[#allocation2 + $0x60] sm:$0xf] }
 0x3c3   : > { %6126 = vst [vmem:[#allocation2 + $0x58] sm:$0xf] %v6125_v55  ;;  %6129 = vst [vmem:[#allocation2 + $0x5c] sm:$0x1] %v6128_v19  ;;  %v6113_v44 = vsel %vm10738_vm4, %v5974_v9, %v6112_v16  ;;  %v6116_v43 = vsel %vm10742_vm5, %v5975_v32, %v6115_v40  ;;  %v5977_v0 = vshrl.u32 %v9113_v24, 16  ;;  %v12577_v54 = vshll.u32 %v11735_v31, 16 }
 0x3c4   : > { %v11817_v23 = vsel %vm10767_vm10, %v12576_v63, %v12575_v33  ;;  %6114 = vst [vmem:[#allocation2 + $0x48] sm:$0xf] %v6113_v44  ;;  %6117 = vst [vmem:[#allocation2 + $0x4c] sm:$0x1] %v6116_v43  ;;  %v5995_v38 = vrot.slane %v5993_v62, 7  ;;  %v5996_v60 = vshll.u32 %v9115_v10, 16  ;;  %v9118_v12 = vpack.c.bf16 %v11793_v52, %v11793_v52 }
 0x3c5   : > { %v11825_v48 = vrot.slane %v12577_v54, 5  ;;  %v11829_v35 = vrot.slane %v6271_v15, 4  ;;  %v6133_v27 = vld [vmem:[#allocation2 + $0x64] sm:$0x1]  ;;  %v5979_v46 = vrot.slane %v5977_v0, 7  ;;  %v5980_v9 = vshll.u32 %v9113_v24, 16 }
 0x3c6   : > { %v9116_v32 = vpack.c.bf16 %v11796_v4, %v11796_v4  ;;  %v11834_v31 = vadd.f32 %v10000_v29, %v11687_v6  ;;  %v5998_v16 = vor.u32 %v5996_v60, %v5995_v38  ;;  %v5999_v55 = vrot.slane %v5995_v38, 4  ;;  %v6531_v63 = vld [vmem:[#allocation2 + $0xc] sm:$0x1]  ;;  %v6118_v43 = vld [vmem:[#allocation2 + $0x50] sm:$0xf] }
 0x3c7   : > { %v6017_v19 = vshrl.u32 %v9118_v12, 16  ;;  %v8963_v10 = vrot.slane %v11809_v14, 9  ;;  %v5982_v40 = vor.u32 %v5980_v9, %v5979_v46  ;;  %v5983_v62 = vrot.slane %v5979_v46, 4  ;;  %v6121_v0 = vld [vmem:[#allocation2 + $0x54] sm:$0x1] }
 0x3c8   : > { %v6020_v33 = vshll.u32 %v9118_v12, 16  ;;  %v6001_v15 = vshrl.u32 %v9116_v32, 16  ;;  %v6131_v44 = vsel %vm10738_vm4, %v5998_v16, %v6130_v45  ;;  %v6134_v24 = vsel %vm10742_vm5, %v5999_v55, %v6133_v27  ;;  %v6148_v38 = vld [vmem:[#allocation2 + $0x78] sm:$0xf]  ;;  %v6151_v60 = vld [vmem:[#allocation2 + $0x7c] sm:$0x1] }
 0x3c9   : > { %v6019_v6 = vrot.slane %v6017_v19, 7  ;;  %v6004_v29 = vshll.u32 %v9116_v32, 16  ;;  %6132 = vst [vmem:[#allocation2 + $0x60] sm:$0xf] %v6131_v44  ;;  %6135 = vst [vmem:[#allocation2 + $0x64] sm:$0x1] %v6134_v24  ;;  %v6119_v14 = vsel %vm10738_vm4, %v5982_v40, %v6118_v43  ;;  %v6122_v54 = vsel %vm10742_vm5, %v5983_v62, %v6121_v0 }
 0x3ca   : > { %v6003_v12 = vrot.slane %v6001_v15, 7  ;;  %v9119_v45 = vpack.c.bf16 %v11834_v31, %v11834_v31  ;;  %6120 = vst [vmem:[#allocation2 + $0x50] sm:$0xf] %v6119_v14  ;;  %6123 = vst [vmem:[#allocation2 + $0x54] sm:$0x1] %v6122_v54  ;;  %v6598_v16 = vrot.slane %v6531_v63, 5  ;;  %v11849_v55 = vadd.f32 %v11798_v59, %v11681_v37 }
 0x3cb   : > { %v6022_v27 = vor.u32 %v6020_v33, %v6019_v6  ;;  %v6023_v46 = vrot.slane %v6019_v6, 4  ;;  %v6136_v9 = vld [vmem:[#allocation2 + $0x68] sm:$0xf]  ;;  %v6139_v32 = vld [vmem:[#allocation2 + $0x6c] sm:$0x1] }
 0x3cc   : > { %12578 = vst [vmem:[#allocation18_spill] sm:$0xff] %v11849_v55  ;;  %v6234_v19 = vld [vmem:[#allocation2 + $0x8] sm:$0xf]  ;;  %v6235_v40 = vld [vmem:[#allocation2 + $0xc] sm:$0x1]  ;;  %v6006_v62 = vor.u32 %v6004_v29, %v6003_v12  ;;  %v6007_v44 = vrot.slane %v6003_v12, 4  ;;  %v6599_v37 = vsel %vm10767_vm10, %v8963_v10, %v6598_v16  ;;  %v9117_v10 = vpack.c.bf16 %v11849_v55, %v11849_v55 }
 0x3cd   : > { %v6025_v24 = vshrl.u32 %v9119_v45, 16  ;;  %v6236_v43 = vld [vmem:[#allocation2 + $0x10] sm:$0xf]  ;;  %v6149_v33 = vsel %vm10738_vm4, %v6022_v27, %v6148_v38  ;;  %v6152_v63 = vsel %vm10742_vm5, %v6023_v46, %v6151_v60  ;;  %v6028_v0 = vshll.u32 %v9119_v45, 16  ;;  %v10235_v59 = vld [vmem:[#allocation2 + $0x18] ss:$8 sps:$4 sm:$0xff]  }
 0x3ce   : > { %6150 = vst [vmem:[#allocation2 + $0x78] sm:$0xf] %v6149_v33  ;;  %6153 = vst [vmem:[#allocation2 + $0x7c] sm:$0x1] %v6152_v63  ;;  %v6137_v6 = vsel %vm10738_vm4, %v6006_v62, %v6136_v9  ;;  %v6140_v29 = vsel %vm10742_vm5, %v6007_v44, %v6139_v32  ;;  %v8978_v54 = vcombine.low %v11817_v23, %v6599_v37  ;;  %v6237_v38 = vld [vmem:[#allocation2 + $0x14] sm:$0x1] }
 0x3cf   : > { %v6027_v14 = vrot.slane %v6025_v24, 7  ;;  %6138 = vst [vmem:[#allocation2 + $0x68] sm:$0xf] %v6137_v6  ;;  %6141 = vst [vmem:[#allocation2 + $0x6c] sm:$0x1] %v6140_v29  ;;  %v6279_v45 = vshrl.u32 %v6234_v19, 16 }
 0x3d0   : > { %v6154_v60 = vld [vmem:[#allocation2 + $0x80] sm:$0xf]  ;;  %v6157_v12 = vld [vmem:[#allocation2 + $0x84] sm:$0x1]  ;;  %v6282_v27 = vshll.u32 %v6234_v19, 16  ;;  %v6288_v46 = vshll.u32 %v6235_v40, 16  ;;  %7970 = vmatmul.mubr.bf16.vlgmr.msra.gmra.mrb[144].mxu1 %v8978_v54 }
 0x3d1   : > { %v6238_v16 = vld [vmem:[#allocation2 + $0x18] sm:$0xf]  ;;  %v6030_v33 = vor.u32 %v6028_v0, %v6027_v14  ;;  %v6031_v9 = vrot.slane %v6027_v14, 4  ;;  %v6239_v62 = vld [vmem:[#allocation2 + $0x1c] sm:$0x1]  ;;  %v6293_v32 = vshrl.u32 %v6236_v43, 16  ;;  %7977 = vmatprep.mubr.bf16.mxu1 %v10235_v59 }
 0x3d2   : > { %v6296_v44 = vshll.u32 %v6236_v43, 16  ;;  %v6009_v24 = vshrl.u32 %v9117_v10, 16  ;;  %v6012_v23 = vshll.u32 %v9117_v10, 16  ;;  %v6281_v63 = vrot.slane %v6279_v45, 4  ;;  %v11868_v6 = vld [vmem:[#allocation2 + $0x10] sm:$0xe] }
 0x3d3   : > { %v6284_v37 = vrot.slane %v6282_v27, 5  ;;  %v10365_v29 = vld [vmem:[#allocation7 + $0x180] sm:$0xff]   ;;  %v6155_v19 = vsel %vm10738_vm4, %v6030_v33, %v6154_v60  ;;  %v6158_v40 = vsel %vm10742_vm5, %v6031_v9, %v6157_v12  ;;  %v6290_v0 = vrot.slane %v6288_v46, 5  ;;  %v10366_v54 = vld [vmem:[#allocation7 + $0x1c8] sm:$0xff]   ;;  %v6240_v46 = vld [vmem:[#allocation2 + $0x20] sm:$0xf] }
 0x3d4   : > { %9858 = vmatpush3.bf16.msra.mxu1 %v10365_v29  ;;  %v6295_v14 = vrot.slane %v6293_v32, 4  ;;  %6156 = vst [vmem:[#allocation2 + $0x80] sm:$0xf] %v6155_v19  ;;  %6159 = vst [vmem:[#allocation2 + $0x84] sm:$0x1] %v6158_v40  ;;  %v6011_v43 = vrot.slane %v6009_v24, 7 }
 0x3d5   : > { %9859 = vmatprep.subr.bf16.mxu1 %v10366_v54  ;;  %v6285_v59 = vor.u32 %v6284_v37, %v6281_v63  ;;  %v6298_v10 = vrot.slane %v6296_v44, 5  ;;  %v6302_v45 = vshll.u32 %v6237_v38, 16  ;;  %v6533_v27 = vld [vmem:[#allocation2 + $0x14] sm:$0x1]  ;;  %v6534_v15 = vld [vmem:[#allocation2 + $0x18] sm:$0xe] }
 0x3d6   : > { %v6145_v29 = vld [vmem:[#allocation2 + $0x74] sm:$0x1]  ;;  %v6307_v58 = vshrl.u32 %v6238_v16, 16  ;;  %v6310_v57 = vshll.u32 %v6238_v16, 16  ;;  %v6316_v60 = vshll.u32 %v6239_v62, 16  ;;  %v8964_v12 = vrot.slane %v11868_v6, 9 }
 0x3d7   : > { %v6535_v33 = vld [vmem:[#allocation2 + $0x1c] sm:$0x1]  ;;  %v6014_v9 = vor.u32 %v6012_v23, %v6011_v43  ;;  %v6015_v32 = vrot.slane %v6011_v43, 4  ;;  %v6286_v54 = vrot.slane %v6285_v59, 4  ;;  %v6299_v19 = vor.u32 %v6298_v10, %v6295_v14  ;;  %v11875_v40 = vld [vmem:[#allocation2 + $0x24] sm:$0x1] }
 0x3d8   : > { %v10367_v24 = vld [vmem:[#allocation7 + $0x188] sm:$0xff]   ;;  %v6304_v38 = vrot.slane %v6302_v45, 5  ;;  %v6309_v44 = vrot.slane %v6307_v58, 4  ;;  %v6312_v63 = vrot.slane %v6310_v57, 5  ;;  %v6318_v37 = vrot.slane %v6316_v60, 5  ;;  %v10368_v55 = vld [vmem:[#allocation7 + $0x1d0] sm:$0xff]  }
 0x3d9   : > { %9860 = vmatpush3.bf16.msra.mxu1 %v10367_v24  ;;  %v6143_v16 = vsel %vm10738_vm4, %v6014_v9, %v6142_v49  ;;  %v6146_v62 = vsel %vm10742_vm5, %v6015_v32, %v6145_v29  ;;  %v6291_v23 = vsel %vm10778_vm11, %v6286_v54, %v6290_v0  ;;  %v10236_v6 = vld [vmem:[#allocation2] ss:$8 sps:$4 sm:$0xff]   ;;  %v6300_v14 = vrot.slane %v6299_v19, 4  ;;  %v6243_v59 = vld [vmem:[#allocation2 + $0x2c] sm:$0x1] }
 0x3da   : > { %9861 = vmatprep.subr.bf16.mxu1 %v10368_v55  ;;  %v6242_v43 = vld [vmem:[#allocation2 + $0x28] sm:$0xf]  ;;  %6144 = vst [vmem:[#allocation2 + $0x70] sm:$0xf] %v6143_v16  ;;  %6147 = vst [vmem:[#allocation2 + $0x74] sm:$0x1] %v6146_v62  ;;  %v12579_v57 = vsel %vm10778_vm11, %v11829_v35, %v11825_v48  ;;  %v6313_v55 = vor.u32 %v6312_v63, %v6309_v44 }
 0x3db   : > { %v8954_v58 = vcombine.low %v12579_v57, %v6291_v23  ;;  %v6602_v41 = vrot.slane %v6533_v27, 5  ;;  %v8965_v49 = vrot.slane %v6534_v15, 9  ;;  %v6305_v42 = vsel %vm10778_vm11, %v6300_v14, %v6304_v38  ;;  %v11890_v29 = vld [vmem:[#allocation2 + $0x20] sm:$0xe]  ;;  %v6537_v60 = vld [vmem:[#allocation2 + $0x24] sm:$0x1] }
 0x3dc   : > { %v6606_v10 = vrot.slane %v6535_v33, 5  ;;  %v6321_v0 = vshrl.u32 %v6240_v46, 16  ;;  %v6324_v45 = vshll.u32 %v6240_v46, 16  ;;  %v10369_v9 = vld [vmem:[#allocation7 + $0x190] sm:$0xff]   ;;  %v6314_v32 = vrot.slane %v6313_v55, 4  ;;  %v10370_v54 = vld [vmem:[#allocation7 + $0x1d8] sm:$0xff]  }
 0x3dd   : > { %9862 = vmatpush3.bf16.msra.mxu1 %v10369_v9  ;;  %7872 = vmatprep.mubr.bf16.mxu0 %v8954_v58  ;;  %v6603_v48 = vsel %vm10767_vm10, %v8964_v12, %v6602_v41  ;;  %v6330_v35 = vshll.u32 %v11875_v40, 16  ;;  %v6335_v15 = vshrl.u32 %v6242_v43, 16  ;;  %v6538_v27 = vld [vmem:[#allocation2 + $0x28] sm:$0xe]  ;;  %v6338_v24 = vshll.u32 %v6242_v43, 16  ;;  %v10371_v16 = vld [vmem:[#allocation7 + $0x100] sm:$0xff]  }
 0x3de   : > { %9863 = vmatprep.subr.bf16.mxu1 %v10370_v54  ;;  %7873 = vmatmul.mubr.bf16.vlgmr.msra.gmra.mrb[144].mxu0 %v10236_v6  ;;  %v6607_v33 = vsel %vm10767_vm10, %v8965_v49, %v6606_v10  ;;  %v6323_v46 = vrot.slane %v6321_v0, 4  ;;  %v6326_v19 = vrot.slane %v6324_v45, 5  ;;  %v6539_v38 = vld [vmem:[#allocation2 + $0x2c] sm:$0x1]  ;;  %v6319_v44 = vsel %vm10778_vm11, %v6314_v32, %v6318_v37  ;;  %v10237_v12 = vld [vmem:[#allocation2 + $0x28] ss:$8 sps:$4 sm:$0xff]  }
 0x3df   : > { %v8979_v63 = vcombine.low %v6603_v48, %v6607_v33  ;;  %9794 = vmatpush3.bf16.msra.mxu0 %v10371_v16  ;;  %v6337_v40 = vrot.slane %v6335_v15, 4  ;;  %v6244_v62 = vld [vmem:[#allocation2 + $0x30] sm:$0xf]  ;;  %v8955_v23 = vcombine.low %v6305_v42, %v6319_v44  ;;  %v10372_v14 = vld [vmem:[#allocation7 + $0x148] sm:$0xff]   ;;  %v6340_v57 = vrot.slane %v6338_v24, 5  ;;  %v10373_v49 = vld [vmem:[#allocation7 + $0x198] sm:$0xff]  }
 0x3e0   : > { %9795 = vmatprep.subr.bf16.mxu0 %v10372_v14  ;;  %v6327_v6 = vor.u32 %v6326_v19, %v6323_v46  ;;  %v6344_v58 = vshll.u32 %v6243_v59, 16  ;;  %v6245_v55 = vld [vmem:[#allocation2 + $0x34] sm:$0x1]  ;;  %v6246_v41 = vld [vmem:[#allocation2 + $0x38] sm:$0xf]  ;;  %v8966_v43 = vrot.slane %v11890_v29, 9 }
 0x3e1   : > { %9864 = vmatpush3.bf16.msra.mxu1 %v10373_v49  ;;  %v6610_v37 = vrot.slane %v6537_v60, 5  ;;  %v8967_v10 = vrot.slane %v6538_v27, 9  ;;  %v6614_v0 = vrot.slane %v6539_v38, 5  ;;  %v11900_v45 = vld [vmem:[#allocation2 + $0x3c] sm:$0x1]  ;;  %v10374_v42 = vld [vmem:[#allocation7 + $0x1e0] sm:$0xff]   ;;  %7880 = vmatprep.mubr.bf16.mxu0 %v8955_v23  ;;  %v6341_v54 = vor.u32 %v6340_v57, %v6337_v40 }
 0x3e2   : > { %7978 = vmatmul.mubr.bf16.gmra.mrb[148].mxu1 %v8979_v63  ;;  %v6540_v9 = vld [vmem:[#allocation2 + $0x30] sm:$0xe]  ;;  %v6541_v32 = vld [vmem:[#allocation2 + $0x34] sm:$0x1]  ;;  %9865 = vmatprep.subr.bf16.mxu1 %v10374_v42  ;;  %v6328_v59 = vrot.slane %v6327_v6, 4  ;;  %v6332_v15 = vrot.slane %v6330_v35, 5 }
 0x3e3   : > { %7985 = vmatprep.mubr.bf16.mxu1 %v10237_v12  ;;  %v10238_v48 = vld [vmem:[#allocation2 + $0x10] ss:$8 sps:$4 sm:$0xff]   ;;  %v6349_v33 = vshrl.u32 %v6244_v62, 16  ;;  %v6346_v46 = vrot.slane %v6344_v58, 5  ;;  %v6615_v29 = vsel %vm10767_vm10, %v8967_v10, %v6614_v0  ;;  %v6352_v27 = vshll.u32 %v6244_v62, 16  ;;  %v10376_v16 = vld [vmem:[#allocation7 + $0x150] sm:$0xff]  }
 0x3e4   : > { %v10375_v60 = vld [vmem:[#allocation7 + $0x108] sm:$0xff]   ;;  %v6358_v19 = vshll.u32 %v6245_v55, 16  ;;  %v6333_v38 = vsel %vm10778_vm11, %v6328_v59, %v6332_v15  ;;  %v6342_v44 = vrot.slane %v6341_v54, 4  ;;  %v6611_v63 = vsel %vm10767_vm10, %v8966_v43, %v6610_v37  ;;  %v10377_v12 = vld [vmem:[#allocation7 + $0x1a0] sm:$0xff]   ;;  %v6248_v10 = vld [vmem:[#allocation2 + $0x40] sm:$0xf] }
 0x3e5   : > { %9796 = vmatpush3.bf16.msra.mxu0 %v10375_v60  ;;  %v6542_v24 = vld [vmem:[#allocation2 + $0x38] sm:$0xe]  ;;  %v6351_v35 = vrot.slane %v6349_v33, 4  ;;  %9866 = vmatpush3.bf16.msra.mxu1 %v10377_v12  ;;  %v8980_v40 = vcombine.low %v6611_v63, %v6615_v29  ;;  %v6354_v23 = vrot.slane %v6352_v27, 5  ;;  %v6363_v14 = vshrl.u32 %v6246_v41, 16  ;;  %v10379_v54 = vld [vmem:[#allocation7 + $0x110] sm:$0xff]  }
 0x3e6   : > { %9797 = vmatprep.subr.bf16.mxu0 %v10376_v16  ;;  %v6366_v6 = vshll.u32 %v6246_v41, 16  ;;  %v6543_v57 = vld [vmem:[#allocation2 + $0x3c] sm:$0x1]  ;;  %7881 = vmatmul.mubr.bf16.gmra.mrb[148].mxu0 %v10238_v48  ;;  %v6347_v58 = vsel %vm10778_vm11, %v6342_v44, %v6346_v46  ;;  %v10239_v55 = vld [vmem:[#allocation2 + $0x38] ss:$8 sps:$4 sm:$0xff]   ;;  %v6372_v49 = vshll.u32 %v11900_v45, 16 }
 0x3e7   : > { %v10378_v62 = vld [vmem:[#allocation7 + $0x1e8] sm:$0xff]   ;;  %v8968_v43 = vrot.slane %v6540_v9, 9  ;;  %v6618_v37 = vrot.slane %v6541_v32, 5  ;;  %v8956_v0 = vcombine.low %v6333_v38, %v6347_v58  ;;  %v6355_v42 = vor.u32 %v6354_v23, %v6351_v35  ;;  %v6249_v41 = vld [vmem:[#allocation2 + $0x44] sm:$0x1]  ;;  %v10380_v27 = vld [vmem:[#allocation7 + $0x158] sm:$0xff]  }
 0x3e8   : > { %9867 = vmatprep.subr.bf16.mxu1 %v10378_v62  ;;  %v6365_v59 = vrot.slane %v6363_v14, 4  ;;  %v6368_v15 = vrot.slane %v6366_v6, 5  ;;  %v6250_v33 = vld [vmem:[#allocation2 + $0x48] sm:$0xf]  ;;  %v6360_v29 = vrot.slane %v6358_v19, 5  ;;  %v8969_v46 = vrot.slane %v6542_v24, 9 }
 0x3e9   : > { %9798 = vmatpush3.bf16.msra.mxu0 %v10379_v54  ;;  %v11913_v48 = vsel %vm10767_vm10, %v8968_v43, %v6618_v37  ;;  %v6622_v60 = vrot.slane %v6543_v57, 5  ;;  %v6251_v45 = vld [vmem:[#allocation2 + $0x4c] sm:$0x1]  ;;  %v11915_v9 = vld [vmem:[#allocation2 + $0x40] sm:$0xe]  ;;  %v10381_v38 = vld [vmem:[#allocation7 + $0x1a8] sm:$0xff]   ;;  %7888 = vmatprep.mubr.bf16.mxu0 %v8956_v0 }
 0x3ea   : > { %9799 = vmatprep.subr.bf16.mxu0 %v10380_v27  ;;  %v11917_v32 = vld [vmem:[#allocation2 + $0x44] sm:$0x1]  ;;  %9868 = vmatpush3.bf16.msra.mxu1 %v10381_v38  ;;  %v6356_v44 = vrot.slane %v6355_v42, 4  ;;  %v6369_v63 = vor.u32 %v6368_v15, %v6365_v59  ;;  %v6377_v19 = vshrl.u32 %v6248_v10, 16  ;;  %v6380_v16 = vshll.u32 %v6248_v10, 16  ;;  %v10383_v10 = vld [vmem:[#allocation7 + $0x118] sm:$0xff]  }
 0x3eb   : > { %7986 = vmatmul.mubr.bf16.gmra.mrb[152].mxu1 %v8980_v40  ;;  %v6546_v35 = vld [vmem:[#allocation2 + $0x48] sm:$0xe]  ;;  %v6374_v24 = vrot.slane %v6372_v49, 5  ;;  %v6623_v23 = vsel %vm10767_vm10, %v8969_v46, %v6622_v60  ;;  %v6391_v14 = vshrl.u32 %v6250_v33, 16  ;;  %v6394_v6 = vshll.u32 %v6250_v33, 16  ;;  %v10382_v58 = vld [vmem:[#allocation7 + $0x1f0] sm:$0xff]  }
 0x3ec   : > { %7993 = vmatprep.mubr.bf16.mxu1 %v10239_v55  ;;  %v10240_v12 = vld [vmem:[#allocation2 + $0x20] ss:$8 sps:$4 sm:$0xff]   ;;  %v6547_v57 = vld [vmem:[#allocation2 + $0x4c] sm:$0x1]  ;;  %v6252_v62 = vld [vmem:[#allocation2 + $0x50] sm:$0xf]  ;;  %9869 = vmatprep.subr.bf16.mxu1 %v10382_v58  ;;  %v6361_v40 = vsel %vm10778_vm11, %v6356_v44, %v6360_v29  ;;  %v8981_v49 = vcombine.low %v11913_v48, %v6623_v23 }
 0x3ed   : > { %v6370_v43 = vrot.slane %v6369_v63, 4  ;;  %v6379_v37 = vrot.slane %v6377_v19, 4  ;;  %v6386_v0 = vshll.u32 %v6249_v41, 16  ;;  %9800 = vmatpush3.bf16.msra.mxu0 %v10383_v10  ;;  %v11923_v55 = vld [vmem:[#allocation2 + $0x54] sm:$0x1]  ;;  %v6382_v42 = vrot.slane %v6380_v16, 5 }
 0x3ee   : > { %v6393_v59 = vrot.slane %v6391_v14, 4  ;;  %v6396_v15 = vrot.slane %v6394_v6, 5  ;;  %v10384_v54 = vld [vmem:[#allocation7 + $0x160] sm:$0xff]   ;;  %v10385_v33 = vld [vmem:[#allocation7 + $0x1b0] sm:$0xff]   ;;  %v6400_v29 = vshll.u32 %v6251_v45, 16  ;;  %v8970_v60 = vrot.slane %v11915_v9, 9  ;;  %7889 = vmatmul.mubr.bf16.gmra.mrb[152].mxu0 %v10240_v12 }
 0x3ef   : > { %9801 = vmatprep.subr.bf16.mxu0 %v10384_v54  ;;  %9870 = vmatpush3.bf16.msra.mxu1 %v10385_v33  ;;  %v6375_v46 = vsel %vm10778_vm11, %v6370_v43, %v6374_v24  ;;  %v6626_v41 = vrot.slane %v11917_v32, 5  ;;  %v10386_v27 = vld [vmem:[#allocation7 + $0x1f8] sm:$0xff]   ;;  %v6383_v44 = vor.u32 %v6382_v42, %v6379_v37  ;;  %v8971_v19 = vrot.slane %v6546_v35, 9  ;;  %v6254_v16 = vld [vmem:[#allocation2 + $0x58] sm:$0xf]  ;;  %v10387_v10 = vld [vmem:[#allocation7 + $0x120] sm:$0xff]  }
 0x3f0   : > { %9871 = vmatprep.subr.bf16.mxu1 %v10386_v27  ;;  %v8957_v38 = vcombine.low %v6361_v40, %v6375_v46  ;;  %v10241_v48 = vld [vmem:[#allocation2 + $0x48] ss:$8 sps:$4 sm:$0xff]   ;;  %v6397_v63 = vor.u32 %v6396_v15, %v6393_v59  ;;  %v6388_v23 = vrot.slane %v6386_v0, 5  ;;  %v6402_v14 = vrot.slane %v6400_v29, 5  ;;  %v6255_v24 = vld [vmem:[#allocation2 + $0x5c] sm:$0x1] }
 0x3f1   : > { %v6630_v6 = vrot.slane %v6547_v57, 5  ;;  %v6405_v58 = vshrl.u32 %v6252_v62, 16  ;;  %9802 = vmatpush3.bf16.msra.mxu0 %v10387_v10  ;;  %v6384_v45 = vrot.slane %v6383_v44, 4  ;;  %v6408_v32 = vshll.u32 %v6252_v62, 16  ;;  %v10388_v12 = vld [vmem:[#allocation7 + $0x168] sm:$0xff]   ;;  %v10389_v54 = vld [vmem:[#allocation7 + $0x1b8] sm:$0xff]  }
 0x3f2   : > { %7896 = vmatprep.mubr.bf16.mxu0 %v8957_v38  ;;  %v6398_v9 = vrot.slane %v6397_v63, 4  ;;  %v6414_v43 = vshll.u32 %v11923_v55, 16  ;;  %9803 = vmatprep.subr.bf16.mxu0 %v10388_v12  ;;  %v6419_v37 = vshrl.u32 %v6254_v16, 16  ;;  %v6422_v0 = vshll.u32 %v6254_v16, 16  ;;  %v11933_v57 = vld [vmem:[#allocation2 + $0x50] sm:$0xe] }
 0x3f3   : > { %7994 = vmatmul.mubr.bf16.gmra.mrb[156].mxu1 %v8981_v49  ;;  %v6631_v35 = vsel %vm10767_vm10, %v8971_v19, %v6630_v6  ;;  %v6407_v40 = vrot.slane %v6405_v58, 4  ;;  %v10242_v42 = vld [vmem:[#allocation2 + $0x30] ss:$8 sps:$4 sm:$0xff]   ;;  %v6627_v62 = vsel %vm10767_vm10, %v8970_v60, %v6626_v41  ;;  %v6410_v55 = vrot.slane %v6408_v32, 5  ;;  %v11939_v15 = vld [vmem:[#allocation2 + $0x54] sm:$0x1] }
 0x3f4   : > { %8001 = vmatprep.mubr.bf16.mxu1 %v10241_v48  ;;  %v6403_v59 = vsel %vm10778_vm11, %v6398_v9, %v6402_v14  ;;  %v6256_v49 = vld [vmem:[#allocation2 + $0x60] sm:$0xf]  ;;  %9872 = vmatpush3.bf16.msra.mxu1 %v10389_v54  ;;  %v6389_v33 = vsel %vm10778_vm11, %v6384_v45, %v6388_v23  ;;  %v8982_v46 = vcombine.low %v6627_v62, %v6631_v35  ;;  %v6421_v29 = vrot.slane %v6419_v37, 4  ;;  %v11943_v38 = vld [vmem:[#allocation2 + $0x58] sm:$0xe]  ;;  %v11947_v63 = vld [vmem:[#allocation7 + $0x200] sm:$0xff]  }
 0x3f5   : > { %v6424_v27 = vrot.slane %v6422_v0, 5  ;;  %v11945_v48 = vld [vmem:[#allocation2 + $0x5c] sm:$0x1]  ;;  %10033 = vmatprep.subr.bf16.mxu1 %v11947_v63  ;;  %v8958_v60 = vcombine.low %v6389_v33, %v6403_v59  ;;  %v6411_v41 = vor.u32 %v6410_v55, %v6407_v40  ;;  %v6416_v19 = vrot.slane %v6414_v43, 5  ;;  %v6257_v14 = vld [vmem:[#allocation2 + $0x64] sm:$0x1] }
 0x3f6   : > { %v10390_v44 = vld [vmem:[#allocation7 + $0x128] sm:$0xff]   ;;  %v6428_v16 = vshll.u32 %v6255_v24, 16  ;;  %v6258_v6 = vld [vmem:[#allocation2 + $0x68] sm:$0xf]  ;;  %v10392_v23 = vld [vmem:[#allocation7 + $0x170] sm:$0xff]   ;;  %v8972_v10 = vrot.slane %v11933_v57, 9  ;;  %7897 = vmatmul.mubr.bf16.gmra.mrb[156].mxu0 %v10242_v42 }
 0x3f7   : > { %9804 = vmatpush3.bf16.msra.mxu0 %v10390_v44  ;;  %v6425_v58 = vor.u32 %v6424_v27, %v6421_v29  ;;  %v6634_v45 = vrot.slane %v11939_v15, 5  ;;  %v6259_v9 = vld [vmem:[#allocation2 + $0x6c] sm:$0x1]  ;;  %v6433_v32 = vshrl.u32 %v6256_v49, 16  ;;  %v10243_v12 = vld [vmem:[#allocation2 + $0x58] ss:$8 sps:$4 sm:$0xff]   ;;  %7904 = vmatprep.mubr.bf16.mxu0 %v8958_v60 }
 0x3f8   : > { %9805 = vmatprep.subr.bf16.mxu0 %v10392_v23  ;;  %v6412_v35 = vrot.slane %v6411_v41, 4  ;;  %v8973_v37 = vrot.slane %v11943_v38, 9  ;;  %v6638_v40 = vrot.slane %v11945_v48, 5  ;;  %v6436_v43 = vshll.u32 %v6256_v49, 16  ;;  %v11954_v24 = vld [vmem:[#allocation2 + $0x60] sm:$0xe] }
 0x3f9   : > { %v6426_v0 = vrot.slane %v6425_v58, 4  ;;  %v6430_v59 = vrot.slane %v6428_v16, 5  ;;  %v6435_v62 = vrot.slane %v6433_v32, 4  ;;  %v6442_v55 = vshll.u32 %v6257_v14, 16  ;;  %v6553_v57 = vld [vmem:[#allocation2 + $0x64] sm:$0x1] }
 0x3fa   : > { %v10393_v54 = vld [vmem:[#allocation7 + $0x130] sm:$0xff]   ;;  %v6438_v15 = vrot.slane %v6436_v43, 5  ;;  %v6447_v33 = vshrl.u32 %v6258_v6, 16  ;;  %v10394_v42 = vld [vmem:[#allocation7 + $0x178] sm:$0xff]   ;;  %v6417_v29 = vsel %vm10778_vm11, %v6412_v35, %v6416_v19  ;;  %v6450_v27 = vshll.u32 %v6258_v6, 16 }
 0x3fb   : > { %9806 = vmatpush3.bf16.msra.mxu0 %v10393_v54  ;;  %8002 = vmatmul.mubr.bf16.gmra.mrb[160].mxu1 %v8982_v46  ;;  %v6456_v49 = vshll.u32 %v6259_v9, 16  ;;  %v6554_v38 = vld [vmem:[#allocation2 + $0x68] sm:$0xe]  ;;  %v6555_v48 = vld [vmem:[#allocation2 + $0x6c] sm:$0x1]  ;;  %v6431_v44 = vsel %vm10778_vm11, %v6426_v0, %v6430_v59  ;;  %v6444_v41 = vrot.slane %v6442_v55, 5  ;;  %v6635_v6 = vsel %vm10767_vm10, %v8972_v10, %v6634_v45 }
 0x3fc   : > { %9807 = vmatprep.subr.bf16.mxu0 %v10394_v42  ;;  %8009 = vmatprep.mubr.bf16.mxu1 %v10243_v12  ;;  %v6439_v60 = vor.u32 %v6438_v15, %v6435_v62  ;;  %v6449_v16 = vrot.slane %v6447_v33, 4  ;;  %v10244_v14 = vld [vmem:[#allocation2 + $0x40] ss:$8 sps:$4 sm:$0xff]   ;;  %v6452_v23 = vrot.slane %v6450_v27, 5  ;;  %v8974_v32 = vrot.slane %v11954_v24, 9 }
 0x3fd   : > { %v6458_v58 = vrot.slane %v6456_v49, 5  ;;  %v6642_v46 = vrot.slane %v6553_v57, 5  ;;  %v10395_v43 = vld [vmem:[#allocation7 + $0x138] sm:$0xff]   ;;  %v8959_v19 = vcombine.low %v6417_v29, %v6431_v44  ;;  %v8975_v12 = vrot.slane %v6554_v38, 9  ;;  %v6260_v35 = vld [vmem:[#allocation2 + $0x70] sm:$0xf] }
 0x3fe   : > { %v6440_v9 = vrot.slane %v6439_v60, 4  ;;  %v6261_v0 = vld [vmem:[#allocation2 + $0x74] sm:$0x1]  ;;  %v6453_v59 = vor.u32 %v6452_v23, %v6449_v16  ;;  %v6646_v62 = vrot.slane %v6555_v48, 5  ;;  %v6262_v55 = vld [vmem:[#allocation2 + $0x78] sm:$0xf]  ;;  %7905 = vmatmul.mubr.bf16.gmra.mrb[160].mxu0 %v10244_v14  ;;  %v6639_v57 = vsel %vm10767_vm10, %v8973_v37, %v6638_v40 }
 0x3ff   : > { %9808 = vmatpush3.bf16.msra.mxu0 %v10395_v43  ;;  %v6461_v54 = vshrl.u32 %v6260_v35, 16  ;;  %v6464_v15 = vshll.u32 %v6260_v35, 16  ;;  %v8343_v24 = vld [vmem:[%s10726_s9 + $0x10] sm:$0xff]  ;;  %v10245_v33 = vld [vmem:[#allocation2 + $0x68] ss:$8 sps:$4 sm:$0xff]   ;;  %v6470_v29 = vshll.u32 %v6261_v0, 16  ;;  %7912 = vmatprep.mubr.bf16.mxu0 %v8959_v19  ;;  %v8983_v27 = vcombine.low %v6635_v6, %v6639_v57 }
 0x400   : > { %10001 = vmatprep.subr.bf16.mxu0 %v11947_v63  ;;  %v6263_v42 = vld [vmem:[#allocation2 + $0x7c] sm:$0x1]  ;;  %v6475_v10 = vshrl.u32 %v6262_v55, 16  ;;  %v11967_v45 = vld [vmem:[#allocation2 + $0x70] sm:$0xe]  ;;  %v6454_v49 = vrot.slane %v6453_v59, 4  ;;  %8361 = vrot.lane.b32.xlu1 %v8343_v24, %s10557_s26  ;;  %v6445_v37 = vsel %vm10778_vm11, %v6440_v9, %v6444_v41  ;;  %v6643_v43 = vsel %vm10767_vm10, %v8974_v32, %v6642_v46 }
 0x401   : > { %v6463_v38 = vrot.slane %v6461_v54, 4  ;;  %v6466_v44 = vrot.slane %v6464_v15, 5  ;;  %v6557_v48 = vld [vmem:[#allocation2 + $0x74] sm:$0x1]  ;;  %v11969_v60 = vrot.slane %v6470_v29, 5  ;;  %v6478_v23 = vshll.u32 %v6262_v55, 16 }
 0x402   : > { %v6477_v16 = vrot.slane %v6475_v10, 4  ;;  %v6558_v14 = vld [vmem:[#allocation2 + $0x78] sm:$0xe]  ;;  %v6459_v40 = vsel %vm10778_vm11, %v6454_v49, %v6458_v58  ;;  %v6559_v6 = vld [vmem:[#allocation2 + $0x7c] sm:$0x1]  ;;  %v6647_v55 = vsel %vm10767_vm10, %v8975_v12, %v6646_v62  ;;  %v6484_v15 = vshll.u32 %v6263_v42, 16 }
 0x403   : > { %8010 = vmatmul.mubr.bf16.gmra.mrb[164].mxu1 %v8983_v27  ;;  %v6467_v19 = vor.u32 %v6466_v44, %v6463_v38  ;;  %v7304_v35 = vld [vmem:[#allocation2 + $0x10] sm:$0xf]  ;;  %v7305_v0 = vld [vmem:[#allocation2 + $0x14] sm:$0x1]  ;;  %v6480_v54 = vrot.slane %v6478_v23, 5  ;;  %v8976_v41 = vrot.slane %v11967_v45, 9  ;;  %v8960_v24 = vcombine.low %v6445_v37, %v6459_v40 }
 0x404   : > { %8017 = vmatprep.mubr.bf16.mxu1 %v10245_v33  ;;  %v10246_v59 = vld [vmem:[#allocation2 + $0x50] ss:$8 sps:$4 sm:$0xff]   ;;  %v6650_v32 = vrot.slane %v6557_v48, 5  ;;  %v7307_v46 = vld [vmem:[#allocation2 + $0x1c] sm:$0x1]  ;;  %v7337_v29 = vshrl.u32 %v7304_v35, 16  ;;  %v8984_v23 = vcombine.low %v6643_v43, %v6647_v55 }
 0x405   : > { %v7306_v9 = vld [vmem:[#allocation2 + $0x18] sm:$0xf]  ;;  %v8341_v58 = vld [vmem:[%s10726_s9] sm:$0xff]  ;;  %v6468_v57 = vrot.slane %v6467_v19, 4  ;;  %v8344_v10 = vld [vmem:[%s10726_s9 + $0x18] sm:$0xff]  ;;  %v6481_v33 = vor.u32 %v6480_v54, %v6477_v16  ;;  %v7340_v27 = vshll.u32 %v7304_v35, 16 }
 0x406   : > { %8357 = vrot.lane.b32.xlu0 %v8341_v58, %s10557_s26  ;;  %v7346_v49 = vshll.u32 %v7305_v0, 16  ;;  %v7351_v12 = vshrl.u32 %v7306_v9, 16  ;;  %8363 = vrot.lane.b32.xlu1 %v8344_v10, %s10557_s26  ;;  %v8342_v62 = vld [vmem:[%s10726_s9 + $0x8] sm:$0xff]  ;;  %v8977_v42 = vrot.slane %v6558_v14, 9  ;;  %v6654_v45 = vrot.slane %v6559_v6, 5 }
 0x407   : > { %v7339_v38 = vrot.slane %v7337_v29, 4  ;;  %v7354_v44 = vshll.u32 %v7306_v9, 16  ;;  %7913 = vmatmul.mubr.bf16.gmra.mrb[164].mxu0 %v10246_v59  ;;  %v10247_v48 = vld [vmem:[#allocation2 + $0x78] ss:$8 sps:$4 sm:$0xff]   ;;  %v6482_v37 = vrot.slane %v6481_v33, 4  ;;  %v6486_v40 = vrot.slane %v6484_v15, 5 }
 0x408   : > { %v7342_v19 = vrot.slane %v7340_v27, 5  ;;  %v7064_v58 = vld [vmem:[#allocation2 + $0x8] sm:$0xe]  ;;  %v8346_v16 = vld [vmem:[%s10726_s9 + $0x28] sm:$0xff]  ;;  %7920 = vmatprep.mubr.bf16.mxu0 %v8960_v24  ;;  %v7348_v35 = vrot.slane %v7346_v49, 5  ;;  %v7353_v0 = vrot.slane %v7351_v12, 4  ;;  %v6473_v14 = vsel %vm10778_vm11, %v6468_v57, %v11969_v60 }
 0x409   : > { %v7356_v54 = vrot.slane %v7354_v44, 5  ;;  %v7360_v26 = vshll.u32 %v7307_v46, 16  ;;  %v7065_v10 = vld [vmem:[#allocation2 + $0xc] sm:$0x1]  ;;  %v6651_v43 = vsel %vm10767_vm10, %v8976_v41, %v6650_v32  ;;  %v7066_v59 = vld [vmem:[#allocation2 + $0x10] sm:$0xe]  ;;  %v6655_v24 = vsel %vm10767_vm10, %v8977_v42, %v6654_v45 }
 0x40a   : > { %8359 = vrot.lane.b32.xlu0 %v8342_v62, %s10557_s26  ;;  %v7343_v6 = vor.u32 %v7342_v19, %v7339_v38  ;;  %v7067_v55 = vld [vmem:[#allocation2 + $0x14] sm:$0x1]  ;;  %v9002_v15 = vrot.slane %v7064_v58, 9  ;;  %8367 = vrot.lane.b32.xlu1 %v8346_v16, %s10557_s26  ;;  %v7130_v29 = vrot.slane %v7065_v10, 5  ;;  %v9003_v33 = vrot.slane %v7066_v59, 9 }
 0x40b   : > { %v8345_v9 = vld [vmem:[%s10726_s9 + $0x20] sm:$0xff]  ;;  %8018 = vmatmul.mubr.bf16.gmra.mrb[168].mxu1 %v8984_v23  ;;  %v7357_v46 = vor.u32 %v7356_v54, %v7353_v0  ;;  %v10248_v27 = vld [vmem:[#allocation2 + $0x60] ss:$8 sps:$4 sm:$0xff]   ;;  %v6487_v60 = vsel %vm10778_vm11, %v6482_v37, %v6486_v40  ;;  %v7362_v57 = vrot.slane %v7360_v26, 5  ;;  %v7134_v32 = vrot.slane %v7067_v55, 5 }
 0x40c   : > { %8025 = vmatprep.mubr.bf16.mxu1 %v10247_v48  ;;  %v7344_v41 = vrot.slane %v7343_v6, 4  ;;  %v7308_v49 = vld [vmem:[#allocation2 + $0x20] sm:$0xf]  ;;  %v8961_v12 = vcombine.low %v6473_v14, %v6487_v60  ;;  %v8985_v62 = vcombine.low %v6651_v43, %v6655_v24  ;;  %v7309_v44 = vld [vmem:[#allocation2 + $0x24] sm:$0x1]  ;;  %v7131_v16 = vsel %vm10767_vm10, %v9002_v15, %v7130_v29 }
 0x40d   : > { %v7358_v38 = vrot.slane %v7357_v46, 4  ;;  %v7310_v23 = vld [vmem:[#allocation2 + $0x28] sm:$0xf]  ;;  %v7365_v19 = vshrl.u32 %v7308_v49, 16  ;;  %v7135_v45 = vsel %vm10767_vm10, %v9003_v33, %v7134_v32  ;;  %v7311_v48 = vld [vmem:[#allocation2 + $0x2c] sm:$0x1] }
 0x40e   : > { %8365 = vrot.lane.b32.xlu0 %v8345_v9, %s10557_s26  ;;  %v7349_v42 = vsel %vm10778_vm11, %v7344_v41, %v7348_v35  ;;  %v7368_v37 = vshll.u32 %v7308_v49, 16  ;;  %v7374_v40 = vshll.u32 %v7309_v44, 16  ;;  %v6768_v26 = vld [vmem:[#allocation2 + $0x8] sm:$0xf]  ;;  %v7379_v54 = vshrl.u32 %v7310_v23, 16 }
 0x40f   : > { %v7363_v58 = vsel %vm10778_vm11, %v7358_v38, %v7362_v57  ;;  %v7367_v0 = vrot.slane %v7365_v19, 4  ;;  %v6769_v10 = vld [vmem:[#allocation2 + $0xc] sm:$0x1]  ;;  %v6770_v14 = vld [vmem:[#allocation2 + $0x10] sm:$0xf]  ;;  %7921 = vmatmul.mubr.bf16.gmra.mrb[168].mxu0 %v10248_v27  ;;  %v9018_v35 = vcombine.low %v7131_v16, %v7135_v45  ;;  %v7382_v59 = vshll.u32 %v7310_v23, 16 }
 0x410   : > { %v9034_v43 = vcombine.low %v7349_v42, %v7363_v58  ;;  %v7370_v6 = vrot.slane %v7368_v37, 5  ;;  %v6771_v55 = vld [vmem:[#allocation2 + $0x14] sm:$0x1]  ;;  %7928 = vmatprep.mubr.bf16.mxu0 %v8961_v12  ;;  %v7381_v9 = vrot.slane %v7379_v54, 4  ;;  %v7388_v24 = vshll.u32 %v7311_v48, 16 }
 0x411   : > { %v6801_v46 = vshrl.u32 %v6768_v26, 16  ;;  %v6804_v33 = vshll.u32 %v6768_v26, 16  ;;  %v7068_v60 = vld [vmem:[#allocation2 + $0x18] sm:$0xe]  ;;  %v7384_v57 = vrot.slane %v7382_v59, 5  ;;  %v6810_v32 = vshll.u32 %v6769_v10, 16 }
 0x412   : > { %v7371_v41 = vor.u32 %v7370_v6, %v7367_v0  ;;  %v6815_v15 = vshrl.u32 %v6770_v14, 16  ;;  %v7069_v29 = vld [vmem:[#allocation2 + $0x1c] sm:$0x1]  ;;  %v7376_v49 = vrot.slane %v7374_v40, 5  ;;  %v6818_v44 = vshll.u32 %v6770_v14, 16 }
 0x413   : > { %8026 = vmatmul.mubr.bf16.gmra.mrb[172].mxu1 %v8985_v62  ;;  %v6803_v38 = vrot.slane %v6801_v46, 4  ;;  %v6806_v27 = vrot.slane %v6804_v33, 5  ;;  %v7070_v19 = vld [vmem:[#allocation2 + $0x20] sm:$0xe]  ;;  %v10249_v23 = vld [vmem:[#allocation2 + $0x70] ss:$8 sps:$4 sm:$0xff]   ;;  %v7385_v12 = vor.u32 %v7384_v57, %v7381_v9 }
 0x414   : > { %8163 = vmatprep.mubr.bf16.mxu1 %v9034_v43  ;;  %v7372_v42 = vrot.slane %v7371_v41, 4  ;;  %v7390_v45 = vrot.slane %v7388_v24, 5  ;;  %v6817_v48 = vrot.slane %v6815_v15, 4  ;;  %v7071_v37 = vld [vmem:[#allocation2 + $0x24] sm:$0x1]  ;;  %v6820_v58 = vrot.slane %v6818_v44, 5 }
 0x415   : > { %v6807_v26 = vor.u32 %v6806_v27, %v6803_v38  ;;  %v6824_v16 = vshll.u32 %v6771_v55, 16  ;;  %v9004_v0 = vrot.slane %v7068_v60, 9  ;;  %v7386_v54 = vrot.slane %v7385_v12, 4  ;;  %v7312_v24 = vld [vmem:[#allocation2 + $0x30] sm:$0xf] }
 0x416   : > { %v6812_v10 = vrot.slane %v6810_v32, 5  ;;  %v7138_v6 = vrot.slane %v7069_v29, 5  ;;  %v9005_v62 = vrot.slane %v7070_v19, 9  ;;  %v6821_v59 = vor.u32 %v6820_v58, %v6817_v48  ;;  %v7313_v33 = vld [vmem:[#allocation2 + $0x34] sm:$0x1] }
 0x417   : > { %v6808_v40 = vrot.slane %v6807_v26, 4  ;;  %v6826_v46 = vrot.slane %v6824_v16, 5  ;;  %v7142_v14 = vrot.slane %v7071_v37, 5  ;;  %7929 = vmatmul.mubr.bf16.gmra.mrb[172].mxu0 %v10249_v23  ;;  %v7377_v43 = vsel %vm10778_vm11, %v7372_v42, %v7376_v49  ;;  %v7314_v41 = vld [vmem:[#allocation2 + $0x38] sm:$0xf] }
 0x418   : > { %v7391_v9 = vsel %vm10778_vm11, %v7386_v54, %v7390_v45  ;;  %8066 = vmatprep.mubr.bf16.mxu0 %v9018_v35  ;;  %v10250_v55 = vld [vmem:[#allocation2 + $0x10] ss:$8 sps:$4 sm:$0xff]   ;;  %v6822_v57 = vrot.slane %v6821_v59, 4  ;;  %v7139_v32 = vsel %vm10767_vm10, %v9004_v0, %v7138_v6  ;;  %v7315_v29 = vld [vmem:[#allocation2 + $0x3c] sm:$0x1]  ;;  %v7393_v38 = vshrl.u32 %v7312_v24, 16 }
 0x419   : > { %v9035_v60 = vcombine.low %v7377_v43, %v7391_v9  ;;  %v7143_v15 = vsel %vm10767_vm10, %v9005_v62, %v7142_v14  ;;  %v6813_v49 = vsel %vm10778_vm11, %v6808_v40, %v6812_v10  ;;  %v7396_v27 = vshll.u32 %v7312_v24, 16  ;;  %v6772_v19 = vld [vmem:[#allocation2 + $0x18] sm:$0xf]  ;;  %v6773_v45 = vld [vmem:[#allocation2 + $0x1c] sm:$0x1] }
 0x41a   : > { %v7402_v44 = vshll.u32 %v7313_v33, 16  ;;  %v6827_v35 = vsel %vm10778_vm11, %v6822_v57, %v6826_v46  ;;  %v9019_v23 = vcombine.low %v7139_v32, %v7143_v15  ;;  %v7407_v42 = vshrl.u32 %v7314_v41, 16  ;;  %v6774_v48 = vld [vmem:[#allocation2 + $0x20] sm:$0xf]  ;;  %v6775_v0 = vld [vmem:[#allocation2 + $0x24] sm:$0x1] }
 0x41b   : > { %8164 = vmatmul.mubr.bf16.vlgmr.msra.gmra.mrb[176].mxu1 %v10250_v55  ;;  %v7410_v12 = vshll.u32 %v7314_v41, 16  ;;  %v8994_v37 = vcombine.low %v6813_v49, %v6827_v35  ;;  %v7395_v26 = vrot.slane %v7393_v38, 4  ;;  %v7398_v58 = vrot.slane %v7396_v27, 5  ;;  %v10396_v40 = vld [vmem:[#allocation7 + $0x208] sm:$0xff]   ;;  %v7072_v59 = vld [vmem:[#allocation2 + $0x28] sm:$0xe] }
 0x41c   : > { %8171 = vmatprep.mubr.bf16.mxu1 %v9035_v60  ;;  %10041 = vmatpush3.bf16.msra.mxu1 %v11947_v63  ;;  %v7416_v16 = vshll.u32 %v7315_v29, 16  ;;  %v7404_v54 = vrot.slane %v7402_v44, 5  ;;  %v7409_v10 = vrot.slane %v7407_v42, 4  ;;  %v6829_v62 = vshrl.u32 %v6772_v19, 16  ;;  %v7073_v24 = vld [vmem:[#allocation2 + $0x2c] sm:$0x1] }
 0x41d   : > { %v7412_v6 = vrot.slane %v7410_v12, 5  ;;  %10034 = vmatprep.subr.bf16.mxu1 %v10396_v40  ;;  %v7399_v46 = vor.u32 %v7398_v58, %v7395_v26  ;;  %v6832_v14 = vshll.u32 %v6772_v19, 16  ;;  %v6838_v43 = vshll.u32 %v6773_v45, 16  ;;  %v10251_v33 = vld [vmem:[#allocation2 + $0x20] ss:$8 sps:$4 sm:$0xff]  }
 0x41e   : > { %v6843_v9 = vshrl.u32 %v6774_v48, 16  ;;  %v6831_v55 = vrot.slane %v6829_v62, 4  ;;  %v6846_v60 = vshll.u32 %v6774_v48, 16  ;;  %v6852_v57 = vshll.u32 %v6775_v0, 16  ;;  %v7074_v32 = vld [vmem:[#allocation2 + $0x30] sm:$0xe] }
 0x41f   : > { %v7413_v41 = vor.u32 %v7412_v6, %v7409_v10  ;;  %8067 = vmatmul.mubr.bf16.vlgmr.msra.gmra.mrb[176].mxu0 %v8994_v37  ;;  %v7400_v15 = vrot.slane %v7399_v46, 4  ;;  %v7418_v29 = vrot.slane %v7416_v16, 5  ;;  %v6834_v49 = vrot.slane %v6832_v14, 5  ;;  %v7075_v27 = vld [vmem:[#allocation2 + $0x34] sm:$0x1]  ;;  %v10397_v26 = vld [vmem:[#allocation7 + $0x210] sm:$0xff]  }
 0x420   : > { %v6845_v38 = vrot.slane %v6843_v9, 4  ;;  %10042 = vmatpush3.bf16.msra.mxu1 %v10396_v40  ;;  %8074 = vmatprep.mubr.bf16.mxu0 %v9019_v23  ;;  %v6840_v19 = vrot.slane %v6838_v43, 5  ;;  %v6848_v35 = vrot.slane %v6846_v60, 5  ;;  %v9006_v42 = vrot.slane %v7072_v59, 9  ;;  %v7316_v0 = vld [vmem:[#allocation2 + $0x40] sm:$0xf] }
 0x421   : > { %10002 = vmatpush3.bf16.msra.mxu0 %v11947_v63  ;;  %v7414_v44 = vrot.slane %v7413_v41, 4  ;;  %v7405_v12 = vsel %vm10778_vm11, %v7400_v15, %v7404_v54  ;;  %v6835_v45 = vor.u32 %v6834_v49, %v6831_v55  ;;  %v7146_v48 = vrot.slane %v7073_v24, 5  ;;  %10035 = vmatprep.subr.bf16.mxu1 %v10397_v26  ;;  %v7317_v10 = vld [vmem:[#allocation2 + $0x44] sm:$0x1]  ;;  %v7318_v59 = vld [vmem:[#allocation2 + $0x48] sm:$0xf] }
 0x422   : > { %10003 = vmatprep.subr.bf16.mxu0 %v10396_v40  ;;  %v9007_v37 = vrot.slane %v7074_v32, 9  ;;  %v6849_v23 = vor.u32 %v6848_v35, %v6845_v38  ;;  %v6854_v16 = vrot.slane %v6852_v57, 5  ;;  %v7150_v63 = vrot.slane %v7075_v27, 5  ;;  %v7319_v46 = vld [vmem:[#allocation2 + $0x4c] sm:$0x1] }
 0x423   : > { %8172 = vmatmul.mubr.bf16.gmra.mrb[180].mxu1 %v10251_v33  ;;  %v7419_v58 = vsel %vm10778_vm11, %v7414_v44, %v7418_v29  ;;  %v6836_v62 = vrot.slane %v6835_v45, 4  ;;  %v7147_v54 = vsel %vm10767_vm10, %v9006_v42, %v7146_v48  ;;  %v7421_v14 = vshrl.u32 %v7316_v0, 16  ;;  %v6776_v41 = vld [vmem:[#allocation2 + $0x28] sm:$0xf]  ;;  %v6777_v29 = vld [vmem:[#allocation2 + $0x2c] sm:$0x1] }
 0x424   : > { %v9036_v6 = vcombine.low %v7405_v12, %v7419_v58  ;;  %10043 = vmatpush3.bf16.msra.mxu1 %v10397_v26  ;;  %v6850_v43 = vrot.slane %v6849_v23, 4  ;;  %v7151_v9 = vsel %vm10767_vm10, %v9007_v37, %v7150_v63  ;;  %v7424_v24 = vshll.u32 %v7316_v0, 16  ;;  %v10398_v55 = vld [vmem:[#allocation7 + $0x218] sm:$0xff]   ;;  %v6778_v49 = vld [vmem:[#allocation2 + $0x30] sm:$0xf] }
 0x425   : > { %10004 = vmatpush3.bf16.msra.mxu0 %v10396_v40  ;;  %v7430_v33 = vshll.u32 %v7317_v10, 16  ;;  %10036 = vmatprep.subr.bf16.mxu1 %v10398_v55  ;;  %v6841_v60 = vsel %vm10778_vm11, %v6836_v62, %v6840_v19  ;;  %v9020_v57 = vcombine.low %v7147_v54, %v7151_v9  ;;  %v7423_v32 = vrot.slane %v7421_v14, 4  ;;  %v10252_v27 = vld [vmem:[#allocation2 + $0x30] ss:$8 sps:$4 sm:$0xff]   ;;  %v6779_v42 = vld [vmem:[#allocation2 + $0x34] sm:$0x1] }
 0x426   : > { %8179 = vmatprep.mubr.bf16.mxu1 %v9036_v6  ;;  %v7435_v15 = vshrl.u32 %v7318_v59, 16  ;;  %10005 = vmatprep.subr.bf16.mxu0 %v10397_v26  ;;  %v6855_v38 = vsel %vm10778_vm11, %v6850_v43, %v6854_v16  ;;  %v7426_v40 = vrot.slane %v7424_v24, 5  ;;  %v7438_v35 = vshll.u32 %v7318_v59, 16  ;;  %v7076_v58 = vld [vmem:[#allocation2 + $0x38] sm:$0xe]  ;;  %v10399_v6 = vld [vmem:[#allocation7 + $0x220] sm:$0xff]  }
 0x427   : > { %v7432_v44 = vrot.slane %v7430_v33, 5  ;;  %v8995_v12 = vcombine.low %v6841_v60, %v6855_v38  ;;  %v7444_v48 = vshll.u32 %v7319_v46, 16  ;;  %v6857_v37 = vshrl.u32 %v6776_v41, 16  ;;  %v7077_v10 = vld [vmem:[#allocation2 + $0x3c] sm:$0x1] }
 0x428   : > { %v7437_v45 = vrot.slane %v7435_v15, 4  ;;  %10044 = vmatpush3.bf16.msra.mxu1 %v10398_v55  ;;  %v7427_v19 = vor.u32 %v7426_v40, %v7423_v32  ;;  %v7440_v23 = vrot.slane %v7438_v35, 5  ;;  %v6860_v63 = vshll.u32 %v6776_v41, 16  ;;  %v7078_v14 = vld [vmem:[#allocation2 + $0x40] sm:$0xe]  ;;  %v8348_v41 = vld [vmem:[%s10726_s9 + $0x38] sm:$0xff] }
 0x429   : > { %v6866_v0 = vshll.u32 %v6777_v29, 16  ;;  %10006 = vmatpush3.bf16.msra.mxu0 %v10397_v26  ;;  %10037 = vmatprep.subr.bf16.mxu1 %v10399_v6  ;;  %v7446_v16 = vrot.slane %v7444_v48, 5  ;;  %v6859_v62 = vrot.slane %v6857_v37, 4  ;;  %v6871_v54 = vshrl.u32 %v6778_v49, 16  ;;  %v7079_v33 = vld [vmem:[#allocation2 + $0x44] sm:$0x1] }
 0x42a   : > { %8075 = vmatmul.mubr.bf16.gmra.mrb[180].mxu0 %v8995_v12  ;;  %v6874_v59 = vshll.u32 %v6778_v49, 16  ;;  %10007 = vmatprep.subr.bf16.mxu0 %v10398_v55  ;;  %v7428_v46 = vrot.slane %v7427_v19, 4  ;;  %v7441_v43 = vor.u32 %v7440_v23, %v7437_v45  ;;  %v6862_v9 = vrot.slane %v6860_v63, 5  ;;  %v7320_v45 = vld [vmem:[#allocation2 + $0x50] sm:$0xf]  ;;  %v8347_v48 = vld [vmem:[%s10726_s9 + $0x30] sm:$0xff] }
 0x42b   : > { %8082 = vmatprep.mubr.bf16.mxu0 %v9020_v57  ;;  %8180 = vmatmul.mubr.bf16.gmra.mrb[184].mxu1 %v10252_v27  ;;  %v6868_v24 = vrot.slane %v6866_v0, 5  ;;  %v6873_v60 = vrot.slane %v6871_v54, 4  ;;  %v6880_v32 = vshll.u32 %v6779_v42, 16  ;;  %v9008_v15 = vrot.slane %v7076_v58, 9  ;;  %v12038_v27 = vld [vmem:[#allocation7 + $0x228] sm:$0xff]  }
 0x42c   : > { %v6876_v26 = vrot.slane %v6874_v59, 5  ;;  %10045 = vmatpush3.bf16.msra.mxu1 %v10399_v6  ;;  %8371 = vrot.lane.b32.xlu1 %v8348_v41, %s10557_s26  ;;  %v7433_v29 = vsel %vm10778_vm11, %v7428_v46, %v7432_v44  ;;  %v7442_v49 = vrot.slane %v7441_v43, 4  ;;  %v6863_v57 = vor.u32 %v6862_v9, %v6859_v62  ;;  %v10253_v19 = vld [vmem:[#allocation2 + $0x40] ss:$8 sps:$4 sm:$0xff]   ;;  %v7322_v23 = vld [vmem:[#allocation2 + $0x58] sm:$0xf] }
 0x42d   : > { %v7154_v38 = vrot.slane %v7077_v10, 5  ;;  %10008 = vmatpush3.bf16.msra.mxu0 %v10398_v55  ;;  %10038 = vmatprep.subr.bf16.mxu1 %v12038_v27  ;;  %v6882_v35 = vrot.slane %v6880_v32, 5  ;;  %v9009_v12 = vrot.slane %v7078_v14, 9  ;;  %v7158_v42 = vrot.slane %v7079_v33, 5  ;;  %v7321_v55 = vld [vmem:[#allocation2 + $0x54] sm:$0x1] }
 0x42e   : > { %v6877_v40 = vor.u32 %v6876_v26, %v6873_v60  ;;  %10009 = vmatprep.subr.bf16.mxu0 %v10399_v6  ;;  %v7447_v37 = vsel %vm10778_vm11, %v7442_v49, %v7446_v16  ;;  %v6864_v58 = vrot.slane %v6863_v57, 4  ;;  %v7449_v63 = vshrl.u32 %v7320_v45, 16  ;;  %8369 = vrot.lane.b32.xlu0 %v8347_v48, %s10557_s26  ;;  %v7323_v54 = vld [vmem:[#allocation2 + $0x5c] sm:$0x1]  ;;  %v6780_v14 = vld [vmem:[#allocation2 + $0x38] sm:$0xf] }
 0x42f   : > { %v7155_v44 = vsel %vm10767_vm10, %v9008_v15, %v7154_v38  ;;  %v9037_v0 = vcombine.low %v7433_v29, %v7447_v37  ;;  %v7159_v62 = vsel %vm10767_vm10, %v9009_v12, %v7158_v42  ;;  %v7452_v59 = vshll.u32 %v7320_v45, 16  ;;  %v6781_v33 = vld [vmem:[#allocation2 + $0x3c] sm:$0x1]  ;;  %v6782_v41 = vld [vmem:[#allocation2 + $0x40] sm:$0xf]  ;;  %v8349_v42 = vld [vmem:[%s10726_s9 + $0x40] sm:$0xff] }
 0x430   : > { %v6878_v10 = vrot.slane %v6877_v40, 4  ;;  %10046 = vmatpush3.bf16.msra.mxu1 %v12038_v27  ;;  %v6869_v16 = vsel %vm10778_vm11, %v6864_v58, %v6868_v24  ;;  %v9021_v46 = vcombine.low %v7155_v44, %v7159_v62  ;;  %v7451_v43 = vrot.slane %v7449_v63, 4  ;;  %v10401_v60 = vld [vmem:[#allocation7 + $0x230] sm:$0xff]   ;;  %v8350_v24 = vld [vmem:[%s10726_s9 + $0x48] sm:$0xff]  ;;  %v7081_v58 = vld [vmem:[#allocation2 + $0x4c] sm:$0x1] }
 0x431   : > { %v7458_v9 = vshll.u32 %v7321_v55, 16  ;;  %10010 = vmatpush3.bf16.msra.mxu0 %v10399_v6  ;;  %10039 = vmatprep.subr.bf16.mxu1 %v10401_v60  ;;  %v7454_v32 = vrot.slane %v7452_v59, 5  ;;  %v7463_v15 = vshrl.u32 %v7322_v23, 16  ;;  %v7466_v29 = vshll.u32 %v7322_v23, 16  ;;  %v6783_v49 = vld [vmem:[#allocation2 + $0x44] sm:$0x1] }
 0x432   : > { %8187 = vmatprep.mubr.bf16.mxu1 %v9037_v0  ;;  %v6883_v26 = vsel %vm10778_vm11, %v6878_v10, %v6882_v35  ;;  %10011 = vmatprep.subr.bf16.mxu0 %v12038_v27  ;;  %v7472_v40 = vshll.u32 %v7323_v54, 16  ;;  %v6885_v12 = vshrl.u32 %v6780_v14, 16  ;;  %v7080_v6 = vld [vmem:[#allocation2 + $0x48] sm:$0xe]  ;;  %v6888_v35 = vshll.u32 %v6780_v14, 16 }
 0x433   : > { %v8996_v57 = vcombine.low %v6869_v16, %v6883_v26  ;;  %8188 = vmatmul.mubr.bf16.gmra.mrb[188].mxu1 %v10253_v19  ;;  %v7460_v38 = vrot.slane %v7458_v9, 5  ;;  %8375 = vrot.lane.b32.xlu1 %v8350_v24, %s10557_s26  ;;  %v7455_v45 = vor.u32 %v7454_v32, %v7451_v43  ;;  %v7465_v48 = vrot.slane %v7463_v15, 4  ;;  %v7082_v63 = vld [vmem:[#allocation2 + $0x50] sm:$0xe]  ;;  %v10402_v0 = vld [vmem:[#allocation7 + $0x238] sm:$0xff]  }
 0x434   : > { %v7468_v37 = vrot.slane %v7466_v29, 5  ;;  %10047 = vmatpush3.bf16.msra.mxu1 %v10401_v60  ;;  %8373 = vrot.lane.b32.xlu0 %v8349_v42, %s10557_s26  ;;  %v7474_v44 = vrot.slane %v7472_v40, 5  ;;  %v6887_v55 = vrot.slane %v6885_v12, 4  ;;  %v6894_v23 = vshll.u32 %v6781_v33, 16  ;;  %v7083_v16 = vld [vmem:[#allocation2 + $0x54] sm:$0x1] }
 0x435   : > { %8083 = vmatmul.mubr.bf16.gmra.mrb[184].mxu0 %v8996_v57  ;;  %v6899_v19 = vshrl.u32 %v6782_v41, 16  ;;  %10040 = vmatprep.subr.bf16.mxu1 %v10402_v0  ;;  %v7456_v10 = vrot.slane %v7455_v45, 4  ;;  %v6890_v54 = vrot.slane %v6888_v35, 5  ;;  %v6902_v59 = vshll.u32 %v6782_v41, 16  ;;  %v7324_v41 = vld [vmem:[#allocation2 + $0x60] sm:$0xf] }
 0x436   : > { %8090 = vmatprep.mubr.bf16.mxu0 %v9021_v46  ;;  %v7469_v62 = vor.u32 %v7468_v37, %v7465_v48  ;;  %10012 = vmatpush3.bf16.msra.mxu0 %v12038_v27  ;;  %v6896_v14 = vrot.slane %v6894_v23, 5  ;;  %v6908_v9 = vshll.u32 %v6783_v49, 16  ;;  %v9010_v26 = vrot.slane %v7080_v6, 9  ;;  %v7325_v6 = vld [vmem:[#allocation2 + $0x64] sm:$0x1]  ;;  %v8352_v23 = vld [vmem:[%s10726_s9 + $0x58] sm:$0xff] }
 0x437   : > { %v6901_v43 = vrot.slane %v6899_v19, 4  ;;  %10013 = vmatprep.subr.bf16.mxu0 %v10401_v60  ;;  %v7461_v33 = vsel %vm10778_vm11, %v7456_v10, %v7460_v38  ;;  %v6891_v15 = vor.u32 %v6890_v54, %v6887_v55  ;;  %v6904_v29 = vrot.slane %v6902_v59, 5  ;;  %v7326_v42 = vld [vmem:[#allocation2 + $0x68] sm:$0xf]  ;;  %v7327_v35 = vld [vmem:[#allocation2 + $0x6c] sm:$0x1]  ;;  %8379 = vrot.lane.b32.xlu1 %v8352_v23, %s10557_s26 }
 0x438   : > { %v7470_v32 = vrot.slane %v7469_v62, 4  ;;  %10048 = vmatpush3.bf16.msra.mxu1 %v10402_v0  ;;  %v6910_v46 = vrot.slane %v6908_v9, 5  ;;  %v7162_v24 = vrot.slane %v7081_v58, 5  ;;  %v9011_v57 = vrot.slane %v7082_v63, 9  ;;  %v6784_v55 = vld [vmem:[#allocation2 + $0x48] sm:$0xf] }
 0x439   : > { %v7166_v40 = vrot.slane %v7083_v16, 5  ;;  %v6892_v12 = vrot.slane %v6891_v15, 4  ;;  %v6905_v49 = vor.u32 %v6904_v29, %v6901_v43  ;;  %v7477_v45 = vshrl.u32 %v7324_v41, 16  ;;  %v10254_v10 = vld [vmem:[#allocation2 + $0x50] ss:$8 sps:$4 sm:$0xff]   ;;  %v8351_v29 = vld [vmem:[%s10726_s9 + $0x50] sm:$0xff] }
 0x43a   : > { %v7475_v27 = vsel %vm10778_vm11, %v7470_v32, %v7474_v44  ;;  %10014 = vmatpush3.bf16.msra.mxu0 %v10401_v60  ;;  %v7163_v48 = vsel %vm10767_vm10, %v9010_v26, %v7162_v24  ;;  %v7480_v58 = vshll.u32 %v7324_v41, 16  ;;  %v6785_v60 = vld [vmem:[#allocation2 + $0x4c] sm:$0x1]  ;;  %v7486_v59 = vshll.u32 %v7325_v6, 16  ;;  %v6786_v9 = vld [vmem:[#allocation2 + $0x50] sm:$0xf]  ;;  %8377 = vrot.lane.b32.xlu0 %v8351_v29, %s10557_s26 }
 0x43b   : > { %v9038_v38 = vcombine.low %v7461_v33, %v7475_v27  ;;  %v7167_v37 = vsel %vm10767_vm10, %v9011_v57, %v7166_v40  ;;  %10015 = vmatprep.subr.bf16.mxu0 %v10402_v0  ;;  %v6897_v44 = vsel %vm10778_vm11, %v6892_v12, %v6896_v14  ;;  %v6906_v19 = vrot.slane %v6905_v49, 4  ;;  %v6787_v14 = vld [vmem:[#allocation2 + $0x54] sm:$0x1]  ;;  %v7084_v27 = vld [vmem:[#allocation2 + $0x58] sm:$0xe] }
 0x43c   : > { %v9022_v63 = vcombine.low %v7163_v48, %v7167_v37  ;;  %v7479_v62 = vrot.slane %v7477_v45, 4  ;;  %v7482_v54 = vrot.slane %v7480_v58, 5  ;;  %v7491_v16 = vshrl.u32 %v7326_v42, 16  ;;  %v7085_v12 = vld [vmem:[#allocation2 + $0x5c] sm:$0x1] }
 0x43d   : > { %8195 = vmatprep.mubr.bf16.mxu1 %v9038_v38  ;;  %v7494_v43 = vshll.u32 %v7326_v42, 16  ;;  %v6911_v26 = vsel %vm10778_vm11, %v6906_v19, %v6910_v46  ;;  %v7500_v33 = vshll.u32 %v7327_v35, 16  ;;  %v6913_v32 = vshrl.u32 %v6784_v55, 16  ;;  %v7086_v46 = vld [vmem:[#allocation2 + $0x60] sm:$0xe] }
 0x43e   : > { %8196 = vmatmul.mubr.bf16.gmra.mrb[192].mxu1 %v10254_v10  ;;  %v6916_v15 = vshll.u32 %v6784_v55, 16  ;;  %10016 = vmatpush3.bf16.msra.mxu0 %v10402_v0  ;;  %v8997_v24 = vcombine.low %v6897_v44, %v6911_v26  ;;  %v7483_v57 = vor.u32 %v7482_v54, %v7479_v62  ;;  %v7488_v40 = vrot.slane %v7486_v59, 5  ;;  %v7087_v23 = vld [vmem:[#allocation2 + $0x64] sm:$0x1]  ;;  %v7328_v54 = vld [vmem:[#allocation2 + $0x70] sm:$0xf] }
 0x43f   : > { %v7493_v41 = vrot.slane %v7491_v16, 4  ;;  %v7496_v49 = vrot.slane %v7494_v43, 5  ;;  %v7502_v6 = vrot.slane %v7500_v33, 5  ;;  %v6915_v42 = vrot.slane %v6913_v32, 4  ;;  %v8354_v59 = vld [vmem:[%s10726_s9 + $0x68] sm:$0xff] }
 0x440   : > { %v6918_v45 = vrot.slane %v6916_v15, 5  ;;  %8091 = vmatmul.mubr.bf16.gmra.mrb[188].mxu0 %v8997_v24  ;;  %v7484_v38 = vrot.slane %v7483_v57, 4  ;;  %v6922_v48 = vshll.u32 %v6785_v60, 16  ;;  %v6927_v37 = vshrl.u32 %v6786_v9, 16  ;;  %8383 = vrot.lane.b32.xlu1 %v8354_v59, %s10557_s26  ;;  %v7329_v32 = vld [vmem:[#allocation2 + $0x74] sm:$0x1] }
 0x441   : > { %v6930_v0 = vshll.u32 %v6786_v9, 16  ;;  %8098 = vmatprep.mubr.bf16.mxu0 %v9022_v63  ;;  %v7497_v35 = vor.u32 %v7496_v49, %v7493_v41  ;;  %v6936_v55 = vshll.u32 %v6787_v14, 16  ;;  %v9012_v44 = vrot.slane %v7084_v27, 9  ;;  %v7330_v15 = vld [vmem:[#allocation2 + $0x78] sm:$0xf]  ;;  %v8353_v49 = vld [vmem:[%s10726_s9 + $0x60] sm:$0xff] }
 0x442   : > { %v6919_v58 = vor.u32 %v6918_v45, %v6915_v42  ;;  %v6924_v19 = vrot.slane %v6922_v48, 5  ;;  %v6929_v10 = vrot.slane %v6927_v37, 4  ;;  %v7170_v33 = vrot.slane %v7085_v12, 5  ;;  %v10255_v41 = vld [vmem:[#allocation2 + $0x60] ss:$8 sps:$4 sm:$0xff]   ;;  %8381 = vrot.lane.b32.xlu0 %v8353_v49, %s10557_s26 }
 0x443   : > { %v6932_v62 = vrot.slane %v6930_v0, 5  ;;  %v7498_v16 = vrot.slane %v7497_v35, 4  ;;  %v6938_v26 = vrot.slane %v6936_v55, 5  ;;  %v7489_v63 = vsel %vm10778_vm11, %v7484_v38, %v7488_v40  ;;  %v7331_v27 = vld [vmem:[#allocation2 + $0x7c] sm:$0x1]  ;;  %v8356_v55 = vld [vmem:[%s10726_s9 + $0x78] sm:$0xff] }
 0x444   : > { %v6920_v43 = vrot.slane %v6919_v58, 4  ;;  %v9013_v9 = vrot.slane %v7086_v46, 9  ;;  %v7174_v14 = vrot.slane %v7087_v23, 5  ;;  %v7171_v57 = vsel %vm10767_vm10, %v9012_v44, %v7170_v33  ;;  %v6788_v38 = vld [vmem:[#allocation2 + $0x58] sm:$0xf]  ;;  %8387 = vrot.lane.b32.xlu1 %v8356_v55, %s10557_s26 }
 0x445   : > { %v6933_v60 = vor.u32 %v6932_v62, %v6929_v10  ;;  %v7503_v29 = vsel %vm10778_vm11, %v7498_v16, %v7502_v6  ;;  %v7505_v12 = vshrl.u32 %v7328_v54, 16  ;;  %v7508_v46 = vshll.u32 %v7328_v54, 16  ;;  %v6789_v6 = vld [vmem:[#allocation2 + $0x5c] sm:$0x1]  ;;  %v6790_v58 = vld [vmem:[#allocation2 + $0x60] sm:$0xf] }
 0x446   : > { %v6925_v24 = vsel %vm10778_vm11, %v6920_v43, %v6924_v19  ;;  %v9039_v40 = vcombine.low %v7489_v63, %v7503_v29  ;;  %v7175_v45 = vsel %vm10767_vm10, %v9013_v9, %v7174_v14  ;;  %v7514_v0 = vshll.u32 %v7329_v32, 16  ;;  %v6791_v62 = vld [vmem:[#allocation2 + $0x64] sm:$0x1]  ;;  %v7088_v63 = vld [vmem:[#allocation2 + $0x68] sm:$0xe] }
 0x447   : > { %v6934_v42 = vrot.slane %v6933_v60, 4  ;;  %v9023_v48 = vcombine.low %v7171_v57, %v7175_v45  ;;  %v7507_v37 = vrot.slane %v7505_v12, 4  ;;  %v7519_v35 = vshrl.u32 %v7330_v15, 16  ;;  %v8355_v54 = vld [vmem:[%s10726_s9 + $0x70] sm:$0xff]  ;;  %v7089_v29 = vld [vmem:[#allocation2 + $0x6c] sm:$0x1] }
 0x448   : > { %8203 = vmatprep.mubr.bf16.mxu1 %v9039_v40  ;;  %v7510_v44 = vrot.slane %v7508_v46, 5  ;;  %v7522_v19 = vshll.u32 %v7330_v15, 16  ;;  %v7528_v10 = vshll.u32 %v7331_v27, 16  ;;  %v7516_v16 = vrot.slane %v7514_v0, 5  ;;  %v7090_v57 = vld [vmem:[#allocation2 + $0x70] sm:$0xe]  ;;  %8385 = vrot.lane.b32.xlu0 %v8355_v54, %s10557_s26 }
 0x449   : > { %v6939_v23 = vsel %vm10778_vm11, %v6934_v42, %v6938_v26  ;;  %8204 = vmatmul.mubr.bf16.gmra.mrb[196].mxu1 %v10255_v41  ;;  %v7521_v43 = vrot.slane %v7519_v35, 4  ;;  %v6941_v33 = vshrl.u32 %v6788_v38, 16  ;;  %v6944_v32 = vshll.u32 %v6788_v38, 16  ;;  %v7091_v26 = vld [vmem:[#allocation2 + $0x74] sm:$0x1] }
 0x44a   : > { %v8998_v59 = vcombine.low %v6925_v24, %v6939_v23  ;;  %v7511_v60 = vor.u32 %v7510_v44, %v7507_v37  ;;  %v7524_v9 = vrot.slane %v7522_v19, 5  ;;  %v7530_v14 = vrot.slane %v7528_v10, 5  ;;  %v7332_v44 = vld [vmem:[#allocation2 + $0x80] sm:$0xf] }
 0x44b   : > { %v6943_v15 = vrot.slane %v6941_v33, 4  ;;  %v6950_v27 = vshll.u32 %v6789_v6, 16  ;;  %v6955_v12 = vshrl.u32 %v6790_v58, 16  ;;  %v6958_v49 = vshll.u32 %v6790_v58, 16 }
 0x44c   : > { %8099 = vmatmul.mubr.bf16.gmra.mrb[192].mxu0 %v8998_v59  ;;  %v7512_v24 = vrot.slane %v7511_v60, 4  ;;  %v7525_v41 = vor.u32 %v7524_v9, %v7521_v43  ;;  %v6946_v40 = vrot.slane %v6944_v32, 5  ;;  %v6964_v42 = vshll.u32 %v6791_v62, 16  ;;  %v7334_v59 = vld [vmem:[#allocation2 + $0x88] sm:$0xf] }
 0x44d   : > { %8106 = vmatprep.mubr.bf16.mxu0 %v9023_v48  ;;  %v6952_v45 = vrot.slane %v6950_v27, 5  ;;  %v6957_v46 = vrot.slane %v6955_v12, 4  ;;  %v6960_v37 = vrot.slane %v6958_v49, 5  ;;  %v9014_v0 = vrot.slane %v7088_v63, 9  ;;  %v7333_v48 = vld [vmem:[#allocation2 + $0x84] sm:$0x1] }
 0x44e   : > { %v7517_v38 = vsel %vm10778_vm11, %v7512_v24, %v7516_v16  ;;  %v7526_v35 = vrot.slane %v7525_v41, 4  ;;  %v6947_v55 = vor.u32 %v6946_v40, %v6943_v15  ;;  %v6966_v23 = vrot.slane %v6964_v42, 5  ;;  %v7335_v32 = vld [vmem:[#allocation2 + $0x8c] sm:$0x1]  ;;  %v10256_v15 = vld [vmem:[#allocation2 + $0x70] ss:$8 sps:$4 sm:$0xff]  }
 0x44f   : > { %v6961_v19 = vor.u32 %v6960_v37, %v6957_v46  ;;  %v7178_v6 = vrot.slane %v7089_v29, 5  ;;  %v9015_v10 = vrot.slane %v7090_v57, 9  ;;  %v7182_v58 = vrot.slane %v7091_v26, 5  ;;  %v6792_v29 = vld [vmem:[#allocation2 + $0x68] sm:$0xf] }
 0x450   : > { %v7531_v54 = vsel %vm10778_vm11, %v7526_v35, %v7530_v14  ;;  %v6948_v62 = vrot.slane %v6947_v55, 4  ;;  %v7533_v43 = vshrl.u32 %v7332_v44, 16  ;;  %v7536_v33 = vshll.u32 %v7332_v44, 16  ;;  %v6793_v12 = vld [vmem:[#allocation2 + $0x6c] sm:$0x1] }
 0x451   : > { %v9040_v63 = vcombine.low %v7517_v38, %v7531_v54  ;;  %v6962_v60 = vrot.slane %v6961_v19, 4  ;;  %v7179_v16 = vsel %vm10767_vm10, %v9014_v0, %v7178_v6  ;;  %v7183_v9 = vsel %vm10767_vm10, %v9015_v10, %v7182_v58  ;;  %v6794_v42 = vld [vmem:[#allocation2 + $0x70] sm:$0xf]  ;;  %v6795_v38 = vld [vmem:[#allocation2 + $0x74] sm:$0x1] }
 0x452   : > { %v6953_v57 = vsel %vm10778_vm11, %v6948_v62, %v6952_v45  ;;  %v9024_v26 = vcombine.low %v7179_v16, %v7183_v9  ;;  %v7535_v14 = vrot.slane %v7533_v43, 4  ;;  %v7538_v27 = vrot.slane %v7536_v33, 5  ;;  %v7092_v45 = vld [vmem:[#allocation2 + $0x78] sm:$0xe]  ;;  %v7093_v10 = vld [vmem:[#allocation2 + $0x7c] sm:$0x1] }
 0x453   : > { %8211 = vmatprep.mubr.bf16.mxu1 %v9040_v63  ;;  %v6967_v49 = vsel %vm10778_vm11, %v6962_v60, %v6966_v23  ;;  %v7542_v24 = vshll.u32 %v7333_v48, 16  ;;  %v7547_v41 = vshrl.u32 %v7334_v59, 16  ;;  %v7550_v40 = vshll.u32 %v7334_v59, 16  ;;  %v7094_v58 = vld [vmem:[#allocation2 + $0x80] sm:$0xe] }
 0x454   : > { %v8999_v46 = vcombine.low %v6953_v57, %v6967_v49  ;;  %8212 = vmatmul.mubr.bf16.gmra.mrb[200].mxu1 %v10256_v15  ;;  %v7539_v37 = vor.u32 %v7538_v27, %v7535_v14  ;;  %v7556_v0 = vshll.u32 %v7335_v32, 16  ;;  %v6969_v35 = vshrl.u32 %v6792_v29, 16  ;;  %v7095_v60 = vld [vmem:[#allocation2 + $0x84] sm:$0x1]  ;;  %v7616_v57 = vld [vmem:[#allocation2 + $0x50] sm:$0xe] }
 0x455   : > { %v7544_v55 = vrot.slane %v7542_v24, 5  ;;  %v7549_v44 = vrot.slane %v7547_v41, 4  ;;  %v7552_v19 = vrot.slane %v7550_v40, 5  ;;  %v6972_v6 = vshll.u32 %v6792_v29, 16  ;;  %v7617_v49 = vld [vmem:[#allocation2 + $0x54] sm:$0x1] }
 0x456   : > { %8107 = vmatmul.mubr.bf16.gmra.mrb[196].mxu0 %v8999_v46  ;;  %v7540_v54 = vrot.slane %v7539_v37, 4  ;;  %v7558_v23 = vrot.slane %v7556_v0, 5  ;;  %v6971_v48 = vrot.slane %v6969_v35, 4  ;;  %v6978_v62 = vshll.u32 %v6793_v12, 16  ;;  %v7618_v40 = vld [vmem:[#allocation2 + $0x58] sm:$0xe] }
 0x457   : > { %8114 = vmatprep.mubr.bf16.mxu0 %v9024_v26  ;;  %v7553_v59 = vor.u32 %v7552_v19, %v7549_v44  ;;  %v6974_v43 = vrot.slane %v6972_v6, 5  ;;  %v6983_v33 = vshrl.u32 %v6794_v42, 16  ;;  %v6986_v63 = vshll.u32 %v6794_v42, 16  ;;  %v10257_v0 = vld [vmem:[#allocation2 + $0x80] ss:$8 sps:$4 sm:$0xff]  }
 0x458   : > { %v7545_v16 = vsel %vm10778_vm11, %v7540_v54, %v7544_v55  ;;  %v6992_v9 = vshll.u32 %v6795_v38, 16  ;;  %v9016_v32 = vrot.slane %v7092_v45, 9  ;;  %v6980_v24 = vrot.slane %v6978_v62, 5  ;;  %v7619_v35 = vld [vmem:[#allocation2 + $0x5c] sm:$0x1] }
 0x459   : > { %v7554_v29 = vrot.slane %v7553_v59, 4  ;;  %v6975_v15 = vor.u32 %v6974_v43, %v6971_v48  ;;  %v6985_v14 = vrot.slane %v6983_v33, 4  ;;  %v6988_v27 = vrot.slane %v6986_v63, 5  ;;  %v6796_v45 = vld [vmem:[#allocation2 + $0x78] sm:$0xf] }
 0x45a   : > { %v7186_v41 = vrot.slane %v7093_v10, 5  ;;  %v9017_v12 = vrot.slane %v7094_v58, 9  ;;  %v7190_v26 = vrot.slane %v7095_v60, 5  ;;  %v9050_v38 = vrot.slane %v7616_v57, 9  ;;  %v6797_v54 = vld [vmem:[#allocation2 + $0x7c] sm:$0x1] }
 0x45b   : > { %v7559_v42 = vsel %vm10778_vm11, %v7554_v29, %v7558_v23  ;;  %v6976_v46 = vrot.slane %v6975_v15, 4  ;;  %v6989_v37 = vor.u32 %v6988_v27, %v6985_v14  ;;  %v6994_v44 = vrot.slane %v6992_v9, 5  ;;  %v6798_v10 = vld [vmem:[#allocation2 + $0x80] sm:$0xf]  ;;  %v6799_v59 = vld [vmem:[#allocation2 + $0x84] sm:$0x1] }
 0x45c   : > { %v9041_v55 = vcombine.low %v7545_v16, %v7559_v42  ;;  %v7187_v19 = vsel %vm10767_vm10, %v9016_v32, %v7186_v41  ;;  %v7698_v6 = vrot.slane %v7617_v49, 5  ;;  %v7191_v23 = vsel %vm10767_vm10, %v9017_v12, %v7190_v26  ;;  %v7600_v43 = vld [vmem:[#allocation2 + $0x10] sm:$0xe]  ;;  %v7601_v9 = vld [vmem:[#allocation2 + $0x14] sm:$0x1] }
 0x45d   : > { %v6981_v58 = vsel %vm10778_vm11, %v6976_v46, %v6980_v24  ;;  %v6990_v48 = vrot.slane %v6989_v37, 4  ;;  %v9051_v62 = vrot.slane %v7618_v40, 9  ;;  %v7702_v63 = vrot.slane %v7619_v35, 5  ;;  %v7602_v14 = vld [vmem:[#allocation2 + $0x18] sm:$0xe] }
 0x45e   : > { %8219 = vmatprep.mubr.bf16.mxu1 %v9041_v55  ;;  %v7699_v33 = vsel %vm10767_vm10, %v9050_v38, %v7698_v6  ;;  %v6997_v60 = vshrl.u32 %v6796_v45, 16  ;;  %v7000_v16 = vshll.u32 %v6796_v45, 16  ;;  %v7006_v57 = vshll.u32 %v6797_v54, 16  ;;  %v7603_v12 = vld [vmem:[#allocation2 + $0x1c] sm:$0x1] }
 0x45f   : > { %v6995_v32 = vsel %vm10778_vm11, %v6990_v48, %v6994_v44  ;;  %8220 = vmatmul.mubr.bf16.gmra.mrb[204].mxu1 %v10257_v0  ;;  %v7011_v29 = vshrl.u32 %v6798_v10, 16  ;;  %v7014_v15 = vshll.u32 %v6798_v10, 16  ;;  %v7703_v49 = vsel %vm10767_vm10, %v9051_v62, %v7702_v63  ;;  %v7620_v26 = vld [vmem:[#allocation2 + $0x60] sm:$0xe]  ;;  %v7621_v35 = vld [vmem:[#allocation2 + $0x64] sm:$0x1] }
 0x460   : > { %v9000_v27 = vcombine.low %v6981_v58, %v6995_v32  ;;  %v6999_v24 = vrot.slane %v6997_v60, 4  ;;  %v7002_v41 = vrot.slane %v7000_v16, 5  ;;  %v9025_v40 = vcombine.low %v7187_v19, %v7191_v23  ;;  %v7622_v44 = vld [vmem:[#allocation2 + $0x68] sm:$0xe]  ;;  %v7623_v58 = vld [vmem:[#allocation2 + $0x6c] sm:$0x1] }
 0x461   : > { %v9062_v42 = vcombine.low %v7699_v33, %v7703_v49  ;;  %v7013_v46 = vrot.slane %v7011_v29, 4  ;;  %v7016_v37 = vrot.slane %v7014_v15, 5  ;;  %v7020_v0 = vshll.u32 %v6799_v59, 16  ;;  %v7624_v33 = vld [vmem:[#allocation2 + $0x70] sm:$0xe] }
 0x462   : > { %8115 = vmatmul.mubr.bf16.gmra.mrb[200].mxu0 %v9000_v27  ;;  %v7003_v38 = vor.u32 %v7002_v41, %v6999_v24  ;;  %v9042_v45 = vrot.slane %v7600_v43, 9  ;;  %v7666_v55 = vrot.slane %v7601_v9, 5  ;;  %v9043_v54 = vrot.slane %v7602_v14, 9  ;;  %v7625_v9 = vld [vmem:[#allocation2 + $0x74] sm:$0x1] }
 0x463   : > { %8122 = vmatprep.mubr.bf16.mxu0 %v9025_v40  ;;  %10025 = vmatprep.mubr.bf16.mxu1 %v9062_v42  ;;  %v7017_v6 = vor.u32 %v7016_v37, %v7013_v46  ;;  %v7670_v10 = vrot.slane %v7603_v12, 5  ;;  %v9052_v48 = vrot.slane %v7620_v26, 9  ;;  %v7008_v63 = vrot.slane %v7006_v57, 5  ;;  %v7626_v57 = vld [vmem:[#allocation2 + $0x78] sm:$0xe] }
 0x464   : > { %v7004_v62 = vrot.slane %v7003_v38, 4  ;;  %v7022_v19 = vrot.slane %v7020_v0, 5  ;;  %v7706_v23 = vrot.slane %v7621_v35, 5  ;;  %v7667_v16 = vsel %vm10767_vm10, %v9042_v45, %v7666_v55  ;;  %v7627_v14 = vld [vmem:[#allocation2 + $0x7c] sm:$0x1] }
 0x465   : > { %v7018_v60 = vrot.slane %v7017_v6, 4  ;;  %v9053_v59 = vrot.slane %v7622_v44, 9  ;;  %v7710_v43 = vrot.slane %v7623_v58, 5  ;;  %v7671_v29 = vsel %vm10767_vm10, %v9043_v54, %v7670_v10  ;;  %v7604_v26 = vld [vmem:[#allocation2 + $0x20] sm:$0xe] }
 0x466   : > { %v7009_v32 = vsel %vm10778_vm11, %v7004_v62, %v7008_v63  ;;  %v7707_v15 = vsel %vm10767_vm10, %v9052_v48, %v7706_v23  ;;  %v9054_v27 = vrot.slane %v7624_v33, 9  ;;  %v7714_v41 = vrot.slane %v7625_v9, 5  ;;  %v7605_v40 = vld [vmem:[#allocation2 + $0x24] sm:$0x1]  ;;  %v7606_v38 = vld [vmem:[#allocation2 + $0x28] sm:$0xe] }
 0x467   : > { %v7023_v49 = vsel %vm10778_vm11, %v7018_v60, %v7022_v19  ;;  %v7711_v24 = vsel %vm10767_vm10, %v9053_v59, %v7710_v43  ;;  %v9055_v12 = vrot.slane %v7626_v57, 9  ;;  %v9058_v46 = vcombine.low %v7667_v16, %v7671_v29  ;;  %v7607_v0 = vld [vmem:[#allocation2 + $0x2c] sm:$0x1]  ;;  %v7608_v6 = vld [vmem:[#allocation2 + $0x30] sm:$0xe] }
 0x468   : > { %v9001_v42 = vcombine.low %v7009_v32, %v7023_v49  ;;  %v9063_v37 = vcombine.low %v7707_v15, %v7711_v24  ;;  %v7718_v35 = vrot.slane %v7627_v14, 5  ;;  %v7715_v45 = vsel %vm10767_vm10, %v9054_v27, %v7714_v41  ;;  %v7609_v10 = vld [vmem:[#allocation2 + $0x34] sm:$0x1]  ;;  %v7610_v58 = vld [vmem:[#allocation2 + $0x38] sm:$0xe] }
 0x469   : > { %v9044_v55 = vrot.slane %v7604_v26, 9  ;;  %v9045_v44 = vrot.slane %v7606_v38, 9  ;;  %v7678_v34 = vrot.slane %v7607_v0, 5  ;;  %v7611_v48 = vld [vmem:[#allocation2 + $0x3c] sm:$0x1]  ;;  %v7674_v63 = vrot.slane %v7605_v40, 5 }
 0x46a   : > { %8123 = vmatmul.mubr.bf16.gmra.mrb[204].mxu0 %v9001_v42  ;;  %10026 = vmatmul.mubr.bf16.vlgmr.msra.gmra.mrb[208].mxu1 %v9063_v37  ;;  %v7719_v54 = vsel %vm10767_vm10, %v9055_v12, %v7718_v35  ;;  %v9046_v19 = vrot.slane %v7608_v6, 9  ;;  %v7628_v23 = vld [vmem:[#allocation2 + $0x80] sm:$0xe]  ;;  %v7629_v33 = vld [vmem:[#allocation2 + $0x84] sm:$0x1]  ;;  %v7682_v60 = vrot.slane %v7609_v10, 5 }
 0x46b   : > { %10017 = vmatprep.mubr.bf16.mxu0 %v9058_v46  ;;  %v9064_v62 = vcombine.low %v7715_v45, %v7719_v54  ;;  %v9047_v16 = vrot.slane %v7610_v58, 9  ;;  %v7686_v59 = vrot.slane %v7611_v48, 5  ;;  %v7630_v43 = vld [vmem:[#allocation2 + $0x88] sm:$0xe]  ;;  %v7679_v9 = vsel %vm10767_vm10, %v9045_v44, %v7678_v34  ;;  %v7631_v32 = vld [vmem:[#allocation2 + $0x8c] sm:$0x1] }
 0x46c   : > { %v9056_v29 = vrot.slane %v7628_v23, 9  ;;  %v7722_v15 = vrot.slane %v7629_v33, 5  ;;  %v9057_v57 = vrot.slane %v7630_v43, 9  ;;  %v7683_v14 = vsel %vm10767_vm10, %v9046_v19, %v7682_v60  ;;  %v7614_v41 = vld [vmem:[#allocation2 + $0x48] sm:$0xe] }
 0x46d   : > { %10029 = vmatprep.mubr.bf16.mxu1 %v9064_v62  ;;  %v7726_v27 = vrot.slane %v7631_v32, 5  ;;  %v7675_v49 = vsel %vm10767_vm10, %v9044_v55, %v7674_v63  ;;  %v7615_v12 = vld [vmem:[#allocation2 + $0x4c] sm:$0x1]  ;;  %v7687_v40 = vsel %vm10767_vm10, %v9047_v16, %v7686_v59  ;;  %v7612_v46 = vld [vmem:[#allocation2 + $0x40] sm:$0xe]  ;;  %v9049_v0 = vrot.slane %v7614_v41, 9 }
 0x46e   : > { %v7723_v24 = vsel %vm10767_vm10, %v9056_v29, %v7722_v15  ;;  %v9059_v26 = vcombine.low %v7675_v49, %v7679_v9  ;;  %v7613_v37 = vld [vmem:[#allocation2 + $0x44] sm:$0x1]  ;;  %v9060_v35 = vcombine.low %v7683_v14, %v7687_v40  ;;  %v7694_v45 = vrot.slane %v7615_v12, 5  ;;  %v12159_v9 = vld [vmem:[%s12536_s2] ss:$0 sm:$0xff] }
 0x46f   : > { %v7727_v42 = vsel %vm10767_vm10, %v9057_v57, %v7726_v27  ;;  %v9048_v55 = vrot.slane %v7612_v46, 9  ;;  %v7690_v44 = vrot.slane %v7613_v37, 5 }
 0x470   : > { %v9065_v38 = vcombine.low %v7723_v24, %v7727_v42  ;;  %v7695_v34 = vsel %vm10767_vm10, %v9049_v0, %v7694_v45 }
 0x471   : > { %v7691_v6 = vsel %vm10767_vm10, %v9048_v55, %v7690_v44 }
 0x472   : > { %10018 = vmatmul.mubr.bf16.vlgmr.msra.gmra.mrb[208].mxu0 %v9059_v26  ;;  %10030 = vmatmul.mubr.bf16.gmra.mrb[212].mxu1 %v9065_v38  ;;  %v9061_v54 = vcombine.low %v7691_v6, %v7695_v34 }
 0x473   : > { %10021 = vmatprep.mubr.bf16.mxu0 %v9060_v35 }
 0x47a   : > { %10022 = vmatmul.mubr.bf16.gmra.mrb[212].mxu0 %v9061_v54 }
 0x4a3   : > { %v9745_v10 = vpop.f32.mrb[144].mxu1 }
 0x4a4   : > { %v9746_v58 = vpop.f32.mrb[145].mxu1 }
 0x4a5   : > { %v9747_v48 = vadd.f32 %v9746_v58, %v9745_v10  ;;  %v9748_v62 = vpop.f32.mrb[146].mxu1 }
 0x4a6   : > { %v9749_v63 = vpop.f32.mrb[147].mxu1 }
 0x4a7   : > { %v9750_v19 = vadd.f32 %v9749_v63, %v9748_v62 }
 0x4b1   : > { %v9681_v23 = vpop.f32.mrb[144].mxu0 }
 0x4b2   : > { %v9682_v33 = vpop.f32.mrb[145].mxu0 }
 0x4b3   : > { %v9683_v60 = vadd.f32 %v9682_v33, %v9681_v23  ;;  %v9684_v16 = vpop.f32.mrb[146].mxu0 }
 0x4b4   : > { %v9685_v43 = vpop.f32.mrb[147].mxu0 }
 0x4b5   : > { %v9751_v59 = vpop.f32.mrb[148].mxu1  ;;  %v7875_v21 = vadd.f32 %v12159_v9, %v9683_v60  ;;  %v9686_v29 = vadd.f32 %v9685_v43, %v9684_v16 }
 0x4b6   : > { %v9752_v32 = vpop.f32.mrb[149].mxu1 }
 0x4b7   : > { %v9753_v15 = vadd.f32 %v9752_v32, %v9751_v59  ;;  %v9754_v57 = vpop.f32.mrb[150].mxu1  ;;  %v7878_v14 = vadd.f32 %v12159_v9, %v9686_v29  ;;  %v12163_v49 = vadd.f32 %v9747_v48, %v7875_v21 }
 0x4b8   : > { %v9755_v27 = vpop.f32.mrb[151].mxu1 }
 0x4b9   : > { %v9756_v24 = vadd.f32 %v9755_v27, %v9754_v57  ;;  %v9687_v41 = vpop.f32.mrb[148].mxu0  ;;  %v12165_v12 = vadd.f32 %v9750_v19, %v7878_v14 }
 0x4ba   : > { %v9688_v26 = vpop.f32.mrb[149].mxu0 }
 0x4bb   : > { %v9689_v40 = vadd.f32 %v9688_v26, %v9687_v41  ;;  %v9690_v42 = vpop.f32.mrb[150].mxu0 }
 0x4bc   : > { %v9691_v37 = vpop.f32.mrb[151].mxu0 }
 0x4bd   : > { %v7883_v35 = vadd.f32 %v12159_v9, %v9689_v40  ;;  %v9692_v0 = vadd.f32 %v9691_v37, %v9690_v42 }
 0x4be   : > { %v9757_v46 = vpop.f32.mrb[152].mxu1 }
 0x4bf   : > { %v9758_v38 = vpop.f32.mrb[153].mxu1  ;;  %v7886_v44 = vadd.f32 %v12159_v9, %v9692_v0  ;;  %v12169_v6 = vadd.f32 %v9753_v15, %v7883_v35 }
 0x4c0   : > { %v9759_v45 = vadd.f32 %v9758_v38, %v9757_v46  ;;  %v9760_v55 = vpop.f32.mrb[154].mxu1 }
 0x4c1   : > { %v9761_v34 = vpop.f32.mrb[155].mxu1  ;;  %v9693_v10 = vpop.f32.mrb[152].mxu0  ;;  %v12171_v58 = vadd.f32 %v9756_v24, %v7886_v44 }
 0x4c2   : > { %v9762_v54 = vadd.f32 %v9761_v34, %v9760_v55  ;;  %v9694_v48 = vpop.f32.mrb[153].mxu0 }
 0x4c3   : > { %v9695_v62 = vadd.f32 %v9694_v48, %v9693_v10  ;;  %v9696_v63 = vpop.f32.mrb[154].mxu0 }
 0x4c4   : > { %v9697_v23 = vpop.f32.mrb[155].mxu0 }
 0x4c5   : > { %v7891_v33 = vadd.f32 %v12159_v9, %v9695_v62  ;;  %v9698_v16 = vadd.f32 %v9697_v23, %v9696_v63 }
 0x4c6   : > { %v9763_v19 = vpop.f32.mrb[156].mxu1 }
 0x4c7   : > { %v9764_v60 = vpop.f32.mrb[157].mxu1  ;;  %v7894_v21 = vadd.f32 %v12159_v9, %v9698_v16  ;;  %v12175_v29 = vadd.f32 %v9759_v45, %v7891_v33 }
 0x4c8   : > { %v9765_v59 = vadd.f32 %v9764_v60, %v9763_v19  ;;  %v9766_v43 = vpop.f32.mrb[158].mxu1 }
 0x4c9   : > { %v9767_v32 = vpop.f32.mrb[159].mxu1  ;;  %v9699_v57 = vpop.f32.mrb[156].mxu0  ;;  %v12177_v14 = vadd.f32 %v9762_v54, %v7894_v21 }
 0x4ca   : > { %v9768_v15 = vadd.f32 %v9767_v32, %v9766_v43  ;;  %v9700_v27 = vpop.f32.mrb[157].mxu0 }
 0x4cb   : > { %v9701_v24 = vadd.f32 %v9700_v27, %v9699_v57  ;;  %v9702_v41 = vpop.f32.mrb[158].mxu0 }
 0x4cc   : > { %v9703_v40 = vpop.f32.mrb[159].mxu0 }
 0x4cd   : > { %v7899_v42 = vadd.f32 %v12159_v9, %v9701_v24  ;;  %v9704_v37 = vadd.f32 %v9703_v40, %v9702_v41 }
 0x4ce   : > { %v9769_v26 = vpop.f32.mrb[160].mxu1 }
 0x4cf   : > { %v9770_v46 = vpop.f32.mrb[161].mxu1  ;;  %v7902_v0 = vadd.f32 %v12159_v9, %v9704_v37  ;;  %v12181_v45 = vadd.f32 %v9765_v59, %v7899_v42 }
 0x4d0   : > { %v9771_v35 = vadd.f32 %v9770_v46, %v9769_v26  ;;  %v9772_v38 = vpop.f32.mrb[162].mxu1 }
 0x4d1   : > { %v9773_v55 = vpop.f32.mrb[163].mxu1  ;;  %v9705_v34 = vpop.f32.mrb[160].mxu0  ;;  %v12183_v54 = vadd.f32 %v9768_v15, %v7902_v0 }
 0x4d2   : > { %v9774_v44 = vadd.f32 %v9773_v55, %v9772_v38  ;;  %v9706_v10 = vpop.f32.mrb[161].mxu0 }
 0x4d3   : > { %v9707_v48 = vadd.f32 %v9706_v10, %v9705_v34  ;;  %v9708_v62 = vpop.f32.mrb[162].mxu0 }
 0x4d4   : > { %v9709_v19 = vpop.f32.mrb[163].mxu0 }
 0x4d5   : > { %v7907_v23 = vadd.f32 %v12159_v9, %v9707_v48  ;;  %v9710_v60 = vadd.f32 %v9709_v19, %v9708_v62 }
 0x4d6   : > { %v9775_v63 = vpop.f32.mrb[164].mxu1 }
 0x4d7   : > { %v9776_v33 = vpop.f32.mrb[165].mxu1  ;;  %v7910_v21 = vadd.f32 %v12159_v9, %v9710_v60  ;;  %v12187_v59 = vadd.f32 %v9771_v35, %v7907_v23 }
 0x4d8   : > { %v9777_v16 = vadd.f32 %v9776_v33, %v9775_v63  ;;  %v9778_v43 = vpop.f32.mrb[166].mxu1 }
 0x4d9   : > { %v9779_v32 = vpop.f32.mrb[167].mxu1  ;;  %v12189_v15 = vadd.f32 %v9774_v44, %v7910_v21 }
 0x4da   : > { %v9780_v57 = vadd.f32 %v9779_v32, %v9778_v43  ;;  %v9711_v27 = vpop.f32.mrb[164].mxu0 }
 0x4db   : > { %v9712_v24 = vpop.f32.mrb[165].mxu0 }
 0x4dc   : > { %v9713_v41 = vadd.f32 %v9712_v24, %v9711_v27  ;;  %v9714_v26 = vpop.f32.mrb[166].mxu0 }
 0x4dd   : > { %v9715_v42 = vpop.f32.mrb[167].mxu0 }
 0x4de   : > { %v9781_v40 = vpop.f32.mrb[168].mxu1  ;;  %v7915_v46 = vadd.f32 %v12159_v9, %v9713_v41  ;;  %v9716_v38 = vadd.f32 %v9715_v42, %v9714_v26 }
 0x4df   : > { %v9782_v37 = vpop.f32.mrb[169].mxu1 }
 0x4e0   : > { %v9783_v0 = vadd.f32 %v9782_v37, %v9781_v40  ;;  %v9784_v55 = vpop.f32.mrb[170].mxu1  ;;  %v7918_v34 = vadd.f32 %v12159_v9, %v9716_v38  ;;  %v12193_v35 = vadd.f32 %v9777_v16, %v7915_v46 }
 0x4e1   : > { %v9785_v10 = vpop.f32.mrb[171].mxu1 }
 0x4e2   : > { %v9786_v48 = vadd.f32 %v9785_v10, %v9784_v55  ;;  %v9717_v62 = vpop.f32.mrb[168].mxu0  ;;  %v12195_v44 = vadd.f32 %v9780_v57, %v7918_v34 }
 0x4e3   : > { %v9718_v63 = vpop.f32.mrb[169].mxu0 }
 0x4e4   : > { %v9719_v19 = vadd.f32 %v9718_v63, %v9717_v62  ;;  %v9720_v23 = vpop.f32.mrb[170].mxu0 }
 0x4e5   : > { %v9721_v60 = vpop.f32.mrb[171].mxu0 }
 0x4e6   : > { %v9787_v33 = vpop.f32.mrb[172].mxu1  ;;  %v7923_v43 = vadd.f32 %v12159_v9, %v9719_v19  ;;  %v9722_v32 = vadd.f32 %v9721_v60, %v9720_v23 }
 0x4e7   : > { %v9788_v21 = vpop.f32.mrb[173].mxu1 }
 0x4e8   : > { %v9789_v27 = vadd.f32 %v9788_v21, %v9787_v33  ;;  %v9790_v24 = vpop.f32.mrb[174].mxu1  ;;  %v7926_v41 = vadd.f32 %v12159_v9, %v9722_v32  ;;  %v12199_v16 = vadd.f32 %v9783_v0, %v7923_v43 }
 0x4e9   : > { %v9791_v26 = vpop.f32.mrb[175].mxu1 }
 0x4ea   : > { %v9792_v40 = vadd.f32 %v9791_v26, %v9790_v24  ;;  %v9723_v42 = vpop.f32.mrb[172].mxu0  ;;  %v12201_v57 = vadd.f32 %v9786_v48, %v7926_v41 }
 0x4eb   : > { %v9724_v46 = vpop.f32.mrb[173].mxu0 }
 0x4ec   : > { %v9725_v37 = vadd.f32 %v9724_v46, %v9723_v42  ;;  %v9726_v38 = vpop.f32.mrb[174].mxu0 }
 0x4ed   : > { %v9727_v34 = vpop.f32.mrb[175].mxu0 }
 0x4ee   : > { %v9873_v55 = vpop.f32.mrb[176].mxu1  ;;  %v7931_v10 = vadd.f32 %v12159_v9, %v9725_v37  ;;  %v9728_v63 = vadd.f32 %v9727_v34, %v9726_v38 }
 0x4ef   : > { %v9874_v62 = vpop.f32.mrb[177].mxu1 }
 0x4f0   : > { %v9875_v19 = vadd.f32 %v9874_v62, %v9873_v55  ;;  %v9876_v23 = vpop.f32.mrb[178].mxu1  ;;  %v7934_v33 = vadd.f32 %v12159_v9, %v9728_v63  ;;  %v12205_v0 = vadd.f32 %v9789_v27, %v7931_v10 }
 0x4f1   : > { %v9877_v60 = vpop.f32.mrb[179].mxu1 }
 0x4f2   : > { %v9878_v43 = vadd.f32 %v9877_v60, %v9876_v23  ;;  %v9809_v21 = vpop.f32.mrb[176].mxu0  ;;  %v12207_v48 = vadd.f32 %v9792_v40, %v7934_v33 }
 0x4f3   : > { %v9810_v32 = vpop.f32.mrb[177].mxu0 }
 0x4f4   : > { %12580 = vst [vmem:[#allocation19_spill] sm:$0xff] %v12207_v48  ;;  %v9811_v24 = vadd.f32 %v9810_v32, %v9809_v21  ;;  %v9812_v41 = vpop.f32.mrb[178].mxu0 }
 0x4f5   : > { %v9813_v42 = vpop.f32.mrb[179].mxu0 }
 0x4f6   : > { %v9879_v26 = vpop.f32.mrb[180].mxu1  ;;  %v8069_v46 = vadd.f32 %v9811_v24, %v12163_v49  ;;  %v9814_v38 = vadd.f32 %v9813_v42, %v9812_v41 }
 0x4f7   : > { %v9880_v37 = vpop.f32.mrb[181].mxu1 }
 0x4f8   : > { %v9881_v55 = vadd.f32 %v9880_v37, %v9879_v26  ;;  %v9882_v34 = vpop.f32.mrb[182].mxu1  ;;  %v8072_v9 = vadd.f32 %v9814_v38, %v12165_v12  ;;  %v12211_v27 = vadd.f32 %v9875_v19, %v8069_v46 }
 0x4f9   : > { %v9883_v62 = vpop.f32.mrb[183].mxu1 }
 0x4fa   : > { %12581 = vst [vmem:[#allocation20_spill] sm:$0xff] %v12211_v27  ;;  %v9884_v10 = vadd.f32 %v9883_v62, %v9882_v34  ;;  %v12213_v63 = vadd.f32 %v9878_v43, %v8072_v9 }
 0x4fc   : > { %12582 = vst [vmem:[#allocation21_spill] sm:$0xff] %v12213_v63 }
 0x4fd   : > { %v9815_v40 = vpop.f32.mrb[180].mxu0 }
 0x4fe   : > { %v9816_v23 = vpop.f32.mrb[181].mxu0  ;;  %v9885_v33 = vpop.f32.mrb[184].mxu1 }
 0x4ff   : > { %v9817_v60 = vadd.f32 %v9816_v23, %v9815_v40  ;;  %v9818_v21 = vpop.f32.mrb[182].mxu0  ;;  %v9886_v32 = vpop.f32.mrb[185].mxu1 }
 0x500   : > { %v9887_v48 = vadd.f32 %v9886_v32, %v9885_v33  ;;  %v9819_v49 = vpop.f32.mrb[183].mxu0  ;;  %v9888_v24 = vpop.f32.mrb[186].mxu1 }
 0x501   : > { %v8077_v41 = vadd.f32 %v9817_v60, %v12169_v6  ;;  %v9820_v26 = vadd.f32 %v9819_v49, %v9818_v21  ;;  %v9889_v42 = vpop.f32.mrb[187].mxu1  ;;  %v12221_v60 = vpop.permute.xlu1 %8361 }
 0x502   : > { %v9890_v12 = vadd.f32 %v9889_v42, %v9888_v24 }
 0x503   : > { %v8080_v19 = vadd.f32 %v9820_v26, %v12171_v58  ;;  %v12217_v46 = vadd.f32 %v9881_v55, %v8077_v41  ;;  %v12224_v55 = vpop.permute.xlu0 %8357 }
 0x505   : > { %12583 = vst [vmem:[#allocation22_spill] sm:$0xff] %v12217_v46  ;;  %v12219_v43 = vadd.f32 %v9884_v10, %v8080_v19  ;;  %v12231_v26 = vpop.permute.xlu1 %8363 }
 0x506   : > { %v9891_v37 = vpop.f32.mrb[188].mxu1 }
 0x507   : > { %12584 = vst [vmem:[#allocation23_spill] sm:$0xff] %v12219_v43  ;;  %v9892_v38 = vpop.f32.mrb[189].mxu1  ;;  %v12233_v19 = vpop.permute.xlu0 %8359 }
 0x508   : > { %v9821_v34 = vpop.f32.mrb[184].mxu0  ;;  %v9893_v9 = vadd.f32 %v9892_v38, %v9891_v37  ;;  %v9894_v62 = vpop.f32.mrb[190].mxu1 }
 0x509   : > { %v9822_v40 = vpop.f32.mrb[185].mxu0  ;;  %v9895_v23 = vpop.f32.mrb[191].mxu1 }
 0x50a   : > { %v9823_v33 = vadd.f32 %v9822_v40, %v9821_v34  ;;  %v9824_v32 = vpop.f32.mrb[186].mxu0  ;;  %v9896_v63 = vadd.f32 %v9895_v23, %v9894_v62 }
 0x50b   : > { %v9825_v6 = vpop.f32.mrb[187].mxu0 }
 0x50c   : > { %v8085_v21 = vadd.f32 %v9823_v33, %v12175_v29  ;;  %v9826_v58 = vadd.f32 %v9825_v6, %v9824_v32  ;;  %v12238_v6 = vpop.permute.xlu0 %8365 }
 0x50e   : > { %v8088_v10 = vadd.f32 %v9826_v58, %v12177_v14  ;;  %v12227_v49 = vadd.f32 %v9887_v48, %v8085_v21  ;;  %v12235_v14 = vpop.permute.xlu1 %8367 }
 0x510   : > { %12585 = vst [vmem:[#allocation24_spill] sm:$0xff] %v12227_v49  ;;  %v12229_v24 = vadd.f32 %v9890_v12, %v8088_v10 }
 0x511   : > { %v9897_v41 = vpop.f32.mrb[192].mxu1 }
 0x512   : > { %12586 = vst [vmem:[#allocation25_spill] sm:$0xff] %v12229_v24  ;;  %v9898_v42 = vpop.f32.mrb[193].mxu1 }
 0x513   : > { %v9899_v37 = vadd.f32 %v9898_v42, %v9897_v41  ;;  %v9900_v38 = vpop.f32.mrb[194].mxu1  ;;  %v9827_v34 = vpop.f32.mrb[188].mxu0 }
 0x514   : > { %v9901_v62 = vpop.f32.mrb[195].mxu1  ;;  %v9828_v29 = vpop.f32.mrb[189].mxu0 }
 0x515   : > { %v9902_v40 = vadd.f32 %v9901_v62, %v9900_v38  ;;  %v9829_v23 = vadd.f32 %v9828_v29, %v9827_v34  ;;  %v9830_v33 = vpop.f32.mrb[190].mxu0  ;;  %v12245_v42 = vpop.permute.xlu1 %8371 }
 0x516   : > { %v9831_v32 = vpop.f32.mrb[191].mxu0  ;;  %v12247_v34 = vpop.permute.xlu0 %8369 }
 0x517   : > { %v8093_v48 = vadd.f32 %v9829_v23, %v12181_v45  ;;  %v9832_v12 = vadd.f32 %v9831_v32, %v9830_v33 }
 0x519   : > { %v8096_v21 = vadd.f32 %v9832_v12, %v12183_v54  ;;  %v12241_v58 = vadd.f32 %v9893_v9, %v8093_v48 }
 0x51b   : > { %12587 = vst [vmem:[#allocation26_spill] sm:$0xff] %v12241_v58  ;;  %v12243_v10 = vadd.f32 %v9896_v63, %v8096_v21  ;;  %v8376_v63 = vpop.permute.xlu1 %8375  ;;  %v8374_v21 = vpop.permute.xlu0 %8373 }
 0x51c   : > { %v9903_v41 = vpop.f32.mrb[196].mxu1 }
 0x51d   : > { %12588 = vst [vmem:[#allocation27_spill] sm:$0xff] %v12243_v10  ;;  %v9904_v38 = vpop.f32.mrb[197].mxu1 }
 0x51e   : > { %v9905_v29 = vadd.f32 %v9904_v38, %v9903_v41  ;;  %v9906_v24 = vpop.f32.mrb[198].mxu1 }
 0x51f   : > { %v9833_v62 = vpop.f32.mrb[192].mxu0  ;;  %v9907_v45 = vpop.f32.mrb[199].mxu1 }
 0x520   : > { %v9834_v49 = vpop.f32.mrb[193].mxu0  ;;  %v9908_v32 = vadd.f32 %v9907_v45, %v9906_v24  ;;  %v8380_v38 = vpop.permute.xlu1 %8379 }
 0x521   : > { %v9835_v23 = vadd.f32 %v9834_v49, %v9833_v62  ;;  %v9836_v33 = vpop.f32.mrb[194].mxu0 }
 0x522   : > { %v9837_v43 = vpop.f32.mrb[195].mxu0 }
 0x523   : > { %v8101_v54 = vadd.f32 %v9835_v23, %v12187_v59  ;;  %v9838_v9 = vadd.f32 %v9837_v43, %v9836_v33 }
 0x525   : > { %v8104_v48 = vadd.f32 %v9838_v9, %v12189_v15  ;;  %v12251_v12 = vadd.f32 %v9899_v37, %v8101_v54  ;;  %v8378_v37 = vpop.permute.xlu0 %8377  ;;  %v12263_v54 = vpop.permute.xlu1 %8383 }
 0x527   : > { %v12253_v10 = vadd.f32 %v9902_v40, %v8104_v48  ;;  %v9909_v58 = vpop.f32.mrb[200].mxu1 }
 0x528   : > { %v9910_v41 = vpop.f32.mrb[201].mxu1 }
 0x529   : > { %v9839_v27 = vpop.f32.mrb[196].mxu0  ;;  %v12255_v46 = vadd.f32 %v9910_v41, %v9909_v58  ;;  %v9912_v49 = vpop.f32.mrb[202].mxu1  ;;  %v12270_v41 = vld [vmem:[%s10726_s9 + $0x58] sm:$0xff] }
 0x52a   : > { %v9840_v24 = vpop.f32.mrb[197].mxu0  ;;  %v9913_v62 = vpop.f32.mrb[203].mxu1 }
 0x52b   : > { %v9841_v59 = vadd.f32 %v9840_v24, %v9839_v27  ;;  %v9842_v43 = vpop.f32.mrb[198].mxu0  ;;  %v12257_v15 = vadd.f32 %v9913_v62, %v9912_v49  ;;  %v12265_v9 = vpop.permute.xlu0 %8381  ;;  %v8400_v49 = vadd.f32 %v12270_v41, %v8380_v38  ;;  %v12274_v24 = vld [vmem:[%s10726_s9 + $0x50] sm:$0xff]  ;;  %v12282_v62 = vld [vmem:[%s10726_s9 + $0x40] sm:$0xff]  ;;  %v12291_v38 = vadd.f32 %v11693_v17, %v11189_v13 }
 0x52c   : > { %v9843_v40 = vpop.f32.mrb[199].mxu0 }
 0x52d   : > { %v8109_v45 = vadd.f32 %v9841_v59, %v12193_v35  ;;  %v9844_v23 = vadd.f32 %v9843_v40, %v9842_v43  ;;  %v8399_v35 = vadd.f32 %v12274_v24, %v8378_v37  ;;  %v12287_v43 = vadd.f32 %v11690_v3, %v11186_v2  ;;  %v12308_v3 = vld [vmem:[%s10726_s9 + $0x10] sm:$0xff] }
 0x52e   : > { %v12295_v37 = vadd.f32 %v11698_v20, %v11200_v56  ;;  %v12305_v2 = vadd.f32 %v11710_v8, %v11220_v5  ;;  %v8391_v13 = vadd.f32 %v12308_v3, %v12221_v60  ;;  %v12313_v56 = vld [vmem:[%s10726_s9 + $0x18] sm:$0xff]  ;;  %v5834_v5 = vadd.f32 %v11759_v22, %v11264_v1  ;;  %v12326_v60 = vld [vmem:[%s10726_s9] sm:$0xff] }
 0x52f   : > { %v8112_v33 = vadd.f32 %v9844_v23, %v12195_v44  ;;  %v12261_v58 = vadd.f32 %v9905_v29, %v8109_v45  ;;  %v12278_v44 = vld [vmem:[%s10726_s9 + $0x48] sm:$0xff]  ;;  %v8392_v17 = vadd.f32 %v12313_v56, %v12231_v26  ;;  %v8410_v23 = vadd.f32 %v8400_v49, %v8399_v35  ;;  %v8386_v22 = vpop.permute.xlu0 %8385 }
 0x530   : > { %v8398_v29 = vadd.f32 %v12278_v44, %v8376_v63  ;;  %12589 = vst [vmem:[#allocation28_spill] sm:$0xff] %v12305_v2  ;;  %v12331_v26 = vld [vmem:[%s10726_s9 + $0x8] sm:$0xff]  ;;  %v5832_v49 = vadd.f32 %v11762_v28, %v11269_v7  ;;  %v5835_v35 = vadd.f32 %v11787_v25, %v11282_v36  ;;  %v12352_v36 = vadd.f32 %v11834_v31, %v11323_v47 }
 0x531   : > { %v12267_v48 = vadd.f32 %v9908_v32, %v8112_v33  ;;  %v8397_v32 = vadd.f32 %v12282_v62, %v8374_v21  ;;  %v12301_v21 = vadd.f32 %v11703_v39, %v11205_v30  ;;  %v12319_v30 = vadd.f32 %v11713_v18, %v11223_v61  ;;  %v8388_v33 = vpop.permute.xlu1 %8387  ;;  %v12367_v47 = vld [vmem:[%s10726_s9 + $0x28] sm:$0xff] }
 0x532   : > { %v9915_v27 = vpop.f32.mrb[204].mxu1  ;;  %12591 = vst [vmem:[#allocation30_spill] sm:$0xff] %v12367_v47  ;;  %v8394_v31 = vadd.f32 %v12367_v47, %v12235_v14 }
 0x533   : > { %v9916_v59 = vpop.f32.mrb[205].mxu1  ;;  %12590 = vst [vmem:[#allocation29_spill] sm:$0xff] %v12319_v30  ;;  %v8409_v61 = vadd.f32 %v8398_v29, %v8397_v32  ;;  %v12347_v29 = vadd.f32 %v11796_v4, %v11303_v53  ;;  %v8406_v32 = vadd.f32 %v8392_v17, %v8391_v13  ;;  %v12372_v17 = vld [vmem:[%s10726_s9 + $0x20] sm:$0xff] }
 0x534   : > { %v12297_v40 = vadd.f32 %v9916_v59, %v9915_v27  ;;  %v9918_v63 = vpop.f32.mrb[206].mxu1  ;;  %v8389_v27 = vadd.f32 %v12326_v60, %v12224_v55  ;;  %v8390_v59 = vadd.f32 %v12331_v26, %v12233_v19  ;;  %v5833_v55 = vadd.f32 %v11790_v11, %v11297_v50  ;;  %v12359_v11 = vld [vmem:[%s10726_s9 + $0x70] sm:$0xff]  ;;  %12592 = vst [vmem:[#allocation31_spill] sm:$0xff] %v12372_v17 }
 0x535   : > { %v9845_v20 = vpop.f32.mrb[200].mxu0  ;;  %v9919_v45 = vpop.f32.mrb[207].mxu1  ;;  %v8418_v50 = vmul.f32 0.25, %v8410_v23  ;;  %v8403_v53 = vadd.f32 %v12359_v11, %v8386_v22  ;;  %v8417_v4 = vmul.f32 0.25, %v8409_v61  ;;  %v12593_v23 = vld [vmem:[#allocation15_spill] sm:$0xff]  ;;  %v12390_v14 = vmul.f32 0.25, %v8406_v32 }
 0x536   : > { %v9846_v39 = vpop.f32.mrb[201].mxu0  ;;  %v12323_v8 = vadd.f32 %v9919_v45, %v9918_v63  ;;  %v12343_v63 = vadd.f32 %v11793_v52, %v11300_v51  ;;  %v12355_v51 = vld [vmem:[%s10726_s9 + $0x78] sm:$0xff]  ;;  %v8405_v52 = vadd.f32 %v8390_v59, %v8389_v27  ;;  %v12377_v45 = vld [vmem:[%s10726_s9 + $0x68] sm:$0xff] }
 0x537   : > { %v9847_v18 = vadd.f32 %v9846_v39, %v9845_v20  ;;  %v9848_v1 = vpop.f32.mrb[202].mxu0  ;;  %v8404_v25 = vadd.f32 %v12355_v51, %v8388_v33  ;;  %v8393_v20 = vadd.f32 %v12372_v17, %v12238_v6  ;;  %v8402_v39 = vadd.f32 %v12377_v45, %v12263_v54  ;;  %v12594_v33 = vld [vmem:[#allocation18_spill] sm:$0xff]  ;;  %v12393_v59 = vld [vmem:[%s10726_s9 + $0x38] sm:$0xff] }
 0x538   : > { %v9849_v19 = vpop.f32.mrb[203].mxu0  ;;  %v12388_v27 = vadd.f32 %v12594_v33, %v12593_v23  ;;  %12595 = vst [vmem:[#allocation15_spill] sm:$0xff] %v12393_v59  ;;  %v8396_v6 = vadd.f32 %v12393_v59, %v12245_v42  ;;  %v8426_v22 = vmax.f32 %v8418_v50, 0.0  ;;  %v12406_v23 = vmul.f32 0.25, %v8405_v52 }
 0x539   : > { %v8117_v7 = vadd.f32 %v9847_v18, %v12199_v16  ;;  %v9850_v28 = vadd.f32 %v9849_v19, %v9848_v1  ;;  %v12401_v1 = vld [vmem:[%s10726_s9 + $0x30] sm:$0xff]  ;;  %v8425_v33 = vmax.f32 %v8417_v4, 0.0 }
 0x53a   : > { %12596 = vst [vmem:[#allocation18_spill] sm:$0xff] %v12401_v1 }
 0x53b   : > { %v8120_v16 = vadd.f32 %v9850_v28, %v12201_v57  ;;  %v12364_v13 = vadd.f32 %v12255_v46, %v8117_v7  ;;  %v12382_v57 = vld [vmem:[%s10726_s9 + $0x60] sm:$0xff]  ;;  %v8412_v28 = vadd.f32 %v8404_v25, %v8403_v53  ;;  %s10484_s9 = scalar_lea.vmem %s10483_s8, 4096 }
 0x53c   : > { %v8401_v46 = vadd.f32 %v12382_v57, %v12265_v9  ;;  %v8395_v9 = vadd.f32 %v12401_v1, %v12247_v34  ;;  %p10486_p13 = scmp.lt.s32.totalorder %s10484_s9, %s10478_s22 }
 0x53d   : > { %v9851_v61 = vpop.f32.mrb[204].mxu0  ;;  %v10027_v18 = vpop.f32.mrb[208].mxu1  ;;  %v12398_v54 = vadd.f32 %v12257_v15, %v8120_v16  ;;  %v8407_v16 = vadd.f32 %v8394_v31, %v8393_v20 }
 0x53e   : > { %v9852_v19 = vpop.f32.mrb[205].mxu0  ;;  %v8303_v32 = vadd.f32 %v10027_v18, %v12261_v58  ;;  %v8294_v7 = vpop.f32.mrb[209].mxu1  ;;  %v8411_v17 = vadd.f32 %v8402_v39, %v8401_v46  ;;  %v8408_v53 = vadd.f32 %v8396_v6, %v8395_v9  ;;  %v12599_v6 = vld [vmem:[#allocation20_spill] sm:$0xff]  ;;  %p10487_p3 = por %p10486_p13, %p10485_p10 }
 0x53f   : > { %v9853_v42 = vadd.f32 %v9852_v19, %v9851_v61  ;;  %v9854_v47 = vpop.f32.mrb[206].mxu0  ;;  %v8295_v59 = vadd.f32 %v8294_v7, %v12251_v12  ;;  %v10028_v15 = vpop.f32.mrb[210].mxu1  ;;  %v8420_v61 = vmul.f32 0.25, %v8412_v28  ;;  %v12597_v19 = vld [vmem:[#allocation19_spill] sm:$0xff]  ;;  %v12419_v46 = vmul.f32 0.25, %v8407_v16 }
 0x540   : > { %v8335_v30 = vadd.f32 %v8303_v32, %v5834_v5  ;;  %v9855_v2 = vpop.f32.mrb[207].mxu0  ;;  %v8306_v34 = vadd.f32 %v10028_v15, %v12267_v48  ;;  %v8297_v50 = vpop.f32.mrb[211].mxu1  ;;  %v8422_v48 = vmax.f32 %v12390_v14, 0.0  ;;  %v8419_v39 = vmul.f32 0.25, %v8411_v17  ;;  %p10488_p7 = pnand %p10487_p3, %p10481_p8 }
 0x541   : > { %v8125_v1 = vadd.f32 %v9853_v42, %v12205_v0  ;;  %v8333_v58 = vadd.f32 %v8295_v59, %v5832_v49  ;;  %v9856_v18 = vadd.f32 %v9855_v2, %v9854_v47  ;;  %v8298_v25 = vadd.f32 %v8297_v50, %v12253_v10 }
 0x542   : > { %v8439_v52 = vmul.f32 %v8426_v22, %v8335_v30  ;;  %v8336_v4 = vadd.f32 %v8306_v34, %v5835_v35  ;;  %v8421_v2 = vmax.f32 %v12406_v23, 0.0  ;;  %v12421_v59 = vmul.f32 0.25, %v8408_v53  ;;  %v12600_v23 = vld [vmem:[#allocation23_spill] sm:$0xff]  ;;  %v12601_v34 = vld [vmem:[#allocation21_spill] sm:$0xff] }
 0x543   : > { %v8437_v12 = vmul.f32 %v8425_v33, %v8333_v58  ;;  %v8128_v31 = vadd.f32 %v9856_v18, %v12597_v19  ;;  %v8334_v20 = vadd.f32 %v8298_v25, %v5833_v55  ;;  %v8222_v5 = vadd.f32 %v12297_v40, %v8125_v1  ;;  %v12598_v40 = vld [vmem:[#allocation22_spill] sm:$0xff] }
 0x544   : > { %v8455_v0 = vadd.f32 %v12274_v24, %v8439_v52  ;;  %v8440_v49 = vmul.f32 %v8426_v22, %v8336_v4  ;;  %v8428_v14 = vmax.f32 %v8420_v61, 0.0  ;;  %v8427_v7 = vmax.f32 %v8419_v39, 0.0 }
 0x545   : > { %v8453_v10 = vadd.f32 %v12282_v62, %v8437_v12  ;;  %v8438_v30 = vmul.f32 %v8425_v33, %v8334_v20  ;;  %v10019_v35 = vpop.f32.mrb[208].mxu0  ;;  %v8225_v47 = vadd.f32 %v12323_v8, %v8128_v31  ;;  %v10031_v17 = vpop.f32.mrb[212].mxu1 }
 0x546   : > { %8471 = vst [vmem:[%s12425_s11 + $0x50] sm:$0xff] %v8455_v0  ;;  %v8456_v24 = vadd.f32 %v12270_v41, %v8440_v49  ;;  %v8271_v55 = vadd.f32 %v10019_v35, %v12598_v40  ;;  %v8262_v62 = vpop.f32.mrb[209].mxu0  ;;  %v8319_v9 = vadd.f32 %v10031_v17, %v8222_v5  ;;  %v8310_v32 = vpop.f32.mrb[213].mxu1  ;;  %v12603_v49 = vld [vmem:[#allocation13_spill] sm:$0xff]  ;;  %v12607_v40 = vld [vmem:[#allocation27_spill] sm:$0xff] }
 0x547   : > { %8469 = vst [vmem:[%s12425_s11 + $0x40] sm:$0xff] %v8453_v10  ;;  %v8454_v8 = vadd.f32 %v12278_v44, %v8438_v30  ;;  %v8263_v1 = vadd.f32 %v8262_v62, %v12599_v6  ;;  %v10020_v22 = vpop.f32.mrb[210].mxu0  ;;  %v8311_v33 = vadd.f32 %v8310_v32, %v12364_v13  ;;  %v10032_v15 = vpop.f32.mrb[214].mxu1  ;;  %v12609_v17 = vld [vmem:[#allocation17_spill] sm:$0xff] }
 0x548   : > { %8472 = vst [vmem:[%s12425_s11 + $0x58] sm:$0xff] %v8456_v24  ;;  %v8327_v28 = vadd.f32 %v8271_v55, %v12287_v43  ;;  %v8274_v41 = vadd.f32 %v10020_v22, %v12600_v23  ;;  %v8265_v42 = vpop.f32.mrb[211].mxu0  ;;  %v8339_v44 = vadd.f32 %v8319_v9, %v12343_v63  ;;  %v8322_v58 = vadd.f32 %v10032_v15, %v8225_v47  ;;  %v8313_v18 = vpop.f32.mrb[215].mxu1  ;;  %v12606_v47 = vld [vmem:[#allocation28_spill] sm:$0xff]  ;;  %v12611_v6 = vld [vmem:[#allocation25_spill] sm:$0xff]  ;;  %v12613_v23 = vld [vmem:[#allocation31_spill] sm:$0xff] }
 0x549   : > { %8470 = vst [vmem:[%s12425_s11 + $0x48] sm:$0xff] %v8454_v8  ;;  %v8325_v16 = vadd.f32 %v8263_v1, %v12291_v38  ;;  %v8266_v50 = vadd.f32 %v8265_v42, %v12601_v34  ;;  %v8337_v43 = vadd.f32 %v8311_v33, %v12347_v29  ;;  %v8314_v52 = vadd.f32 %v8313_v18, %v12398_v54  ;;  %v12614_v42 = vld [vmem:[#allocation15_spill] sm:$0xff] }
 0x54a   : > { %v8431_v25 = vmul.f32 %v8422_v48, %v8327_v28  ;;  %v8328_v53 = vadd.f32 %v8274_v41, %v12295_v37  ;;  %v8443_v4 = vmul.f32 %v8428_v14, %v8339_v44  ;;  %v8340_v38 = vadd.f32 %v8322_v58, %v12352_v36 }
 0x54b   : > { %v8429_v13 = vmul.f32 %v8421_v2, %v8325_v16  ;;  %v8326_v61 = vadd.f32 %v8266_v50, %v12301_v21  ;;  %v8441_v19 = vmul.f32 %v8427_v7, %v8337_v43  ;;  %v8338_v31 = vadd.f32 %v8314_v52, %v12388_v27  ;;  %v12604_v27 = vld [vmem:[#allocation16_spill] sm:$0xff]  ;;  %v12615_v16 = vld [vmem:[#allocation30_spill] sm:$0xff] }
 0x54c   : > { %v8447_v63 = vadd.f32 %v12308_v3, %v8431_v25  ;;  %v8432_v12 = vmul.f32 %v8422_v48, %v8328_v53  ;;  %v8459_v29 = vadd.f32 %v12359_v11, %v8443_v4  ;;  %v8444_v54 = vmul.f32 %v8428_v14, %v8340_v38  ;;  %v12602_v48 = vld [vmem:[#allocation26_spill] sm:$0xff] }
 0x54d   : > { %v8445_v37 = vadd.f32 %v12326_v60, %v8429_v13  ;;  %v8430_v20 = vmul.f32 %v8421_v2, %v8326_v61  ;;  %v10023_v5 = vpop.f32.mrb[212].mxu0  ;;  %v8457_v3 = vadd.f32 %v12382_v57, %v8441_v19  ;;  %v8442_v36 = vmul.f32 %v8427_v7, %v8338_v31  ;;  %v12605_v2 = vld [vmem:[#allocation24_spill] sm:$0xff]  ;;  %v12612_v7 = vld [vmem:[#allocation18_spill] sm:$0xff] }
 0x54e   : > { %8463 = vst [vmem:[%s12425_s11 + $0x10] sm:$0xff] %v8447_v63  ;;  %v8448_v21 = vadd.f32 %v12313_v56, %v8432_v12  ;;  %v8287_v39 = vadd.f32 %v10023_v5, %v12602_v48  ;;  %v8278_v0 = vpop.f32.mrb[213].mxu0  ;;  %v5831_v10 = vadd.f32 %v12604_v27, %v12603_v49  ;;  %8475 = vst [vmem:[%s12425_s11 + $0x70] sm:$0xff] %v8459_v29  ;;  %v8424_v57 = vmax.f32 %v12421_v59, 0.0  ;;  %v12610_v59 = vld [vmem:[#allocation29_spill] sm:$0xff] }
 0x54f   : > { %8461 = vst [vmem:[%s12425_s11] sm:$0xff] %v8445_v37  ;;  %v8446_v60 = vadd.f32 %v12331_v26, %v8430_v20  ;;  %v8460_v11 = vadd.f32 %v12355_v51, %v8444_v54  ;;  %v8279_v56 = vadd.f32 %v8278_v0, %v12605_v2  ;;  %v10024_v30 = vpop.f32.mrb[214].mxu0  ;;  %8473 = vst [vmem:[%s12425_s11 + $0x60] sm:$0xff] %v8457_v3  ;;  %v12608_v26 = vld [vmem:[#allocation14_spill] sm:$0xff]  ;;  %v8423_v8 = vmax.f32 %v12419_v46, 0.0 }
 0x550   : > { %8464 = vst [vmem:[%s12425_s11 + $0x18] sm:$0xff] %v8448_v21  ;;  %v8458_v35 = vadd.f32 %v12377_v45, %v8442_v36  ;;  %v8331_v24 = vadd.f32 %v8287_v39, %v12606_v47  ;;  %v8290_v55 = vadd.f32 %v10024_v30, %v12607_v40  ;;  %v8281_v62 = vpop.f32.mrb[215].mxu0  ;;  %v5829_v51 = vadd.f32 %v12609_v17, %v12608_v26 }
 0x551   : > { %8462 = vst [vmem:[%s12425_s11 + $0x8] sm:$0xff] %v8446_v60  ;;  %8476 = vst [vmem:[%s12425_s11 + $0x78] sm:$0xff] %v8460_v11  ;;  %v8329_v14 = vadd.f32 %v8279_v56, %v12610_v59  ;;  %v8282_v1 = vadd.f32 %v8281_v62, %v12611_v6 }
 0x552   : > { %8474 = vst [vmem:[%s12425_s11 + $0x68] sm:$0xff] %v8458_v35  ;;  %v8435_v45 = vmul.f32 %v8424_v57, %v8331_v24  ;;  %v8332_v9 = vadd.f32 %v8290_v55, %v5831_v10 }
 0x553   : > { %v8433_v22 = vmul.f32 %v8423_v8, %v8329_v14  ;;  %v8330_v32 = vadd.f32 %v8282_v1, %v5829_v51 }
 0x554   : > { %v8451_v46 = vadd.f32 %v12612_v7, %v8435_v45  ;;  %v8436_v28 = vmul.f32 %v8424_v57, %v8332_v9 }
 0x555   : > { %v8449_v41 = vadd.f32 %v12613_v23, %v8433_v22  ;;  %v8434_v33 = vmul.f32 %v8423_v8, %v8330_v32 }
 0x556   : > { %8467 = vst [vmem:[%s12425_s11 + $0x30] sm:$0xff] %v8451_v46  ;;  %v8452_v15 = vadd.f32 %v12614_v42, %v8436_v28 }
 0x557   : > { %8465 = vst [vmem:[%s12425_s11 + $0x20] sm:$0xff] %v8449_v41  ;;  %v8450_v44 = vadd.f32 %v12615_v16, %v8434_v33 }
 0x558   : > { %8468 = vst [vmem:[%s12425_s11 + $0x38] sm:$0xff] %v8452_v15 }
 0x559   : > { %8466 = vst [vmem:[%s12425_s11 + $0x28] sm:$0xff] %v8450_v44 }
 0x55a   : > { %10491 = shalt.err (!%p10488_p7)
}
 0x55b   : > { %s10492_s18 = scalar_lea.hbm %s12484_s30, 2048  ;;  %s10496_s25 = scalar_lea.hbm %s12537_s3, 4096 }
 0x55c   : > { %p10493_p9 = scmp.ne.s32.totalorder %s12484_s30, %s10492_s18  ;;  %p10497_p5 = scmp.lt.u32.totalorder %s12484_s30, %s12537_s3 }
 0x55d   : > { %p10498_p11 = scmp.lt.u32.totalorder %s10496_s25, %s10492_s18  ;;  %p10500_p4 = scmp.lt.u32.totalorder %s10492_s18, %s12484_s30 }
 0x55e   : > { %p10494_p2 = pnand %p10493_p9, %p10672_p12 }
 0x55f   : > { %p10499_p1 = por %p10498_p11, %p10497_p5 }
 0x560   : > { %p10495_p0 = pneg %p10494_p2 }
 0x561   : > { %p10501_p6 = por %p10500_p4, %p10499_p1 }
 0x563   : > { %p10502_p8 = pnand %p10501_p6, %p10495_p0 }
 0x565   : > { %10505 = shalt.err (!%p10502_p8)
}
 0x566   : > { %s10559_s10 = smov 128   ;;  %s10560_s11 = smov 8  }
 0x567   : > { %10055 = dma.vmem_to_hbm [thread:$0]  (%p10672_p12), %s12486_s28, 2048, %s12484_s30, %s8478_s16, %s10559_s10, %s10559_s10, %s10560_s11  }
 0x568 PF: > { %s8506_s27 = sand.u32 1, %s10536_s12   ;;  %p12616_p10 = scmp.ne.s32.totalorder %s12552_s19, 0 }
 0x569   : > { %p12617_p13 = scmp.ge.s32.totalorder %s10548_s15, 2  ;;  %s8507_s29 = scalar_lea.sflag [#allocation6], %s8506_s27 }
 0x56b   : > { %p10066_p3 = pnand %p12617_p13, %p12616_p10 }
 0x56d   : > { %10531 = dma.done.wait (!%p10066_p3), %s8507_s29, 2048  }
 0x56e   : > { %10533 = vsyncadd (!%p10066_p3), %s8507_s29, 4294965248  ;;  %p17_p7 = scmp.ge.s32.totalorder %s10637_s24, 4   ;;  %s12618_s12 = smov %s10540_s13 }
 0x56f   : > { %s12619_s13 = smov %s10544_s14  ;;  %s12620_s14 = smov %s10668_s17 }
 0x570   : > { %s12621_s15 = smov %s10637_s24  ;;  %19 = sbr.rel (!%p17_p7) target bundleno = 6 (0x6), region = 83 }
 0x577   :  { %8512 = vsyncpa [#allocation5], 1 }
 0x578   :  { %8514 = vsyncpa [#allocation5 + $0x1], 1 }
 0x579   :  { %8515 = vsyncpa [#allocation8], 1 }
 0x57a   :  { %8516 = vsyncpa [#allocation6], 1 }
 0x57b   :  { %8518 = vsyncpa [#allocation6 + $0x1], 1 }

</bundles_post_ra>
